<compile_context>
chip_gen: v6e
topology: v6e:2x2x1
jax: 0.10.0
libtpu: 0.0.40
codegen_flags: <defaults>
</compile_context>

<pallas_src>
import functools

import jax
import jax.numpy as jnp
import numpy as np
from jax import lax
from jax.experimental import pallas as pl
from jax.experimental.pallas import tpu as pltpu

EPS = 1e-5
BF16 = jnp.bfloat16
LANE = 128


# --------------------------------- kernel -----------------------------------

def _cross_modality_decode_kernel(
        mask_ref, f1_ref, f2_ref, up_ref,
        qw_ref, qb_ref, kvw_ref, kvb_ref,
        rpw_ref, rpb_ref, rcw_ref, rcb_ref,
        d1w_ref, d1b_ref, d2w_ref, d2b_ref,
        out_ref,
        xwide_ref, col_ref, fpad_ref, qkv_ref,
        *, H, W, c, c2, cout, NPL):
    """One full CrossModalityDecode forward for a single batch element.

    Activation layout: channels on sublanes, zero-padded flattened spatial on
    lanes (NPL = next multiple of 128 of (H+2)*(W+2)); the pad ring and lane
    filler are kept at zero so 3x3-conv tap shifts and channel-attention sums
    are exact without extra masking of the inputs.
    """
    WP = W + 2
    PADL = WP + 1
    mask = mask_ref[...]                                    # (1, NPL) f32

    # Side bands of the halo scratch / ring of the scatter scratch: zero once.
    xwide_ref[...] = jnp.zeros_like(xwide_ref)
    fpad_ref[...] = jnp.zeros_like(fpad_ref)

    def stage_im2col(x, cin, row_off):
        """x: (cin, NPL) f32 with zero pad ring + lane filler.

        Writes the 9 shifted taps (tap-major, channel-minor) into
        col_ref[row_off : row_off + 9*cin]."""
        xwide_ref[0:cin, PADL:PADL + NPL] = x.astype(BF16)
        t = 0
        for ky in (-1, 0, 1):
            for kx in (-1, 0, 1):
                d = ky * WP + kx
                col_ref[row_off + t * cin:row_off + (t + 1) * cin, :] = (
                    xwide_ref[0:cin, PADL + d:PADL + d + NPL])
                t += 1

    def conv_mm(w_ref, b_ref, krows):
        """Folded Conv3x3+BN as (Cout, K)@(K, NPL) + bias, ReLU, ring zeroed."""
        acc = jnp.dot(w_ref[...], col_ref[0:krows, :],
                      preferred_element_type=jnp.float32)
        return jnp.maximum(acc + b_ref[...], 0.0) * mask

    f1 = f1_ref[0]                                          # (c2, NPL) f32
    f2 = f2_ref[0]
    up = up_ref[0]

    # Fused q convs (input feature2): rows [0:c) = q_pos, [c:2c) = q_chan.
    stage_im2col(f2, c2, 0)
    q2 = conv_mm(qw_ref, qb_ref, 9 * c2)                    # (2c, NPL)

    # Fused k/v convs (input feature1): k_pos, v_pos, k_chan, v_chan.
    stage_im2col(f1, c2, 0)
    kv = conv_mm(kvw_ref, kvb_ref, 9 * c2)                  # (4c, NPL)
    k_pos, v_pos = kv[0:c], kv[c:2 * c]
    k_chan, v_chan = kv[2 * c:3 * c], kv[3 * c:4 * c]

    # -------------- position attention on the H*W interior pixels -----------
    q_pos = q2[0:c]
    for r in range(H):                                      # compact 324 -> 256
        src = slice((r + 1) * WP + 1, (r + 1) * WP + 1 + W)
        dst = slice(r * W, (r + 1) * W)
        qkv_ref[0:c, dst] = q_pos[:, src]
        qkv_ref[c:2 * c, dst] = k_pos[:, src]
        qkv_ref[2 * c:3 * c, dst] = v_pos[:, src]
    qp = qkv_ref[0:c, :]                                    # (c, N)
    kp = qkv_ref[c:2 * c, :]
    vp = qkv_ref[2 * c:3 * c, :]
    # S[n, m] = sum_ch q[ch, n] * k[ch, m]; softmax over keys m (interior only,
    # so no additive key mask is needed).
    s = jnp.dot(qp.T.astype(BF16), kp.astype(BF16),
                preferred_element_type=jnp.float32)         # (N, N)
    s_max = jnp.max(s, axis=-1, keepdims=True)
    p = jnp.exp(s - s_max)
    p = p * pl.reciprocal(jnp.sum(p, axis=-1, keepdims=True), approx=False)
    # f[ch, n] = sum_m v[ch, m] * p[n, m]  (contract the key axis, NT form).
    f_cn = lax.dot_general(vp.astype(BF16), p.astype(BF16),
                           (((1,), (1,)), ((), ())),
                           preferred_element_type=jnp.float32)   # (c, N)
    for r in range(H):                                      # scatter 256 -> 324
        fpad_ref[:, (r + 1) * WP + 1:(r + 1) * WP + 1 + W] = (
            f_cn[:, r * W:(r + 1) * W])
    f_pos = fpad_ref[...]                                   # (c, NPL), ring = 0

    # -------------- channel attention (padded layout, ring/filler = 0) ------
    q_chan = q2[c:2 * c]
    sc = lax.dot_general(q_chan.astype(BF16), k_chan.astype(BF16),
                         (((1,), (1,)), ((), ())),
                         preferred_element_type=jnp.float32)     # (c, c)
    pc = jnp.exp(sc - jnp.max(sc, axis=-1, keepdims=True))
    ac = pc * pl.reciprocal(jnp.sum(pc, axis=-1, keepdims=True), approx=False)
    f_chan = jnp.dot(ac.astype(BF16), v_chan.astype(BF16),
                     preferred_element_type=jnp.float32)         # (c, NPL)

    # -------------- residual convs + branch sum ------------------------------
    # pos_out + chan_out = 2*f1 + relu(bn(conv(f_pos))) + relu(bn(conv(f_chan)))
    stage_im2col(f_pos, c, 0)
    res_pos = conv_mm(rpw_ref, rpb_ref, 9 * c)              # (c2, NPL)
    stage_im2col(f_chan, c, 0)
    res_chan = conv_mm(rcw_ref, rcb_ref, 9 * c)             # (c2, NPL)
    concat_sum = 2.0 * f1 + res_pos + res_chan              # (c2, NPL)

    # -------------- DoubleConv on channel-concat([concat_sum, up]) ----------
    stage_im2col(concat_sum, c2, 0)
    stage_im2col(up, c2, 9 * c2)
    y = conv_mm(d1w_ref, d1b_ref, 18 * c2)                  # (cout, NPL)
    stage_im2col(y, cout, 0)
    y = conv_mm(d2w_ref, d2b_ref, 9 * cout)                 # (cout, NPL)
    out_ref[0] = y.astype(out_ref.dtype)


# --------------------------- layout / param folding -------------------------

def _bcast_spec(shape):
    return pl.BlockSpec(shape, lambda i, _n=len(shape): (0,) * _n)


def _pad_flat_nchw(x, npl):
    """(B, C, H, W) -> (B, C, npl): zero pad ring, flatten, zero lane filler."""
    B, C, H, W = x.shape
    xp = jnp.pad(x, ((0, 0), (0, 0), (1, 1), (1, 1)))
    xp = xp.reshape(B, C, (H + 2) * (W + 2))
    return jnp.pad(xp, ((0, 0), (0, 0), (0, npl - (H + 2) * (W + 2))))


def _interior_mask(H, W, npl):
    wp = W + 2
    m = np.zeros((1, npl), np.float32)
    for r in range(H):
        m[0, (r + 1) * wp + 1:(r + 1) * wp + 1 + W] = 1.0
    return jnp.asarray(m)


def _fold_conv(p, cin_splits=None):
    """Conv(3x3)+BatchNorm(eval) folded to (Cout, 9*Cin) bf16 + (Cout, 1) f32.

    Column order is tap-major, channel-minor, matching the in-kernel im2col.
    cin_splits builds the columns block-by-block along Cin (for a conv whose
    im2col is assembled from separate channel groups, e.g. a channel concat).
    """
    cin, cout = p['w'].shape[2], p['w'].shape[3]
    scale = p['gamma'] * jax.lax.rsqrt(p['var'] + EPS)
    w = p['w'] * scale[None, None, None, :]                 # (3, 3, cin, cout)
    b = (p['b'] - p['mean']) * scale + p['beta']
    if cin_splits is None:
        cin_splits = [cin]
    blocks, off = [], 0
    for s in cin_splits:
        wb = jnp.transpose(w[:, :, off:off + s, :], (3, 0, 1, 2))
        blocks.append(wb.reshape(cout, 9 * s))
        off += s
    w2 = jnp.concatenate(blocks, axis=1).astype(BF16)
    return w2, b.reshape(cout, 1).astype(jnp.float32)


def _upsample_xla(x, p):
    """ConvTranspose2d(k=2, s=2): one matmul + 2x2 pixel shuffle (XLA glue).

    Weights are expected in (Cin, 2, 2, Cout) layout; permute PyTorch's
    (Cin, Cout, kH, kW) before importing real checkpoints.
    """
    B, cin, h0, w0 = x.shape
    cout = p['w'].shape[3]
    w4 = jnp.transpose(p['w'], (1, 2, 3, 0)).reshape(4 * cout, cin)
    y = jnp.einsum('oc,bcn->bon', w4, x.reshape(B, cin, h0 * w0),
                   precision=jax.lax.Precision.HIGHEST)
    y = y + jnp.tile(p['b'], 4)[None, :, None]
    y = (y.reshape(B, 2, 2, cout, h0, w0)
           .transpose(0, 3, 4, 1, 5, 2)
           .reshape(B, cout, 2 * h0, 2 * w0))
    return y


# ------------------------------ Pallas forward ------------------------------

def cross_modality_decode_pallas(params, feature_, feature1, feature2):
    """CrossModalityDecode forward (NCHW in / NCHW out), one fused Pallas kernel."""
    B = feature_.shape[0]
    _, c2, H, W = feature1.shape
    NP = (H + 2) * (W + 2)
    NPL = -(-NP // LANE) * LANE                             # 324 -> 384 lanes
    c = params['pos']['q']['w'].shape[3]
    cout = params['dc2']['w'].shape[3]

    # Fold Conv+BN params into matmul form (tiny one-off XLA work).
    qpw, qpb = _fold_conv(params['pos']['q'])
    qcw, qcb = _fold_conv(params['chan']['q'])
    qw = jnp.concatenate([qpw, qcw], axis=0)
    qb = jnp.concatenate([qpb, qcb], axis=0)
    kvparts = [_fold_conv(params['pos']['k']), _fold_conv(params['pos']['v']),
               _fold_conv(params['chan']['k']), _fold_conv(params['chan']['v'])]
    kvw = jnp.concatenate([w for w, _ in kvparts], axis=0)
    kvb = jnp.concatenate([b for _, b in kvparts], axis=0)
    rpw, rpb = _fold_conv(params['pos']['res'])
    rcw, rcb = _fold_conv(params['chan']['res'])
    d1w, d1b = _fold_conv(params['dc1'], cin_splits=[c2, c2])
    d2w, d2b = _fold_conv(params['dc2'])
    weights = [qw, qb, kvw, kvb, rpw, rpb, rcw, rcb, d1w, d1b, d2w, d2b]

    # Up-sample (ConvTranspose2d k=2 s=2) in XLA glue, then padded-flat layout.
    up = _upsample_xla(feature_, params['up'])              # (B, c2, H, W)
    mask = _interior_mask(H, W, NPL)
    f1p = _pad_flat_nchw(feature1, NPL)
    f2p = _pad_flat_nchw(feature2, NPL)
    upp = _pad_flat_nchw(up, NPL)

    kern = functools.partial(_cross_modality_decode_kernel,
                             H=H, W=W, c=c, c2=c2, cout=cout, NPL=NPL)
    act = lambda ch: pl.BlockSpec((1, ch, NPL), lambda i: (i, 0, 0))

    out = pl.pallas_call(
        kern,
        out_shape=jax.ShapeDtypeStruct((B, cout, NPL), jnp.float32),
        grid=(B,),
        in_specs=([_bcast_spec(mask.shape), act(c2), act(c2), act(c2)]
                  + [_bcast_spec(w.shape) for w in weights]),
        out_specs=pl.BlockSpec((1, cout, NPL), lambda i: (i, 0, 0)),
        scratch_shapes=[
            pltpu.VMEM((max(c2, cout), NPL + 2 * (W + 3)), BF16),  # halo stage
            pltpu.VMEM((max(18 * c2, 9 * cout), NPL), BF16),       # im2col
            pltpu.VMEM((c, NPL), jnp.float32),                     # f_pos pad
            pltpu.VMEM((3 * c, H * W), jnp.float32),               # compact qkv
        ],
        compiler_params=pltpu.CompilerParams(
            dimension_semantics=("parallel",)),
    )(mask, f1p, f2p, upp, *weights)

    y = out[:, :, :NP].reshape(B, cout, H + 2, W + 2)[:, :, 1:H + 1, 1:W + 1]
    return y


# ------------------------- pure-JAX f32 reference ---------------------------

def _im2col_3x3(x):
    B, H, W, C = x.shape
    xp = jnp.pad(x, ((0, 0), (1, 1), (1, 1), (0, 0)))
    cols = [xp[:, ky:ky + H, kx:kx + W, :] for ky in range(3) for kx in range(3)]
    return jnp.concatenate(cols, axis=-1).reshape(B, H * W, 9 * C)


def _conv_block_ref(x, p):
    B, H, W, cin = x.shape
    cout = p['w'].shape[-1]
    scale = p['gamma'] / jnp.sqrt(p['var'] + EPS)
    bias = (p['b'] - p['mean']) * scale + p['beta']
    y = jnp.dot(_im2col_3x3(x), p['w'].reshape(9 * cin, cout),
                precision=jax.lax.Precision.HIGHEST)
    return jnp.maximum(y * scale + bias, 0.0).reshape(B, H, W, cout)


def _conv_transpose_ref(x, p):
    B, H, W, cin = x.shape
    cout = p['w'].shape[-1]
    y = jnp.dot(x.reshape(B, H * W, cin), p['w'].reshape(cin, 4 * cout),
                precision=jax.lax.Precision.HIGHEST) + jnp.tile(p['b'], 4)
    y = y.reshape(B, H, W, 2, 2, cout).transpose(0, 1, 3, 2, 4, 5)
    return y.reshape(B, 2 * H, 2 * W, cout)


def _channel_attention_ref(f1, f2, p):
    B, H, W, _ = f1.shape
    q = _conv_block_ref(f2, p['q'])
    k = _conv_block_ref(f1, p['k'])
    v = _conv_block_ref(f1, p['v'])
    c, N = q.shape[-1], H * W
    q_cn = q.reshape(B, N, c).transpose(0, 2, 1)
    k_nc = k.reshape(B, N, c)
    v_cn = v.reshape(B, N, c).transpose(0, 2, 1)
    s = jnp.einsum('bcn,bnd->bcd', q_cn, k_nc,
                   precision=jax.lax.Precision.HIGHEST)
    f = jnp.einsum('bcd,bdn->bcn', jax.nn.softmax(s, axis=-1), v_cn,
                   precision=jax.lax.Precision.HIGHEST)
    f = f.transpose(0, 2, 1).reshape(B, H, W, c)
    return f1 + _conv_block_ref(f, p['res'])


def _position_attention_ref(f1, f2, p):
    B, H, W, _ = f1.shape
    q = _conv_block_ref(f2, p['q'])
    k = _conv_block_ref(f1, p['k'])
    v = _conv_block_ref(f1, p['v'])
    c, N = q.shape[-1], H * W
    q_nc = q.reshape(B, N, c)
    k_cn = k.reshape(B, N, c).transpose(0, 2, 1)
    v_nc = v.reshape(B, N, c)
    s = jnp.einsum('bnc,bcm->bnm', q_nc, k_cn,
                   precision=jax.lax.Precision.HIGHEST)
    f = jnp.einsum('bnm,bmc->bnc', jax.nn.softmax(s, axis=-1), v_nc,
                   precision=jax.lax.Precision.HIGHEST)
    f = f.reshape(B, H, W, c)
    return f1 + _conv_block_ref(f, p['res'])


def reference_forward(params, feature_, feature1, feature2):
    f_ = jnp.transpose(feature_, (0, 2, 3, 1))
    f1 = jnp.transpose(feature1, (0, 2, 3, 1))
    f2 = jnp.transpose(feature2, (0, 2, 3, 1))
    up = _conv_transpose_ref(f_, params['up'])
    concat = (_position_attention_ref(f1, f2, params['pos'])
              + _channel_attention_ref(f1, f2, params['chan']))
    x = jnp.concatenate([concat, up], axis=-1)
    x = _conv_block_ref(x, params['dc1'])
    x = _conv_block_ref(x, params['dc2'])
    return jnp.transpose(x, (0, 3, 1, 2))


# ------------------------------ parameter setup -----------------------------

def make_conv_params(key, cin, cout):
    k = jax.random.split(key, 6)
    return dict(
        w=0.1 * jax.random.normal(k[0], (3, 3, cin, cout), jnp.float32),
        b=0.1 * jax.random.normal(k[1], (cout,), jnp.float32),
        gamma=1.0 + 0.1 * jax.random.normal(k[2], (cout,), jnp.float32),
        beta=0.1 * jax.random.normal(k[3], (cout,), jnp.float32),
        mean=0.1 * jax.random.normal(k[4], (cout,), jnp.float32),
        var=0.5 + 0.5 * jax.random.uniform(k[5], (cout,), jnp.float32),
    )


def make_params(key, in_channels, out_channels):
    c2 = in_channels // 2
    c = c2 // 4
    keys = jax.random.split(key, 6)

    def attn_params(kk):
        ks = jax.random.split(kk, 4)
        return dict(q=make_conv_params(ks[0], c2, c),
                    k=make_conv_params(ks[1], c2, c),
                    v=make_conv_params(ks[2], c2, c),
                    res=make_conv_params(ks[3], c, c2))

    return dict(
        up=dict(w=0.1 * jax.random.normal(keys[0], (in_channels, 2, 2, c2),
                                          jnp.float32),
                b=0.1 * jax.random.normal(keys[1], (c2,), jnp.float32)),
        pos=attn_params(keys[2]),
        chan=attn_params(keys[3]),
        dc1=make_conv_params(keys[4], in_channels, out_channels),
        dc2=make_conv_params(keys[5], out_channels, out_channels),
    )


# ----------------------------------- main ------------------------------------

if __name__ == "__main__":
    key = jax.random.PRNGKey(0)
    in_channels, out_channels = 32, 16
    B, H0, W0 = 2, 8, 8                 # feature_ spatial; feature1/2 are 2x

    kf, k1, k2, kp = jax.random.split(key, 4)
    feature_ = jax.random.normal(kf, (B, in_channels, H0, W0), jnp.float32)
    feature1 = jax.random.normal(k1, (B, in_channels // 2, 2 * H0, 2 * W0),
                                 jnp.float32)
    feature2 = jax.random.normal(k2, (B, in_channels // 2, 2 * H0, 2 * W0),
                                 jnp.float32)
    params = make_params(kp, in_channels, out_channels)

    fwd = jax.jit(cross_modality_decode_pallas)
    out = jax.block_until_ready(fwd(params, feature_, feature1, feature2))

    ref = jax.block_until_ready(
        jax.jit(reference_forward)(params, feature_, feature1, feature2))

    assert out.shape == (B, out_channels, 2 * H0, 2 * W0)
    # bf16 MXU operands vs a float32 HIGHEST-precision reference across ~6
    # chained conv/attention layers -> loose tolerance.
    np.testing.assert_allclose(np.asarray(out), np.asarray(ref),
                               rtol=1e-1, atol=1e-1)
    print("KERNEL_OK")
</pallas_src>

<mosaic_0001>
module attributes {stable_mosaic.version = 11 : i64} {
  func.func @_cross_modality_decode_kernel(%arg0: i32, %arg1: memref<1x384xf32, #tpu.memory_space<vmem>>, %arg2: memref<1x16x384xf32, #tpu.memory_space<vmem>>, %arg3: memref<1x16x384xf32, #tpu.memory_space<vmem>>, %arg4: memref<1x16x384xf32, #tpu.memory_space<vmem>>, %arg5: memref<8x144xbf16, #tpu.memory_space<vmem>>, %arg6: memref<8x1xf32, #tpu.memory_space<vmem>>, %arg7: memref<16x144xbf16, #tpu.memory_space<vmem>>, %arg8: memref<16x1xf32, #tpu.memory_space<vmem>>, %arg9: memref<16x36xbf16, #tpu.memory_space<vmem>>, %arg10: memref<16x1xf32, #tpu.memory_space<vmem>>, %arg11: memref<16x36xbf16, #tpu.memory_space<vmem>>, %arg12: memref<16x1xf32, #tpu.memory_space<vmem>>, %arg13: memref<16x288xbf16, #tpu.memory_space<vmem>>, %arg14: memref<16x1xf32, #tpu.memory_space<vmem>>, %arg15: memref<16x144xbf16, #tpu.memory_space<vmem>>, %arg16: memref<16x1xf32, #tpu.memory_space<vmem>>, %arg17: memref<1x16x384xf32, #tpu.memory_space<vmem>>, %arg18: memref<16x422xbf16, #tpu.memory_space<vmem>>, %arg19: memref<288x384xbf16, #tpu.memory_space<vmem>>, %arg20: memref<4x384xf32, #tpu.memory_space<vmem>>, %arg21: memref<12x256xf32, #tpu.memory_space<vmem>>) attributes {dimension_semantics = [#tpu.dimension_semantics<parallel>], iteration_bounds = array<i64: 2>, scalar_prefetch = 0 : i64, scratch_operands = 4 : i64, tpu.core_type = #tpu.core_type<tc>, window_params = [{pipeline_mode = #tpu.pipeline_mode<synchronous>, transform_indices = @transform_0, window_bounds = array<i64: 1, 384>}, {transform_indices = @transform_1, window_bounds = array<i64: 1, 16, 384>}, {transform_indices = @transform_2, window_bounds = array<i64: 1, 16, 384>}, {transform_indices = @transform_3, window_bounds = array<i64: 1, 16, 384>}, {pipeline_mode = #tpu.pipeline_mode<synchronous>, transform_indices = @transform_4, window_bounds = array<i64: 8, 144>}, {pipeline_mode = #tpu.pipeline_mode<synchronous>, transform_indices = @transform_5, window_bounds = array<i64: 8, 1>}, {pipeline_mode = #tpu.pipeline_mode<synchronous>, transform_indices = @transform_6, window_bounds = array<i64: 16, 144>}, {pipeline_mode = #tpu.pipeline_mode<synchronous>, transform_indices = @transform_7, window_bounds = array<i64: 16, 1>}, {pipeline_mode = #tpu.pipeline_mode<synchronous>, transform_indices = @transform_8, window_bounds = array<i64: 16, 36>}, {pipeline_mode = #tpu.pipeline_mode<synchronous>, transform_indices = @transform_9, window_bounds = array<i64: 16, 1>}, {pipeline_mode = #tpu.pipeline_mode<synchronous>, transform_indices = @transform_10, window_bounds = array<i64: 16, 36>}, {pipeline_mode = #tpu.pipeline_mode<synchronous>, transform_indices = @transform_11, window_bounds = array<i64: 16, 1>}, {pipeline_mode = #tpu.pipeline_mode<synchronous>, transform_indices = @transform_12, window_bounds = array<i64: 16, 288>}, {pipeline_mode = #tpu.pipeline_mode<synchronous>, transform_indices = @transform_13, window_bounds = array<i64: 16, 1>}, {pipeline_mode = #tpu.pipeline_mode<synchronous>, transform_indices = @transform_14, window_bounds = array<i64: 16, 144>}, {pipeline_mode = #tpu.pipeline_mode<synchronous>, transform_indices = @transform_15, window_bounds = array<i64: 16, 1>}, {transform_indices = @transform_16, window_bounds = array<i64: 1, 16, 384>}]} {
    %c0 = arith.constant 0 : index
    %c0_0 = arith.constant 0 : index
    %0 = vector.load %arg1[%c0, %c0_0] : memref<1x384xf32, #tpu.memory_space<vmem>>, vector<1x384xf32>
    %cst = arith.constant 0.000000e+00 : bf16
    %1 = vector.broadcast %cst : bf16 to vector<16x422xbf16>
    %c0_1 = arith.constant 0 : index
    %c0_2 = arith.constant 0 : index
    %2 = vector.load %arg18[%c0_1, %c0_2] : memref<16x422xbf16, #tpu.memory_space<vmem>>, vector<16x422xbf16>
    tpu.vector_store %arg18[%c0_1, %c0_2], %1 {strides = array<i32>} : memref<16x422xbf16, #tpu.memory_space<vmem>>, vector<16x422xbf16>,
    %cst_3 = arith.constant 0.000000e+00 : f32
    %3 = vector.broadcast %cst_3 : f32 to vector<4x384xf32>
    %c0_4 = arith.constant 0 : index
    %c0_5 = arith.constant 0 : index
    %4 = vector.load %arg20[%c0_4, %c0_5] : memref<4x384xf32, #tpu.memory_space<vmem>>, vector<4x384xf32>
    tpu.vector_store %arg20[%c0_4, %c0_5], %3 {strides = array<i32>} : memref<4x384xf32, #tpu.memory_space<vmem>>, vector<4x384xf32>,
    %c0_6 = arith.constant 0 : index
    %c0_7 = arith.constant 0 : index
    %c0_8 = arith.constant 0 : index
    %5 = vector.load %arg2[%c0_6, %c0_7, %c0_8] : memref<1x16x384xf32, #tpu.memory_space<vmem>>, vector<1x16x384xf32>
    %6 = vector.shape_cast %5 : vector<1x16x384xf32> to vector<16x384xf32>
    %c0_9 = arith.constant 0 : index
    %c0_10 = arith.constant 0 : index
    %c0_11 = arith.constant 0 : index
    %7 = vector.load %arg3[%c0_9, %c0_10, %c0_11] : memref<1x16x384xf32, #tpu.memory_space<vmem>>, vector<1x16x384xf32>
    %8 = vector.shape_cast %7 : vector<1x16x384xf32> to vector<16x384xf32>
    %c0_12 = arith.constant 0 : index
    %c0_13 = arith.constant 0 : index
    %c0_14 = arith.constant 0 : index
    %9 = vector.load %arg4[%c0_12, %c0_13, %c0_14] : memref<1x16x384xf32, #tpu.memory_space<vmem>>, vector<1x16x384xf32>
    %10 = vector.shape_cast %9 : vector<1x16x384xf32> to vector<16x384xf32>
    %11 = arith.truncf %8 : vector<16x384xf32> to vector<16x384xbf16>
    %c0_15 = arith.constant 0 : index
    %c19 = arith.constant 19 : index
    %12 = vector.load %arg18[%c0_15, %c19] : memref<16x422xbf16, #tpu.memory_space<vmem>>, vector<16x384xbf16>
    tpu.vector_store %arg18[%c0_15, %c19], %11 {strides = array<i32>} : memref<16x422xbf16, #tpu.memory_space<vmem>>, vector<16x384xbf16>,
    %c0_16 = arith.constant 0 : index
    %c0_17 = arith.constant 0 : index
    %13 = vector.load %arg18[%c0_16, %c0_17] : memref<16x422xbf16, #tpu.memory_space<vmem>>, vector<16x384xbf16>
    %c0_18 = arith.constant 0 : index
    %c0_19 = arith.constant 0 : index
    %14 = vector.load %arg19[%c0_18, %c0_19] : memref<288x384xbf16, #tpu.memory_space<vmem>>, vector<16x384xbf16>
    tpu.vector_store %arg19[%c0_18, %c0_19], %13 {strides = array<i32>} : memref<288x384xbf16, #tpu.memory_space<vmem>>, vector<16x384xbf16>,
    %c0_20 = arith.constant 0 : index
    %c1 = arith.constant 1 : index
    %15 = vector.load %arg18[%c0_20, %c1] : memref<16x422xbf16, #tpu.memory_space<vmem>>, vector<16x384xbf16>
    %c16 = arith.constant 16 : index
    %c0_21 = arith.constant 0 : index
    %16 = vector.load %arg19[%c16, %c0_21] : memref<288x384xbf16, #tpu.memory_space<vmem>>, vector<16x384xbf16>
    tpu.vector_store %arg19[%c16, %c0_21], %15 {strides = array<i32>} : memref<288x384xbf16, #tpu.memory_space<vmem>>, vector<16x384xbf16>,
    %c0_22 = arith.constant 0 : index
    %c2 = arith.constant 2 : index
    %17 = vector.load %arg18[%c0_22, %c2] : memref<16x422xbf16, #tpu.memory_space<vmem>>, vector<16x384xbf16>
    %c32 = arith.constant 32 : index
    %c0_23 = arith.constant 0 : index
    %18 = vector.load %arg19[%c32, %c0_23] : memref<288x384xbf16, #tpu.memory_space<vmem>>, vector<16x384xbf16>
    tpu.vector_store %arg19[%c32, %c0_23], %17 {strides = array<i32>} : memref<288x384xbf16, #tpu.memory_space<vmem>>, vector<16x384xbf16>,
    %c0_24 = arith.constant 0 : index
    %c18 = arith.constant 18 : index
    %19 = vector.load %arg18[%c0_24, %c18] : memref<16x422xbf16, #tpu.memory_space<vmem>>, vector<16x384xbf16>
    %c48 = arith.constant 48 : index
    %c0_25 = arith.constant 0 : index
    %20 = vector.load %arg19[%c48, %c0_25] : memref<288x384xbf16, #tpu.memory_space<vmem>>, vector<16x384xbf16>
    tpu.vector_store %arg19[%c48, %c0_25], %19 {strides = array<i32>} : memref<288x384xbf16, #tpu.memory_space<vmem>>, vector<16x384xbf16>,
    %c0_26 = arith.constant 0 : index
    %c19_27 = arith.constant 19 : index
    %21 = vector.load %arg18[%c0_26, %c19_27] : memref<16x422xbf16, #tpu.memory_space<vmem>>, vector<16x384xbf16>
    %c64 = arith.constant 64 : index
    %c0_28 = arith.constant 0 : index
    %22 = vector.load %arg19[%c64, %c0_28] : memref<288x384xbf16, #tpu.memory_space<vmem>>, vector<16x384xbf16>
    tpu.vector_store %arg19[%c64, %c0_28], %21 {strides = array<i32>} : memref<288x384xbf16, #tpu.memory_space<vmem>>, vector<16x384xbf16>,
    %c0_29 = arith.constant 0 : index
    %c20 = arith.constant 20 : index
    %23 = vector.load %arg18[%c0_29, %c20] : memref<16x422xbf16, #tpu.memory_space<vmem>>, vector<16x384xbf16>
    %c80 = arith.constant 80 : index
    %c0_30 = arith.constant 0 : index
    %24 = vector.load %arg19[%c80, %c0_30] : memref<288x384xbf16, #tpu.memory_space<vmem>>, vector<16x384xbf16>
    tpu.vector_store %arg19[%c80, %c0_30], %23 {strides = array<i32>} : memref<288x384xbf16, #tpu.memory_space<vmem>>, vector<16x384xbf16>,
    %c0_31 = arith.constant 0 : index
    %c36 = arith.constant 36 : index
    %25 = vector.load %arg18[%c0_31, %c36] : memref<16x422xbf16, #tpu.memory_space<vmem>>, vector<16x384xbf16>
    %c96 = arith.constant 96 : index
    %c0_32 = arith.constant 0 : index
    %26 = vector.load %arg19[%c96, %c0_32] : memref<288x384xbf16, #tpu.memory_space<vmem>>, vector<16x384xbf16>
    tpu.vector_store %arg19[%c96, %c0_32], %25 {strides = array<i32>} : memref<288x384xbf16, #tpu.memory_space<vmem>>, vector<16x384xbf16>,
    %c0_33 = arith.constant 0 : index
    %c37 = arith.constant 37 : index
    %27 = vector.load %arg18[%c0_33, %c37] : memref<16x422xbf16, #tpu.memory_space<vmem>>, vector<16x384xbf16>
    %c112 = arith.constant 112 : index
    %c0_34 = arith.constant 0 : index
    %28 = vector.load %arg19[%c112, %c0_34] : memref<288x384xbf16, #tpu.memory_space<vmem>>, vector<16x384xbf16>
    tpu.vector_store %arg19[%c112, %c0_34], %27 {strides = array<i32>} : memref<288x384xbf16, #tpu.memory_space<vmem>>, vector<16x384xbf16>,
    %c0_35 = arith.constant 0 : index
    %c38 = arith.constant 38 : index
    %29 = vector.load %arg18[%c0_35, %c38] : memref<16x422xbf16, #tpu.memory_space<vmem>>, vector<16x384xbf16>
    %c128 = arith.constant 128 : index
    %c0_36 = arith.constant 0 : index
    %30 = vector.load %arg19[%c128, %c0_36] : memref<288x384xbf16, #tpu.memory_space<vmem>>, vector<16x384xbf16>
    tpu.vector_store %arg19[%c128, %c0_36], %29 {strides = array<i32>} : memref<288x384xbf16, #tpu.memory_space<vmem>>, vector<16x384xbf16>,
    %c0_37 = arith.constant 0 : index
    %c0_38 = arith.constant 0 : index
    %31 = vector.load %arg5[%c0_37, %c0_38] : memref<8x144xbf16, #tpu.memory_space<vmem>>, vector<8x144xbf16>
    %c0_39 = arith.constant 0 : index
    %c0_40 = arith.constant 0 : index
    %32 = vector.load %arg19[%c0_39, %c0_40] : memref<288x384xbf16, #tpu.memory_space<vmem>>, vector<144x384xbf16>
    %cst_41 = arith.constant dense<0.000000e+00> : vector<8x384xf32>
    %33 = tpu.matmul %31, %32, %cst_41 {dimension_numbers = #tpu.dot_dimension_numbers<[1], [0], [0], [1], [0, 0, 1, 1], [], []>} : vector<8x144xbf16>, vector<144x384xbf16>, vector<8x384xf32> -> vector<8x384xf32>
    %c0_42 = arith.constant 0 : index
    %c0_43 = arith.constant 0 : index
    %34 = vector.load %arg6[%c0_42, %c0_43] : memref<8x1xf32, #tpu.memory_space<vmem>>, vector<8x1xf32>
    %35 = vector.broadcast %34 : vector<8x1xf32> to vector<8x384xf32>
    %36 = arith.addf %33, %35 : vector<8x384xf32>
    %cst_44 = arith.constant 0.000000e+00 : f32
    %37 = vector.broadcast %cst_44 : f32 to vector<8x384xf32>
    %38 = arith.maximumf %36, %37 : vector<8x384xf32>
    %39 = vector.broadcast %0 : vector<1x384xf32> to vector<8x384xf32>
    %40 = arith.mulf %38, %39 : vector<8x384xf32>
    %41 = arith.truncf %6 : vector<16x384xf32> to vector<16x384xbf16>
    %c0_45 = arith.constant 0 : index
    %c19_46 = arith.constant 19 : index
    %42 = vector.load %arg18[%c0_45, %c19_46] : memref<16x422xbf16, #tpu.memory_space<vmem>>, vector<16x384xbf16>
    tpu.vector_store %arg18[%c0_45, %c19_46], %41 {strides = array<i32>} : memref<16x422xbf16, #tpu.memory_space<vmem>>, vector<16x384xbf16>,
    %c0_47 = arith.constant 0 : index
    %c0_48 = arith.constant 0 : index
    %43 = vector.load %arg18[%c0_47, %c0_48] : memref<16x422xbf16, #tpu.memory_space<vmem>>, vector<16x384xbf16>
    %c0_49 = arith.constant 0 : index
    %c0_50 = arith.constant 0 : index
    %44 = vector.load %arg19[%c0_49, %c0_50] : memref<288x384xbf16, #tpu.memory_space<vmem>>, vector<16x384xbf16>
    tpu.vector_store %arg19[%c0_49, %c0_50], %43 {strides = array<i32>} : memref<288x384xbf16, #tpu.memory_space<vmem>>, vector<16x384xbf16>,
    %c0_51 = arith.constant 0 : index
    %c1_52 = arith.constant 1 : index
    %45 = vector.load %arg18[%c0_51, %c1_52] : memref<16x422xbf16, #tpu.memory_space<vmem>>, vector<16x384xbf16>
    %c16_53 = arith.constant 16 : index
    %c0_54 = arith.constant 0 : index
    %46 = vector.load %arg19[%c16_53, %c0_54] : memref<288x384xbf16, #tpu.memory_space<vmem>>, vector<16x384xbf16>
    tpu.vector_store %arg19[%c16_53, %c0_54], %45 {strides = array<i32>} : memref<288x384xbf16, #tpu.memory_space<vmem>>, vector<16x384xbf16>,
    %c0_55 = arith.constant 0 : index
    %c2_56 = arith.constant 2 : index
    %47 = vector.load %arg18[%c0_55, %c2_56] : memref<16x422xbf16, #tpu.memory_space<vmem>>, vector<16x384xbf16>
    %c32_57 = arith.constant 32 : index
    %c0_58 = arith.constant 0 : index
    %48 = vector.load %arg19[%c32_57, %c0_58] : memref<288x384xbf16, #tpu.memory_space<vmem>>, vector<16x384xbf16>
    tpu.vector_store %arg19[%c32_57, %c0_58], %47 {strides = array<i32>} : memref<288x384xbf16, #tpu.memory_space<vmem>>, vector<16x384xbf16>,
    %c0_59 = arith.constant 0 : index
    %c18_60 = arith.constant 18 : index
    %49 = vector.load %arg18[%c0_59, %c18_60] : memref<16x422xbf16, #tpu.memory_space<vmem>>, vector<16x384xbf16>
    %c48_61 = arith.constant 48 : index
    %c0_62 = arith.constant 0 : index
    %50 = vector.load %arg19[%c48_61, %c0_62] : memref<288x384xbf16, #tpu.memory_space<vmem>>, vector<16x384xbf16>
    tpu.vector_store %arg19[%c48_61, %c0_62], %49 {strides = array<i32>} : memref<288x384xbf16, #tpu.memory_space<vmem>>, vector<16x384xbf16>,
    %c0_63 = arith.constant 0 : index
    %c19_64 = arith.constant 19 : index
    %51 = vector.load %arg18[%c0_63, %c19_64] : memref<16x422xbf16, #tpu.memory_space<vmem>>, vector<16x384xbf16>
    %c64_65 = arith.constant 64 : index
    %c0_66 = arith.constant 0 : index
    %52 = vector.load %arg19[%c64_65, %c0_66] : memref<288x384xbf16, #tpu.memory_space<vmem>>, vector<16x384xbf16>
    tpu.vector_store %arg19[%c64_65, %c0_66], %51 {strides = array<i32>} : memref<288x384xbf16, #tpu.memory_space<vmem>>, vector<16x384xbf16>,
    %c0_67 = arith.constant 0 : index
    %c20_68 = arith.constant 20 : index
    %53 = vector.load %arg18[%c0_67, %c20_68] : memref<16x422xbf16, #tpu.memory_space<vmem>>, vector<16x384xbf16>
    %c80_69 = arith.constant 80 : index
    %c0_70 = arith.constant 0 : index
    %54 = vector.load %arg19[%c80_69, %c0_70] : memref<288x384xbf16, #tpu.memory_space<vmem>>, vector<16x384xbf16>
    tpu.vector_store %arg19[%c80_69, %c0_70], %53 {strides = array<i32>} : memref<288x384xbf16, #tpu.memory_space<vmem>>, vector<16x384xbf16>,
    %c0_71 = arith.constant 0 : index
    %c36_72 = arith.constant 36 : index
    %55 = vector.load %arg18[%c0_71, %c36_72] : memref<16x422xbf16, #tpu.memory_space<vmem>>, vector<16x384xbf16>
    %c96_73 = arith.constant 96 : index
    %c0_74 = arith.constant 0 : index
    %56 = vector.load %arg19[%c96_73, %c0_74] : memref<288x384xbf16, #tpu.memory_space<vmem>>, vector<16x384xbf16>
    tpu.vector_store %arg19[%c96_73, %c0_74], %55 {strides = array<i32>} : memref<288x384xbf16, #tpu.memory_space<vmem>>, vector<16x384xbf16>,
    %c0_75 = arith.constant 0 : index
    %c37_76 = arith.constant 37 : index
    %57 = vector.load %arg18[%c0_75, %c37_76] : memref<16x422xbf16, #tpu.memory_space<vmem>>, vector<16x384xbf16>
    %c112_77 = arith.constant 112 : index
    %c0_78 = arith.constant 0 : index
    %58 = vector.load %arg19[%c112_77, %c0_78] : memref<288x384xbf16, #tpu.memory_space<vmem>>, vector<16x384xbf16>
    tpu.vector_store %arg19[%c112_77, %c0_78], %57 {strides = array<i32>} : memref<288x384xbf16, #tpu.memory_space<vmem>>, vector<16x384xbf16>,
    %c0_79 = arith.constant 0 : index
    %c38_80 = arith.constant 38 : index
    %59 = vector.load %arg18[%c0_79, %c38_80] : memref<16x422xbf16, #tpu.memory_space<vmem>>, vector<16x384xbf16>
    %c128_81 = arith.constant 128 : index
    %c0_82 = arith.constant 0 : index
    %60 = vector.load %arg19[%c128_81, %c0_82] : memref<288x384xbf16, #tpu.memory_space<vmem>>, vector<16x384xbf16>
    tpu.vector_store %arg19[%c128_81, %c0_82], %59 {strides = array<i32>} : memref<288x384xbf16, #tpu.memory_space<vmem>>, vector<16x384xbf16>,
    %c0_83 = arith.constant 0 : index
    %c0_84 = arith.constant 0 : index
    %61 = vector.load %arg7[%c0_83, %c0_84] : memref<16x144xbf16, #tpu.memory_space<vmem>>, vector<16x144xbf16>
    %c0_85 = arith.constant 0 : index
    %c0_86 = arith.constant 0 : index
    %62 = vector.load %arg19[%c0_85, %c0_86] : memref<288x384xbf16, #tpu.memory_space<vmem>>, vector<144x384xbf16>
    %cst_87 = arith.constant dense<0.000000e+00> : vector<16x384xf32>
    %63 = tpu.matmul %61, %62, %cst_87 {dimension_numbers = #tpu.dot_dimension_numbers<[1], [0], [0], [1], [0, 0, 1, 1], [], []>} : vector<16x144xbf16>, vector<144x384xbf16>, vector<16x384xf32> -> vector<16x384xf32>
    %c0_88 = arith.constant 0 : index
    %c0_89 = arith.constant 0 : index
    %64 = vector.load %arg8[%c0_88, %c0_89] : memref<16x1xf32, #tpu.memory_space<vmem>>, vector<16x1xf32>
    %65 = vector.broadcast %64 : vector<16x1xf32> to vector<16x384xf32>
    %66 = arith.addf %63, %65 : vector<16x384xf32>
    %cst_90 = arith.constant 0.000000e+00 : f32
    %67 = vector.broadcast %cst_90 : f32 to vector<16x384xf32>
    %68 = arith.maximumf %66, %67 : vector<16x384xf32>
    %69 = vector.broadcast %0 : vector<1x384xf32> to vector<16x384xf32>
    %70 = arith.mulf %68, %69 : vector<16x384xf32>
    %71 = vector.extract_strided_slice %70 {offsets = [0, 0], sizes = [4, 384], strides = [1, 1]} : vector<16x384xf32> to vector<4x384xf32>
    %72 = vector.extract_strided_slice %70 {offsets = [4, 0], sizes = [4, 384], strides = [1, 1]} : vector<16x384xf32> to vector<4x384xf32>
    %73 = vector.extract_strided_slice %70 {offsets = [8, 0], sizes = [4, 384], strides = [1, 1]} : vector<16x384xf32> to vector<4x384xf32>
    %74 = vector.extract_strided_slice %70 {offsets = [12, 0], sizes = [4, 384], strides = [1, 1]} : vector<16x384xf32> to vector<4x384xf32>
    %75 = vector.extract_strided_slice %40 {offsets = [0, 0], sizes = [4, 384], strides = [1, 1]} : vector<8x384xf32> to vector<4x384xf32>
    %76 = vector.extract_strided_slice %75 {offsets = [0, 19], sizes = [4, 16], strides = [1, 1]} : vector<4x384xf32> to vector<4x16xf32>
    %c0_91 = arith.constant 0 : index
    %c0_92 = arith.constant 0 : index
    %77 = vector.load %arg21[%c0_91, %c0_92] : memref<12x256xf32, #tpu.memory_space<vmem>>, vector<4x16xf32>
    tpu.vector_store %arg21[%c0_91, %c0_92], %76 {strides = array<i32>} : memref<12x256xf32, #tpu.memory_space<vmem>>, vector<4x16xf32>,
    %78 = vector.extract_strided_slice %71 {offsets = [0, 19], sizes = [4, 16], strides = [1, 1]} : vector<4x384xf32> to vector<4x16xf32>
    %c4 = arith.constant 4 : index
    %c0_93 = arith.constant 0 : index
    %79 = vector.load %arg21[%c4, %c0_93] : memref<12x256xf32, #tpu.memory_space<vmem>>, vector<4x16xf32>
    tpu.vector_store %arg21[%c4, %c0_93], %78 {strides = array<i32>} : memref<12x256xf32, #tpu.memory_space<vmem>>, vector<4x16xf32>,
    %80 = vector.extract_strided_slice %72 {offsets = [0, 19], sizes = [4, 16], strides = [1, 1]} : vector<4x384xf32> to vector<4x16xf32>
    %c8 = arith.constant 8 : index
    %c0_94 = arith.constant 0 : index
    %81 = vector.load %arg21[%c8, %c0_94] : memref<12x256xf32, #tpu.memory_space<vmem>>, vector<4x16xf32>
    tpu.vector_store %arg21[%c8, %c0_94], %80 {strides = array<i32>} : memref<12x256xf32, #tpu.memory_space<vmem>>, vector<4x16xf32>,
    %82 = vector.extract_strided_slice %75 {offsets = [0, 37], sizes = [4, 16], strides = [1, 1]} : vector<4x384xf32> to vector<4x16xf32>
    %c0_95 = arith.constant 0 : index
    %c16_96 = arith.constant 16 : index
    %83 = vector.load %arg21[%c0_95, %c16_96] : memref<12x256xf32, #tpu.memory_space<vmem>>, vector<4x16xf32>
    tpu.vector_store %arg21[%c0_95, %c16_96], %82 {strides = array<i32>} : memref<12x256xf32, #tpu.memory_space<vmem>>, vector<4x16xf32>,
    %84 = vector.extract_strided_slice %71 {offsets = [0, 37], sizes = [4, 16], strides = [1, 1]} : vector<4x384xf32> to vector<4x16xf32>
    %c4_97 = arith.constant 4 : index
    %c16_98 = arith.constant 16 : index
    %85 = vector.load %arg21[%c4_97, %c16_98] : memref<12x256xf32, #tpu.memory_space<vmem>>, vector<4x16xf32>
    tpu.vector_store %arg21[%c4_97, %c16_98], %84 {strides = array<i32>} : memref<12x256xf32, #tpu.memory_space<vmem>>, vector<4x16xf32>,
    %86 = vector.extract_strided_slice %72 {offsets = [0, 37], sizes = [4, 16], strides = [1, 1]} : vector<4x384xf32> to vector<4x16xf32>
    %c8_99 = arith.constant 8 : index
    %c16_100 = arith.constant 16 : index
    %87 = vector.load %arg21[%c8_99, %c16_100] : memref<12x256xf32, #tpu.memory_space<vmem>>, vector<4x16xf32>
    tpu.vector_store %arg21[%c8_99, %c16_100], %86 {strides = array<i32>} : memref<12x256xf32, #tpu.memory_space<vmem>>, vector<4x16xf32>,
    %88 = vector.extract_strided_slice %75 {offsets = [0, 55], sizes = [4, 16], strides = [1, 1]} : vector<4x384xf32> to vector<4x16xf32>
    %c0_101 = arith.constant 0 : index
    %c32_102 = arith.constant 32 : index
    %89 = vector.load %arg21[%c0_101, %c32_102] : memref<12x256xf32, #tpu.memory_space<vmem>>, vector<4x16xf32>
    tpu.vector_store %arg21[%c0_101, %c32_102], %88 {strides = array<i32>} : memref<12x256xf32, #tpu.memory_space<vmem>>, vector<4x16xf32>,
    %90 = vector.extract_strided_slice %71 {offsets = [0, 55], sizes = [4, 16], strides = [1, 1]} : vector<4x384xf32> to vector<4x16xf32>
    %c4_103 = arith.constant 4 : index
    %c32_104 = arith.constant 32 : index
    %91 = vector.load %arg21[%c4_103, %c32_104] : memref<12x256xf32, #tpu.memory_space<vmem>>, vector<4x16xf32>
    tpu.vector_store %arg21[%c4_103, %c32_104], %90 {strides = array<i32>} : memref<12x256xf32, #tpu.memory_space<vmem>>, vector<4x16xf32>,
    %92 = vector.extract_strided_slice %72 {offsets = [0, 55], sizes = [4, 16], strides = [1, 1]} : vector<4x384xf32> to vector<4x16xf32>
    %c8_105 = arith.constant 8 : index
    %c32_106 = arith.constant 32 : index
    %93 = vector.load %arg21[%c8_105, %c32_106] : memref<12x256xf32, #tpu.memory_space<vmem>>, vector<4x16xf32>
    tpu.vector_store %arg21[%c8_105, %c32_106], %92 {strides = array<i32>} : memref<12x256xf32, #tpu.memory_space<vmem>>, vector<4x16xf32>,
    %94 = vector.extract_strided_slice %75 {offsets = [0, 73], sizes = [4, 16], strides = [1, 1]} : vector<4x384xf32> to vector<4x16xf32>
    %c0_107 = arith.constant 0 : index
    %c48_108 = arith.constant 48 : index
    %95 = vector.load %arg21[%c0_107, %c48_108] : memref<12x256xf32, #tpu.memory_space<vmem>>, vector<4x16xf32>
    tpu.vector_store %arg21[%c0_107, %c48_108], %94 {strides = array<i32>} : memref<12x256xf32, #tpu.memory_space<vmem>>, vector<4x16xf32>,
    %96 = vector.extract_strided_slice %71 {offsets = [0, 73], sizes = [4, 16], strides = [1, 1]} : vector<4x384xf32> to vector<4x16xf32>
    %c4_109 = arith.constant 4 : index
    %c48_110 = arith.constant 48 : index
    %97 = vector.load %arg21[%c4_109, %c48_110] : memref<12x256xf32, #tpu.memory_space<vmem>>, vector<4x16xf32>
    tpu.vector_store %arg21[%c4_109, %c48_110], %96 {strides = array<i32>} : memref<12x256xf32, #tpu.memory_space<vmem>>, vector<4x16xf32>,
    %98 = vector.extract_strided_slice %72 {offsets = [0, 73], sizes = [4, 16], strides = [1, 1]} : vector<4x384xf32> to vector<4x16xf32>
    %c8_111 = arith.constant 8 : index
    %c48_112 = arith.constant 48 : index
    %99 = vector.load %arg21[%c8_111, %c48_112] : memref<12x256xf32, #tpu.memory_space<vmem>>, vector<4x16xf32>
    tpu.vector_store %arg21[%c8_111, %c48_112], %98 {strides = array<i32>} : memref<12x256xf32, #tpu.memory_space<vmem>>, vector<4x16xf32>,
    %100 = vector.extract_strided_slice %75 {offsets = [0, 91], sizes = [4, 16], strides = [1, 1]} : vector<4x384xf32> to vector<4x16xf32>
    %c0_113 = arith.constant 0 : index
    %c64_114 = arith.constant 64 : index
    %101 = vector.load %arg21[%c0_113, %c64_114] : memref<12x256xf32, #tpu.memory_space<vmem>>, vector<4x16xf32>
    tpu.vector_store %arg21[%c0_113, %c64_114], %100 {strides = array<i32>} : memref<12x256xf32, #tpu.memory_space<vmem>>, vector<4x16xf32>,
    %102 = vector.extract_strided_slice %71 {offsets = [0, 91], sizes = [4, 16], strides = [1, 1]} : vector<4x384xf32> to vector<4x16xf32>
    %c4_115 = arith.constant 4 : index
    %c64_116 = arith.constant 64 : index
    %103 = vector.load %arg21[%c4_115, %c64_116] : memref<12x256xf32, #tpu.memory_space<vmem>>, vector<4x16xf32>
    tpu.vector_store %arg21[%c4_115, %c64_116], %102 {strides = array<i32>} : memref<12x256xf32, #tpu.memory_space<vmem>>, vector<4x16xf32>,
    %104 = vector.extract_strided_slice %72 {offsets = [0, 91], sizes = [4, 16], strides = [1, 1]} : vector<4x384xf32> to vector<4x16xf32>
    %c8_117 = arith.constant 8 : index
    %c64_118 = arith.constant 64 : index
    %105 = vector.load %arg21[%c8_117, %c64_118] : memref<12x256xf32, #tpu.memory_space<vmem>>, vector<4x16xf32>
    tpu.vector_store %arg21[%c8_117, %c64_118], %104 {strides = array<i32>} : memref<12x256xf32, #tpu.memory_space<vmem>>, vector<4x16xf32>,
    %106 = vector.extract_strided_slice %75 {offsets = [0, 109], sizes = [4, 16], strides = [1, 1]} : vector<4x384xf32> to vector<4x16xf32>
    %c0_119 = arith.constant 0 : index
    %c80_120 = arith.constant 80 : index
    %107 = vector.load %arg21[%c0_119, %c80_120] : memref<12x256xf32, #tpu.memory_space<vmem>>, vector<4x16xf32>
    tpu.vector_store %arg21[%c0_119, %c80_120], %106 {strides = array<i32>} : memref<12x256xf32, #tpu.memory_space<vmem>>, vector<4x16xf32>,
    %108 = vector.extract_strided_slice %71 {offsets = [0, 109], sizes = [4, 16], strides = [1, 1]} : vector<4x384xf32> to vector<4x16xf32>
    %c4_121 = arith.constant 4 : index
    %c80_122 = arith.constant 80 : index
    %109 = vector.load %arg21[%c4_121, %c80_122] : memref<12x256xf32, #tpu.memory_space<vmem>>, vector<4x16xf32>
    tpu.vector_store %arg21[%c4_121, %c80_122], %108 {strides = array<i32>} : memref<12x256xf32, #tpu.memory_space<vmem>>, vector<4x16xf32>,
    %110 = vector.extract_strided_slice %72 {offsets = [0, 109], sizes = [4, 16], strides = [1, 1]} : vector<4x384xf32> to vector<4x16xf32>
    %c8_123 = arith.constant 8 : index
    %c80_124 = arith.constant 80 : index
    %111 = vector.load %arg21[%c8_123, %c80_124] : memref<12x256xf32, #tpu.memory_space<vmem>>, vector<4x16xf32>
    tpu.vector_store %arg21[%c8_123, %c80_124], %110 {strides = array<i32>} : memref<12x256xf32, #tpu.memory_space<vmem>>, vector<4x16xf32>,
    %112 = vector.extract_strided_slice %75 {offsets = [0, 127], sizes = [4, 16], strides = [1, 1]} : vector<4x384xf32> to vector<4x16xf32>
    %c0_125 = arith.constant 0 : index
    %c96_126 = arith.constant 96 : index
    %113 = vector.load %arg21[%c0_125, %c96_126] : memref<12x256xf32, #tpu.memory_space<vmem>>, vector<4x16xf32>
    tpu.vector_store %arg21[%c0_125, %c96_126], %112 {strides = array<i32>} : memref<12x256xf32, #tpu.memory_space<vmem>>, vector<4x16xf32>,
    %114 = vector.extract_strided_slice %71 {offsets = [0, 127], sizes = [4, 16], strides = [1, 1]} : vector<4x384xf32> to vector<4x16xf32>
    %c4_127 = arith.constant 4 : index
    %c96_128 = arith.constant 96 : index
    %115 = vector.load %arg21[%c4_127, %c96_128] : memref<12x256xf32, #tpu.memory_space<vmem>>, vector<4x16xf32>
    tpu.vector_store %arg21[%c4_127, %c96_128], %114 {strides = array<i32>} : memref<12x256xf32, #tpu.memory_space<vmem>>, vector<4x16xf32>,
    %116 = vector.extract_strided_slice %72 {offsets = [0, 127], sizes = [4, 16], strides = [1, 1]} : vector<4x384xf32> to vector<4x16xf32>
    %c8_129 = arith.constant 8 : index
    %c96_130 = arith.constant 96 : index
    %117 = vector.load %arg21[%c8_129, %c96_130] : memref<12x256xf32, #tpu.memory_space<vmem>>, vector<4x16xf32>
    tpu.vector_store %arg21[%c8_129, %c96_130], %116 {strides = array<i32>} : memref<12x256xf32, #tpu.memory_space<vmem>>, vector<4x16xf32>,
    %118 = vector.extract_strided_slice %75 {offsets = [0, 145], sizes = [4, 16], strides = [1, 1]} : vector<4x384xf32> to vector<4x16xf32>
    %c0_131 = arith.constant 0 : index
    %c112_132 = arith.constant 112 : index
    %119 = vector.load %arg21[%c0_131, %c112_132] : memref<12x256xf32, #tpu.memory_space<vmem>>, vector<4x16xf32>
    tpu.vector_store %arg21[%c0_131, %c112_132], %118 {strides = array<i32>} : memref<12x256xf32, #tpu.memory_space<vmem>>, vector<4x16xf32>,
    %120 = vector.extract_strided_slice %71 {offsets = [0, 145], sizes = [4, 16], strides = [1, 1]} : vector<4x384xf32> to vector<4x16xf32>
    %c4_133 = arith.constant 4 : index
    %c112_134 = arith.constant 112 : index
    %121 = vector.load %arg21[%c4_133, %c112_134] : memref<12x256xf32, #tpu.memory_space<vmem>>, vector<4x16xf32>
    tpu.vector_store %arg21[%c4_133, %c112_134], %120 {strides = array<i32>} : memref<12x256xf32, #tpu.memory_space<vmem>>, vector<4x16xf32>,
    %122 = vector.extract_strided_slice %72 {offsets = [0, 145], sizes = [4, 16], strides = [1, 1]} : vector<4x384xf32> to vector<4x16xf32>
    %c8_135 = arith.constant 8 : index
    %c112_136 = arith.constant 112 : index
    %123 = vector.load %arg21[%c8_135, %c112_136] : memref<12x256xf32, #tpu.memory_space<vmem>>, vector<4x16xf32>
    tpu.vector_store %arg21[%c8_135, %c112_136], %122 {strides = array<i32>} : memref<12x256xf32, #tpu.memory_space<vmem>>, vector<4x16xf32>,
    %124 = vector.extract_strided_slice %75 {offsets = [0, 163], sizes = [4, 16], strides = [1, 1]} : vector<4x384xf32> to vector<4x16xf32>
    %c0_137 = arith.constant 0 : index
    %c128_138 = arith.constant 128 : index
    %125 = vector.load %arg21[%c0_137, %c128_138] : memref<12x256xf32, #tpu.memory_space<vmem>>, vector<4x16xf32>
    tpu.vector_store %arg21[%c0_137, %c128_138], %124 {strides = array<i32>} : memref<12x256xf32, #tpu.memory_space<vmem>>, vector<4x16xf32>,
    %126 = vector.extract_strided_slice %71 {offsets = [0, 163], sizes = [4, 16], strides = [1, 1]} : vector<4x384xf32> to vector<4x16xf32>
    %c4_139 = arith.constant 4 : index
    %c128_140 = arith.constant 128 : index
    %127 = vector.load %arg21[%c4_139, %c128_140] : memref<12x256xf32, #tpu.memory_space<vmem>>, vector<4x16xf32>
    tpu.vector_store %arg21[%c4_139, %c128_140], %126 {strides = array<i32>} : memref<12x256xf32, #tpu.memory_space<vmem>>, vector<4x16xf32>,
    %128 = vector.extract_strided_slice %72 {offsets = [0, 163], sizes = [4, 16], strides = [1, 1]} : vector<4x384xf32> to vector<4x16xf32>
    %c8_141 = arith.constant 8 : index
    %c128_142 = arith.constant 128 : index
    %129 = vector.load %arg21[%c8_141, %c128_142] : memref<12x256xf32, #tpu.memory_space<vmem>>, vector<4x16xf32>
    tpu.vector_store %arg21[%c8_141, %c128_142], %128 {strides = array<i32>} : memref<12x256xf32, #tpu.memory_space<vmem>>, vector<4x16xf32>,
    %130 = vector.extract_strided_slice %75 {offsets = [0, 181], sizes = [4, 16], strides = [1, 1]} : vector<4x384xf32> to vector<4x16xf32>
    %c0_143 = arith.constant 0 : index
    %c144 = arith.constant 144 : index
    %131 = vector.load %arg21[%c0_143, %c144] : memref<12x256xf32, #tpu.memory_space<vmem>>, vector<4x16xf32>
    tpu.vector_store %arg21[%c0_143, %c144], %130 {strides = array<i32>} : memref<12x256xf32, #tpu.memory_space<vmem>>, vector<4x16xf32>,
    %132 = vector.extract_strided_slice %71 {offsets = [0, 181], sizes = [4, 16], strides = [1, 1]} : vector<4x384xf32> to vector<4x16xf32>
    %c4_144 = arith.constant 4 : index
    %c144_145 = arith.constant 144 : index
    %133 = vector.load %arg21[%c4_144, %c144_145] : memref<12x256xf32, #tpu.memory_space<vmem>>, vector<4x16xf32>
    tpu.vector_store %arg21[%c4_144, %c144_145], %132 {strides = array<i32>} : memref<12x256xf32, #tpu.memory_space<vmem>>, vector<4x16xf32>,
    %134 = vector.extract_strided_slice %72 {offsets = [0, 181], sizes = [4, 16], strides = [1, 1]} : vector<4x384xf32> to vector<4x16xf32>
    %c8_146 = arith.constant 8 : index
    %c144_147 = arith.constant 144 : index
    %135 = vector.load %arg21[%c8_146, %c144_147] : memref<12x256xf32, #tpu.memory_space<vmem>>, vector<4x16xf32>
    tpu.vector_store %arg21[%c8_146, %c144_147], %134 {strides = array<i32>} : memref<12x256xf32, #tpu.memory_space<vmem>>, vector<4x16xf32>,
    %136 = vector.extract_strided_slice %75 {offsets = [0, 199], sizes = [4, 16], strides = [1, 1]} : vector<4x384xf32> to vector<4x16xf32>
    %c0_148 = arith.constant 0 : index
    %c160 = arith.constant 160 : index
    %137 = vector.load %arg21[%c0_148, %c160] : memref<12x256xf32, #tpu.memory_space<vmem>>, vector<4x16xf32>
    tpu.vector_store %arg21[%c0_148, %c160], %136 {strides = array<i32>} : memref<12x256xf32, #tpu.memory_space<vmem>>, vector<4x16xf32>,
    %138 = vector.extract_strided_slice %71 {offsets = [0, 199], sizes = [4, 16], strides = [1, 1]} : vector<4x384xf32> to vector<4x16xf32>
    %c4_149 = arith.constant 4 : index
    %c160_150 = arith.constant 160 : index
    %139 = vector.load %arg21[%c4_149, %c160_150] : memref<12x256xf32, #tpu.memory_space<vmem>>, vector<4x16xf32>
    tpu.vector_store %arg21[%c4_149, %c160_150], %138 {strides = array<i32>} : memref<12x256xf32, #tpu.memory_space<vmem>>, vector<4x16xf32>,
    %140 = vector.extract_strided_slice %72 {offsets = [0, 199], sizes = [4, 16], strides = [1, 1]} : vector<4x384xf32> to vector<4x16xf32>
    %c8_151 = arith.constant 8 : index
    %c160_152 = arith.constant 160 : index
    %141 = vector.load %arg21[%c8_151, %c160_152] : memref<12x256xf32, #tpu.memory_space<vmem>>, vector<4x16xf32>
    tpu.vector_store %arg21[%c8_151, %c160_152], %140 {strides = array<i32>} : memref<12x256xf32, #tpu.memory_space<vmem>>, vector<4x16xf32>,
    %142 = vector.extract_strided_slice %75 {offsets = [0, 217], sizes = [4, 16], strides = [1, 1]} : vector<4x384xf32> to vector<4x16xf32>
    %c0_153 = arith.constant 0 : index
    %c176 = arith.constant 176 : index
    %143 = vector.load %arg21[%c0_153, %c176] : memref<12x256xf32, #tpu.memory_space<vmem>>, vector<4x16xf32>
    tpu.vector_store %arg21[%c0_153, %c176], %142 {strides = array<i32>} : memref<12x256xf32, #tpu.memory_space<vmem>>, vector<4x16xf32>,
    %144 = vector.extract_strided_slice %71 {offsets = [0, 217], sizes = [4, 16], strides = [1, 1]} : vector<4x384xf32> to vector<4x16xf32>
    %c4_154 = arith.constant 4 : index
    %c176_155 = arith.constant 176 : index
    %145 = vector.load %arg21[%c4_154, %c176_155] : memref<12x256xf32, #tpu.memory_space<vmem>>, vector<4x16xf32>
    tpu.vector_store %arg21[%c4_154, %c176_155], %144 {strides = array<i32>} : memref<12x256xf32, #tpu.memory_space<vmem>>, vector<4x16xf32>,
    %146 = vector.extract_strided_slice %72 {offsets = [0, 217], sizes = [4, 16], strides = [1, 1]} : vector<4x384xf32> to vector<4x16xf32>
    %c8_156 = arith.constant 8 : index
    %c176_157 = arith.constant 176 : index
    %147 = vector.load %arg21[%c8_156, %c176_157] : memref<12x256xf32, #tpu.memory_space<vmem>>, vector<4x16xf32>
    tpu.vector_store %arg21[%c8_156, %c176_157], %146 {strides = array<i32>} : memref<12x256xf32, #tpu.memory_space<vmem>>, vector<4x16xf32>,
    %148 = vector.extract_strided_slice %75 {offsets = [0, 235], sizes = [4, 16], strides = [1, 1]} : vector<4x384xf32> to vector<4x16xf32>
    %c0_158 = arith.constant 0 : index
    %c192 = arith.constant 192 : index
    %149 = vector.load %arg21[%c0_158, %c192] : memref<12x256xf32, #tpu.memory_space<vmem>>, vector<4x16xf32>
    tpu.vector_store %arg21[%c0_158, %c192], %148 {strides = array<i32>} : memref<12x256xf32, #tpu.memory_space<vmem>>, vector<4x16xf32>,
    %150 = vector.extract_strided_slice %71 {offsets = [0, 235], sizes = [4, 16], strides = [1, 1]} : vector<4x384xf32> to vector<4x16xf32>
    %c4_159 = arith.constant 4 : index
    %c192_160 = arith.constant 192 : index
    %151 = vector.load %arg21[%c4_159, %c192_160] : memref<12x256xf32, #tpu.memory_space<vmem>>, vector<4x16xf32>
    tpu.vector_store %arg21[%c4_159, %c192_160], %150 {strides = array<i32>} : memref<12x256xf32, #tpu.memory_space<vmem>>, vector<4x16xf32>,
    %152 = vector.extract_strided_slice %72 {offsets = [0, 235], sizes = [4, 16], strides = [1, 1]} : vector<4x384xf32> to vector<4x16xf32>
    %c8_161 = arith.constant 8 : index
    %c192_162 = arith.constant 192 : index
    %153 = vector.load %arg21[%c8_161, %c192_162] : memref<12x256xf32, #tpu.memory_space<vmem>>, vector<4x16xf32>
    tpu.vector_store %arg21[%c8_161, %c192_162], %152 {strides = array<i32>} : memref<12x256xf32, #tpu.memory_space<vmem>>, vector<4x16xf32>,
    %154 = vector.extract_strided_slice %75 {offsets = [0, 253], sizes = [4, 16], strides = [1, 1]} : vector<4x384xf32> to vector<4x16xf32>
    %c0_163 = arith.constant 0 : index
    %c208 = arith.constant 208 : index
    %155 = vector.load %arg21[%c0_163, %c208] : memref<12x256xf32, #tpu.memory_space<vmem>>, vector<4x16xf32>
    tpu.vector_store %arg21[%c0_163, %c208], %154 {strides = array<i32>} : memref<12x256xf32, #tpu.memory_space<vmem>>, vector<4x16xf32>,
    %156 = vector.extract_strided_slice %71 {offsets = [0, 253], sizes = [4, 16], strides = [1, 1]} : vector<4x384xf32> to vector<4x16xf32>
    %c4_164 = arith.constant 4 : index
    %c208_165 = arith.constant 208 : index
    %157 = vector.load %arg21[%c4_164, %c208_165] : memref<12x256xf32, #tpu.memory_space<vmem>>, vector<4x16xf32>
    tpu.vector_store %arg21[%c4_164, %c208_165], %156 {strides = array<i32>} : memref<12x256xf32, #tpu.memory_space<vmem>>, vector<4x16xf32>,
    %158 = vector.extract_strided_slice %72 {offsets = [0, 253], sizes = [4, 16], strides = [1, 1]} : vector<4x384xf32> to vector<4x16xf32>
    %c8_166 = arith.constant 8 : index
    %c208_167 = arith.constant 208 : index
    %159 = vector.load %arg21[%c8_166, %c208_167] : memref<12x256xf32, #tpu.memory_space<vmem>>, vector<4x16xf32>
    tpu.vector_store %arg21[%c8_166, %c208_167], %158 {strides = array<i32>} : memref<12x256xf32, #tpu.memory_space<vmem>>, vector<4x16xf32>,
    %160 = vector.extract_strided_slice %75 {offsets = [0, 271], sizes = [4, 16], strides = [1, 1]} : vector<4x384xf32> to vector<4x16xf32>
    %c0_168 = arith.constant 0 : index
    %c224 = arith.constant 224 : index
    %161 = vector.load %arg21[%c0_168, %c224] : memref<12x256xf32, #tpu.memory_space<vmem>>, vector<4x16xf32>
    tpu.vector_store %arg21[%c0_168, %c224], %160 {strides = array<i32>} : memref<12x256xf32, #tpu.memory_space<vmem>>, vector<4x16xf32>,
    %162 = vector.extract_strided_slice %71 {offsets = [0, 271], sizes = [4, 16], strides = [1, 1]} : vector<4x384xf32> to vector<4x16xf32>
    %c4_169 = arith.constant 4 : index
    %c224_170 = arith.constant 224 : index
    %163 = vector.load %arg21[%c4_169, %c224_170] : memref<12x256xf32, #tpu.memory_space<vmem>>, vector<4x16xf32>
    tpu.vector_store %arg21[%c4_169, %c224_170], %162 {strides = array<i32>} : memref<12x256xf32, #tpu.memory_space<vmem>>, vector<4x16xf32>,
    %164 = vector.extract_strided_slice %72 {offsets = [0, 271], sizes = [4, 16], strides = [1, 1]} : vector<4x384xf32> to vector<4x16xf32>
    %c8_171 = arith.constant 8 : index
    %c224_172 = arith.constant 224 : index
    %165 = vector.load %arg21[%c8_171, %c224_172] : memref<12x256xf32, #tpu.memory_space<vmem>>, vector<4x16xf32>
    tpu.vector_store %arg21[%c8_171, %c224_172], %164 {strides = array<i32>} : memref<12x256xf32, #tpu.memory_space<vmem>>, vector<4x16xf32>,
    %166 = vector.extract_strided_slice %75 {offsets = [0, 289], sizes = [4, 16], strides = [1, 1]} : vector<4x384xf32> to vector<4x16xf32>
    %c0_173 = arith.constant 0 : index
    %c240 = arith.constant 240 : index
    %167 = vector.load %arg21[%c0_173, %c240] : memref<12x256xf32, #tpu.memory_space<vmem>>, vector<4x16xf32>
    tpu.vector_store %arg21[%c0_173, %c240], %166 {strides = array<i32>} : memref<12x256xf32, #tpu.memory_space<vmem>>, vector<4x16xf32>,
    %168 = vector.extract_strided_slice %71 {offsets = [0, 289], sizes = [4, 16], strides = [1, 1]} : vector<4x384xf32> to vector<4x16xf32>
    %c4_174 = arith.constant 4 : index
    %c240_175 = arith.constant 240 : index
    %169 = vector.load %arg21[%c4_174, %c240_175] : memref<12x256xf32, #tpu.memory_space<vmem>>, vector<4x16xf32>
    tpu.vector_store %arg21[%c4_174, %c240_175], %168 {strides = array<i32>} : memref<12x256xf32, #tpu.memory_space<vmem>>, vector<4x16xf32>,
    %170 = vector.extract_strided_slice %72 {offsets = [0, 289], sizes = [4, 16], strides = [1, 1]} : vector<4x384xf32> to vector<4x16xf32>
    %c8_176 = arith.constant 8 : index
    %c240_177 = arith.constant 240 : index
    %171 = vector.load %arg21[%c8_176, %c240_177] : memref<12x256xf32, #tpu.memory_space<vmem>>, vector<4x16xf32>
    tpu.vector_store %arg21[%c8_176, %c240_177], %170 {strides = array<i32>} : memref<12x256xf32, #tpu.memory_space<vmem>>, vector<4x16xf32>,
    %c0_178 = arith.constant 0 : index
    %c0_179 = arith.constant 0 : index
    %172 = vector.load %arg21[%c0_178, %c0_179] : memref<12x256xf32, #tpu.memory_space<vmem>>, vector<4x256xf32>
    %c4_180 = arith.constant 4 : index
    %c0_181 = arith.constant 0 : index
    %173 = vector.load %arg21[%c4_180, %c0_181] : memref<12x256xf32, #tpu.memory_space<vmem>>, vector<4x256xf32>
    %c8_182 = arith.constant 8 : index
    %c0_183 = arith.constant 0 : index
    %174 = vector.load %arg21[%c8_182, %c0_183] : memref<12x256xf32, #tpu.memory_space<vmem>>, vector<4x256xf32>
    %175 = tpu.transpose %172, [1, 0] : vector<4x256xf32> -> vector<256x4xf32>
    %176 = arith.truncf %175 : vector<256x4xf32> to vector<256x4xbf16>
    %177 = arith.truncf %173 : vector<4x256xf32> to vector<4x256xbf16>
    %cst_184 = arith.constant dense<0.000000e+00> : vector<256x256xf32>
    %178 = tpu.matmul %176, %177, %cst_184 {dimension_numbers = #tpu.dot_dimension_numbers<[1], [0], [0], [1], [0, 0, 1, 1], [], []>} : vector<256x4xbf16>, vector<4x256xbf16>, vector<256x256xf32> -> vector<256x256xf32>
    %cst_185 = arith.constant dense<0xFF800000> : vector<256xf32>
    %179 = vector.multi_reduction <maximumf>, %178, %cst_185 [1] : vector<256x256xf32> to vector<256xf32>
    %180 = vector.shape_cast %179 : vector<256xf32> to vector<256x1xf32>
    %181 = vector.broadcast %180 : vector<256x1xf32> to vector<256x256xf32>
    %182 = arith.subf %178, %181 : vector<256x256xf32>
    %183 = math.exp %182 : vector<256x256xf32>
    %cst_186 = arith.constant dense<0.000000e+00> : vector<256xf32>
    %184 = vector.multi_reduction <add>, %183, %cst_186 [1] : vector<256x256xf32> to vector<256xf32>
    %185 = vector.shape_cast %184 : vector<256xf32> to vector<256x1xf32>
    %186 = tpu.reciprocal %185 : vector<256x1xf32> -> vector<256x1xf32>
    %187 = vector.broadcast %186 : vector<256x1xf32> to vector<256x256xf32>
    %188 = arith.mulf %183, %187 : vector<256x256xf32>
    %189 = arith.truncf %174 : vector<4x256xf32> to vector<4x256xbf16>
    %190 = arith.truncf %188 : vector<256x256xf32> to vector<256x256xbf16>
    %cst_187 = arith.constant dense<0.000000e+00> : vector<4x256xf32>
    %191 = tpu.matmul %189, %190, %cst_187 {dimension_numbers = #tpu.dot_dimension_numbers<[1], [1], [0], [0], [0, 0, 1, 0], [], []>} : vector<4x256xbf16>, vector<256x256xbf16>, vector<4x256xf32> -> vector<4x256xf32>
    %192 = vector.extract_strided_slice %191 {offsets = [0, 0], sizes = [4, 16], strides = [1, 1]} : vector<4x256xf32> to vector<4x16xf32>
    %c0_188 = arith.constant 0 : index
    %c19_189 = arith.constant 19 : index
    %193 = vector.load %arg20[%c0_188, %c19_189] : memref<4x384xf32, #tpu.memory_space<vmem>>, vector<4x16xf32>
    tpu.vector_store %arg20[%c0_188, %c19_189], %192 {strides = array<i32>} : memref<4x384xf32, #tpu.memory_space<vmem>>, vector<4x16xf32>,
    %194 = vector.extract_strided_slice %191 {offsets = [0, 16], sizes = [4, 16], strides = [1, 1]} : vector<4x256xf32> to vector<4x16xf32>
    %c0_190 = arith.constant 0 : index
    %c37_191 = arith.constant 37 : index
    %195 = vector.load %arg20[%c0_190, %c37_191] : memref<4x384xf32, #tpu.memory_space<vmem>>, vector<4x16xf32>
    tpu.vector_store %arg20[%c0_190, %c37_191], %194 {strides = array<i32>} : memref<4x384xf32, #tpu.memory_space<vmem>>, vector<4x16xf32>,
    %196 = vector.extract_strided_slice %191 {offsets = [0, 32], sizes = [4, 16], strides = [1, 1]} : vector<4x256xf32> to vector<4x16xf32>
    %c0_192 = arith.constant 0 : index
    %c55 = arith.constant 55 : index
    %197 = vector.load %arg20[%c0_192, %c55] : memref<4x384xf32, #tpu.memory_space<vmem>>, vector<4x16xf32>
    tpu.vector_store %arg20[%c0_192, %c55], %196 {strides = array<i32>} : memref<4x384xf32, #tpu.memory_space<vmem>>, vector<4x16xf32>,
    %198 = vector.extract_strided_slice %191 {offsets = [0, 48], sizes = [4, 16], strides = [1, 1]} : vector<4x256xf32> to vector<4x16xf32>
    %c0_193 = arith.constant 0 : index
    %c73 = arith.constant 73 : index
    %199 = vector.load %arg20[%c0_193, %c73] : memref<4x384xf32, #tpu.memory_space<vmem>>, vector<4x16xf32>
    tpu.vector_store %arg20[%c0_193, %c73], %198 {strides = array<i32>} : memref<4x384xf32, #tpu.memory_space<vmem>>, vector<4x16xf32>,
    %200 = vector.extract_strided_slice %191 {offsets = [0, 64], sizes = [4, 16], strides = [1, 1]} : vector<4x256xf32> to vector<4x16xf32>
    %c0_194 = arith.constant 0 : index
    %c91 = arith.constant 91 : index
    %201 = vector.load %arg20[%c0_194, %c91] : memref<4x384xf32, #tpu.memory_space<vmem>>, vector<4x16xf32>
    tpu.vector_store %arg20[%c0_194, %c91], %200 {strides = array<i32>} : memref<4x384xf32, #tpu.memory_space<vmem>>, vector<4x16xf32>,
    %202 = vector.extract_strided_slice %191 {offsets = [0, 80], sizes = [4, 16], strides = [1, 1]} : vector<4x256xf32> to vector<4x16xf32>
    %c0_195 = arith.constant 0 : index
    %c109 = arith.constant 109 : index
    %203 = vector.load %arg20[%c0_195, %c109] : memref<4x384xf32, #tpu.memory_space<vmem>>, vector<4x16xf32>
    tpu.vector_store %arg20[%c0_195, %c109], %202 {strides = array<i32>} : memref<4x384xf32, #tpu.memory_space<vmem>>, vector<4x16xf32>,
    %204 = vector.extract_strided_slice %191 {offsets = [0, 96], sizes = [4, 16], strides = [1, 1]} : vector<4x256xf32> to vector<4x16xf32>
    %c0_196 = arith.constant 0 : index
    %c127 = arith.constant 127 : index
    %205 = vector.load %arg20[%c0_196, %c127] : memref<4x384xf32, #tpu.memory_space<vmem>>, vector<4x16xf32>
    tpu.vector_store %arg20[%c0_196, %c127], %204 {strides = array<i32>} : memref<4x384xf32, #tpu.memory_space<vmem>>, vector<4x16xf32>,
    %206 = vector.extract_strided_slice %191 {offsets = [0, 112], sizes = [4, 16], strides = [1, 1]} : vector<4x256xf32> to vector<4x16xf32>
    %c0_197 = arith.constant 0 : index
    %c145 = arith.constant 145 : index
    %207 = vector.load %arg20[%c0_197, %c145] : memref<4x384xf32, #tpu.memory_space<vmem>>, vector<4x16xf32>
    tpu.vector_store %arg20[%c0_197, %c145], %206 {strides = array<i32>} : memref<4x384xf32, #tpu.memory_space<vmem>>, vector<4x16xf32>,
    %208 = vector.extract_strided_slice %191 {offsets = [0, 128], sizes = [4, 16], strides = [1, 1]} : vector<4x256xf32> to vector<4x16xf32>
    %c0_198 = arith.constant 0 : index
    %c163 = arith.constant 163 : index
    %209 = vector.load %arg20[%c0_198, %c163] : memref<4x384xf32, #tpu.memory_space<vmem>>, vector<4x16xf32>
    tpu.vector_store %arg20[%c0_198, %c163], %208 {strides = array<i32>} : memref<4x384xf32, #tpu.memory_space<vmem>>, vector<4x16xf32>,
    %210 = vector.extract_strided_slice %191 {offsets = [0, 144], sizes = [4, 16], strides = [1, 1]} : vector<4x256xf32> to vector<4x16xf32>
    %c0_199 = arith.constant 0 : index
    %c181 = arith.constant 181 : index
    %211 = vector.load %arg20[%c0_199, %c181] : memref<4x384xf32, #tpu.memory_space<vmem>>, vector<4x16xf32>
    tpu.vector_store %arg20[%c0_199, %c181], %210 {strides = array<i32>} : memref<4x384xf32, #tpu.memory_space<vmem>>, vector<4x16xf32>,
    %212 = vector.extract_strided_slice %191 {offsets = [0, 160], sizes = [4, 16], strides = [1, 1]} : vector<4x256xf32> to vector<4x16xf32>
    %c0_200 = arith.constant 0 : index
    %c199 = arith.constant 199 : index
    %213 = vector.load %arg20[%c0_200, %c199] : memref<4x384xf32, #tpu.memory_space<vmem>>, vector<4x16xf32>
    tpu.vector_store %arg20[%c0_200, %c199], %212 {strides = array<i32>} : memref<4x384xf32, #tpu.memory_space<vmem>>, vector<4x16xf32>,
    %214 = vector.extract_strided_slice %191 {offsets = [0, 176], sizes = [4, 16], strides = [1, 1]} : vector<4x256xf32> to vector<4x16xf32>
    %c0_201 = arith.constant 0 : index
    %c217 = arith.constant 217 : index
    %215 = vector.load %arg20[%c0_201, %c217] : memref<4x384xf32, #tpu.memory_space<vmem>>, vector<4x16xf32>
    tpu.vector_store %arg20[%c0_201, %c217], %214 {strides = array<i32>} : memref<4x384xf32, #tpu.memory_space<vmem>>, vector<4x16xf32>,
    %216 = vector.extract_strided_slice %191 {offsets = [0, 192], sizes = [4, 16], strides = [1, 1]} : vector<4x256xf32> to vector<4x16xf32>
    %c0_202 = arith.constant 0 : index
    %c235 = arith.constant 235 : index
    %217 = vector.load %arg20[%c0_202, %c235] : memref<4x384xf32, #tpu.memory_space<vmem>>, vector<4x16xf32>
    tpu.vector_store %arg20[%c0_202, %c235], %216 {strides = array<i32>} : memref<4x384xf32, #tpu.memory_space<vmem>>, vector<4x16xf32>,
    %218 = vector.extract_strided_slice %191 {offsets = [0, 208], sizes = [4, 16], strides = [1, 1]} : vector<4x256xf32> to vector<4x16xf32>
    %c0_203 = arith.constant 0 : index
    %c253 = arith.constant 253 : index
    %219 = vector.load %arg20[%c0_203, %c253] : memref<4x384xf32, #tpu.memory_space<vmem>>, vector<4x16xf32>
    tpu.vector_store %arg20[%c0_203, %c253], %218 {strides = array<i32>} : memref<4x384xf32, #tpu.memory_space<vmem>>, vector<4x16xf32>,
    %220 = vector.extract_strided_slice %191 {offsets = [0, 224], sizes = [4, 16], strides = [1, 1]} : vector<4x256xf32> to vector<4x16xf32>
    %c0_204 = arith.constant 0 : index
    %c271 = arith.constant 271 : index
    %221 = vector.load %arg20[%c0_204, %c271] : memref<4x384xf32, #tpu.memory_space<vmem>>, vector<4x16xf32>
    tpu.vector_store %arg20[%c0_204, %c271], %220 {strides = array<i32>} : memref<4x384xf32, #tpu.memory_space<vmem>>, vector<4x16xf32>,
    %222 = vector.extract_strided_slice %191 {offsets = [0, 240], sizes = [4, 16], strides = [1, 1]} : vector<4x256xf32> to vector<4x16xf32>
    %c0_205 = arith.constant 0 : index
    %c289 = arith.constant 289 : index
    %223 = vector.load %arg20[%c0_205, %c289] : memref<4x384xf32, #tpu.memory_space<vmem>>, vector<4x16xf32>
    tpu.vector_store %arg20[%c0_205, %c289], %222 {strides = array<i32>} : memref<4x384xf32, #tpu.memory_space<vmem>>, vector<4x16xf32>,
    %c0_206 = arith.constant 0 : index
    %c0_207 = arith.constant 0 : index
    %224 = vector.load %arg20[%c0_206, %c0_207] : memref<4x384xf32, #tpu.memory_space<vmem>>, vector<4x384xf32>
    %225 = vector.extract_strided_slice %40 {offsets = [4, 0], sizes = [4, 384], strides = [1, 1]} : vector<8x384xf32> to vector<4x384xf32>
    %226 = arith.truncf %225 : vector<4x384xf32> to vector<4x384xbf16>
    %227 = arith.truncf %73 : vector<4x384xf32> to vector<4x384xbf16>
    %cst_208 = arith.constant dense<0.000000e+00> : vector<4x4xf32>
    %228 = tpu.matmul %226, %227, %cst_208 {dimension_numbers = #tpu.dot_dimension_numbers<[1], [1], [0], [0], [0, 0, 1, 0], [], []>} : vector<4x384xbf16>, vector<4x384xbf16>, vector<4x4xf32> -> vector<4x4xf32>
    %cst_209 = arith.constant dense<0xFF800000> : vector<4xf32>
    %229 = vector.multi_reduction <maximumf>, %228, %cst_209 [1] : vector<4x4xf32> to vector<4xf32>
    %230 = vector.shape_cast %229 : vector<4xf32> to vector<4x1xf32>
    %231 = vector.broadcast %230 : vector<4x1xf32> to vector<4x4xf32>
    %232 = arith.subf %228, %231 : vector<4x4xf32>
    %233 = math.exp %232 : vector<4x4xf32>
    %cst_210 = arith.constant dense<0.000000e+00> : vector<4xf32>
    %234 = vector.multi_reduction <add>, %233, %cst_210 [1] : vector<4x4xf32> to vector<4xf32>
    %235 = vector.shape_cast %234 : vector<4xf32> to vector<4x1xf32>
    %236 = tpu.reciprocal %235 : vector<4x1xf32> -> vector<4x1xf32>
    %237 = vector.broadcast %236 : vector<4x1xf32> to vector<4x4xf32>
    %238 = arith.mulf %233, %237 : vector<4x4xf32>
    %239 = arith.truncf %238 : vector<4x4xf32> to vector<4x4xbf16>
    %240 = arith.truncf %74 : vector<4x384xf32> to vector<4x384xbf16>
    %cst_211 = arith.constant dense<0.000000e+00> : vector<4x384xf32>
    %241 = tpu.matmul %239, %240, %cst_211 {dimension_numbers = #tpu.dot_dimension_numbers<[1], [0], [0], [1], [0, 0, 1, 1], [], []>} : vector<4x4xbf16>, vector<4x384xbf16>, vector<4x384xf32> -> vector<4x384xf32>
    %242 = arith.truncf %224 : vector<4x384xf32> to vector<4x384xbf16>
    %c0_212 = arith.constant 0 : index
    %c19_213 = arith.constant 19 : index
    %243 = vector.load %arg18[%c0_212, %c19_213] : memref<16x422xbf16, #tpu.memory_space<vmem>>, vector<4x384xbf16>
    tpu.vector_store %arg18[%c0_212, %c19_213], %242 {strides = array<i32>} : memref<16x422xbf16, #tpu.memory_space<vmem>>, vector<4x384xbf16>,
    %c0_214 = arith.constant 0 : index
    %c0_215 = arith.constant 0 : index
    %244 = vector.load %arg18[%c0_214, %c0_215] : memref<16x422xbf16, #tpu.memory_space<vmem>>, vector<4x384xbf16>
    %c0_216 = arith.constant 0 : index
    %c0_217 = arith.constant 0 : index
    %245 = vector.load %arg19[%c0_216, %c0_217] : memref<288x384xbf16, #tpu.memory_space<vmem>>, vector<4x384xbf16>
    tpu.vector_store %arg19[%c0_216, %c0_217], %244 {strides = array<i32>} : memref<288x384xbf16, #tpu.memory_space<vmem>>, vector<4x384xbf16>,
    %c0_218 = arith.constant 0 : index
    %c1_219 = arith.constant 1 : index
    %246 = vector.load %arg18[%c0_218, %c1_219] : memref<16x422xbf16, #tpu.memory_space<vmem>>, vector<4x384xbf16>
    %c4_220 = arith.constant 4 : index
    %c0_221 = arith.constant 0 : index
    %247 = vector.load %arg19[%c4_220, %c0_221] : memref<288x384xbf16, #tpu.memory_space<vmem>>, vector<4x384xbf16>
    tpu.vector_store %arg19[%c4_220, %c0_221], %246 {strides = array<i32>} : memref<288x384xbf16, #tpu.memory_space<vmem>>, vector<4x384xbf16>,
    %c0_222 = arith.constant 0 : index
    %c2_223 = arith.constant 2 : index
    %248 = vector.load %arg18[%c0_222, %c2_223] : memref<16x422xbf16, #tpu.memory_space<vmem>>, vector<4x384xbf16>
    %c8_224 = arith.constant 8 : index
    %c0_225 = arith.constant 0 : index
    %249 = vector.load %arg19[%c8_224, %c0_225] : memref<288x384xbf16, #tpu.memory_space<vmem>>, vector<4x384xbf16>
    tpu.vector_store %arg19[%c8_224, %c0_225], %248 {strides = array<i32>} : memref<288x384xbf16, #tpu.memory_space<vmem>>, vector<4x384xbf16>,
    %c0_226 = arith.constant 0 : index
    %c18_227 = arith.constant 18 : index
    %250 = vector.load %arg18[%c0_226, %c18_227] : memref<16x422xbf16, #tpu.memory_space<vmem>>, vector<4x384xbf16>
    %c12 = arith.constant 12 : index
    %c0_228 = arith.constant 0 : index
    %251 = vector.load %arg19[%c12, %c0_228] : memref<288x384xbf16, #tpu.memory_space<vmem>>, vector<4x384xbf16>
    tpu.vector_store %arg19[%c12, %c0_228], %250 {strides = array<i32>} : memref<288x384xbf16, #tpu.memory_space<vmem>>, vector<4x384xbf16>,
    %c0_229 = arith.constant 0 : index
    %c19_230 = arith.constant 19 : index
    %252 = vector.load %arg18[%c0_229, %c19_230] : memref<16x422xbf16, #tpu.memory_space<vmem>>, vector<4x384xbf16>
    %c16_231 = arith.constant 16 : index
    %c0_232 = arith.constant 0 : index
    %253 = vector.load %arg19[%c16_231, %c0_232] : memref<288x384xbf16, #tpu.memory_space<vmem>>, vector<4x384xbf16>
    tpu.vector_store %arg19[%c16_231, %c0_232], %252 {strides = array<i32>} : memref<288x384xbf16, #tpu.memory_space<vmem>>, vector<4x384xbf16>,
    %c0_233 = arith.constant 0 : index
    %c20_234 = arith.constant 20 : index
    %254 = vector.load %arg18[%c0_233, %c20_234] : memref<16x422xbf16, #tpu.memory_space<vmem>>, vector<4x384xbf16>
    %c20_235 = arith.constant 20 : index
    %c0_236 = arith.constant 0 : index
    %255 = vector.load %arg19[%c20_235, %c0_236] : memref<288x384xbf16, #tpu.memory_space<vmem>>, vector<4x384xbf16>
    tpu.vector_store %arg19[%c20_235, %c0_236], %254 {strides = array<i32>} : memref<288x384xbf16, #tpu.memory_space<vmem>>, vector<4x384xbf16>,
    %c0_237 = arith.constant 0 : index
    %c36_238 = arith.constant 36 : index
    %256 = vector.load %arg18[%c0_237, %c36_238] : memref<16x422xbf16, #tpu.memory_space<vmem>>, vector<4x384xbf16>
    %c24 = arith.constant 24 : index
    %c0_239 = arith.constant 0 : index
    %257 = vector.load %arg19[%c24, %c0_239] : memref<288x384xbf16, #tpu.memory_space<vmem>>, vector<4x384xbf16>
    tpu.vector_store %arg19[%c24, %c0_239], %256 {strides = array<i32>} : memref<288x384xbf16, #tpu.memory_space<vmem>>, vector<4x384xbf16>,
    %c0_240 = arith.constant 0 : index
    %c37_241 = arith.constant 37 : index
    %258 = vector.load %arg18[%c0_240, %c37_241] : memref<16x422xbf16, #tpu.memory_space<vmem>>, vector<4x384xbf16>
    %c28 = arith.constant 28 : index
    %c0_242 = arith.constant 0 : index
    %259 = vector.load %arg19[%c28, %c0_242] : memref<288x384xbf16, #tpu.memory_space<vmem>>, vector<4x384xbf16>
    tpu.vector_store %arg19[%c28, %c0_242], %258 {strides = array<i32>} : memref<288x384xbf16, #tpu.memory_space<vmem>>, vector<4x384xbf16>,
    %c0_243 = arith.constant 0 : index
    %c38_244 = arith.constant 38 : index
    %260 = vector.load %arg18[%c0_243, %c38_244] : memref<16x422xbf16, #tpu.memory_space<vmem>>, vector<4x384xbf16>
    %c32_245 = arith.constant 32 : index
    %c0_246 = arith.constant 0 : index
    %261 = vector.load %arg19[%c32_245, %c0_246] : memref<288x384xbf16, #tpu.memory_space<vmem>>, vector<4x384xbf16>
    tpu.vector_store %arg19[%c32_245, %c0_246], %260 {strides = array<i32>} : memref<288x384xbf16, #tpu.memory_space<vmem>>, vector<4x384xbf16>,
    %c0_247 = arith.constant 0 : index
    %c0_248 = arith.constant 0 : index
    %262 = vector.load %arg9[%c0_247, %c0_248] : memref<16x36xbf16, #tpu.memory_space<vmem>>, vector<16x36xbf16>
    %c0_249 = arith.constant 0 : index
    %c0_250 = arith.constant 0 : index
    %263 = vector.load %arg19[%c0_249, %c0_250] : memref<288x384xbf16, #tpu.memory_space<vmem>>, vector<36x384xbf16>
    %cst_251 = arith.constant dense<0.000000e+00> : vector<16x384xf32>
    %264 = tpu.matmul %262, %263, %cst_251 {dimension_numbers = #tpu.dot_dimension_numbers<[1], [0], [0], [1], [0, 0, 1, 1], [], []>} : vector<16x36xbf16>, vector<36x384xbf16>, vector<16x384xf32> -> vector<16x384xf32>
    %c0_252 = arith.constant 0 : index
    %c0_253 = arith.constant 0 : index
    %265 = vector.load %arg10[%c0_252, %c0_253] : memref<16x1xf32, #tpu.memory_space<vmem>>, vector<16x1xf32>
    %266 = vector.broadcast %265 : vector<16x1xf32> to vector<16x384xf32>
    %267 = arith.addf %264, %266 : vector<16x384xf32>
    %cst_254 = arith.constant 0.000000e+00 : f32
    %268 = vector.broadcast %cst_254 : f32 to vector<16x384xf32>
    %269 = arith.maximumf %267, %268 : vector<16x384xf32>
    %270 = vector.broadcast %0 : vector<1x384xf32> to vector<16x384xf32>
    %271 = arith.mulf %269, %270 : vector<16x384xf32>
    %272 = arith.truncf %241 : vector<4x384xf32> to vector<4x384xbf16>
    %c0_255 = arith.constant 0 : index
    %c19_256 = arith.constant 19 : index
    %273 = vector.load %arg18[%c0_255, %c19_256] : memref<16x422xbf16, #tpu.memory_space<vmem>>, vector<4x384xbf16>
    tpu.vector_store %arg18[%c0_255, %c19_256], %272 {strides = array<i32>} : memref<16x422xbf16, #tpu.memory_space<vmem>>, vector<4x384xbf16>,
    %c0_257 = arith.constant 0 : index
    %c0_258 = arith.constant 0 : index
    %274 = vector.load %arg18[%c0_257, %c0_258] : memref<16x422xbf16, #tpu.memory_space<vmem>>, vector<4x384xbf16>
    %c0_259 = arith.constant 0 : index
    %c0_260 = arith.constant 0 : index
    %275 = vector.load %arg19[%c0_259, %c0_260] : memref<288x384xbf16, #tpu.memory_space<vmem>>, vector<4x384xbf16>
    tpu.vector_store %arg19[%c0_259, %c0_260], %274 {strides = array<i32>} : memref<288x384xbf16, #tpu.memory_space<vmem>>, vector<4x384xbf16>,
    %c0_261 = arith.constant 0 : index
    %c1_262 = arith.constant 1 : index
    %276 = vector.load %arg18[%c0_261, %c1_262] : memref<16x422xbf16, #tpu.memory_space<vmem>>, vector<4x384xbf16>
    %c4_263 = arith.constant 4 : index
    %c0_264 = arith.constant 0 : index
    %277 = vector.load %arg19[%c4_263, %c0_264] : memref<288x384xbf16, #tpu.memory_space<vmem>>, vector<4x384xbf16>
    tpu.vector_store %arg19[%c4_263, %c0_264], %276 {strides = array<i32>} : memref<288x384xbf16, #tpu.memory_space<vmem>>, vector<4x384xbf16>,
    %c0_265 = arith.constant 0 : index
    %c2_266 = arith.constant 2 : index
    %278 = vector.load %arg18[%c0_265, %c2_266] : memref<16x422xbf16, #tpu.memory_space<vmem>>, vector<4x384xbf16>
    %c8_267 = arith.constant 8 : index
    %c0_268 = arith.constant 0 : index
    %279 = vector.load %arg19[%c8_267, %c0_268] : memref<288x384xbf16, #tpu.memory_space<vmem>>, vector<4x384xbf16>
    tpu.vector_store %arg19[%c8_267, %c0_268], %278 {strides = array<i32>} : memref<288x384xbf16, #tpu.memory_space<vmem>>, vector<4x384xbf16>,
    %c0_269 = arith.constant 0 : index
    %c18_270 = arith.constant 18 : index
    %280 = vector.load %arg18[%c0_269, %c18_270] : memref<16x422xbf16, #tpu.memory_space<vmem>>, vector<4x384xbf16>
    %c12_271 = arith.constant 12 : index
    %c0_272 = arith.constant 0 : index
    %281 = vector.load %arg19[%c12_271, %c0_272] : memref<288x384xbf16, #tpu.memory_space<vmem>>, vector<4x384xbf16>
    tpu.vector_store %arg19[%c12_271, %c0_272], %280 {strides = array<i32>} : memref<288x384xbf16, #tpu.memory_space<vmem>>, vector<4x384xbf16>,
    %c0_273 = arith.constant 0 : index
    %c19_274 = arith.constant 19 : index
    %282 = vector.load %arg18[%c0_273, %c19_274] : memref<16x422xbf16, #tpu.memory_space<vmem>>, vector<4x384xbf16>
    %c16_275 = arith.constant 16 : index
    %c0_276 = arith.constant 0 : index
    %283 = vector.load %arg19[%c16_275, %c0_276] : memref<288x384xbf16, #tpu.memory_space<vmem>>, vector<4x384xbf16>
    tpu.vector_store %arg19[%c16_275, %c0_276], %282 {strides = array<i32>} : memref<288x384xbf16, #tpu.memory_space<vmem>>, vector<4x384xbf16>,
    %c0_277 = arith.constant 0 : index
    %c20_278 = arith.constant 20 : index
    %284 = vector.load %arg18[%c0_277, %c20_278] : memref<16x422xbf16, #tpu.memory_space<vmem>>, vector<4x384xbf16>
    %c20_279 = arith.constant 20 : index
    %c0_280 = arith.constant 0 : index
    %285 = vector.load %arg19[%c20_279, %c0_280] : memref<288x384xbf16, #tpu.memory_space<vmem>>, vector<4x384xbf16>
    tpu.vector_store %arg19[%c20_279, %c0_280], %284 {strides = array<i32>} : memref<288x384xbf16, #tpu.memory_space<vmem>>, vector<4x384xbf16>,
    %c0_281 = arith.constant 0 : index
    %c36_282 = arith.constant 36 : index
    %286 = vector.load %arg18[%c0_281, %c36_282] : memref<16x422xbf16, #tpu.memory_space<vmem>>, vector<4x384xbf16>
    %c24_283 = arith.constant 24 : index
    %c0_284 = arith.constant 0 : index
    %287 = vector.load %arg19[%c24_283, %c0_284] : memref<288x384xbf16, #tpu.memory_space<vmem>>, vector<4x384xbf16>
    tpu.vector_store %arg19[%c24_283, %c0_284], %286 {strides = array<i32>} : memref<288x384xbf16, #tpu.memory_space<vmem>>, vector<4x384xbf16>,
    %c0_285 = arith.constant 0 : index
    %c37_286 = arith.constant 37 : index
    %288 = vector.load %arg18[%c0_285, %c37_286] : memref<16x422xbf16, #tpu.memory_space<vmem>>, vector<4x384xbf16>
    %c28_287 = arith.constant 28 : index
    %c0_288 = arith.constant 0 : index
    %289 = vector.load %arg19[%c28_287, %c0_288] : memref<288x384xbf16, #tpu.memory_space<vmem>>, vector<4x384xbf16>
    tpu.vector_store %arg19[%c28_287, %c0_288], %288 {strides = array<i32>} : memref<288x384xbf16, #tpu.memory_space<vmem>>, vector<4x384xbf16>,
    %c0_289 = arith.constant 0 : index
    %c38_290 = arith.constant 38 : index
    %290 = vector.load %arg18[%c0_289, %c38_290] : memref<16x422xbf16, #tpu.memory_space<vmem>>, vector<4x384xbf16>
    %c32_291 = arith.constant 32 : index
    %c0_292 = arith.constant 0 : index
    %291 = vector.load %arg19[%c32_291, %c0_292] : memref<288x384xbf16, #tpu.memory_space<vmem>>, vector<4x384xbf16>
    tpu.vector_store %arg19[%c32_291, %c0_292], %290 {strides = array<i32>} : memref<288x384xbf16, #tpu.memory_space<vmem>>, vector<4x384xbf16>,
    %c0_293 = arith.constant 0 : index
    %c0_294 = arith.constant 0 : index
    %292 = vector.load %arg11[%c0_293, %c0_294] : memref<16x36xbf16, #tpu.memory_space<vmem>>, vector<16x36xbf16>
    %c0_295 = arith.constant 0 : index
    %c0_296 = arith.constant 0 : index
    %293 = vector.load %arg19[%c0_295, %c0_296] : memref<288x384xbf16, #tpu.memory_space<vmem>>, vector<36x384xbf16>
    %cst_297 = arith.constant dense<0.000000e+00> : vector<16x384xf32>
    %294 = tpu.matmul %292, %293, %cst_297 {dimension_numbers = #tpu.dot_dimension_numbers<[1], [0], [0], [1], [0, 0, 1, 1], [], []>} : vector<16x36xbf16>, vector<36x384xbf16>, vector<16x384xf32> -> vector<16x384xf32>
    %c0_298 = arith.constant 0 : index
    %c0_299 = arith.constant 0 : index
    %295 = vector.load %arg12[%c0_298, %c0_299] : memref<16x1xf32, #tpu.memory_space<vmem>>, vector<16x1xf32>
    %296 = vector.broadcast %295 : vector<16x1xf32> to vector<16x384xf32>
    %297 = arith.addf %294, %296 : vector<16x384xf32>
    %cst_300 = arith.constant 0.000000e+00 : f32
    %298 = vector.broadcast %cst_300 : f32 to vector<16x384xf32>
    %299 = arith.maximumf %297, %298 : vector<16x384xf32>
    %300 = vector.broadcast %0 : vector<1x384xf32> to vector<16x384xf32>
    %301 = arith.mulf %299, %300 : vector<16x384xf32>
    %cst_301 = arith.constant 2.000000e+00 : f32
    %302 = vector.broadcast %cst_301 : f32 to vector<16x384xf32>
    %303 = arith.mulf %302, %6 : vector<16x384xf32>
    %304 = arith.addf %303, %271 : vector<16x384xf32>
    %305 = arith.addf %304, %301 : vector<16x384xf32>
    %306 = arith.truncf %305 : vector<16x384xf32> to vector<16x384xbf16>
    %c0_302 = arith.constant 0 : index
    %c19_303 = arith.constant 19 : index
    %307 = vector.load %arg18[%c0_302, %c19_303] : memref<16x422xbf16, #tpu.memory_space<vmem>>, vector<16x384xbf16>
    tpu.vector_store %arg18[%c0_302, %c19_303], %306 {strides = array<i32>} : memref<16x422xbf16, #tpu.memory_space<vmem>>, vector<16x384xbf16>,
    %c0_304 = arith.constant 0 : index
    %c0_305 = arith.constant 0 : index
    %308 = vector.load %arg18[%c0_304, %c0_305] : memref<16x422xbf16, #tpu.memory_space<vmem>>, vector<16x384xbf16>
    %c0_306 = arith.constant 0 : index
    %c0_307 = arith.constant 0 : index
    %309 = vector.load %arg19[%c0_306, %c0_307] : memref<288x384xbf16, #tpu.memory_space<vmem>>, vector<16x384xbf16>
    tpu.vector_store %arg19[%c0_306, %c0_307], %308 {strides = array<i32>} : memref<288x384xbf16, #tpu.memory_space<vmem>>, vector<16x384xbf16>,
    %c0_308 = arith.constant 0 : index
    %c1_309 = arith.constant 1 : index
    %310 = vector.load %arg18[%c0_308, %c1_309] : memref<16x422xbf16, #tpu.memory_space<vmem>>, vector<16x384xbf16>
    %c16_310 = arith.constant 16 : index
    %c0_311 = arith.constant 0 : index
    %311 = vector.load %arg19[%c16_310, %c0_311] : memref<288x384xbf16, #tpu.memory_space<vmem>>, vector<16x384xbf16>
    tpu.vector_store %arg19[%c16_310, %c0_311], %310 {strides = array<i32>} : memref<288x384xbf16, #tpu.memory_space<vmem>>, vector<16x384xbf16>,
    %c0_312 = arith.constant 0 : index
    %c2_313 = arith.constant 2 : index
    %312 = vector.load %arg18[%c0_312, %c2_313] : memref<16x422xbf16, #tpu.memory_space<vmem>>, vector<16x384xbf16>
    %c32_314 = arith.constant 32 : index
    %c0_315 = arith.constant 0 : index
    %313 = vector.load %arg19[%c32_314, %c0_315] : memref<288x384xbf16, #tpu.memory_space<vmem>>, vector<16x384xbf16>
    tpu.vector_store %arg19[%c32_314, %c0_315], %312 {strides = array<i32>} : memref<288x384xbf16, #tpu.memory_space<vmem>>, vector<16x384xbf16>,
    %c0_316 = arith.constant 0 : index
    %c18_317 = arith.constant 18 : index
    %314 = vector.load %arg18[%c0_316, %c18_317] : memref<16x422xbf16, #tpu.memory_space<vmem>>, vector<16x384xbf16>
    %c48_318 = arith.constant 48 : index
    %c0_319 = arith.constant 0 : index
    %315 = vector.load %arg19[%c48_318, %c0_319] : memref<288x384xbf16, #tpu.memory_space<vmem>>, vector<16x384xbf16>
    tpu.vector_store %arg19[%c48_318, %c0_319], %314 {strides = array<i32>} : memref<288x384xbf16, #tpu.memory_space<vmem>>, vector<16x384xbf16>,
    %c0_320 = arith.constant 0 : index
    %c19_321 = arith.constant 19 : index
    %316 = vector.load %arg18[%c0_320, %c19_321] : memref<16x422xbf16, #tpu.memory_space<vmem>>, vector<16x384xbf16>
    %c64_322 = arith.constant 64 : index
    %c0_323 = arith.constant 0 : index
    %317 = vector.load %arg19[%c64_322, %c0_323] : memref<288x384xbf16, #tpu.memory_space<vmem>>, vector<16x384xbf16>
    tpu.vector_store %arg19[%c64_322, %c0_323], %316 {strides = array<i32>} : memref<288x384xbf16, #tpu.memory_space<vmem>>, vector<16x384xbf16>,
    %c0_324 = arith.constant 0 : index
    %c20_325 = arith.constant 20 : index
    %318 = vector.load %arg18[%c0_324, %c20_325] : memref<16x422xbf16, #tpu.memory_space<vmem>>, vector<16x384xbf16>
    %c80_326 = arith.constant 80 : index
    %c0_327 = arith.constant 0 : index
    %319 = vector.load %arg19[%c80_326, %c0_327] : memref<288x384xbf16, #tpu.memory_space<vmem>>, vector<16x384xbf16>
    tpu.vector_store %arg19[%c80_326, %c0_327], %318 {strides = array<i32>} : memref<288x384xbf16, #tpu.memory_space<vmem>>, vector<16x384xbf16>,
    %c0_328 = arith.constant 0 : index
    %c36_329 = arith.constant 36 : index
    %320 = vector.load %arg18[%c0_328, %c36_329] : memref<16x422xbf16, #tpu.memory_space<vmem>>, vector<16x384xbf16>
    %c96_330 = arith.constant 96 : index
    %c0_331 = arith.constant 0 : index
    %321 = vector.load %arg19[%c96_330, %c0_331] : memref<288x384xbf16, #tpu.memory_space<vmem>>, vector<16x384xbf16>
    tpu.vector_store %arg19[%c96_330, %c0_331], %320 {strides = array<i32>} : memref<288x384xbf16, #tpu.memory_space<vmem>>, vector<16x384xbf16>,
    %c0_332 = arith.constant 0 : index
    %c37_333 = arith.constant 37 : index
    %322 = vector.load %arg18[%c0_332, %c37_333] : memref<16x422xbf16, #tpu.memory_space<vmem>>, vector<16x384xbf16>
    %c112_334 = arith.constant 112 : index
    %c0_335 = arith.constant 0 : index
    %323 = vector.load %arg19[%c112_334, %c0_335] : memref<288x384xbf16, #tpu.memory_space<vmem>>, vector<16x384xbf16>
    tpu.vector_store %arg19[%c112_334, %c0_335], %322 {strides = array<i32>} : memref<288x384xbf16, #tpu.memory_space<vmem>>, vector<16x384xbf16>,
    %c0_336 = arith.constant 0 : index
    %c38_337 = arith.constant 38 : index
    %324 = vector.load %arg18[%c0_336, %c38_337] : memref<16x422xbf16, #tpu.memory_space<vmem>>, vector<16x384xbf16>
    %c128_338 = arith.constant 128 : index
    %c0_339 = arith.constant 0 : index
    %325 = vector.load %arg19[%c128_338, %c0_339] : memref<288x384xbf16, #tpu.memory_space<vmem>>, vector<16x384xbf16>
    tpu.vector_store %arg19[%c128_338, %c0_339], %324 {strides = array<i32>} : memref<288x384xbf16, #tpu.memory_space<vmem>>, vector<16x384xbf16>,
    %326 = arith.truncf %10 : vector<16x384xf32> to vector<16x384xbf16>
    %c0_340 = arith.constant 0 : index
    %c19_341 = arith.constant 19 : index
    %327 = vector.load %arg18[%c0_340, %c19_341] : memref<16x422xbf16, #tpu.memory_space<vmem>>, vector<16x384xbf16>
    tpu.vector_store %arg18[%c0_340, %c19_341], %326 {strides = array<i32>} : memref<16x422xbf16, #tpu.memory_space<vmem>>, vector<16x384xbf16>,
    %c0_342 = arith.constant 0 : index
    %c0_343 = arith.constant 0 : index
    %328 = vector.load %arg18[%c0_342, %c0_343] : memref<16x422xbf16, #tpu.memory_space<vmem>>, vector<16x384xbf16>
    %c144_344 = arith.constant 144 : index
    %c0_345 = arith.constant 0 : index
    %329 = vector.load %arg19[%c144_344, %c0_345] : memref<288x384xbf16, #tpu.memory_space<vmem>>, vector<16x384xbf16>
    tpu.vector_store %arg19[%c144_344, %c0_345], %328 {strides = array<i32>} : memref<288x384xbf16, #tpu.memory_space<vmem>>, vector<16x384xbf16>,
    %c0_346 = arith.constant 0 : index
    %c1_347 = arith.constant 1 : index
    %330 = vector.load %arg18[%c0_346, %c1_347] : memref<16x422xbf16, #tpu.memory_space<vmem>>, vector<16x384xbf16>
    %c160_348 = arith.constant 160 : index
    %c0_349 = arith.constant 0 : index
    %331 = vector.load %arg19[%c160_348, %c0_349] : memref<288x384xbf16, #tpu.memory_space<vmem>>, vector<16x384xbf16>
    tpu.vector_store %arg19[%c160_348, %c0_349], %330 {strides = array<i32>} : memref<288x384xbf16, #tpu.memory_space<vmem>>, vector<16x384xbf16>,
    %c0_350 = arith.constant 0 : index
    %c2_351 = arith.constant 2 : index
    %332 = vector.load %arg18[%c0_350, %c2_351] : memref<16x422xbf16, #tpu.memory_space<vmem>>, vector<16x384xbf16>
    %c176_352 = arith.constant 176 : index
    %c0_353 = arith.constant 0 : index
    %333 = vector.load %arg19[%c176_352, %c0_353] : memref<288x384xbf16, #tpu.memory_space<vmem>>, vector<16x384xbf16>
    tpu.vector_store %arg19[%c176_352, %c0_353], %332 {strides = array<i32>} : memref<288x384xbf16, #tpu.memory_space<vmem>>, vector<16x384xbf16>,
    %c0_354 = arith.constant 0 : index
    %c18_355 = arith.constant 18 : index
    %334 = vector.load %arg18[%c0_354, %c18_355] : memref<16x422xbf16, #tpu.memory_space<vmem>>, vector<16x384xbf16>
    %c192_356 = arith.constant 192 : index
    %c0_357 = arith.constant 0 : index
    %335 = vector.load %arg19[%c192_356, %c0_357] : memref<288x384xbf16, #tpu.memory_space<vmem>>, vector<16x384xbf16>
    tpu.vector_store %arg19[%c192_356, %c0_357], %334 {strides = array<i32>} : memref<288x384xbf16, #tpu.memory_space<vmem>>, vector<16x384xbf16>,
    %c0_358 = arith.constant 0 : index
    %c19_359 = arith.constant 19 : index
    %336 = vector.load %arg18[%c0_358, %c19_359] : memref<16x422xbf16, #tpu.memory_space<vmem>>, vector<16x384xbf16>
    %c208_360 = arith.constant 208 : index
    %c0_361 = arith.constant 0 : index
    %337 = vector.load %arg19[%c208_360, %c0_361] : memref<288x384xbf16, #tpu.memory_space<vmem>>, vector<16x384xbf16>
    tpu.vector_store %arg19[%c208_360, %c0_361], %336 {strides = array<i32>} : memref<288x384xbf16, #tpu.memory_space<vmem>>, vector<16x384xbf16>,
    %c0_362 = arith.constant 0 : index
    %c20_363 = arith.constant 20 : index
    %338 = vector.load %arg18[%c0_362, %c20_363] : memref<16x422xbf16, #tpu.memory_space<vmem>>, vector<16x384xbf16>
    %c224_364 = arith.constant 224 : index
    %c0_365 = arith.constant 0 : index
    %339 = vector.load %arg19[%c224_364, %c0_365] : memref<288x384xbf16, #tpu.memory_space<vmem>>, vector<16x384xbf16>
    tpu.vector_store %arg19[%c224_364, %c0_365], %338 {strides = array<i32>} : memref<288x384xbf16, #tpu.memory_space<vmem>>, vector<16x384xbf16>,
    %c0_366 = arith.constant 0 : index
    %c36_367 = arith.constant 36 : index
    %340 = vector.load %arg18[%c0_366, %c36_367] : memref<16x422xbf16, #tpu.memory_space<vmem>>, vector<16x384xbf16>
    %c240_368 = arith.constant 240 : index
    %c0_369 = arith.constant 0 : index
    %341 = vector.load %arg19[%c240_368, %c0_369] : memref<288x384xbf16, #tpu.memory_space<vmem>>, vector<16x384xbf16>
    tpu.vector_store %arg19[%c240_368, %c0_369], %340 {strides = array<i32>} : memref<288x384xbf16, #tpu.memory_space<vmem>>, vector<16x384xbf16>,
    %c0_370 = arith.constant 0 : index
    %c37_371 = arith.constant 37 : index
    %342 = vector.load %arg18[%c0_370, %c37_371] : memref<16x422xbf16, #tpu.memory_space<vmem>>, vector<16x384xbf16>
    %c256 = arith.constant 256 : index
    %c0_372 = arith.constant 0 : index
    %343 = vector.load %arg19[%c256, %c0_372] : memref<288x384xbf16, #tpu.memory_space<vmem>>, vector<16x384xbf16>
    tpu.vector_store %arg19[%c256, %c0_372], %342 {strides = array<i32>} : memref<288x384xbf16, #tpu.memory_space<vmem>>, vector<16x384xbf16>,
    %c0_373 = arith.constant 0 : index
    %c38_374 = arith.constant 38 : index
    %344 = vector.load %arg18[%c0_373, %c38_374] : memref<16x422xbf16, #tpu.memory_space<vmem>>, vector<16x384xbf16>
    %c272 = arith.constant 272 : index
    %c0_375 = arith.constant 0 : index
    %345 = vector.load %arg19[%c272, %c0_375] : memref<288x384xbf16, #tpu.memory_space<vmem>>, vector<16x384xbf16>
    tpu.vector_store %arg19[%c272, %c0_375], %344 {strides = array<i32>} : memref<288x384xbf16, #tpu.memory_space<vmem>>, vector<16x384xbf16>,
    %c0_376 = arith.constant 0 : index
    %c0_377 = arith.constant 0 : index
    %346 = vector.load %arg13[%c0_376, %c0_377] : memref<16x288xbf16, #tpu.memory_space<vmem>>, vector<16x288xbf16>
    %c0_378 = arith.constant 0 : index
    %c0_379 = arith.constant 0 : index
    %347 = vector.load %arg19[%c0_378, %c0_379] : memref<288x384xbf16, #tpu.memory_space<vmem>>, vector<288x384xbf16>
    %cst_380 = arith.constant dense<0.000000e+00> : vector<16x384xf32>
    %348 = tpu.matmul %346, %347, %cst_380 {dimension_numbers = #tpu.dot_dimension_numbers<[1], [0], [0], [1], [0, 0, 1, 1], [], []>} : vector<16x288xbf16>, vector<288x384xbf16>, vector<16x384xf32> -> vector<16x384xf32>
    %c0_381 = arith.constant 0 : index
    %c0_382 = arith.constant 0 : index
    %349 = vector.load %arg14[%c0_381, %c0_382] : memref<16x1xf32, #tpu.memory_space<vmem>>, vector<16x1xf32>
    %350 = vector.broadcast %349 : vector<16x1xf32> to vector<16x384xf32>
    %351 = arith.addf %348, %350 : vector<16x384xf32>
    %cst_383 = arith.constant 0.000000e+00 : f32
    %352 = vector.broadcast %cst_383 : f32 to vector<16x384xf32>
    %353 = arith.maximumf %351, %352 : vector<16x384xf32>
    %354 = vector.broadcast %0 : vector<1x384xf32> to vector<16x384xf32>
    %355 = arith.mulf %353, %354 : vector<16x384xf32>
    %356 = arith.truncf %355 : vector<16x384xf32> to vector<16x384xbf16>
    %c0_384 = arith.constant 0 : index
    %c19_385 = arith.constant 19 : index
    %357 = vector.load %arg18[%c0_384, %c19_385] : memref<16x422xbf16, #tpu.memory_space<vmem>>, vector<16x384xbf16>
    tpu.vector_store %arg18[%c0_384, %c19_385], %356 {strides = array<i32>} : memref<16x422xbf16, #tpu.memory_space<vmem>>, vector<16x384xbf16>,
    %c0_386 = arith.constant 0 : index
    %c0_387 = arith.constant 0 : index
    %358 = vector.load %arg18[%c0_386, %c0_387] : memref<16x422xbf16, #tpu.memory_space<vmem>>, vector<16x384xbf16>
    %c0_388 = arith.constant 0 : index
    %c0_389 = arith.constant 0 : index
    %359 = vector.load %arg19[%c0_388, %c0_389] : memref<288x384xbf16, #tpu.memory_space<vmem>>, vector<16x384xbf16>
    tpu.vector_store %arg19[%c0_388, %c0_389], %358 {strides = array<i32>} : memref<288x384xbf16, #tpu.memory_space<vmem>>, vector<16x384xbf16>,
    %c0_390 = arith.constant 0 : index
    %c1_391 = arith.constant 1 : index
    %360 = vector.load %arg18[%c0_390, %c1_391] : memref<16x422xbf16, #tpu.memory_space<vmem>>, vector<16x384xbf16>
    %c16_392 = arith.constant 16 : index
    %c0_393 = arith.constant 0 : index
    %361 = vector.load %arg19[%c16_392, %c0_393] : memref<288x384xbf16, #tpu.memory_space<vmem>>, vector<16x384xbf16>
    tpu.vector_store %arg19[%c16_392, %c0_393], %360 {strides = array<i32>} : memref<288x384xbf16, #tpu.memory_space<vmem>>, vector<16x384xbf16>,
    %c0_394 = arith.constant 0 : index
    %c2_395 = arith.constant 2 : index
    %362 = vector.load %arg18[%c0_394, %c2_395] : memref<16x422xbf16, #tpu.memory_space<vmem>>, vector<16x384xbf16>
    %c32_396 = arith.constant 32 : index
    %c0_397 = arith.constant 0 : index
    %363 = vector.load %arg19[%c32_396, %c0_397] : memref<288x384xbf16, #tpu.memory_space<vmem>>, vector<16x384xbf16>
    tpu.vector_store %arg19[%c32_396, %c0_397], %362 {strides = array<i32>} : memref<288x384xbf16, #tpu.memory_space<vmem>>, vector<16x384xbf16>,
    %c0_398 = arith.constant 0 : index
    %c18_399 = arith.constant 18 : index
    %364 = vector.load %arg18[%c0_398, %c18_399] : memref<16x422xbf16, #tpu.memory_space<vmem>>, vector<16x384xbf16>
    %c48_400 = arith.constant 48 : index
    %c0_401 = arith.constant 0 : index
    %365 = vector.load %arg19[%c48_400, %c0_401] : memref<288x384xbf16, #tpu.memory_space<vmem>>, vector<16x384xbf16>
    tpu.vector_store %arg19[%c48_400, %c0_401], %364 {strides = array<i32>} : memref<288x384xbf16, #tpu.memory_space<vmem>>, vector<16x384xbf16>,
    %c0_402 = arith.constant 0 : index
    %c19_403 = arith.constant 19 : index
    %366 = vector.load %arg18[%c0_402, %c19_403] : memref<16x422xbf16, #tpu.memory_space<vmem>>, vector<16x384xbf16>
    %c64_404 = arith.constant 64 : index
    %c0_405 = arith.constant 0 : index
    %367 = vector.load %arg19[%c64_404, %c0_405] : memref<288x384xbf16, #tpu.memory_space<vmem>>, vector<16x384xbf16>
    tpu.vector_store %arg19[%c64_404, %c0_405], %366 {strides = array<i32>} : memref<288x384xbf16, #tpu.memory_space<vmem>>, vector<16x384xbf16>,
    %c0_406 = arith.constant 0 : index
    %c20_407 = arith.constant 20 : index
    %368 = vector.load %arg18[%c0_406, %c20_407] : memref<16x422xbf16, #tpu.memory_space<vmem>>, vector<16x384xbf16>
    %c80_408 = arith.constant 80 : index
    %c0_409 = arith.constant 0 : index
    %369 = vector.load %arg19[%c80_408, %c0_409] : memref<288x384xbf16, #tpu.memory_space<vmem>>, vector<16x384xbf16>
    tpu.vector_store %arg19[%c80_408, %c0_409], %368 {strides = array<i32>} : memref<288x384xbf16, #tpu.memory_space<vmem>>, vector<16x384xbf16>,
    %c0_410 = arith.constant 0 : index
    %c36_411 = arith.constant 36 : index
    %370 = vector.load %arg18[%c0_410, %c36_411] : memref<16x422xbf16, #tpu.memory_space<vmem>>, vector<16x384xbf16>
    %c96_412 = arith.constant 96 : index
    %c0_413 = arith.constant 0 : index
    %371 = vector.load %arg19[%c96_412, %c0_413] : memref<288x384xbf16, #tpu.memory_space<vmem>>, vector<16x384xbf16>
    tpu.vector_store %arg19[%c96_412, %c0_413], %370 {strides = array<i32>} : memref<288x384xbf16, #tpu.memory_space<vmem>>, vector<16x384xbf16>,
    %c0_414 = arith.constant 0 : index
    %c37_415 = arith.constant 37 : index
    %372 = vector.load %arg18[%c0_414, %c37_415] : memref<16x422xbf16, #tpu.memory_space<vmem>>, vector<16x384xbf16>
    %c112_416 = arith.constant 112 : index
    %c0_417 = arith.constant 0 : index
    %373 = vector.load %arg19[%c112_416, %c0_417] : memref<288x384xbf16, #tpu.memory_space<vmem>>, vector<16x384xbf16>
    tpu.vector_store %arg19[%c112_416, %c0_417], %372 {strides = array<i32>} : memref<288x384xbf16, #tpu.memory_space<vmem>>, vector<16x384xbf16>,
    %c0_418 = arith.constant 0 : index
    %c38_419 = arith.constant 38 : index
    %374 = vector.load %arg18[%c0_418, %c38_419] : memref<16x422xbf16, #tpu.memory_space<vmem>>, vector<16x384xbf16>
    %c128_420 = arith.constant 128 : index
    %c0_421 = arith.constant 0 : index
    %375 = vector.load %arg19[%c128_420, %c0_421] : memref<288x384xbf16, #tpu.memory_space<vmem>>, vector<16x384xbf16>
    tpu.vector_store %arg19[%c128_420, %c0_421], %374 {strides = array<i32>} : memref<288x384xbf16, #tpu.memory_space<vmem>>, vector<16x384xbf16>,
    %c0_422 = arith.constant 0 : index
    %c0_423 = arith.constant 0 : index
    %376 = vector.load %arg15[%c0_422, %c0_423] : memref<16x144xbf16, #tpu.memory_space<vmem>>, vector<16x144xbf16>
    %c0_424 = arith.constant 0 : index
    %c0_425 = arith.constant 0 : index
    %377 = vector.load %arg19[%c0_424, %c0_425] : memref<288x384xbf16, #tpu.memory_space<vmem>>, vector<144x384xbf16>
    %cst_426 = arith.constant dense<0.000000e+00> : vector<16x384xf32>
    %378 = tpu.matmul %376, %377, %cst_426 {dimension_numbers = #tpu.dot_dimension_numbers<[1], [0], [0], [1], [0, 0, 1, 1], [], []>} : vector<16x144xbf16>, vector<144x384xbf16>, vector<16x384xf32> -> vector<16x384xf32>
    %c0_427 = arith.constant 0 : index
    %c0_428 = arith.constant 0 : index
    %379 = vector.load %arg16[%c0_427, %c0_428] : memref<16x1xf32, #tpu.memory_space<vmem>>, vector<16x1xf32>
    %380 = vector.broadcast %379 : vector<16x1xf32> to vector<16x384xf32>
    %381 = arith.addf %378, %380 : vector<16x384xf32>
    %cst_429 = arith.constant 0.000000e+00 : f32
    %382 = vector.broadcast %cst_429 : f32 to vector<16x384xf32>
    %383 = arith.maximumf %381, %382 : vector<16x384xf32>
    %384 = vector.broadcast %0 : vector<1x384xf32> to vector<16x384xf32>
    %385 = arith.mulf %383, %384 : vector<16x384xf32>
    %c0_430 = arith.constant 0 : index
    %c0_431 = arith.constant 0 : index
    %c0_432 = arith.constant 0 : index
    %386 = vector.load %arg17[%c0_430, %c0_431, %c0_432] : memref<1x16x384xf32, #tpu.memory_space<vmem>>, vector<1x16x384xf32>
    %387 = vector.shape_cast %386 : vector<1x16x384xf32> to vector<16x384xf32>
    %388 = vector.shape_cast %385 : vector<16x384xf32> to vector<1x16x384xf32>
    tpu.vector_store %arg17[%c0_430, %c0_431, %c0_432], %388 {strides = array<i32>} : memref<1x16x384xf32, #tpu.memory_space<vmem>>, vector<1x16x384xf32>,
    return
  }
  func.func @transform_0(%arg0: i32) -> (i32, i32) {
    %c0_i32 = arith.constant 0 : i32
    %c0_i32_0 = arith.constant 0 : i32
    %c0_i32_1 = arith.constant 0 : i32
    return %c0_i32, %c0_i32_0 : i32, i32
  }
  func.func @transform_1(%arg0: i32) -> (i32, i32, i32) {
    %c0_i32 = arith.constant 0 : i32
    %c0_i32_0 = arith.constant 0 : i32
    %c0_i32_1 = arith.constant 0 : i32
    return %arg0, %c0_i32, %c0_i32_0 : i32, i32, i32
  }
  func.func @transform_2(%arg0: i32) -> (i32, i32, i32) {
    %c0_i32 = arith.constant 0 : i32
    %c0_i32_0 = arith.constant 0 : i32
    %c0_i32_1 = arith.constant 0 : i32
    return %arg0, %c0_i32, %c0_i32_0 : i32, i32, i32
  }
  func.func @transform_3(%arg0: i32) -> (i32, i32, i32) {
    %c0_i32 = arith.constant 0 : i32
    %c0_i32_0 = arith.constant 0 : i32
    %c0_i32_1 = arith.constant 0 : i32
    return %arg0, %c0_i32, %c0_i32_0 : i32, i32, i32
  }
  func.func @transform_4(%arg0: i32) -> (i32, i32) {
    %c0_i32 = arith.constant 0 : i32
    %c0_i32_0 = arith.constant 0 : i32
    %c0_i32_1 = arith.constant 0 : i32
    return %c0_i32, %c0_i32_0 : i32, i32
  }
  func.func @transform_5(%arg0: i32) -> (i32, i32) {
    %c0_i32 = arith.constant 0 : i32
    %c0_i32_0 = arith.constant 0 : i32
    %c0_i32_1 = arith.constant 0 : i32
    return %c0_i32, %c0_i32_0 : i32, i32
  }
  func.func @transform_6(%arg0: i32) -> (i32, i32) {
    %c0_i32 = arith.constant 0 : i32
    %c0_i32_0 = arith.constant 0 : i32
    %c0_i32_1 = arith.constant 0 : i32
    return %c0_i32, %c0_i32_0 : i32, i32
  }
  func.func @transform_7(%arg0: i32) -> (i32, i32) {
    %c0_i32 = arith.constant 0 : i32
    %c0_i32_0 = arith.constant 0 : i32
    %c0_i32_1 = arith.constant 0 : i32
    return %c0_i32, %c0_i32_0 : i32, i32
  }
  func.func @transform_8(%arg0: i32) -> (i32, i32) {
    %c0_i32 = arith.constant 0 : i32
    %c0_i32_0 = arith.constant 0 : i32
    %c0_i32_1 = arith.constant 0 : i32
    return %c0_i32, %c0_i32_0 : i32, i32
  }
  func.func @transform_9(%arg0: i32) -> (i32, i32) {
    %c0_i32 = arith.constant 0 : i32
    %c0_i32_0 = arith.constant 0 : i32
    %c0_i32_1 = arith.constant 0 : i32
    return %c0_i32, %c0_i32_0 : i32, i32
  }
  func.func @transform_10(%arg0: i32) -> (i32, i32) {
    %c0_i32 = arith.constant 0 : i32
    %c0_i32_0 = arith.constant 0 : i32
    %c0_i32_1 = arith.constant 0 : i32
    return %c0_i32, %c0_i32_0 : i32, i32
  }
  func.func @transform_11(%arg0: i32) -> (i32, i32) {
    %c0_i32 = arith.constant 0 : i32
    %c0_i32_0 = arith.constant 0 : i32
    %c0_i32_1 = arith.constant 0 : i32
    return %c0_i32, %c0_i32_0 : i32, i32
  }
  func.func @transform_12(%arg0: i32) -> (i32, i32) {
    %c0_i32 = arith.constant 0 : i32
    %c0_i32_0 = arith.constant 0 : i32
    %c0_i32_1 = arith.constant 0 : i32
    return %c0_i32, %c0_i32_0 : i32, i32
  }
  func.func @transform_13(%arg0: i32) -> (i32, i32) {
    %c0_i32 = arith.constant 0 : i32
    %c0_i32_0 = arith.constant 0 : i32
    %c0_i32_1 = arith.constant 0 : i32
    return %c0_i32, %c0_i32_0 : i32, i32
  }
  func.func @transform_14(%arg0: i32) -> (i32, i32) {
    %c0_i32 = arith.constant 0 : i32
    %c0_i32_0 = arith.constant 0 : i32
    %c0_i32_1 = arith.constant 0 : i32
    return %c0_i32, %c0_i32_0 : i32, i32
  }
  func.func @transform_15(%arg0: i32) -> (i32, i32) {
    %c0_i32 = arith.constant 0 : i32
    %c0_i32_0 = arith.constant 0 : i32
    %c0_i32_1 = arith.constant 0 : i32
    return %c0_i32, %c0_i32_0 : i32, i32
  }
  func.func @transform_16(%arg0: i32) -> (i32, i32, i32) {
    %c0_i32 = arith.constant 0 : i32
    %c0_i32_0 = arith.constant 0 : i32
    %c0_i32_1 = arith.constant 0 : i32
    return %arg0, %c0_i32, %c0_i32_0 : i32, i32, i32
  }
}

</mosaic_0001>

<bundles_post_ra>
// kernel: tile.8
= control target key start
LH: loop header
LB: loop body
LE: loop exit
PB: predicated region body
PF: predicated region fallthrough
CT: control target
= control target key end

     0   :  { %s22_s0 = inlined_call_operand.vmem [shape: f32[16], index: 0, kind: input, shape index: {}]   ;;  %s23_s1 = inlined_call_operand.vmem [shape: f32[4,16], index: 1, kind: output, shape index: {}]  }
   0x1   :  { %v4_v0 = vld [vmem:[%s22_s0] ss:$0 sm:$0xff] }
   0x2   :  { %5 = vst [vmem:[%s23_s1] sm:$0xf] %v4_v0 }

// kernel: cross_modality_decode_pallas.1
= control target key start
LH: loop header
LB: loop body
LE: loop exit
PB: predicated region body
PF: predicated region fallthrough
CT: control target
= control target key end

     0   :  { %s6683_s21 = smov 0   ;;  %s8595_s0 = inlined_call_operand.vmem [shape: f32[1,384], index: 0, kind: input, shape index: {}]   ;;  %s8596_s1 = inlined_call_operand.vmem [shape: f32[2,16,384], index: 1, kind: input, shape index: {}]   ;;  %s8597_s2 = inlined_call_operand.vmem [shape: f32[2,16,384], index: 2, kind: input, shape index: {}]   ;;  %s8598_s3 = inlined_call_operand.vmem [shape: f32[2,16,384], index: 3, kind: input, shape index: {}]   ;;  %s8599_s4 = inlined_call_operand.vmem [shape: bf16[8,144], index: 4, kind: input, shape index: {}]   ;;  %s8600_s5 = inlined_call_operand.vmem [shape: f32[8,1], index: 5, kind: input, shape index: {}]   ;;  %s8601_s6 = inlined_call_operand.vmem [shape: bf16[16,144], index: 6, kind: input, shape index: {}]   ;;  %s8602_s7 = inlined_call_operand.vmem [shape: f32[16,1], index: 7, kind: input, shape index: {}]   ;;  %s8603_s8 = inlined_call_operand.vmem [shape: bf16[16,36], index: 8, kind: input, shape index: {}]   ;;  %s8604_s9 = inlined_call_operand.vmem [shape: f32[16,1], index: 9, kind: input, shape index: {}]   ;;  %s8605_s10 = inlined_call_operand.vmem [shape: bf16[16,36], index: 10, kind: input, shape index: {}]   ;;  %s8606_s11 = inlined_call_operand.vmem [shape: f32[16,1], index: 11, kind: input, shape index: {}]   ;;  %s8607_s12 = inlined_call_operand.vmem [shape: bf16[16,288], index: 12, kind: input, shape index: {}]   ;;  %s8608_s13 = inlined_call_operand.vmem [shape: f32[16,1], index: 13, kind: input, shape index: {}]   ;;  %s8609_s14 = inlined_call_operand.vmem [shape: bf16[16,144], index: 14, kind: input, shape index: {}]   ;;  %s8610_s15 = inlined_call_operand.vmem [shape: f32[16,1], index: 15, kind: input, shape index: {}]   ;;  %s8611_s16 = inlined_call_operand.vmem [shape: f32[2,16,384], index: 16, kind: output, shape index: {}]  }
   0x1   :  { %8687 = sst [smem:[#allocation33_spill]] %s8595_s0 }
   0x2   :  { %8688 = sst [smem:[#allocation34_spill]] %s8596_s1 }
   0x3   :  { %8689 = sst [smem:[#allocation35_spill]] %s8597_s2 }
   0x4 LB: > { %s5885_s22 = sadd.s32 4294967295, %s6555_s21   ;;  %p5889_p0 = scmp.ge.s32.totalorder %s6555_s21, 1  ;;  %s6555_s21 = sphi %s6683_s21, %s26_s21  }
   0x5   : > { %p482_p1 = scmp.lt.s32.totalorder %s6555_s21, 3 }
   0x7   : > { %p483_p2 = pnand %p5889_p0, %p482_p1 }
   0x9   : > { %486 = sbr.rel (%p483_p2) target bundleno = 3932 (0xf5c), region = 84 }
   0xe   : > { %p542_p3 = scmp.lt.s32.totalorder %s5885_s22, 1  ;;  %v8641_v0 = vmov 0   ;;  %vm8638_vm0 = vcmask 1043456   ;;  %vm566_vm1 = vcmask 310276   ;;  %s8690_s2 = sld [smem:[#allocation35_spill]]  ;;  %vm631_vm3 = vcmask 1043608  }
   0xf   : > { %569 = vst [vmem:[#allocation2 + $0x10] sm:$0xff] %v8641_v0  ;;  %564 = vst [vmem:[#allocation2] sm:$0xff] %v8641_v0  ;;  %1799 = vmatprep.subr.bf16.mxu1 %v8641_v0  ;;  %6269 = vset.pattern.permute.xlu0 %v8641_v0  ;;  %s8691_s1 = sld [smem:[#allocation34_spill]]  ;;  %s8624_s30 = smov 19   ;;  %vm632_vm4 = vcmask 1047556   ;;  %vm8639_vm5 = vcmask 154624  }
  0x10   : > { %s9001_s22 = smov (!%p542_p3, %s5885_s22), 1  ;;  %6270 = vset.pattern.permute.xlu1 %v8641_v0  ;;  %vm567_vm2 = vmor %vm566_vm1, %vm8638_vm0  ;;  %v8692_v22 = vmov 0  ;;  %vm635_vm7 = vcmask 154628   ;;  %v8695_v31 = vmov 0  ;;  %s8685_s0 = smov 91   ;;  %vm8629_vm9 = vcmask 130048  }
  0x11   : > { %s6696_s23 = smul.u32 48, %s9001_s22  ;;  %570 = vst.msk [vmem:[#allocation2 + $0x18] sm:$0xff] %vm567_vm2, %v8641_v0  ;;  %568 = vst.msk [vmem:[#allocation2 + $0x8] sm:$0xff] %vm567_vm2, %v8641_v0  ;;  %s8618_s17 = smov 92   ;;  %vm8633_vm10 = vcmask 744448   ;;  %vm8634_vm11 = vcmask 752640  }
  0x12   : > { %vm6725_vm6 = vmor %vm632_vm4, %vm631_vm3  ;;  %s8620_s18 = smov 108   ;;  %s8626_s19 = smov 109   ;;  %vm8635_vm12 = vcmask 883712   ;;  %vm8636_vm13 = vcmask 891904   ;;  %vm8630_vm14 = vcmask 900096   ;;  %vm8631_vm15 = vcmask 1031168  }
  0x13   : > { %v8693_v22 = vsel %vm6725_vm6, 4294967295, %v8692_v22  ;;  %vm6736_vm8 = vmor %vm635_vm7, %vm8638_vm0  ;;  %s8612_s20 = smov 110   ;;  %s8614_s22 = smov 126   ;;  %vm8632_vm1 = vcmask 1039360   ;;  %vm8637_vm2 = vcmask 736256   ;;  %vm1856_vm3 = vcmask 125952  }
  0x14   : > { %s551_s26 = scalar_lea.vmem %s8690_s2, %s6696_s23  ;;  %8694 = vst [vmem:[#allocation6_spill] sm:$0xff] %v8693_v22  ;;  %v8696_v31 = vsel %vm6736_vm8, 4294967295, %v8695_v31  ;;  %s8616_s24 = smov 127   ;;  %vm8640_vm4 = vcmask 257152   ;;  %vm1880_vm7 = vcmask 388352  }
  0x15   : > { %v582_v1 = vld [vmem:[%s551_s26 + $0x18] sm:$0xff]  ;;  %v583_v2 = vld [vmem:[%s551_s26 + $0x20] sm:$0xff]  ;;  %v580_v5 = vld [vmem:[%s551_s26 + $0x8] sm:$0xff]  ;;  %s6709_s29 = scalar_lea.vmem %s8691_s1, %s6696_s23  ;;  %8697 = vst [vmem:[#allocation7_spill] sm:$0xff] %v8696_v31  ;;  %s8622_s25 = smov 90  }
  0x16   : > { %v579_v3 = vld [vmem:[%s551_s26] sm:$0xff]  ;;  %v6120_v4 = vpack.c.bf16 %v583_v2, %v582_v1  ;;  %v584_v6 = vld [vmem:[%s551_s26 + $0x28] sm:$0xff]  ;;  %v581_v7 = vld [vmem:[%s551_s26 + $0x10] sm:$0xff]  ;;  %s6569_s27 = smov 105   ;;  %s6570_s28 = smov 99  }
  0x17   : > { %v6118_v8 = vpack.c.bf16 %v580_v5, %v579_v3  ;;  %v6121_v9 = vpack.c.bf16 %v584_v6, %v584_v6  ;;  %v6119_v10 = vpack.c.bf16 %v581_v7, %v581_v7  ;;  %v575_v11 = vld [vmem:[%s6709_s29 + $0x10] sm:$0xff]  ;;  %v573_v12 = vld [vmem:[%s6709_s29] sm:$0xff]  ;;  %v574_v13 = vld [vmem:[%s6709_s29 + $0x8] sm:$0xff]  ;;  %s6571_s26 = smov 101   ;;  %s8008_s1 = scalar_lea.vmem %s8598_s3, %s6696_s23 }
  0x18   : > { %611 = vrot.lane.b32.xlu1 %v6120_v4, %s8624_s30  ;;  %v6123_v14 = vpack.c.bf16 %v575_v11, %v575_v11  ;;  %v6122_v15 = vpack.c.bf16 %v574_v13, %v573_v12  ;;  %v578_v16 = vld [vmem:[%s6709_s29 + $0x28] sm:$0xff]  ;;  %v576_v17 = vld [vmem:[%s6709_s29 + $0x18] sm:$0xff]  ;;  %v577_v18 = vld [vmem:[%s6709_s29 + $0x20] sm:$0xff] }
  0x19   : > { %607 = vrot.lane.b32.xlu0 %v6118_v8, %s8624_s30  ;;  %v6125_v19 = vpack.c.bf16 %v578_v16, %v578_v16  ;;  %v6124_v20 = vpack.c.bf16 %v577_v18, %v576_v17  ;;  %v6825_v1 = vld [vmem:[%s8599_s4] sm:$0xff] }
  0x1a   : > { %v6829_v2 = vcombine.high %v6825_v1, %v6825_v1 }
  0x1c   : > { %613 = vrot.lane.b32.xlu1 %v6121_v9, %s8624_s30  ;;  %5927 = vmatprep.mubr.msk.bf16.mxu0 %vm8629_vm9, %v6829_v2 }
  0x1d   : > { %609 = vrot.lane.b32.xlu0 %v6119_v10, %s8624_s30 }
  0x20   : > { %1246 = vrot.lane.b32.xlu1 %v6123_v14, %s8624_s30 }
  0x21   : > { %1244 = vrot.lane.b32.xlu0 %v6122_v15, %s8624_s30 }
  0x24   : > { %1250 = vrot.lane.b32.xlu1 %v6125_v19, %s8624_s30 }
  0x25   : > { %1248 = vrot.lane.b32.xlu0 %v6124_v20, %s8624_s30  ;;  %s6576_s30 = smov 93  }
  0x8a   : > { %v612_v21 = vpop.permute.xlu1 %611 }
  0x8b   : > { %v617_v23 = vrot.slane %v612_v21, 4  ;;  %v608_v24 = vpop.permute.xlu0 %607 }
  0x8c   : > { %v615_v25 = vrot.slane %v608_v24, 4 }
  0x8d   : > { %v624_v26 = vsel %vm8639_vm5, %v617_v23, %v612_v21 }
  0x8e   : > { %638 = vst.msk [vmem:[#allocation2 + $0x10] sm:$0xff] %vm6725_vm6, %v624_v26  ;;  %v620_v27 = vsel %vm8639_vm5, %v615_v25, %v608_v24  ;;  %v614_v28 = vpop.permute.xlu1 %613  ;;  %v6893_v26 = vld [vmem:[%s8601_s6 + $0x4] ss:$8 sps:$4 sm:$0xff]  }
  0x8f   : > { %634 = vst.msk [vmem:[#allocation2] sm:$0xff] %vm6725_vm6, %v620_v27  ;;  %v618_v29 = vrot.slane %v614_v28, 4  ;;  %v610_v30 = vpop.permute.xlu0 %609  ;;  %5963 = vmatprep.mubr.msk.bf16.mxu1 %vm8629_vm9, %v6893_v26 }
  0x90   : > { %v616_v32 = vrot.slane %v610_v30, 4 }
  0x91   : > { %v625_v33 = vsel %vm8638_vm0, %v617_v23, %v618_v29 }
  0x92   : > { %v626_v34 = vsel %vm8639_vm5, %v625_v33, %v614_v28  ;;  %v622_v35 = vsel %vm8638_vm0, %v615_v25, %v616_v32  ;;  %v1247_v36 = vpop.permute.xlu1 %1246  ;;  %v965_v32 = vld [vmem:[%s8600_s5] sm:$0xff] }
  0x93   : > { %639 = vst.msk [vmem:[#allocation2 + $0x18] sm:$0xff] %vm6736_vm8, %v626_v34  ;;  %v623_v37 = vsel %vm8639_vm5, %v622_v35, %v610_v30  ;;  %v1253_v38 = vrot.slane %v1247_v36, 4  ;;  %v1245_v39 = vpop.permute.xlu0 %1244 }
  0x94   : > { %637 = vst.msk [vmem:[#allocation2 + $0x8] sm:$0xff] %vm6736_vm8, %v623_v37  ;;  %v1252_v40 = vrot.slane %v1245_v39, 4 }
  0x95   : > { %v6748_v41 = vld [vmem:[#allocation2 + $0x10] sm:$0xff] }
  0x96   : > { %v6750_v42 = vld [vmem:[#allocation2] sm:$0xff]  ;;  %v1256_v43 = vsel %vm8639_vm5, %v1252_v40, %v1245_v39  ;;  %v1257_v44 = vsel %vm8638_vm0, %v1252_v40, %v1253_v38  ;;  %v1251_v45 = vpop.permute.xlu1 %1250 }
  0x97   : > { %866 = vrot.lane.b32.xlu0 %v6750_v42, %s8685_s0  ;;  %v1255_v46 = vrot.slane %v1251_v45, 4  ;;  %v1249_v47 = vpop.permute.xlu0 %1248  ;;  %1266 = vst.msk [vmem:[#allocation2] sm:$0xff] %vm6725_vm6, %v1256_v43  ;;  %v5901_v48 = vcombine.high %v6750_v42, %v6748_v41  ;;  %v5900_v49 = vcombine.low %v6750_v42, %v6748_v41  ;;  %v1258_v51 = vsel %vm8639_vm5, %v1257_v44, %v1247_v36  ;;  %v1588_v39 = vld [vmem:[%s8602_s7] sm:$0xff] }
  0x98   : > { %v1254_v50 = vrot.slane %v1249_v47, 4 }
  0x9a   : > { %v643_v52 = vld [vmem:[#allocation2 + $0x18] sm:$0xf]  ;;  %v1259_v53 = vsel %vm8639_vm5, %v1254_v50, %v1249_v47  ;;  %v1260_v54 = vsel %vm8638_vm0, %v1254_v50, %v1255_v46 }
  0x9b   : > { %647 = vst [vmem:[#allocation3 + $0x14] sm:$0xf] %v643_v52  ;;  %v641_v55 = vld [vmem:[#allocation2 + $0x8] sm:$0xf]  ;;  %870 = vrot.lane.b32.xlu0 %v6748_v41, %s8685_s0  ;;  %v861_v57 = vld [vmem:[#allocation2 + $0x18] sm:$0xff]  ;;  %v1261_v58 = vsel %vm8639_vm5, %v1260_v54, %v1251_v45  ;;  %1268 = vst.msk [vmem:[#allocation2 + $0x10] sm:$0xff] %vm6725_vm6, %v1259_v53 }
  0x9c   : > { %v859_v56 = vld [vmem:[#allocation2 + $0x8] sm:$0xff]  ;;  %645 = vst [vmem:[#allocation3 + $0x8] sm:$0xf] %v641_v55  ;;  %1269 = vst.msk [vmem:[#allocation2 + $0x18] sm:$0xff] %vm6736_vm8, %v1261_v58  ;;  %vm1907_vm5 = vcmask 654852  }
  0x9d   : > { %868 = vrot.lane.b32.xlu1 %v859_v56, %s8685_s0  ;;  %1267 = vst.msk [vmem:[#allocation2 + $0x8] sm:$0xff] %vm6736_vm8, %v1258_v51 }
  0x9e   : > { %v6775_v59 = vld [vmem:[#allocation2] sm:$0xff] }
  0x9f   : > { %831 = vrot.lane.b32.xlu0 %v6750_v42, %s8618_s17  ;;  %1274 = vst [vmem:[#allocation3] sm:$0xff] %v6775_v59 }
  0xa1   : > { %872 = vrot.lane.b32.xlu1 %v861_v57, %s8685_s0 }
  0xa2   : > { %v6781_v60 = vld [vmem:[#allocation2 + $0x10] sm:$0xff] }
  0xa3   : > { %835 = vrot.lane.b32.xlu0 %v6748_v41, %s8618_s17  ;;  %1276 = vst [vmem:[#allocation3 + $0xc] sm:$0xff] %v6781_v60  ;;  %v6787_v61 = vld [vmem:[#allocation3 + $0x8] ss:$12 sps:$4 sm:$0xff]   ;;  %v1273_v63 = vld [vmem:[#allocation2 + $0x18] sm:$0xf] }
  0xa4   : > { %v1271_v62 = vld [vmem:[#allocation2 + $0x8] sm:$0xf]  ;;  %1277 = vst [vmem:[#allocation3 + $0x14] sm:$0xf] %v1273_v63  ;;  %v1485_v4 = vld [vmem:[#allocation2 + $0x18] sm:$0xff] }
  0xa5   : > { %833 = vrot.lane.b32.xlu1 %v859_v56, %s8618_s17  ;;  %1275 = vst [vmem:[#allocation3 + $0x8] sm:$0xf] %v1271_v62  ;;  %v1483_v3 = vld [vmem:[#allocation2 + $0x8] sm:$0xff] }
  0xa7   : > { %796 = vrot.lane.b32.xlu0 %v6750_v42, %s8620_s18 }
  0xa9   : > { %837 = vrot.lane.b32.xlu1 %v861_v57, %s8618_s17 }
  0xab   : > { %800 = vrot.lane.b32.xlu0 %v6748_v41, %s8620_s18 }
  0xad   : > { %798 = vrot.lane.b32.xlu1 %v859_v56, %s8620_s18 }
  0xaf   : > { %761 = vrot.lane.b32.xlu0 %v6750_v42, %s8626_s19 }
  0xb1   : > { %802 = vrot.lane.b32.xlu1 %v861_v57, %s8620_s18 }
  0xb3   : > { %765 = vrot.lane.b32.xlu0 %v6748_v41, %s8626_s19 }
  0xb5   : > { %763 = vrot.lane.b32.xlu1 %v859_v56, %s8626_s19 }
  0xb7   : > { %726 = vrot.lane.b32.xlu0 %v6750_v42, %s8612_s20 }
  0xb9   : > { %767 = vrot.lane.b32.xlu1 %v861_v57, %s8626_s19 }
  0xbb   : > { %730 = vrot.lane.b32.xlu0 %v6748_v41, %s8612_s20 }
  0xbd   : > { %728 = vrot.lane.b32.xlu1 %v859_v56, %s8612_s20 }
  0xbf   : > { %691 = vrot.lane.b32.xlu0 %v6750_v42, %s8614_s22 }
  0xc1   : > { %732 = vrot.lane.b32.xlu1 %v861_v57, %s8612_s20 }
  0xc3   : > { %695 = vrot.lane.b32.xlu0 %v6748_v41, %s8614_s22 }
  0xc5   : > { %693 = vrot.lane.b32.xlu1 %v859_v56, %s8614_s22 }
  0xc7   : > { %656 = vrot.lane.b32.xlu0 %v6750_v42, %s8616_s24 }
  0xc9   : > { %697 = vrot.lane.b32.xlu1 %v861_v57, %s8614_s22 }
  0xcb   : > { %660 = vrot.lane.b32.xlu0 %v6748_v41, %s8616_s24 }
  0xcd   : > { %658 = vrot.lane.b32.xlu1 %v859_v56, %s8616_s24 }
  0xcf   : > { %901 = vrot.lane.b32.xlu0 %v6750_v42, %s8622_s25 }
  0xd1   : > { %662 = vrot.lane.b32.xlu1 %v861_v57, %s8616_s24 }
  0xd3   : > { %905 = vrot.lane.b32.xlu0 %v6748_v41, %s8622_s25 }
  0xd5   : > { %903 = vrot.lane.b32.xlu1 %v859_v56, %s8622_s25 }
  0xd7   : > { %1490 = vrot.lane.b32.xlu0 %v6775_v59, %s8685_s0 }
  0xd9   : > { %907 = vrot.lane.b32.xlu1 %v861_v57, %s8622_s25 }
  0xdb   : > { %1494 = vrot.lane.b32.xlu0 %v6781_v60, %s8685_s0 }
  0xdd   : > { %1492 = vrot.lane.b32.xlu1 %v1483_v3, %s8685_s0 }
  0xdf   : > { %1456 = vrot.lane.b32.xlu0 %v6775_v59, %s8618_s17 }
  0xe1   : > { %1496 = vrot.lane.b32.xlu1 %v1485_v4, %s8685_s0 }
  0xe3   : > { %1460 = vrot.lane.b32.xlu0 %v6781_v60, %s8618_s17 }
  0xe5   : > { %1458 = vrot.lane.b32.xlu1 %v1483_v3, %s8618_s17 }
  0xe7   : > { %1422 = vrot.lane.b32.xlu0 %v6775_v59, %s8620_s18 }
  0xe9   : > { %1462 = vrot.lane.b32.xlu1 %v1485_v4, %s8618_s17  ;;  %s6573_s17 = smov 95  }
  0xeb   : > { %1426 = vrot.lane.b32.xlu0 %v6781_v60, %s8620_s18 }
  0xed   : > { %1424 = vrot.lane.b32.xlu1 %v1483_v3, %s8620_s18 }
  0xef   : > { %1388 = vrot.lane.b32.xlu0 %v6775_v59, %s8626_s19 }
  0xf1   : > { %1428 = vrot.lane.b32.xlu1 %v1485_v4, %s8620_s18  ;;  %s6574_s18 = smov 83  }
  0xf3   : > { %1392 = vrot.lane.b32.xlu0 %v6781_v60, %s8626_s19 }
  0xf5   : > { %1390 = vrot.lane.b32.xlu1 %v1483_v3, %s8626_s19 }
  0xf7   : > { %1354 = vrot.lane.b32.xlu0 %v6775_v59, %s8612_s20 }
  0xf9   : > { %1394 = vrot.lane.b32.xlu1 %v1485_v4, %s8626_s19 }
  0xfb   : > { %1358 = vrot.lane.b32.xlu0 %v6781_v60, %s8612_s20 }
  0xfd   : > { %1356 = vrot.lane.b32.xlu1 %v1483_v3, %s8612_s20 }
  0xff   : > { %1320 = vrot.lane.b32.xlu0 %v6775_v59, %s8614_s22 }
 0x101   : > { %1360 = vrot.lane.b32.xlu1 %v1485_v4, %s8612_s20  ;;  %s6567_s20 = smov 107  }
 0x103   : > { %1324 = vrot.lane.b32.xlu0 %v6781_v60, %s8614_s22 }
 0x105   : > { %1322 = vrot.lane.b32.xlu1 %v1483_v3, %s8614_s22 }
 0x107   : > { %1286 = vrot.lane.b32.xlu0 %v6775_v59, %s8616_s24 }
 0x109   : > { %1326 = vrot.lane.b32.xlu1 %v1485_v4, %s8614_s22  ;;  %v867_v5 = vpop.permute.xlu0 %866  ;;  %s8698_s22 = sld [smem:[#allocation33_spill]] }
 0x10a   : > { %v874_v9 = vrot.slane %v867_v5, 4 }
 0x10b   : > { %1290 = vrot.lane.b32.xlu0 %v6781_v60, %s8616_s24 }
 0x10d   : > { %1288 = vrot.lane.b32.xlu1 %v1483_v3, %s8616_s24  ;;  %v871_v6 = vpop.permute.xlu0 %870 }
 0x10e   : > { %v876_v13 = vrot.slane %v871_v6, 4 }
 0x10f   : > { %v869_v7 = vpop.permute.xlu1 %868  ;;  %1524 = vrot.lane.b32.xlu0 %v6775_v59, %s8622_s25 }
 0x110   : > { %v875_v8 = vrot.slane %v869_v7, 4 }
 0x111   : > { %1292 = vrot.lane.b32.xlu1 %v1485_v4, %s8616_s24  ;;  %v832_v11 = vpop.permute.xlu0 %831  ;;  %s6572_s24 = smov 97  }
 0x112   : > { %v881_v10 = vsel %vm8633_vm10, %v869_v7, %v875_v8  ;;  %v878_v14 = vsel %vm8638_vm0, %v874_v9, %v875_v8  ;;  %v839_v27 = vrot.slane %v832_v11, 4 }
 0x113   : > { %890 = vst [vmem:[#allocation3 + $0xb0] sm:$0xf] %v881_v10  ;;  %v873_v12 = vpop.permute.xlu1 %872  ;;  %1528 = vrot.lane.b32.xlu0 %v6781_v60, %s8622_s25  ;;  %v880_v19 = vsel %vm8633_vm10, %v867_v5, %v878_v14 }
 0x114   : > { %v877_v15 = vrot.slane %v873_v12, 4 }
 0x115   : > { %1526 = vrot.lane.b32.xlu1 %v1483_v3, %s8622_s25  ;;  %v836_v18 = vpop.permute.xlu0 %835 }
 0x116   : > { %v882_v16 = vsel %vm8638_vm0, %v876_v13, %v877_v15  ;;  %v884_v17 = vsel %vm8633_vm10, %v873_v12, %v877_v15  ;;  %v841_v33 = vrot.slane %v836_v18, 4 }
 0x117   : > { %v883_v20 = vsel %vm8633_vm10, %v871_v6, %v882_v16  ;;  %892 = vst [vmem:[#allocation3 + $0xbc] sm:$0xf] %v884_v17  ;;  %v834_v21 = vpop.permute.xlu1 %833  ;;  %968 = vperm.xlu0 %6269, %v965_v32  }
 0x118   : > { %v840_v23 = vrot.slane %v834_v21, 4  ;;  %v5922_v24 = vcombine.high %v880_v19, %v883_v20  ;;  %v5921_v25 = vcombine.low %v880_v19, %v883_v20 }
 0x119   : > { %1530 = vrot.lane.b32.xlu1 %v1485_v4, %s8622_s25  ;;  %v797_v29 = vpop.permute.xlu0 %796  ;;  %s8628_s25 = smov 81  }
 0x11a   : > { %v846_v28 = vsel %vm8634_vm11, %v834_v21, %v840_v23  ;;  %1125 = vmatprep.subr.bf16.mxu0 %v5922_v24  ;;  %v843_v34 = vsel %vm8638_vm0, %v839_v27, %v840_v23  ;;  %v804_v50 = vrot.slane %v797_v29, 4 }
 0x11b   : > { %855 = vst [vmem:[#allocation3 + $0x98] sm:$0xf] %v846_v28  ;;  %v838_v30 = vpop.permute.xlu1 %837  ;;  %1126 = vmatpush1.bf16.msra.mxu0 %v5921_v25  ;;  %v845_v40 = vsel %vm8634_vm11, %v832_v11, %v843_v34 }
 0x11c   : > { %v842_v35 = vrot.slane %v838_v30, 4 }
 0x11d   : > { %v801_v38 = vpop.permute.xlu0 %800  ;;  %1592 = vperm.xlu1 %6270, %v1588_v39  }
 0x11e   : > { %v847_v36 = vsel %vm8638_vm0, %v841_v33, %v842_v35  ;;  %v849_v37 = vsel %vm8634_vm11, %v838_v30, %v842_v35  ;;  %v806_v54 = vrot.slane %v801_v38, 4 }
 0x11f   : > { %v848_v43 = vsel %vm8634_vm11, %v836_v18, %v847_v36  ;;  %857 = vst [vmem:[#allocation3 + $0xa4] sm:$0xf] %v849_v37  ;;  %v799_v44 = vpop.permute.xlu1 %798 }
 0x120   : > { %v805_v45 = vrot.slane %v799_v44, 4  ;;  %v5919_v46 = vcombine.high %v845_v40, %v848_v43  ;;  %v5918_v47 = vcombine.low %v845_v40, %v848_v43 }
 0x121   : > { %v762_v52 = vpop.permute.xlu0 %761 }
 0x122   : > { %v811_v51 = vsel %vm8635_vm12, %v799_v44, %v805_v45  ;;  %1127 = vmatprep.subr.bf16.mxu0 %v5919_v46  ;;  %v808_v55 = vsel %vm8638_vm0, %v804_v50, %v805_v45  ;;  %v769_v8 = vrot.slane %v762_v52, 4 }
 0x123   : > { %820 = vst [vmem:[#allocation3 + $0x80] sm:$0xf] %v811_v51  ;;  %v803_v53 = vpop.permute.xlu1 %802  ;;  %1128 = vmatpush1.bf16.msra.mxu0 %v5918_v47  ;;  %v810_v63 = vsel %vm8635_vm12, %v797_v29, %v808_v55 }
 0x124   : > { %v807_v56 = vrot.slane %v803_v53, 4 }
 0x125   : > { %v766_v62 = vpop.permute.xlu0 %765 }
 0x126   : > { %v812_v57 = vsel %vm8638_vm0, %v806_v54, %v807_v56  ;;  %v814_v58 = vsel %vm8635_vm12, %v803_v53, %v807_v56  ;;  %v771_v12 = vrot.slane %v766_v62, 4 }
 0x127   : > { %v813_v3 = vsel %vm8635_vm12, %v801_v38, %v812_v57  ;;  %822 = vst [vmem:[#allocation3 + $0x8c] sm:$0xf] %v814_v58  ;;  %v764_v4 = vpop.permute.xlu1 %763 }
 0x128   : > { %v770_v5 = vrot.slane %v764_v4, 4  ;;  %v5916_v6 = vcombine.high %v810_v63, %v813_v3  ;;  %v5915_v7 = vcombine.low %v810_v63, %v813_v3 }
 0x129   : > { %v727_v10 = vpop.permute.xlu0 %726 }
 0x12a   : > { %v776_v9 = vsel %vm8636_vm13, %v764_v4, %v770_v5  ;;  %1129 = vmatprep.subr.bf16.mxu0 %v5916_v6  ;;  %v773_v13 = vsel %vm8638_vm0, %v769_v8, %v770_v5  ;;  %v734_v25 = vrot.slane %v727_v10, 4 }
 0x12b   : > { %785 = vst [vmem:[#allocation3 + $0x68] sm:$0xf] %v776_v9  ;;  %v768_v11 = vpop.permute.xlu1 %767  ;;  %1130 = vmatpush1.bf16.msra.mxu0 %v5915_v7  ;;  %v775_v18 = vsel %vm8636_vm13, %v762_v52, %v773_v13 }
 0x12c   : > { %v772_v14 = vrot.slane %v768_v11, 4 }
 0x12d   : > { %v731_v17 = vpop.permute.xlu0 %730 }
 0x12e   : > { %v777_v15 = vsel %vm8638_vm0, %v771_v12, %v772_v14  ;;  %v779_v16 = vsel %vm8636_vm13, %v768_v11, %v772_v14  ;;  %v736_v30 = vrot.slane %v731_v17, 4 }
 0x12f   : > { %v778_v19 = vsel %vm8636_vm13, %v766_v62, %v777_v15  ;;  %787 = vst [vmem:[#allocation3 + $0x74] sm:$0xf] %v779_v16  ;;  %v729_v20 = vpop.permute.xlu1 %728 }
 0x130   : > { %v735_v21 = vrot.slane %v729_v20, 4  ;;  %v5913_v23 = vcombine.high %v775_v18, %v778_v19  ;;  %v5912_v24 = vcombine.low %v775_v18, %v778_v19 }
 0x131   : > { %v692_v28 = vpop.permute.xlu0 %691 }
 0x132   : > { %v741_v27 = vsel %vm8630_vm14, %v729_v20, %v735_v21  ;;  %1131 = vmatprep.subr.bf16.mxu0 %v5913_v23  ;;  %v738_v32 = vsel %vm8638_vm0, %v734_v25, %v735_v21  ;;  %v699_v45 = vrot.slane %v692_v28, 4 }
 0x133   : > { %750 = vst [vmem:[#allocation3 + $0x50] sm:$0xf] %v741_v27  ;;  %v733_v29 = vpop.permute.xlu1 %732  ;;  %1132 = vmatpush1.bf16.msra.mxu0 %v5912_v24  ;;  %v740_v37 = vsel %vm8630_vm14, %v727_v10, %v738_v32 }
 0x134   : > { %v737_v33 = vrot.slane %v733_v29, 4 }
 0x135   : > { %v696_v36 = vpop.permute.xlu0 %695 }
 0x136   : > { %v742_v34 = vsel %vm8638_vm0, %v736_v30, %v737_v33  ;;  %v744_v35 = vsel %vm8630_vm14, %v733_v29, %v737_v33  ;;  %v701_v51 = vrot.slane %v696_v36, 4 }
 0x137   : > { %v743_v38 = vsel %vm8630_vm14, %v731_v17, %v742_v34  ;;  %752 = vst [vmem:[#allocation3 + $0x5c] sm:$0xf] %v744_v35  ;;  %v694_v39 = vpop.permute.xlu1 %693 }
 0x138   : > { %v700_v40 = vrot.slane %v694_v39, 4  ;;  %v5910_v43 = vcombine.high %v740_v37, %v743_v38  ;;  %v5909_v44 = vcombine.low %v740_v37, %v743_v38 }
 0x139   : > { %v657_v47 = vpop.permute.xlu0 %656 }
 0x13a   : > { %v706_v46 = vsel %vm8631_vm15, %v694_v39, %v700_v40  ;;  %1133 = vmatprep.subr.bf16.mxu0 %v5910_v43  ;;  %v703_v52 = vsel %vm8638_vm0, %v699_v45, %v700_v40  ;;  %v664_v5 = vrot.slane %v657_v47, 4  ;;  %v958_v39 = vld [vmem:[#allocation3 + $0xb0] sm:$0xf]  ;;  %v6967_v45 = vcombine.low %v6825_v1, %v6825_v1 }
 0x13b   : > { %715 = vst [vmem:[#allocation3 + $0x38] sm:$0xf] %v706_v46  ;;  %v698_v50 = vpop.permute.xlu1 %697  ;;  %1134 = vmatpush1.bf16.msra.mxu0 %v5909_v44  ;;  %v705_v57 = vsel %vm8631_vm15, %v692_v28, %v703_v52  ;;  %v960_v44 = vld [vmem:[#allocation3 + $0xbc] sm:$0xf] }
 0x13c   : > { %v702_v53 = vrot.slane %v698_v50, 4 }
 0x13d   : > { %v661_v56 = vpop.permute.xlu0 %660 }
 0x13e   : > { %v707_v54 = vsel %vm8638_vm0, %v701_v51, %v702_v53  ;;  %v709_v55 = vsel %vm8631_vm15, %v698_v50, %v702_v53  ;;  %v666_v9 = vrot.slane %v661_v56, 4  ;;  %v956_v50 = vld [vmem:[#allocation3 + $0xa4] sm:$0xf]  ;;  %v954_v51 = vld [vmem:[#allocation3 + $0x98] sm:$0xf] }
 0x13f   : > { %v708_v58 = vsel %vm8631_vm15, %v696_v36, %v707_v54  ;;  %717 = vst [vmem:[#allocation3 + $0x44] sm:$0xf] %v709_v55  ;;  %v659_v62 = vpop.permute.xlu1 %658  ;;  %v5920_v53 = vcombine.low %v954_v51, %v956_v50 }
 0x140   : > { %v665_v63 = vrot.slane %v659_v62, 4  ;;  %v5907_v3 = vcombine.high %v705_v57, %v708_v58  ;;  %v5906_v4 = vcombine.low %v705_v57, %v708_v58  ;;  %v950_v58 = vld [vmem:[#allocation3 + $0x80] sm:$0xf] }
 0x141   : > { %v902_v7 = vpop.permute.xlu0 %901 }
 0x142   : > { %v671_v6 = vsel %vm8632_vm1, %v659_v62, %v665_v63  ;;  %1135 = vmatprep.subr.bf16.mxu0 %v5907_v3  ;;  %v668_v10 = vsel %vm8638_vm0, %v664_v5, %v665_v63  ;;  %v909_v21 = vrot.slane %v902_v7, 4  ;;  %v948_v5 = vld [vmem:[#allocation3 + $0x74] sm:$0xf] }
 0x143   : > { %680 = vst [vmem:[#allocation3 + $0x20] sm:$0xf] %v671_v6  ;;  %v663_v8 = vpop.permute.xlu1 %662  ;;  %1136 = vmatpush1.bf16.msra.mxu0 %v5906_v4  ;;  %v670_v15 = vsel %vm8632_vm1, %v657_v47, %v668_v10 }
 0x144   : > { %v667_v11 = vrot.slane %v663_v8, 4 }
 0x145   : > { %v906_v14 = vpop.permute.xlu0 %905 }
 0x146   : > { %v672_v12 = vsel %vm8638_vm0, %v666_v9, %v667_v11  ;;  %v674_v13 = vsel %vm8632_vm1, %v663_v8, %v667_v11  ;;  %v911_v27 = vrot.slane %v906_v14, 4  ;;  %v946_v8 = vld [vmem:[#allocation3 + $0x68] sm:$0xf] }
 0x147   : > { %v673_v16 = vsel %vm8632_vm1, %v661_v56, %v672_v12  ;;  %682 = vst [vmem:[#allocation3 + $0x2c] sm:$0xf] %v674_v13  ;;  %v904_v17 = vpop.permute.xlu1 %903  ;;  %v952_v56 = vld [vmem:[#allocation3 + $0x8c] sm:$0xf]  ;;  %v5914_v9 = vcombine.low %v946_v8, %v948_v5  ;;  %v944_v12 = vld [vmem:[#allocation3 + $0x5c] sm:$0xf] }
 0x148   : > { %v910_v18 = vrot.slane %v904_v17, 4  ;;  %v5904_v19 = vcombine.high %v670_v15, %v673_v16  ;;  %v5903_v20 = vcombine.low %v670_v15, %v673_v16  ;;  %v5917_v62 = vcombine.low %v950_v58, %v952_v56  ;;  %v942_v15 = vld [vmem:[#allocation3 + $0x50] sm:$0xf] }
 0x149   : > { %v6941_v24 = vpop.permute.xlu0 %1490  ;;  %v5911_v16 = vcombine.low %v942_v15, %v944_v12 }
 0x14a   : > { %v916_v23 = vsel %vm8637_vm2, %v904_v17, %v910_v18  ;;  %1137 = vmatprep.subr.bf16.mxu0 %v5904_v19  ;;  %v913_v28 = vsel %vm8638_vm0, %v909_v21, %v910_v18 }
 0x14b   : > { %925 = vst [vmem:[#allocation3 + $0xc8] sm:$0xf] %v916_v23  ;;  %v908_v25 = vpop.permute.xlu1 %907  ;;  %1138 = vmatpush1.bf16.msra.mxu0 %v5903_v20  ;;  %v915_v34 = vsel %vm8637_vm2, %v902_v7, %v913_v28  ;;  %v6276_v23 = vld [vmem:[#allocation3 + $0x38] ss:$12 sps:$4 sm:$0xff]  }
 0x14c   : > { %v912_v29 = vrot.slane %v908_v25, 4  ;;  %1139 = vmatprep.subr.bf16.mxu0 %v5901_v48 }
 0x14d   : > { %v6949_v33 = vpop.permute.xlu0 %1494 }
 0x14e   : > { %v917_v30 = vsel %vm8638_vm0, %v911_v27, %v912_v29  ;;  %v919_v32 = vsel %vm8637_vm2, %v908_v25, %v912_v29 }
 0x14f   : > { %v918_v35 = vsel %vm8637_vm2, %v906_v14, %v917_v30  ;;  %927 = vst [vmem:[#allocation3 + $0xd4] sm:$0xf] %v919_v32  ;;  %v6953_v36 = vpop.permute.xlu1 %1492  ;;  %1140 = vmatpush1.bf16.msra.mxu0 %v5900_v49  ;;  %v5923_v49 = vcombine.low %v958_v39, %v960_v44  ;;  %v6277_v30 = vld [vmem:[#allocation3 + $0x20] ss:$12 sps:$4 sm:$0xff]   ;;  %v1500_v32 = vrot.slane %v6949_v33, 4  ;;  %v1498_v39 = vrot.slane %v6941_v24, 4 }
 0x150   : > { %v1499_v37 = vrot.slane %v6953_v36, 4  ;;  %v5925_v48 = vcombine.high %v915_v34, %v918_v35  ;;  %v5924_v38 = vcombine.low %v915_v34, %v918_v35 }
 0x151   : > { %v6963_v43 = vpop.permute.xlu0 %1456 }
 0x152   : > { %v1504_v40 = vsel %vm8633_vm10, %v6953_v36, %v1499_v37  ;;  %1155 = vmatprep.subr.bf16.mxu0 %v5925_v48  ;;  %v1464_v50 = vrot.slane %v6963_v43, 4 }
 0x153   : > { %1513 = vst [vmem:[#allocation3 + $0xb0] sm:$0xf] %v1504_v40  ;;  %v6969_v41 = vpop.permute.xlu1 %1496  ;;  %1156 = vmatpush2.bf16.msra.mxu0 %v5924_v38 }
 0x154   : > { %v1501_v42 = vrot.slane %v6969_v41, 4  ;;  %1166 = vmatprep.subr.bf16.mxu0 %v8641_v0 }
 0x155   : > { %v6977_v47 = vpop.permute.xlu0 %1460 }
 0x156   : > { %v1507_v46 = vsel %vm8633_vm10, %v6969_v41, %v1501_v42  ;;  %1158 = vmatmul.mubr.bf16.vlgmr.msra.gmra.mxu0 %v6967_v45  ;;  %v1505_v40 = vsel %vm8638_vm0, %v1500_v32, %v1501_v42  ;;  %v6280_v58 = vld [vmem:[#allocation3 + $0xc8] ss:$12 sps:$4 sm:$0xff]  }
 0x157   : > { %1515 = vst [vmem:[#allocation3 + $0xbc] sm:$0xf] %v1507_v46  ;;  %v6980_v1 = vpop.permute.xlu1 %1458  ;;  %1167 = vmatpush1.bf16.msra.mxu0 %v5923_v49  ;;  %5928 = vmatprep.mubr.msk.bf16.mxu0 %vm8629_vm9, %v6829_v2  ;;  %v1466_v49 = vrot.slane %v6977_v47, 4  ;;  %v1502_v46 = vsel %vm8638_vm0, %v1498_v39, %v1499_v37  ;;  %v1506_v51 = vsel %vm8633_vm10, %v6949_v33, %v1505_v40 }
 0x158   : > { %v1465_v52 = vrot.slane %v6980_v1, 4  ;;  %1168 = vmatprep.subr.bf16.mxu0 %v8641_v0  ;;  %v1503_v56 = vsel %vm8633_vm10, %v6941_v24, %v1502_v46  ;;  %vm1929_vm10 = vcmask 913152  }
 0x159   : > { %v6990_v55 = vpop.permute.xlu0 %1422 }
 0x15a   : > { %v1470_v54 = vsel %vm8634_vm11, %v6980_v1, %v1465_v52  ;;  %v1468_v36 = vsel %vm8638_vm0, %v1464_v50, %v1465_v52  ;;  %v5957_v1 = vcombine.high %v1503_v56, %v1506_v51  ;;  %v1430_v24 = vrot.slane %v6990_v55, 4 }
 0x15b   : > { %1479 = vst [vmem:[#allocation3 + $0x98] sm:$0xf] %v1470_v54  ;;  %v6992_v57 = vpop.permute.xlu1 %1462  ;;  %1169 = vmatpush1.bf16.msra.mxu0 %v5920_v53  ;;  %v1469_v52 = vsel %vm8634_vm11, %v6963_v43, %v1468_v36 }
 0x15c   : > { %v1467_v2 = vrot.slane %v6992_v57, 4  ;;  %1170 = vmatprep.subr.bf16.mxu0 %v8641_v0 }
 0x15d   : > { %v7000_v3 = vpop.permute.xlu0 %1426 }
 0x15e   : > { %v1473_v63 = vsel %vm8634_vm11, %v6992_v57, %v1467_v2  ;;  %v6273_v4 = vld [vmem:[#allocation3 + $0xb0] ss:$12 sps:$4 sm:$0xff]   ;;  %v1471_v53 = vsel %vm8638_vm0, %v1466_v49, %v1467_v2  ;;  %v1432_v57 = vrot.slane %v7000_v3, 4 }
 0x15f   : > { %1481 = vst [vmem:[#allocation3 + $0xa4] sm:$0xf] %v1473_v63  ;;  %v7002_v6 = vpop.permute.xlu1 %1424  ;;  %1171 = vmatpush1.bf16.msra.mxu0 %v5917_v62  ;;  %1800 = vmatpush1.bf16.msra.mxu1 %v6273_v4  ;;  %v1472_v33 = vsel %vm8634_vm11, %v6977_v47, %v1471_v53  ;;  %vm1945_vm11 = vcmask 1044352  }
 0x160   : > { %v1431_v7 = vrot.slane %v7002_v6, 4  ;;  %1172 = vmatprep.subr.bf16.mxu0 %v8641_v0  ;;  %1801 = vmatprep.subr.bf16.mxu1 %v8641_v0 }
 0x161   : > { %v7011_v11 = vpop.permute.xlu0 %1388 }
 0x162   : > { %v1436_v10 = vsel %vm8635_vm12, %v7002_v6, %v1431_v7  ;;  %v1434_v43 = vsel %vm8638_vm0, %v1430_v24, %v1431_v7  ;;  %v1396_v12 = vrot.slane %v7011_v11, 4 }
 0x163   : > { %1445 = vst [vmem:[#allocation3 + $0x80] sm:$0xf] %v1436_v10  ;;  %v7013_v13 = vpop.permute.xlu1 %1428  ;;  %1173 = vmatpush1.bf16.msra.mxu0 %v5914_v9  ;;  %v5956_v9 = vcombine.low %v1503_v56, %v1506_v51  ;;  %v5954_v10 = vcombine.high %v1469_v52, %v1472_v33 }
 0x164   : > { %v1433_v14 = vrot.slane %v7013_v13, 4  ;;  %1174 = vmatprep.subr.bf16.mxu0 %v8641_v0 }
 0x165   : > { %v7021_v18 = vpop.permute.xlu0 %1392 }
 0x166   : > { %v1439_v17 = vsel %vm8635_vm12, %v7013_v13, %v1433_v14  ;;  %v6274_v19 = vld [vmem:[#allocation3 + $0x98] ss:$12 sps:$4 sm:$0xff]   ;;  %v1437_v47 = vsel %vm8638_vm0, %v1432_v57, %v1433_v14  ;;  %v1398_v8 = vrot.slane %v7021_v18, 4 }
 0x167   : > { %1447 = vst [vmem:[#allocation3 + $0x8c] sm:$0xf] %v1439_v17  ;;  %v7023_v20 = vpop.permute.xlu1 %1390  ;;  %1175 = vmatpush1.bf16.msra.mxu0 %v5911_v16  ;;  %1802 = vmatpush1.bf16.msra.mxu1 %v6274_v19  ;;  %v1438_v16 = vsel %vm8635_vm12, %v7000_v3, %v1437_v47  ;;  %v1435_v3 = vsel %vm8635_vm12, %v6990_v55, %v1434_v43  ;;  %vm1863_vm12 = vcmask 130052  }
 0x168   : > { %v1397_v21 = vrot.slane %v7023_v20, 4  ;;  %1176 = vmatprep.subr.bf16.mxu0 %v8641_v0  ;;  %1803 = vmatprep.subr.bf16.mxu1 %v8641_v0 }
 0x169   : > { %v7032_v27 = vpop.permute.xlu0 %1354 }
 0x16a   : > { %v1402_v25 = vsel %vm8636_vm13, %v7023_v20, %v1397_v21  ;;  %v1400_v7 = vsel %vm8638_vm0, %v1396_v12, %v1397_v21 }
 0x16b   : > { %1411 = vst [vmem:[#allocation3 + $0x68] sm:$0xf] %v1402_v25  ;;  %v1395_v28 = vpop.permute.xlu1 %1394  ;;  %1177 = vmatpush1.bf16.msra.mxu0 %v6276_v23  ;;  %v5953_v23 = vcombine.low %v1469_v52, %v1472_v33  ;;  %v1401_v20 = vsel %vm8636_vm13, %v7011_v11, %v1400_v7 }
 0x16c   : > { %v1399_v29 = vrot.slane %v1395_v28, 4  ;;  %1178 = vmatprep.subr.bf16.mxu0 %v8641_v0 }
 0x16d   : > { %v7037_v35 = vpop.permute.xlu0 %1358 }
 0x16e   : > { %v1405_v34 = vsel %vm8636_vm13, %v1395_v28, %v1399_v29  ;;  %v6275_v48 = vld [vmem:[#allocation3 + $0x80] ss:$12 sps:$4 sm:$0xff]   ;;  %v1403_v17 = vsel %vm8638_vm0, %v1398_v8, %v1399_v29  ;;  %v1364_v28 = vrot.slane %v7037_v35, 4 }
 0x16f   : > { %1413 = vst [vmem:[#allocation3 + $0x74] sm:$0xf] %v1405_v34  ;;  %v7039_v38 = vpop.permute.xlu1 %1356  ;;  %1179 = vmatpush1.bf16.msra.mxu0 %v6277_v30  ;;  %1804 = vmatpush1.bf16.msra.mxu1 %v6275_v48  ;;  %v1404_v25 = vsel %vm8636_vm13, %v7021_v18, %v1403_v17  ;;  %v5951_v30 = vcombine.high %v1435_v3, %v1438_v16  ;;  %v1362_v34 = vrot.slane %v7032_v27, 4  ;;  %vm1874_vm13 = vcmask 261252  }
 0x170   : > { %v1363_v44 = vrot.slane %v7039_v38, 4  ;;  %1180 = vmatprep.subr.bf16.mxu0 %v8641_v0  ;;  %1805 = vmatprep.subr.bf16.mxu1 %v8641_v0  ;;  %v5950_v18 = vcombine.low %v1435_v3, %v1438_v16  ;;  %v5948_v40 = vcombine.high %v1401_v20, %v1404_v25  ;;  %v5936_v16 = vcombine.high %v6775_v59, %v6781_v60  ;;  %v6286_v3 = vld [vmem:[%s8601_s6] ss:$8 sps:$4 sm:$0xff]  }
 0x171   : > { %v1321_v42 = vpop.permute.xlu0 %1320 }
 0x172   : > { %v1368_v41 = vsel %vm8630_vm14, %v7039_v38, %v1363_v44  ;;  %v1328_v4 = vrot.slane %v1321_v42, 4  ;;  %v1366_v11 = vsel %vm8638_vm0, %v1362_v34, %v1363_v44 }
 0x173   : > { %1377 = vst [vmem:[#allocation3 + $0x50] sm:$0xf] %v1368_v41  ;;  %v1361_v54 = vpop.permute.xlu1 %1360  ;;  %1181 = vmatpush1.bf16.msra.mxu0 %v6787_v61  ;;  %v1367_v44 = vsel %vm8630_vm14, %v7032_v27, %v1366_v11 }
 0x174   : > { %v1365_v37 = vrot.slane %v1361_v54, 4  ;;  %1196 = vmatprep.subr.bf16.mxu0 %v8641_v0 }
 0x175   : > { %v7073_v62 = vpop.permute.xlu0 %1324 }
 0x176   : > { %v1371_v2 = vsel %vm8630_vm14, %v1361_v54, %v1365_v37  ;;  %v6278_v61 = vld [vmem:[#allocation3 + $0x68] ss:$12 sps:$4 sm:$0xff]   ;;  %v1369_v55 = vsel %vm8638_vm0, %v1364_v28, %v1365_v37  ;;  %v1330_v49 = vrot.slane %v7073_v62, 4  ;;  %v5947_v37 = vcombine.low %v1401_v20, %v1404_v25 }
 0x177   : > { %1379 = vst [vmem:[#allocation3 + $0x5c] sm:$0xf] %v1371_v2  ;;  %v1323_v63 = vpop.permute.xlu1 %1322  ;;  %1197 = vmatpush2.bf16.msra.mxu0 %v6280_v58  ;;  %1806 = vmatpush1.bf16.msra.mxu1 %v6278_v61  ;;  %v1370_v41 = vsel %vm8630_vm14, %v7037_v35, %v1369_v55  ;;  %v1210_v25 = vlaneseq  ;;  %vm1902_vm14 = vcmask 650752  }
 0x178   : > { %v1329_v5 = vrot.slane %v1323_v63, 4  ;;  %1756 = vmatprep.subr.bf16.mxu0 %v5957_v1  ;;  %1807 = vmatprep.subr.bf16.mxu1 %v8641_v0  ;;  %v5945_v33 = vcombine.high %v1367_v44, %v1370_v41  ;;  %v5944_v27 = vcombine.low %v1367_v44, %v1370_v41 }
 0x179   : > { %v1287_v15 = vpop.permute.xlu0 %1286  ;;  %v1211_v28 = vshrl.u32 %v1210_v25, 7 }
 0x17a   : > { %v1332_v13 = vsel %vm8638_vm0, %v1328_v4, %v1329_v5  ;;  %v1334_v14 = vsel %vm8631_vm15, %v1323_v63, %v1329_v5  ;;  %1199 = vmatmul.mubr.bf16.vlgmr.msra.gmra.mxu0 %v6967_v45  ;;  %v1294_v48 = vrot.slane %v1287_v15, 4 }
 0x17b   : > { %v7094_v19 = vsel %vm8631_vm15, %v1321_v42, %v1332_v13  ;;  %1343 = vst [vmem:[#allocation3 + $0x38] sm:$0xf] %v1334_v14  ;;  %v1327_v6 = vpop.permute.xlu1 %1326  ;;  %1757 = vmatpush1.bf16.msra.mxu0 %v5956_v9  ;;  %5962 = vmatprep.mubr.msk.bf16.mxu0 %vm8629_vm9, %v6893_v26  ;;  %v1216_v11 = vsub.s32 1, %v1211_v28  ;;  %vm1891_vm9 = vcmask 519552  }
 0x17c   : > { %1342 = vst [vmem:[#allocation3 + $0x30] sm:$0xff] %v7094_v19  ;;  %v1331_v45 = vrot.slane %v1327_v6, 4  ;;  %1758 = vmatprep.subr.bf16.mxu0 %v5954_v10 }
 0x17d   : > { %v1291_v21 = vpop.permute.xlu0 %1290 }
 0x17e   : > { %v1337_v29 = vsel %vm8631_vm15, %v1327_v6, %v1331_v45  ;;  %v6281_v26 = vld [vmem:[#allocation3 + $0x50] ss:$12 sps:$4 sm:$0xff]   ;;  %v1335_v53 = vsel %vm8638_vm0, %v1330_v49, %v1331_v45  ;;  %v1296_v54 = vrot.slane %v1291_v21, 4  ;;  %v5935_v6 = vcombine.low %v6775_v59, %v6781_v60  ;;  %v563_v60 = vld [vmem:[%s8698_s22] sm:$0x7]  ;;  %s6568_s22 = smov 103  }
 0x17f   : > { %1345 = vst [vmem:[#allocation3 + $0x44] sm:$0xf] %v1337_v29  ;;  %v1289_v32 = vpop.permute.xlu1 %1288  ;;  %1759 = vmatpush1.bf16.msra.mxu0 %v5953_v23  ;;  %1808 = vmatpush1.bf16.msra.mxu1 %v6281_v26  ;;  %v1336_v57 = vsel %vm8631_vm15, %v7073_v62, %v1335_v53  ;;  %v1220_v59 = vsub.s32 2, %v1211_v28  ;;  %v1212_v26 = vsub.s32 0, %v1211_v28  ;;  %vm1913_vm15 = vcmask 781952  }
 0x180   : > { %v1295_v39 = vrot.slane %v1289_v32, 4  ;;  %1760 = vmatprep.subr.bf16.mxu0 %v5951_v30  ;;  %1809 = vmatprep.subr.bf16.mxu1 %v8641_v0  ;;  %v5942_v63 = vcombine.high %v7094_v19, %v1336_v57  ;;  %v5941_v4 = vcombine.low %v7094_v19, %v1336_v57 }
 0x181   : > { %v1525_v36 = vpop.permute.xlu0 %1524  ;;  %v7153_v29 = vrot.slane %v563_v60, %v1220_v59 }
 0x182   : > { %v1298_v46 = vsel %vm8638_vm0, %v1294_v48, %v1295_v39  ;;  %v1300_v50 = vsel %vm8632_vm1, %v1289_v32, %v1295_v39  ;;  %v1532_v43 = vrot.slane %v1525_v36, 4 }
 0x183   : > { %v1299_v42 = vsel %vm8632_vm1, %v1287_v15, %v1298_v46  ;;  %1309 = vst [vmem:[#allocation3 + $0x20] sm:$0xf] %v1300_v50  ;;  %v1293_v51 = vpop.permute.xlu1 %1292  ;;  %1761 = vmatpush1.bf16.msra.mxu0 %v5950_v18  ;;  %v6284_v15 = vld [vmem:[#allocation3 + $0x8] ss:$12 sps:$4 sm:$0xff]   ;;  %8699 = vst [vmem:[#allocation8_spill] sm:$0xff] %v7153_v29  ;;  %v7172_v46 = vrot.slane %v563_v60, %v1216_v11 }
 0x184   : > { %1308 = vst [vmem:[#allocation3 + $0x18] sm:$0xff] %v1299_v42  ;;  %v1297_v38 = vrot.slane %v1293_v51, 4  ;;  %1762 = vmatprep.subr.bf16.mxu0 %v5948_v40 }
 0x185   : > { %v1529_v24 = vpop.permute.xlu0 %1528  ;;  %8702 = vst [vmem:[#allocation11_spill] sm:$0xff] %v7172_v46 }
 0x186   : > { %v1301_v56 = vsel %vm8638_vm0, %v1296_v54, %v1297_v38  ;;  %v1303_v35 = vsel %vm8632_vm1, %v1293_v51, %v1297_v38  ;;  %v6282_v58 = vld [vmem:[#allocation3 + $0x38] ss:$12 sps:$4 sm:$0xff]   ;;  %v1534_v5 = vrot.slane %v1529_v24, 4 }
 0x187   : > { %v1302_v2 = vsel %vm8632_vm1, %v1291_v21, %v1301_v56  ;;  %1311 = vst [vmem:[#allocation3 + $0x2c] sm:$0xf] %v1303_v35  ;;  %v1527_v61 = vpop.permute.xlu1 %1526  ;;  %1763 = vmatpush1.bf16.msra.mxu0 %v5947_v37  ;;  %1810 = vmatpush1.bf16.msra.mxu1 %v6282_v58  ;;  %v7157_v21 = vrot.slane %v563_v60, %v1212_v26  ;;  %vm1926_vm1 = vcmask 793600  }
 0x188   : > { %1310 = vst [vmem:[#allocation3 + $0x24] sm:$0xff] %v1302_v2  ;;  %v1533_v1 = vrot.slane %v1527_v61, 4  ;;  %1764 = vmatprep.subr.bf16.mxu0 %v5945_v33  ;;  %1811 = vmatprep.subr.bf16.mxu1 %v8641_v0  ;;  %v5939_v10 = vcombine.high %v1299_v42, %v1302_v2  ;;  %v5938_v13 = vcombine.low %v1299_v42, %v1302_v2 }
 0x189   : > { %8700 = vst [vmem:[#allocation9_spill] sm:$0xff] %v7157_v21 }
 0x18a   : > { %v1538_v52 = vsel %vm8637_vm2, %v1527_v61, %v1533_v1  ;;  %v1536_v14 = vsel %vm8638_vm0, %v1532_v43, %v1533_v1 }
 0x18b   : > { %1547 = vst [vmem:[#allocation3 + $0xc8] sm:$0xf] %v1538_v52  ;;  %v1531_v47 = vpop.permute.xlu1 %1530  ;;  %1765 = vmatpush1.bf16.msra.mxu0 %v5944_v27  ;;  %v1537_v19 = vsel %vm8637_vm2, %v1525_v36, %v1536_v14 }
 0x18c   : > { %v1535_v62 = vrot.slane %v1531_v47, 4  ;;  %1766 = vmatprep.subr.bf16.mxu0 %v5942_v63 }
 0x18e   : > { %v1541_v8 = vsel %vm8637_vm2, %v1531_v47, %v1535_v62  ;;  %v6283_v9 = vld [vmem:[#allocation3 + $0x20] ss:$12 sps:$4 sm:$0xff]   ;;  %v1539_v12 = vsel %vm8638_vm0, %v1534_v5, %v1535_v62  ;;  %vm1896_vm0 = vcmask 523652  }
 0x18f   : > { %1549 = vst [vmem:[#allocation3 + $0xd4] sm:$0xf] %v1541_v8  ;;  %1767 = vmatpush1.bf16.msra.mxu0 %v5941_v4  ;;  %1812 = vmatpush1.bf16.msra.mxu1 %v6283_v9  ;;  %v1540_v17 = vsel %vm8637_vm2, %v1529_v24, %v1539_v12  ;;  %vm1885_vm2 = vcmask 392452  }
 0x190   : > { %1768 = vmatprep.subr.bf16.mxu0 %v5939_v10  ;;  %1813 = vmatprep.subr.bf16.mxu1 %v8641_v0  ;;  %v5960_v45 = vcombine.high %v1537_v19, %v1540_v17  ;;  %v5959_v23 = vcombine.low %v1537_v19, %v1540_v17 }
 0x192   : > { %v7155_v30 = vpop.permute.xlu0 %968 }
 0x193   : > { %1769 = vmatpush1.bf16.msra.mxu0 %v5938_v13  ;;  %1814 = vmatpush1.bf16.msra.mxu1 %v6284_v15 }
 0x194   : > { %1770 = vmatprep.subr.bf16.mxu0 %v5936_v16  ;;  %1829 = vmatprep.subr.bf16.mxu1 %v8641_v0 }
 0x196   : > { %v6285_v7 = vld [vmem:[#allocation3 + $0xc8] ss:$12 sps:$4 sm:$0xff]  }
 0x197   : > { %1771 = vmatpush1.bf16.msra.mxu0 %v5935_v6  ;;  %1830 = vmatpush2.bf16.msra.mxu1 %v6285_v7 }
 0x198   : > { %1786 = vmatprep.subr.bf16.mxu0 %v5960_v45  ;;  %v1593_v54 = vpop.permute.xlu1 %1592 }
 0x19a   : > { %1832 = vmatmul.mubr.bf16.vlgmr.msra.gmra.mxu1 %v6286_v3 }
 0x19b   : > { %1787 = vmatpush2.bf16.msra.mxu0 %v5959_v23  ;;  %2215 = vmatprep.mubr.bf16.mxu1 %v8641_v0 }
 0x19e   : > { %1789 = vmatmul.mubr.bf16.vlgmr.msra.gmra.mxu0 %v6286_v3 }
 0x19f   : > { %3183 = vmatprep.mubr.bf16.mxu0 %v8641_v0 }
 0x216   : > { %v1159_v20 = vpop.f32.mrf.mxu0 }
 0x217   : > { %v1160_v32 = vadd.f32 %v1159_v20, %v7155_v30 }
 0x218   : > { %v1161_v34 = vpop.f32.mrf.mxu0 }
 0x219   : > { %v1206_v55 = vmax.f32 %v1160_v32, 0.0  ;;  %v1162_v40 = vadd.f32 %v1161_v34, %v7155_v30 }
 0x21a   : > { %v1163_v48 = vpop.f32.mrf.mxu0 }
 0x21b   : > { %v7161_v39 = vmul.f32 %v7157_v21, %v1206_v55  ;;  %v1207_v49 = vmax.f32 %v1162_v40, 0.0 }
 0x21c   : > { %v1164_v18 = vpop.f32.mrf.mxu0 }
 0x21d   : > { %8701 = vst [vmem:[#allocation10_spill] sm:$0xff] %v7161_v39  ;;  %1866 = vrot.lane.b32.xlu0 %v7161_v39, %s6567_s20  ;;  %1853 = vrot.lane.b32.xlu1 %v7161_v39, %s8626_s19  ;;  %v7179_v50 = vmul.f32 %v7172_v46, %v1207_v49 }
 0x21f   : > { %8703 = vst [vmem:[#allocation12_spill] sm:$0xff] %v7179_v50 }
 0x221   : > { %1888 = vrot.lane.b32.xlu0 %v7161_v39, %s6568_s22  ;;  %1877 = vrot.lane.b32.xlu1 %v7161_v39, %s6569_s27 }
 0x225   : > { %1910 = vrot.lane.b32.xlu0 %v7161_v39, %s6570_s28  ;;  %1899 = vrot.lane.b32.xlu1 %v7161_v39, %s6571_s26 }
 0x229   : > { %1924 = vrot.lane.b32.xlu0 %v7179_v50, %s6572_s24  ;;  %1922 = vrot.lane.b32.xlu1 %v7161_v39, %s6572_s24 }
 0x22d   : > { %1942 = vrot.lane.b32.xlu1 %v7179_v50, %s6573_s17 }
 0x23a   : > { %v1200_v41 = vpop.f32.mrf.mxu0 }
 0x23b   : > { %v1201_v4 = vadd.f32 %v1200_v41, %v7155_v30 }
 0x23c   : > { %v1202_v42 = vpop.f32.mrf.mxu0 }
 0x23d   : > { %v1208_v5 = vmax.f32 %v1201_v4, 0.0 }
 0x23e   : > { %v1203_v51 = vpop.f32.mrf.mxu0 }
 0x23f   : > { %v7217_v10 = vmul.f32 %v7153_v29, %v1208_v5 }
 0x240   : > { %v1204_v53 = vpop.f32.mrf.mxu0 }
 0x241   : > { %8705 = vst [vmem:[#allocation14_spill] sm:$0xff] %v7217_v10 }
 0x25a   : > { %v1833_v38 = vpop.f32.mrf.mxu1 }
 0x25b   : > { %v1834_v44 = vadd.f32 %v1833_v38, %v1593_v54 }
 0x25c   : > { %v1835_v36 = vpop.f32.mrf.mxu1 }
 0x25d   : > { %v1842_v37 = vmax.f32 %v1834_v44, 0.0 }
 0x25e   : > { %v1790_v56 = vpop.f32.mrf.mxu0  ;;  %v7187_v35 = vpop.f32.mrf.mxu1 }
 0x25f   : > { %8704 = vst [vmem:[#allocation13_spill] sm:$0xff] %v7187_v35  ;;  %v1791_v58 = vadd.f32 %v1790_v56, %v1593_v54  ;;  %v1848_v33 = vmul.f32 %v1842_v37, %v7153_v29 }
 0x260   : > { %v1792_v57 = vpop.f32.mrf.mxu0  ;;  %v1838_v2 = vpop.f32.mrf.mxu1 }
 0x261   : > { %v1840_v61 = vmax.f32 %v1791_v58, 0.0  ;;  %v2008_v1 = vrot.slane %v1848_v33, 4  ;;  %v1793_v27 = vadd.f32 %v1792_v57, %v1593_v54 }
 0x263   : > { %v1846_v52 = vmul.f32 %v1840_v61, %v7157_v21  ;;  %2011 = vrot.lane.b32.xlu1 %v2008_v1, %s6574_s18  ;;  %v1841_v24 = vmax.f32 %v1793_v27, 0.0 }
 0x265   : > { %v1859_v63 = vrot.slane %v1846_v52, 4  ;;  %v1847_v47 = vmul.f32 %v1841_v24, %v7172_v46 }
 0x267   : > { %1860 = vrot.lane.b32.xlu0 %v1859_v63, %s8626_s19  ;;  %2021 = vrot.lane.b32.xlu1 %v2008_v1, %s8628_s25  ;;  %v1932_v62 = vrot.slane %v1847_v47, 4  ;;  %s6577_s19 = smov 89   ;;  %s6578_s25 = smov 87  }
 0x26b   : > { %1871 = vrot.lane.b32.xlu0 %v1859_v63, %s6567_s20  ;;  %1933 = vrot.lane.b32.xlu1 %v1859_v63, %s6572_s24  ;;  %s6579_s20 = smov 85  }
 0x26f   : > { %1882 = vrot.lane.b32.xlu0 %v1859_v63, %s6569_s27  ;;  %1957 = vrot.lane.b32.xlu1 %v1932_v62, %s6576_s30  ;;  %s6580_s27 = smov 79  }
 0x273   : > { %1893 = vrot.lane.b32.xlu0 %v1859_v63, %s6568_s22  ;;  %1966 = vrot.lane.b32.xlu1 %v1932_v62, %s8685_s0  ;;  %s6586_s22 = smov 29  }
 0x277   : > { %1904 = vrot.lane.b32.xlu0 %v1859_v63, %s6571_s26  ;;  %1975 = vrot.lane.b32.xlu1 %v1932_v62, %s6577_s19  ;;  %s6588_s26 = smov 39  }
 0x27b   : > { %1915 = vrot.lane.b32.xlu0 %v1859_v63, %s6570_s28  ;;  %1984 = vrot.lane.b32.xlu1 %v1932_v62, %s6578_s25  ;;  %s6587_s28 = smov 35  }
 0x27f   : > { %2009 = vrot.lane.b32.xlu0 %v1932_v62, %s6574_s18  ;;  %1993 = vrot.lane.b32.xlu1 %v1932_v62, %s6579_s20 }
 0x283   : > { %1935 = vrot.lane.b32.xlu0 %v1932_v62, %s6572_s24  ;;  %2030 = vrot.lane.b32.xlu1 %v2008_v1, %s6580_s27  ;;  %s6584_s24 = smov 23  }
 0x287   : > { %1947 = vrot.lane.b32.xlu0 %v1932_v62, %s6573_s17  ;;  %1962 = vrot.lane.b32.xlu1 %v7179_v50, %s8685_s0  ;;  %s6591_s17 = smov 25  }
 0x28b   : > { %1953 = vrot.lane.b32.xlu0 %v7179_v50, %s6576_s30  ;;  %1980 = vrot.lane.b32.xlu1 %v7179_v50, %s6578_s25  ;;  %s8706_s30 = smov 81   ;;  %s6585_s25 = smov 31  }
 0x28f   : > { %1971 = vrot.lane.b32.xlu0 %v7179_v50, %s6577_s19  ;;  %v1867_v8 = vpop.permute.xlu0 %1866  ;;  %v1854_v9 = vpop.permute.xlu1 %1853  ;;  %1999 = vrot.lane.b32.xlu1 %v7179_v50, %s6574_s18  ;;  %s6583_s19 = smov 21  }
 0x290   : > { %1857 = vst.msk [vmem:[#allocation5] sm:$0xf] %vm1856_vm3, %v1854_v9 }
 0x291   : > { %1870 = vst.msk [vmem:[#allocation5] sm:$0xf] %vm8640_vm4, %v1867_v8 }
 0x293   : > { %1989 = vrot.lane.b32.xlu0 %v7179_v50, %s6579_s20  ;;  %v1889_v43 = vpop.permute.xlu0 %1888  ;;  %v1878_v12 = vpop.permute.xlu1 %1877  ;;  %2017 = vrot.lane.b32.xlu1 %v7217_v10, %s8706_s30  ;;  %s6589_s20 = smov 41   ;;  %s8773_s30 = smov 19  }
 0x294   : > { %1881 = vst.msk [vmem:[#allocation5] sm:$0xf] %vm1880_vm7, %v1878_v12 }
 0x295   : > { %1892 = vst.msk [vmem:[#allocation5] sm:$0xf] %vm1891_vm9, %v1889_v43 }
 0x297   : > { %2001 = vrot.lane.b32.xlu0 %v7217_v10, %s6574_s18  ;;  %v1911_v13 = vpop.permute.xlu0 %1910  ;;  %v1900_v14 = vpop.permute.xlu1 %1899  ;;  %s6592_s18 = smov 27  }
 0x298   : > { %1903 = vst.msk [vmem:[#allocation5] sm:$0xf] %vm1902_vm14, %v1900_v14 }
 0x299   : > { %1914 = vst.msk [vmem:[#allocation5] sm:$0xf] %vm1913_vm15, %v1911_v13 }
 0x29b   : > { %2026 = vrot.lane.b32.xlu0 %v7217_v10, %s6580_s27  ;;  %v1925_v15 = vpop.permute.xlu0 %1924  ;;  %v1923_v16 = vpop.permute.xlu1 %1922  ;;  %s6590_s27 = smov 47  }
 0x29c   : > { %v1927_v17 = vsel %vm1926_vm1, %v1923_v16, %v1925_v15 }
 0x29d   : > { %1930 = vst.msk [vmem:[#allocation5] sm:$0xf] %vm1929_vm10, %v1927_v17 }
 0x29f   : > { %v1943_v19 = vpop.permute.xlu1 %1942 }
 0x2a0   : > { %1946 = vst.msk [vmem:[#allocation5] sm:$0xf] %vm1945_vm11, %v1943_v19 }
 0x2a7   : > { %v2035_v6 = vld [vmem:[#allocation5] sm:$0xf] }
 0x2bc   : > { %2041 = vxpose.xlu1.b32.start.end [1/1] (short) %v2035_v6, 128 }
 0x2d5   : > { %v2012_v7 = vpop.permute.xlu1 %2011 }
 0x2d9   : > { %v1861_v45 = vpop.permute.xlu0 %1860  ;;  %v2022_v3 = vpop.permute.xlu1 %2021 }
 0x2da   : > { %1864 = vst.msk [vmem:[#allocation5] sm:$0xf0] %vm1863_vm12, %v1861_v45 }
 0x2db   : > { %1865 = vst.msk [vmem:[#allocation5 + $0x10] sm:$0xf] %vm1856_vm3, %v1861_v45 }
 0x2dd   : > { %v1872_v23 = vpop.permute.xlu0 %1871  ;;  %v1934_v25 = vpop.permute.xlu1 %1933 }
 0x2de   : > { %1875 = vst.msk [vmem:[#allocation5] sm:$0xf0] %vm1874_vm13, %v1872_v23 }
 0x2df   : > { %1876 = vst.msk [vmem:[#allocation5 + $0x10] sm:$0xf] %vm8640_vm4, %v1872_v23 }
 0x2e1   : > { %v1883_v28 = vpop.permute.xlu0 %1882  ;;  %v1958_v59 = vpop.permute.xlu1 %1957 }
 0x2e2   : > { %1886 = vst.msk [vmem:[#allocation5] sm:$0xf0] %vm1885_vm2, %v1883_v28 }
 0x2e3   : > { %1887 = vst.msk [vmem:[#allocation5 + $0x10] sm:$0xf] %vm1880_vm7, %v1883_v28 }
 0x2e4   : > { %1960 = vst.msk [vmem:[#allocation5 + $0x8] sm:$0xf0] %vm1863_vm12, %v1958_v59  ;;  %vm1918_vm12 = vcmask 786052  }
 0x2e5   : > { %1961 = vst.msk [vmem:[#allocation5 + $0x18] sm:$0xf] %vm1856_vm3, %v1958_v59  ;;  %v1894_v60 = vpop.permute.xlu0 %1893  ;;  %v1967_v26 = vpop.permute.xlu1 %1966 }
 0x2e6   : > { %1897 = vst.msk [vmem:[#allocation5] sm:$0xf0] %vm1896_vm0, %v1894_v60 }
 0x2e7   : > { %1898 = vst.msk [vmem:[#allocation5 + $0x10] sm:$0xf] %vm1891_vm9, %v1894_v60 }
 0x2e8   : > { %1969 = vst.msk [vmem:[#allocation5 + $0x8] sm:$0xf0] %vm1874_vm13, %v1967_v26  ;;  %vm2003_vm13 = vcmask 678912  }
 0x2e9   : > { %1970 = vst.msk [vmem:[#allocation5 + $0x18] sm:$0xf] %vm8640_vm4, %v1967_v26  ;;  %v1905_v30 = vpop.permute.xlu0 %1904  ;;  %v1976_v20 = vpop.permute.xlu1 %1975  ;;  %vm1939_vm4 = vcmask 917252  }
 0x2ea   : > { %1908 = vst.msk [vmem:[#allocation5] sm:$0xf0] %vm1907_vm5, %v1905_v30 }
 0x2eb   : > { %1909 = vst.msk [vmem:[#allocation5 + $0x10] sm:$0xf] %vm1902_vm14, %v1905_v30 }
 0x2ec   : > { %1978 = vst.msk [vmem:[#allocation5 + $0x8] sm:$0xf0] %vm1885_vm2, %v1976_v20  ;;  %vm1950_vm2 = vcmask 1048452  }
 0x2ed   : > { %1979 = vst.msk [vmem:[#allocation5 + $0x18] sm:$0xf] %vm1880_vm7, %v1976_v20  ;;  %v1916_v32 = vpop.permute.xlu0 %1915  ;;  %v1985_v34 = vpop.permute.xlu1 %1984 }
 0x2ee   : > { %1919 = vst.msk [vmem:[#allocation5] sm:$0xf0] %vm1918_vm12, %v1916_v32 }
 0x2ef   : > { %1920 = vst.msk [vmem:[#allocation5 + $0x10] sm:$0xf] %vm1913_vm15, %v1916_v32 }
 0x2f0   : > { %1987 = vst.msk [vmem:[#allocation5 + $0x8] sm:$0xf0] %vm1896_vm0, %v1985_v34  ;;  %vm8707_vm0 = vcmask 257152  }
 0x2f1   : > { %1988 = vst.msk [vmem:[#allocation5 + $0x18] sm:$0xf] %vm1891_vm9, %v1985_v34  ;;  %v2010_v55 = vpop.permute.xlu0 %2009  ;;  %v1994_v48 = vpop.permute.xlu1 %1993 }
 0x2f2   : > { %v2013_v18 = vsel %vm2003_vm13, %v2010_v55, %v2012_v7  ;;  %1996 = vst.msk [vmem:[#allocation5 + $0x8] sm:$0xf0] %vm1907_vm5, %v1994_v48  ;;  %vm2176_vm5 = vcmask 1041408  }
 0x2f3   : > { %1997 = vst.msk [vmem:[#allocation5 + $0x18] sm:$0xf] %vm1902_vm14, %v1994_v48 }
 0x2f4   : > { %2015 = vst.msk [vmem:[#allocation5 + $0x8] sm:$0xf0] %vm1918_vm12, %v2013_v18  ;;  %vm2955_vm12 = vcmask 872152  }
 0x2f5   : > { %2016 = vst.msk [vmem:[#allocation5 + $0x18] sm:$0xf] %vm1913_vm15, %v2013_v18  ;;  %v1936_v40 = vpop.permute.xlu0 %1935  ;;  %v2031_v11 = vpop.permute.xlu1 %2030 }
 0x2f6   : > { %2025 = vst.msk [vmem:[#allocation5 + $0x18] sm:$0xf] %vm1929_vm10, %v2022_v3  ;;  %v1937_v49 = vsel %vm1926_vm1, %v1934_v25, %v1936_v40  ;;  %vm2945_vm1 = vcmask 576952  }
 0x2f7   : > { %2024 = vst.msk [vmem:[#allocation5 + $0x8] sm:$0xf0] %vm1939_vm4, %v2022_v3  ;;  %1940 = vst.msk [vmem:[#allocation5] sm:$0xf0] %vm1939_vm4, %v1937_v49  ;;  %vm2968_vm4 = vcmask 1044472  }
 0x2f8   : > { %2033 = vst.msk [vmem:[#allocation5 + $0x8] sm:$0xf0] %vm1950_vm2, %v2031_v11 }
 0x2f9   : > { %2034 = vst.msk [vmem:[#allocation5 + $0x18] sm:$0xf] %vm1945_vm11, %v2031_v11  ;;  %v1948_v41 = vpop.permute.xlu0 %1947  ;;  %v1963_v42 = vpop.permute.xlu1 %1962 }
 0x2fa   : > { %1941 = vst.msk [vmem:[#allocation5 + $0x10] sm:$0xf] %vm1929_vm10, %v1937_v49 }
 0x2fb   : > { %1951 = vst.msk [vmem:[#allocation5] sm:$0xf0] %vm1950_vm2, %v1948_v41  ;;  %vm2960_vm2 = vcmask 1019752  }
 0x2fc   : > { %1952 = vst.msk [vmem:[#allocation5 + $0x10] sm:$0xf] %vm1945_vm11, %v1948_v41 }
 0x2fd   : > { %v1954_v51 = vpop.permute.xlu0 %1953  ;;  %v1981_v54 = vpop.permute.xlu1 %1980 }
 0x2fe   : > { %1956 = vst.msk [vmem:[#allocation5 + $0x8] sm:$0xf] %vm1856_vm3, %v1954_v51  ;;  %vm2950_vm3 = vcmask 724552  }
 0x2ff   : > { %v2038_v53 = vld [vmem:[#allocation5 + $0x8] sm:$0xf0]  ;;  %1965 = vst.msk [vmem:[#allocation5 + $0x8] sm:$0xf] %vm8707_vm0, %v1963_v42 }
 0x300   : > { %v2122_v38 = vpack.c.bf16 %v2038_v53, %v2038_v53 }
 0x301   : > { %v1972_v44 = vpop.permute.xlu0 %1971  ;;  %v2000_v33 = vpop.permute.xlu1 %1999 }
 0x302   : > { %v2126_v36 = vrot.slane %v2122_v38, 2  ;;  %v2037_v37 = vld [vmem:[#allocation5] sm:$0xf0]  ;;  %1974 = vst.msk [vmem:[#allocation5 + $0x8] sm:$0xf] %vm1880_vm7, %v1972_v44  ;;  %vm2969_vm7 = vcmask 121860  }
 0x303   : > { %v2121_v56 = vpack.c.bf16 %v2037_v37, %v2037_v37  ;;  %1983 = vst.msk [vmem:[#allocation5 + $0x8] sm:$0xf] %vm1891_vm9, %v1981_v54  ;;  %vm2127_vm9 = vcmask 31744   ;;  %vm2970_vm0 = vmor %vm2969_vm7, %vm2968_vm4  ;;  %vm3009_vm4 = vcmask 1044456   ;;  %vm3010_vm7 = vcmask 105476  }
 0x304   : > { %5964 = vmatprep.subr.msk.bf16.mxu1 %vm2176_vm5, %v2126_v36 }
 0x305   : > { %v2125_v58 = vrot.slane %v2121_v56, 2  ;;  %v1990_v57 = vpop.permute.xlu0 %1989  ;;  %v2018_v27 = vpop.permute.xlu1 %2017 }
 0x306   : > { %1992 = vst.msk [vmem:[#allocation5 + $0x8] sm:$0xf] %vm1902_vm14, %v1990_v57  ;;  %vm2935_vm14 = vcmask 281752  }
 0x307   : > { %v2178_v2 = vsel %vm2176_vm5, %v2125_v58, 0 }
 0x308   : > { %2198 = vmatpush1.bf16.msra.mxu1 %v2178_v2 }
 0x309   : > { %v2002_v61 = vpop.permute.xlu0 %2001 }
 0x30a   : > { %v2004_v1 = vsel %vm2003_vm13, %v2000_v33, %v2002_v61  ;;  %v2040_v33 = vld [vmem:[#allocation5 + $0x18] sm:$0xf]  ;;  %vm2965_vm13 = vcmask 252928  }
 0x30b   : > { %2006 = vst.msk [vmem:[#allocation5 + $0x8] sm:$0xf] %vm1913_vm15, %v2004_v1  ;;  %v2857_v61 = vpack.c.bf16 %v2040_v33, %v2040_v33  ;;  %vm2940_vm15 = vcmask 429352  }
 0x30c   : > { %2020 = vst.msk [vmem:[#allocation5 + $0x8] sm:$0xf] %vm1929_vm10, %v2018_v27  ;;  %vm6582_vm10 = vmmov 0  }
 0x30d   : > { %v2027_v52 = vpop.permute.xlu0 %2026 }
 0x30e   : > { %2029 = vst.msk [vmem:[#allocation5 + $0x8] sm:$0xf] %vm1945_vm11, %v2027_v52  ;;  %vm3120_vm11 = vcmask 27648  }
 0x315   : > { %v2036_v63 = vld [vmem:[#allocation5 + $0x8] sm:$0xf] }
 0x316   : > { %2073 = vxpose.xlu0.b32.start.end [1/1] (short) %v2036_v63, 128 }
 0x338   : > { %v2057_v24 = vpop.trf.xlu1 }
 0x33c   : > { %v2058_v47 = vpop.trf.xlu1 }
 0x33d   : > { %v2105_v62 = vpack.c.bf16 %v2058_v47, %v2057_v24 }
 0x33f   : > { %5965 = vmatmul.mubr.msk.bf16.vlgmr.msra.gmra.mxu1 %vm2127_vm9, %v2105_v62 }
 0x340   : > { %v2059_v4 = vpop.trf.xlu1  ;;  %2225 = vmatprep.mubr.bf16.mxu1 %v8641_v0 }
 0x344   : > { %v2060_v5 = vpop.trf.xlu1 }
 0x345   : > { %v2106_v8 = vpack.c.bf16 %v2060_v5, %v2059_v4 }
 0x347   : > { %5966 = vmatmul.mubr.msk.bf16.gmra.mxu1 %vm2127_vm9, %v2106_v8 }
 0x348   : > { %v2061_v9 = vpop.trf.xlu1  ;;  %2235 = vmatprep.mubr.bf16.mxu1 %v8641_v0 }
 0x34c   : > { %v2062_v43 = vpop.trf.xlu1 }
 0x34d   : > { %v2107_v12 = vpack.c.bf16 %v2062_v43, %v2061_v9 }
 0x34f   : > { %5967 = vmatmul.mubr.msk.bf16.gmra.mxu1 %vm2127_vm9, %v2107_v12 }
 0x350   : > { %v2063_v13 = vpop.trf.xlu1  ;;  %2245 = vmatprep.mubr.bf16.mxu1 %v8641_v0 }
 0x354   : > { %v2064_v14 = vpop.trf.xlu1 }
 0x355   : > { %v2108_v15 = vpack.c.bf16 %v2064_v14, %v2063_v13 }
 0x357   : > { %5968 = vmatmul.mubr.msk.bf16.gmra.mxu1 %vm2127_vm9, %v2108_v15 }
 0x358   : > { %v2065_v16 = vpop.trf.xlu1  ;;  %2255 = vmatprep.mubr.bf16.mxu1 %v8641_v0 }
 0x35c   : > { %v2066_v17 = vpop.trf.xlu1 }
 0x35d   : > { %v2109_v19 = vpack.c.bf16 %v2066_v17, %v2065_v16 }
 0x35f   : > { %5969 = vmatmul.mubr.msk.bf16.gmra.mxu1 %vm2127_vm9, %v2109_v19 }
 0x360   : > { %v2067_v6 = vpop.trf.xlu1  ;;  %2265 = vmatprep.mubr.bf16.mxu1 %v8641_v0 }
 0x364   : > { %v2068_v7 = vpop.trf.xlu1 }
 0x365   : > { %v2110_v45 = vpack.c.bf16 %v2068_v7, %v2067_v6 }
 0x367   : > { %5970 = vmatmul.mubr.msk.bf16.gmra.mxu1 %vm2127_vm9, %v2110_v45 }
 0x368   : > { %v2069_v3 = vpop.trf.xlu1  ;;  %2275 = vmatprep.mubr.bf16.mxu1 %v8641_v0 }
 0x36c   : > { %v2070_v23 = vpop.trf.xlu1 }
 0x36d   : > { %v2111_v25 = vpack.c.bf16 %v2070_v23, %v2069_v3 }
 0x36f   : > { %5971 = vmatmul.mubr.msk.bf16.gmra.mxu1 %vm2127_vm9, %v2111_v25 }
 0x370   : > { %v2071_v28 = vpop.trf.xlu1  ;;  %2285 = vmatprep.mubr.bf16.mxu1 %v8641_v0 }
 0x374   : > { %v2072_v59 = vpop.trf.xlu1 }
 0x375   : > { %v2112_v60 = vpack.c.bf16 %v2072_v59, %v2071_v28 }
 0x377   : > { %5972 = vmatmul.mubr.msk.bf16.gmra.mxu1 %vm2127_vm9, %v2112_v60 }
 0x378   : > { %2295 = vmatprep.mubr.bf16.mxu1 %v8641_v0 }
 0x392   : > { %v2089_v26 = vpop.trf.xlu0 }
 0x396   : > { %v2090_v30 = vpop.trf.xlu0 }
 0x397   : > { %v2113_v20 = vpack.c.bf16 %v2090_v30, %v2089_v26 }
 0x399   : > { %5973 = vmatmul.mubr.msk.bf16.gmra.mxu1 %vm2127_vm9, %v2113_v20 }
 0x39a   : > { %v2091_v32 = vpop.trf.xlu0  ;;  %2305 = vmatprep.mubr.bf16.mxu1 %v8641_v0 }
 0x39e   : > { %v2092_v34 = vpop.trf.xlu0 }
 0x39f   : > { %v2114_v55 = vpack.c.bf16 %v2092_v34, %v2091_v32 }
 0x3a1   : > { %5974 = vmatmul.mubr.msk.bf16.gmra.mxu1 %vm2127_vm9, %v2114_v55 }
 0x3a2   : > { %v2093_v48 = vpop.trf.xlu0  ;;  %2315 = vmatprep.mubr.bf16.mxu1 %v8641_v0 }
 0x3a6   : > { %v2094_v18 = vpop.trf.xlu0 }
 0x3a7   : > { %v2115_v40 = vpack.c.bf16 %v2094_v18, %v2093_v48 }
 0x3a9   : > { %5975 = vmatmul.mubr.msk.bf16.gmra.mxu1 %vm2127_vm9, %v2115_v40 }
 0x3aa   : > { %v2095_v11 = vpop.trf.xlu0  ;;  %2325 = vmatprep.mubr.bf16.mxu1 %v8641_v0 }
 0x3ae   : > { %v2096_v49 = vpop.trf.xlu0 }
 0x3af   : > { %v2116_v41 = vpack.c.bf16 %v2096_v49, %v2095_v11 }
 0x3b1   : > { %5976 = vmatmul.mubr.msk.bf16.gmra.mxu1 %vm2127_vm9, %v2116_v41 }
 0x3b2   : > { %v2097_v42 = vpop.trf.xlu0  ;;  %2335 = vmatprep.mubr.bf16.mxu1 %v8641_v0 }
 0x3b6   : > { %v2098_v51 = vpop.trf.xlu0 }
 0x3b7   : > { %v2117_v53 = vpack.c.bf16 %v2098_v51, %v2097_v42 }
 0x3b9   : > { %5977 = vmatmul.mubr.msk.bf16.gmra.mxu1 %vm2127_vm9, %v2117_v53 }
 0x3ba   : > { %v2099_v54 = vpop.trf.xlu0  ;;  %2345 = vmatprep.mubr.bf16.mxu1 %v8641_v0 }
 0x3be   : > { %v2100_v38 = vpop.trf.xlu0 }
 0x3bf   : > { %v2118_v44 = vpack.c.bf16 %v2100_v38, %v2099_v54 }
 0x3c1   : > { %5978 = vmatmul.mubr.msk.bf16.gmra.mxu1 %vm2127_vm9, %v2118_v44 }
 0x3c2   : > { %v2101_v36 = vpop.trf.xlu0  ;;  %2355 = vmatprep.mubr.bf16.mxu1 %v8641_v0 }
 0x3c6   : > { %v2102_v37 = vpop.trf.xlu0 }
 0x3c7   : > { %v2119_v56 = vpack.c.bf16 %v2102_v37, %v2101_v36 }
 0x3c9   : > { %5979 = vmatmul.mubr.msk.bf16.gmra.mxu1 %vm2127_vm9, %v2119_v56 }
 0x3ca   : > { %v2103_v58 = vpop.trf.xlu0  ;;  %2365 = vmatprep.mubr.bf16.mxu1 %v8641_v0 }
 0x3ce   : > { %v2104_v57 = vpop.trf.xlu0 }
 0x3cf   : > { %v2120_v2 = vpack.c.bf16 %v2104_v57, %v2103_v58 }
 0x3d1   : > { %5980 = vmatmul.mubr.msk.bf16.gmra.mxu1 %vm2127_vm9, %v2120_v2 }
 0x3d2   : > { %2922 = vmatprep.mubr.bf16.mxu1 %v2857_v61 }
 0x3ff   : > { %v7301_v1 = vpop.f32.mrf.mxu1 }
 0x401   : > { %v7303_v27 = vpop.f32.mrf.mxu1 }
 0x402   : > { %v2376_v44 = vmax.f32 %v7301_v1, %v7303_v27 }
 0x403   : > { %v7305_v52 = vpop.f32.mrf.mxu1 }
 0x405   : > { %v7307_v63 = vpop.f32.mrf.mxu1 }
 0x406   : > { %8708 = vst [vmem:[#allocation15_spill] sm:$0xff] %v7307_v63  ;;  %v2379_v56 = vmax.f32 %v7305_v52, %v7307_v63 }
 0x407   : > { %v7309_v24 = vpop.f32.mrf.mxu1 }
 0x409   : > { %v7311_v47 = vpop.f32.mrf.mxu1 }
 0x40a   : > { %v2382_v54 = vmax.f32 %v7309_v24, %v7311_v47 }
 0x40b   : > { %v7313_v62 = vpop.f32.mrf.mxu1 }
 0x40d   : > { %v7315_v4 = vpop.f32.mrf.mxu1 }
 0x40e   : > { %v2385_v36 = vmax.f32 %v7313_v62, %v7315_v4 }
 0x40f   : > { %v7317_v5 = vpop.f32.mrf.mxu1 }
 0x411   : > { %v7319_v8 = vpop.f32.mrf.mxu1 }
 0x412   : > { %v2388_v51 = vmax.f32 %v7317_v5, %v7319_v8 }
 0x413   : > { %v7321_v9 = vpop.f32.mrf.mxu1 }
 0x415   : > { %v7323_v43 = vpop.f32.mrf.mxu1 }
 0x416   : > { %v2391_v38 = vmax.f32 %v7321_v9, %v7323_v43 }
 0x417   : > { %v7325_v12 = vpop.f32.mrf.mxu1 }
 0x419   : > { %v7327_v13 = vpop.f32.mrf.mxu1 }
 0x41a   : > { %v2394_v41 = vmax.f32 %v7325_v12, %v7327_v13 }
 0x41b   : > { %v7329_v14 = vpop.f32.mrf.mxu1 }
 0x41d   : > { %v7331_v15 = vpop.f32.mrf.mxu1 }
 0x41e   : > { %v2397_v53 = vmax.f32 %v7329_v14, %v7331_v15 }
 0x41f   : > { %v7333_v16 = vpop.f32.mrf.mxu1 }
 0x421   : > { %v7335_v17 = vpop.f32.mrf.mxu1 }
 0x422   : > { %v2400_v11 = vmax.f32 %v7333_v16, %v7335_v17 }
 0x423   : > { %v7337_v19 = vpop.f32.mrf.mxu1 }
 0x425   : > { %v7339_v6 = vpop.f32.mrf.mxu1 }
 0x426   : > { %v2403_v42 = vmax.f32 %v7337_v19, %v7339_v6 }
 0x427   : > { %v7341_v7 = vpop.f32.mrf.mxu1 }
 0x429   : > { %v7343_v45 = vpop.f32.mrf.mxu1 }
 0x42a   : > { %v2406_v18 = vmax.f32 %v7341_v7, %v7343_v45 }
 0x42b   : > { %v7345_v3 = vpop.f32.mrf.mxu1 }
 0x42d   : > { %v7347_v23 = vpop.f32.mrf.mxu1 }
 0x42e   : > { %v2409_v49 = vmax.f32 %v7345_v3, %v7347_v23 }
 0x42f   : > { %v7349_v25 = vpop.f32.mrf.mxu1 }
 0x431   : > { %v7351_v28 = vpop.f32.mrf.mxu1 }
 0x432   : > { %v2412_v55 = vmax.f32 %v7349_v25, %v7351_v28 }
 0x433   : > { %v7353_v59 = vpop.f32.mrf.mxu1 }
 0x435   : > { %v7355_v60 = vpop.f32.mrf.mxu1 }
 0x436   : > { %v2415_v40 = vmax.f32 %v7353_v59, %v7355_v60 }
 0x437   : > { %v7357_v26 = vpop.f32.mrf.mxu1 }
 0x439   : > { %v7359_v30 = vpop.f32.mrf.mxu1 }
 0x43a   : > { %v2418_v20 = vmax.f32 %v7357_v26, %v7359_v30 }
 0x43b   : > { %v7363_v32 = vpop.f32.mrf.mxu1 }
 0x43c   : > { %2419 = vmax.xlane.f32.xlu0 %v2418_v20 }
 0x43d   : > { %v7365_v34 = vpop.f32.mrf.mxu1 }
 0x43e   : > { %v2421_v48 = vmax.f32 %v7363_v32, %v7365_v34 }
 0x440   : > { %2413 = vmax.xlane.f32.xlu0 %v2412_v55  ;;  %2422 = vmax.xlane.f32.xlu1 %v2421_v48 }
 0x444   : > { %2407 = vmax.xlane.f32.xlu0 %v2406_v18  ;;  %2416 = vmax.xlane.f32.xlu1 %v2415_v40 }
 0x448   : > { %2401 = vmax.xlane.f32.xlu0 %v2400_v11  ;;  %2410 = vmax.xlane.f32.xlu1 %v2409_v49 }
 0x44c   : > { %2395 = vmax.xlane.f32.xlu0 %v2394_v41  ;;  %2404 = vmax.xlane.f32.xlu1 %v2403_v42 }
 0x450   : > { %2389 = vmax.xlane.f32.xlu0 %v2388_v51  ;;  %2398 = vmax.xlane.f32.xlu1 %v2397_v53 }
 0x454   : > { %2383 = vmax.xlane.f32.xlu0 %v2382_v54  ;;  %2392 = vmax.xlane.f32.xlu1 %v2391_v38 }
 0x458   : > { %2377 = vmax.xlane.f32.xlu0 %v2376_v44  ;;  %2386 = vmax.xlane.f32.xlu1 %v2385_v36 }
 0x459   : > { %v7395_v37 = vpop.f32.mrf.mxu1 }
 0x45a   : > { %8709 = vst [vmem:[#allocation16_spill] sm:$0xff] %v7395_v37 }
 0x45b   : > { %v7399_v58 = vpop.f32.mrf.mxu1 }
 0x45c   : > { %8710 = vst [vmem:[#allocation17_spill] sm:$0xff] %v7399_v58  ;;  %2380 = vmax.xlane.f32.xlu1 %v2379_v56 }
 0x45d   : > { %v7401_v33 = vpop.f32.mrf.mxu1 }
 0x45e   : > { %8711 = vst [vmem:[#allocation18_spill] sm:$0xff] %v7401_v33 }
 0x45f   : > { %v7403_v57 = vpop.f32.mrf.mxu1 }
 0x460   : > { %8712 = vst [vmem:[#allocation19_spill] sm:$0xff] %v7403_v57 }
 0x461   : > { %v7405_v2 = vpop.f32.mrf.mxu1 }
 0x463   : > { %v7407_v61 = vpop.f32.mrf.mxu1 }
 0x465   : > { %v7409_v20 = vpop.f32.mrf.mxu1 }
 0x467   : > { %v7411_v55 = vpop.f32.mrf.mxu1 }
 0x469   : > { %v7413_v48 = vpop.f32.mrf.mxu1 }
 0x46b   : > { %v7415_v18 = vpop.f32.mrf.mxu1 }
 0x46d   : > { %v7417_v40 = vpop.f32.mrf.mxu1 }
 0x46f   : > { %v7419_v11 = vpop.f32.mrf.mxu1 }
 0x471   : > { %v7421_v49 = vpop.f32.mrf.mxu1 }
 0x473   : > { %v7423_v41 = vpop.f32.mrf.mxu1 }
 0x475   : > { %v7425_v42 = vpop.f32.mrf.mxu1 }
 0x477   : > { %v7427_v51 = vpop.f32.mrf.mxu1 }
 0x479   : > { %v7429_v53 = vpop.f32.mrf.mxu1 }
 0x47b   : > { %v7431_v54 = vpop.f32.mrf.mxu1 }
 0x47c   : > { %8713 = vst [vmem:[#allocation20_spill] sm:$0xff] %v7431_v54 }
 0x47d   : > { %v7433_v38 = vpop.f32.mrf.mxu1 }
 0x47e   : > { %8714 = vst [vmem:[#allocation21_spill] sm:$0xff] %v7433_v38 }
 0x47f   : > { %v7435_v44 = vpop.f32.mrf.mxu1 }
 0x480   : > { %8715 = vst [vmem:[#allocation22_spill] sm:$0xff] %v7435_v44 }
 0x481   : > { %v7437_v36 = vpop.f32.mrf.mxu1 }
 0x482   : > { %8716 = vst [vmem:[#allocation23_spill] sm:$0xff] %v7437_v36 }
 0x483   : > { %v7439_v56 = vpop.f32.mrf.mxu1 }
 0x484   : > { %8717 = vst [vmem:[#allocation24_spill] sm:$0xff] %v7439_v56  ;;  %v2454_v58 = vmax.f32 %v7437_v36, %v7439_v56 }
 0x485   : > { %v7441_v0 = vpop.f32.mrf.mxu1 }
 0x487   : > { %v7443_v31 = vpop.f32.mrf.mxu1 }
 0x488   : > { %8718 = vst [vmem:[#allocation25_spill] sm:$0xff] %v7443_v31 }
 0x489   : > { %v7445_v22 = vpop.f32.mrf.mxu1 }
 0x48b   : > { %v7447_v10 = vpop.f32.mrf.mxu1 }
 0x48c   : > { %8719 = vst [vmem:[#allocation26_spill] sm:$0xff] %v7447_v10  ;;  %v2460_v33 = vmax.f32 %v7445_v22, %v7447_v10  ;;  %v2457_v10 = vmax.f32 %v7441_v0, %v7443_v31 }
 0x48d   : > { %v7449_v29 = vpop.f32.mrf.mxu1 }
 0x48e   : > { %8720 = vst [vmem:[#allocation27_spill] sm:$0xff] %v7449_v29 }
 0x48f   : > { %v7451_v39 = vpop.f32.mrf.mxu1 }
 0x490   : > { %8721 = vst [vmem:[#allocation28_spill] sm:$0xff] %v7451_v39  ;;  %v2463_v63 = vmax.f32 %v7449_v29, %v7451_v39 }
 0x491   : > { %v7453_v50 = vpop.f32.mrf.mxu1 }
 0x493   : > { %v7455_v35 = vpop.f32.mrf.mxu1 }
 0x494   : > { %8722 = vst [vmem:[#allocation29_spill] sm:$0xff] %v7455_v35  ;;  %v2466_v21 = vmax.f32 %v7453_v50, %v7455_v35  ;;  %v2448_v35 = vmax.f32 %v7429_v53, %v7431_v54 }
 0x495   : > { %v7459_v46 = vpop.f32.mrf.mxu1 }
 0x496   : > { %2467 = vmax.xlane.f32.xlu0 %v2466_v21  ;;  %v2451_v21 = vmax.f32 %v7433_v38, %v7435_v44 }
 0x497   : > { %v7463_v57 = vpop.f32.mrf.mxu1 }
 0x498   : > { %v2469_v37 = vmax.f32 %v7459_v46, %v7463_v57 }
 0x49a   : > { %2461 = vmax.xlane.f32.xlu0 %v2460_v33  ;;  %2470 = vmax.xlane.f32.xlu1 %v2469_v37 }
 0x49e   : > { %2455 = vmax.xlane.f32.xlu0 %v2454_v58  ;;  %2464 = vmax.xlane.f32.xlu1 %v2463_v63 }
 0x4a2   : > { %2449 = vmax.xlane.f32.xlu0 %v2448_v35  ;;  %2458 = vmax.xlane.f32.xlu1 %v2457_v10 }
 0x4a6   : > { %2452 = vmax.xlane.f32.xlu1 %v2451_v21 }
 0x4c5   : > { %v2420_v56 = vpop.xlane.xlu0 %2419 }
 0x4c6   : > { %v2500_v36 = vsub.f32 %v7357_v26, %v2420_v56  ;;  %v2501_v33 = vsub.f32 %v7359_v30, %v2420_v56 }
 0x4c8   : > { %v2592_v37 = vmul.f32 1.442695, %v2500_v36  ;;  %v2594_v39 = vmul.f32 1.442695, %v2501_v33 }
 0x4c9   : > { %v2414_v29 = vpop.xlane.xlu0 %2413  ;;  %v2423_v54 = vpop.xlane.xlu1 %2422 }
 0x4ca   : > { %6347 = vpow2.f32 %v2592_v37  ;;  %v2496_v31 = vsub.f32 %v7349_v25, %v2414_v29  ;;  %v2497_v63 = vsub.f32 %v7351_v28, %v2414_v29  ;;  %v2502_v35 = vsub.f32 %v7363_v32, %v2423_v54 }
 0x4cb   : > { %6349 = vpow2.f32 %v2594_v39  ;;  %v2503_v10 = vsub.f32 %v7365_v34, %v2423_v54 }
 0x4cc   : > { %v2584_v58 = vmul.f32 1.442695, %v2496_v31  ;;  %v2586_v21 = vmul.f32 1.442695, %v2497_v63  ;;  %v2596_v44 = vmul.f32 1.442695, %v2502_v35 }
 0x4cd   : > { %v2598_v26 = vmul.f32 1.442695, %v2503_v10  ;;  %v2408_v38 = vpop.xlane.xlu0 %2407  ;;  %v2417_v30 = vpop.xlane.xlu1 %2416 }
 0x4ce   : > { %6351 = vpow2.f32 %v2584_v58  ;;  %v2498_v36 = vsub.f32 %v7353_v59, %v2417_v30  ;;  %v2499_v56 = vsub.f32 %v7355_v60, %v2417_v30  ;;  %v2492_v29 = vsub.f32 %v7341_v7, %v2408_v38 }
 0x4cf   : > { %6353 = vpow2.f32 %v2586_v21  ;;  %v2493_v39 = vsub.f32 %v7343_v45, %v2408_v38 }
 0x4d0   : > { %6355 = vpow2.f32 %v2596_v44  ;;  %v2588_v31 = vmul.f32 1.442695, %v2498_v36  ;;  %v2590_v32 = vmul.f32 1.442695, %v2499_v56  ;;  %v2576_v34 = vmul.f32 1.442695, %v2492_v29 }
 0x4d1   : > { %6357 = vpow2.f32 %v2598_v26  ;;  %v2402_v25 = vpop.xlane.xlu0 %2401  ;;  %v2411_v28 = vpop.xlane.xlu1 %2410  ;;  %v2578_v54 = vmul.f32 1.442695, %v2493_v39  ;;  %v2442_v26 = vmax.f32 %v7421_v49, %v7423_v41 }
 0x4d2   : > { %6359 = vpow2.f32 %v2588_v31  ;;  %v2494_v33 = vsub.f32 %v7345_v3, %v2411_v28  ;;  %v2495_v59 = vsub.f32 %v7347_v23, %v2411_v28  ;;  %v2488_v45 = vsub.f32 %v7333_v16, %v2402_v25 }
 0x4d3   : > { %6361 = vpow2.f32 %v2590_v32  ;;  %v2489_v38 = vsub.f32 %v7335_v17, %v2402_v25 }
 0x4d4   : > { %6363 = vpow2.f32 %v2576_v34  ;;  %v2580_v35 = vmul.f32 1.442695, %v2494_v33  ;;  %v2582_v10 = vmul.f32 1.442695, %v2495_v59  ;;  %v2568_v23 = vmul.f32 1.442695, %v2488_v45 }
 0x4d5   : > { %v2396_v60 = vpop.xlane.xlu0 %2395  ;;  %v2405_v44 = vpop.xlane.xlu1 %2404  ;;  %6365 = vpow2.f32 %v2578_v54  ;;  %v2570_v16 = vmul.f32 1.442695, %v2489_v38 }
 0x4d6   : > { %6367 = vpow2.f32 %v2580_v35  ;;  %v2490_v56 = vsub.f32 %v7337_v19, %v2405_v44  ;;  %v2491_v29 = vsub.f32 %v7339_v6, %v2405_v44  ;;  %v2484_v25 = vsub.f32 %v7325_v12, %v2396_v60 }
 0x4d7   : > { %v7488_v37 = vpop.eup %6347  ;;  %6369 = vpow2.f32 %v2582_v10  ;;  %v2485_v28 = vsub.f32 %v7327_v13, %v2396_v60  ;;  %v2445_v19 = vmax.f32 %v7425_v42, %v7427_v51  ;;  %v2436_v60 = vmax.f32 %v7413_v48, %v7415_v18 }
 0x4d8   : > { %v7491_v7 = vpop.eup %6349  ;;  %6371 = vpow2.f32 %v2568_v23  ;;  %v2572_v32 = vmul.f32 1.442695, %v2490_v56  ;;  %v2574_v6 = vmul.f32 1.442695, %v2491_v29  ;;  %v2560_v12 = vmul.f32 1.442695, %v2484_v25 }
 0x4d9   : > { %v2706_v63 = vadd.f32 %v7491_v7, %v7488_v37  ;;  %v2390_v30 = vpop.xlane.xlu0 %2389  ;;  %v2399_v36 = vpop.xlane.xlu1 %2398  ;;  %6373 = vpow2.f32 %v2570_v16  ;;  %v2562_v45 = vmul.f32 1.442695, %v2485_v28 }
 0x4da   : > { %v2480_v44 = vsub.f32 %v7317_v5, %v2390_v30  ;;  %v2481_v38 = vsub.f32 %v7319_v8, %v2390_v30  ;;  %6375 = vpow2.f32 %v2572_v32  ;;  %v2486_v35 = vsub.f32 %v7329_v14, %v2399_v36 }
 0x4db   : > { %v7497_v3 = vpop.eup %6351  ;;  %2707 = vadd.xlane.f32.xlu0 %v2706_v63  ;;  %6377 = vpow2.f32 %v2574_v6  ;;  %v2487_v10 = vsub.f32 %v7331_v15, %v2399_v36 }
 0x4dc   : > { %v7499_v58 = vpop.eup %6353  ;;  %6379 = vpow2.f32 %v2560_v12  ;;  %v2552_v23 = vmul.f32 1.442695, %v2480_v44  ;;  %v2554_v16 = vmul.f32 1.442695, %v2481_v38  ;;  %v2564_v29 = vmul.f32 1.442695, %v2486_v35 }
 0x4dd   : > { %v7501_v21 = vpop.eup %6355  ;;  %v2700_v31 = vadd.f32 %v7499_v58, %v7497_v3  ;;  %v2384_v54 = vpop.xlane.xlu0 %2383  ;;  %6381 = vpow2.f32 %v2562_v45  ;;  %v2566_v25 = vmul.f32 1.442695, %v2487_v10 }
 0x4de   : > { %v7505_v17 = vpop.eup %6357  ;;  %v2393_v33 = vpop.xlane.xlu1 %2392  ;;  %v2477_v8 = vsub.f32 %v7311_v47, %v2384_v54  ;;  %6383 = vpow2.f32 %v2552_v23  ;;  %v8723_v23 = vld [vmem:[#allocation15_spill] sm:$0xff] }
 0x4df   : > { %2443 = vmax.xlane.f32.xlu0 %v2442_v26  ;;  %v2709_v39 = vadd.f32 %v7505_v17, %v7501_v21  ;;  %v7515_v34 = vpop.eup %6359  ;;  %v2476_v26 = vsub.f32 %v7309_v24, %v2384_v54  ;;  %v2482_v15 = vsub.f32 %v7321_v9, %v2393_v33  ;;  %v2483_v24 = vsub.f32 %v7323_v43, %v2393_v33 }
 0x4e0   : > { %v7519_v59 = vpop.eup %6361  ;;  %v2430_v9 = vmax.f32 %v7405_v2, %v7407_v61  ;;  %6385 = vpow2.f32 %v2554_v16 }
 0x4e1   : > { %2710 = vadd.xlane.f32.xlu1 %v2709_v39  ;;  %v7522_v13 = vpop.eup %6363  ;;  %v2703_v5 = vadd.f32 %v7519_v59, %v7515_v34  ;;  %v2378_v30 = vpop.xlane.xlu0 %2377  ;;  %v2439_v39 = vmax.f32 %v7417_v40, %v7419_v11  ;;  %v2544_v47 = vmul.f32 1.442695, %v2476_v26  ;;  %6387 = vpow2.f32 %v2564_v29 }
 0x4e2   : > { %v7527_v63 = vpop.eup %6365  ;;  %v2387_v56 = vpop.xlane.xlu1 %2386  ;;  %v2473_v6 = vsub.f32 %v7303_v27, %v2378_v30  ;;  %v2556_v43 = vmul.f32 1.442695, %v2482_v15  ;;  %6389 = vpow2.f32 %v2566_v25  ;;  %v2558_v12 = vmul.f32 1.442695, %v2483_v24 }
 0x4e3   : > { %2701 = vadd.xlane.f32.xlu0 %v2700_v31  ;;  %v2694_v14 = vadd.f32 %v7527_v63, %v7522_v13  ;;  %v7538_v36 = vpop.eup %6367  ;;  %v2472_v31 = vsub.f32 %v7301_v1, %v2378_v30  ;;  %v2478_v33 = vsub.f32 %v7313_v62, %v2387_v56  ;;  %v2479_v1 = vsub.f32 %v7315_v4, %v2387_v56  ;;  %v8724_v30 = vld [vmem:[#allocation17_spill] sm:$0xff]  ;;  %v8725_v56 = vld [vmem:[#allocation16_spill] sm:$0xff] }
 0x4e4   : > { %v7543_v28 = vpop.eup %6369  ;;  %6391 = vpow2.f32 %v2544_v47  ;;  %v2538_v27 = vmul.f32 1.442695, %v2473_v6  ;;  %v2433_v4 = vmax.f32 %v7409_v20, %v7411_v55 }
 0x4e5   : > { %2446 = vmax.xlane.f32.xlu1 %v2445_v19  ;;  %v7546_v32 = vpop.eup %6371  ;;  %v2546_v19 = vmul.f32 1.442695, %v2477_v8  ;;  %v2536_v45 = vmul.f32 1.442695, %v2472_v31  ;;  %v2548_v35 = vmul.f32 1.442695, %v2478_v33 }
 0x4e6   : > { %v7551_v54 = vpop.eup %6373  ;;  %v2381_v44 = vpop.xlane.xlu1 %2380 }
 0x4e7   : > { %2437 = vmax.xlane.f32.xlu0 %v2436_v60  ;;  %v2697_v60 = vadd.f32 %v7543_v28, %v7538_v36  ;;  %6393 = vpow2.f32 %v2546_v19  ;;  %v2688_v38 = vadd.f32 %v7551_v54, %v7546_v32  ;;  %v2474_v62 = vsub.f32 %v7305_v52, %v2381_v44  ;;  %v7560_v10 = vpop.eup %6375  ;;  %v8728_v19 = vld [vmem:[#allocation18_spill] sm:$0xff] }
 0x4e8   : > { %6395 = vpow2.f32 %v2556_v43  ;;  %v2475_v26 = vsub.f32 %v8723_v23, %v2381_v44  ;;  %v7565_v16 = vpop.eup %6377 }
 0x4e9   : > { %2704 = vadd.xlane.f32.xlu1 %v2703_v5  ;;  %6397 = vpow2.f32 %v2558_v12  ;;  %v2550_v5 = vmul.f32 1.442695, %v2479_v1  ;;  %v7567_v8 = vpop.eup %6379  ;;  %v2540_v29 = vmul.f32 1.442695, %v2474_v62 }
 0x4ea   : > { %6399 = vpow2.f32 %v2536_v45  ;;  %v7571_v52 = vpop.eup %6381  ;;  %v2542_v15 = vmul.f32 1.442695, %v2475_v26 }
 0x4eb   : > { %2695 = vadd.xlane.f32.xlu0 %v2694_v14  ;;  %v2424_v14 = vmax.f32 %v8725_v56, %v8724_v30  ;;  %6401 = vpow2.f32 %v2538_v27  ;;  %v7575_v25 = vpop.eup %6383  ;;  %v2682_v24 = vadd.f32 %v7571_v52, %v7567_v8 }
 0x4ec   : > { %6403 = vpow2.f32 %v2548_v35  ;;  %8726 = vst [vmem:[#allocation15_spill] sm:$0xff] %v7575_v25 }
 0x4ed   : > { %2440 = vmax.xlane.f32.xlu1 %v2439_v39  ;;  %6405 = vpow2.f32 %v2550_v5  ;;  %v2691_v39 = vadd.f32 %v7565_v16, %v7560_v10  ;;  %v7579_v47 = vpop.eup %6385 }
 0x4ee   : > { %6407 = vpow2.f32 %v2540_v29  ;;  %v7581_v31 = vpop.eup %6387  ;;  %v2676_v12 = vadd.f32 %v7579_v47, %v7575_v25  ;;  %v8740_v25 = vld [vmem:[#allocation27_spill] sm:$0xff] }
 0x4ef   : > { %2431 = vmax.xlane.f32.xlu0 %v2430_v9  ;;  %v8727_v9 = vld [vmem:[#allocation19_spill] sm:$0xff]  ;;  %6409 = vpow2.f32 %v2542_v15  ;;  %v7585_v43 = vpop.eup %6389 }
 0x4f0   : > { %v2427_v6 = vmax.f32 %v8728_v19, %v8727_v9 }
 0x4f1   : > { %2698 = vadd.xlane.f32.xlu1 %v2697_v60  ;;  %v7587_v33 = vpop.eup %6391  ;;  %v2685_v60 = vadd.f32 %v7585_v43, %v7581_v31 }
 0x4f2   : > { %8729 = vst [vmem:[#allocation17_spill] sm:$0xff] %v7587_v33 }
 0x4f3   : > { %2689 = vadd.xlane.f32.xlu0 %v2688_v38 }
 0x4f4   : > { %v7591_v1 = vpop.eup %6393 }
 0x4f5   : > { %2434 = vmax.xlane.f32.xlu1 %v2433_v4  ;;  %8730 = vst [vmem:[#allocation16_spill] sm:$0xff] %v7591_v1  ;;  %v7593_v44 = vpop.eup %6395  ;;  %v2670_v38 = vadd.f32 %v7591_v1, %v7587_v33 }
 0x4f6   : > { %v7597_v45 = vpop.eup %6397 }
 0x4f7   : > { %2425 = vmax.xlane.f32.xlu0 %v2424_v14  ;;  %v7599_v27 = vpop.eup %6399  ;;  %v2679_v4 = vadd.f32 %v7597_v45, %v7593_v44 }
 0x4f8   : > { %8731 = vst [vmem:[#allocation19_spill] sm:$0xff] %v7599_v27  ;;  %v7603_v35 = vpop.eup %6401 }
 0x4f9   : > { %2692 = vadd.xlane.f32.xlu1 %v2691_v39  ;;  %8732 = vst [vmem:[#allocation18_spill] sm:$0xff] %v7603_v35  ;;  %v7605_v62 = vpop.eup %6403  ;;  %v2664_v23 = vadd.f32 %v7603_v35, %v7599_v27  ;;  %v8737_v35 = vld [vmem:[#allocation26_spill] sm:$0xff] }
 0x4fa   : > { %8733 = vst [vmem:[#allocation30_spill] sm:$0xff] %v7605_v62  ;;  %v7609_v5 = vpop.eup %6405 }
 0x4fb   : > { %2683 = vadd.xlane.f32.xlu0 %v2682_v24  ;;  %v7613_v26 = vpop.eup %6407  ;;  %v2673_v14 = vadd.f32 %v7609_v5, %v7605_v62 }
 0x4fc   : > { %8734 = vst [vmem:[#allocation31_spill] sm:$0xff] %v7613_v26  ;;  %v7617_v29 = vpop.eup %6409 }
 0x4fd   : > { %2428 = vmax.xlane.f32.xlu1 %v2427_v6  ;;  %8735 = vst [vmem:[#allocation32_spill] sm:$0xff] %v7617_v29  ;;  %v2667_v15 = vadd.f32 %v7617_v29, %v7613_v26  ;;  %v8736_v6 = vld [vmem:[#allocation29_spill] sm:$0xff] }
 0x4ff   : > { %2677 = vadd.xlane.f32.xlu0 %v2676_v12 }
 0x501   : > { %2686 = vadd.xlane.f32.xlu1 %v2685_v60 }
 0x503   : > { %2671 = vadd.xlane.f32.xlu0 %v2670_v38 }
 0x505   : > { %2680 = vadd.xlane.f32.xlu1 %v2679_v4 }
 0x507   : > { %2665 = vadd.xlane.f32.xlu0 %v2664_v23 }
 0x509   : > { %2674 = vadd.xlane.f32.xlu1 %v2673_v14 }
 0x50d   : > { %2668 = vadd.xlane.f32.xlu1 %v2667_v15 }
 0x51f   : > { %v2468_v39 = vpop.xlane.xlu0 %2467 }
 0x520   : > { %v2532_v24 = vsub.f32 %v7453_v50, %v2468_v39  ;;  %v2533_v12 = vsub.f32 %v8736_v6, %v2468_v39 }
 0x522   : > { %v2656_v60 = vmul.f32 1.442695, %v2532_v24  ;;  %v2658_v38 = vmul.f32 1.442695, %v2533_v12  ;;  %v8738_v24 = vld [vmem:[#allocation23_spill] sm:$0xff]  ;;  %v8739_v12 = vld [vmem:[#allocation24_spill] sm:$0xff] }
 0x523   : > { %v2462_v4 = vpop.xlane.xlu0 %2461  ;;  %v2471_v27 = vpop.xlane.xlu1 %2470 }
 0x524   : > { %6411 = vpow2.f32 %v2656_v60  ;;  %v2528_v23 = vsub.f32 %v7445_v22, %v2462_v4  ;;  %v2529_v33 = vsub.f32 %v8737_v35, %v2462_v4  ;;  %v2534_v14 = vsub.f32 %v7459_v46, %v2471_v27  ;;  %v8741_v35 = vld [vmem:[#allocation28_spill] sm:$0xff] }
 0x525   : > { %6413 = vpow2.f32 %v2658_v38  ;;  %v2535_v26 = vsub.f32 %v7463_v57, %v2471_v27 }
 0x526   : > { %v2648_v15 = vmul.f32 1.442695, %v2528_v23  ;;  %v2650_v29 = vmul.f32 1.442695, %v2529_v33  ;;  %v2660_v62 = vmul.f32 1.442695, %v2534_v14 }
 0x527   : > { %v2662_v50 = vmul.f32 1.442695, %v2535_v26  ;;  %v2456_v1 = vpop.xlane.xlu0 %2455  ;;  %v2465_v39 = vpop.xlane.xlu1 %2464  ;;  %v8742_v14 = vld [vmem:[#allocation20_spill] sm:$0xff] }
 0x528   : > { %6415 = vpow2.f32 %v2648_v15  ;;  %v2524_v6 = vsub.f32 %v8738_v24, %v2456_v1  ;;  %v2525_v60 = vsub.f32 %v8739_v12, %v2456_v1  ;;  %v2530_v22 = vsub.f32 %v8740_v25, %v2465_v39  ;;  %v8743_v25 = vld [vmem:[#allocation25_spill] sm:$0xff] }
 0x529   : > { %6417 = vpow2.f32 %v2650_v29  ;;  %v2531_v4 = vsub.f32 %v8741_v35, %v2465_v39  ;;  %v8744_v12 = vld [vmem:[#allocation21_spill] sm:$0xff] }
 0x52a   : > { %6419 = vpow2.f32 %v2660_v62  ;;  %v2640_v46 = vmul.f32 1.442695, %v2524_v6  ;;  %v2642_v38 = vmul.f32 1.442695, %v2525_v60  ;;  %v2652_v57 = vmul.f32 1.442695, %v2530_v22 }
 0x52b   : > { %6421 = vpow2.f32 %v2662_v50  ;;  %v2654_v33 = vmul.f32 1.442695, %v2531_v4  ;;  %v2450_v27 = vpop.xlane.xlu0 %2449  ;;  %v2459_v26 = vpop.xlane.xlu1 %2458  ;;  %v8745_v22 = vld [vmem:[#allocation22_spill] sm:$0xff] }
 0x52c   : > { %6423 = vpow2.f32 %v2640_v46  ;;  %v2520_v23 = vsub.f32 %v7429_v53, %v2450_v27  ;;  %v2521_v15 = vsub.f32 %v8742_v14, %v2450_v27  ;;  %v2526_v1 = vsub.f32 %v7441_v0, %v2459_v26 }
 0x52d   : > { %6425 = vpow2.f32 %v2642_v38  ;;  %v2527_v29 = vsub.f32 %v8743_v25, %v2459_v26 }
 0x52e   : > { %6427 = vpow2.f32 %v2652_v57  ;;  %v2632_v39 = vmul.f32 1.442695, %v2520_v23  ;;  %v2634_v62 = vmul.f32 1.442695, %v2521_v15  ;;  %v2644_v24 = vmul.f32 1.442695, %v2526_v1 }
 0x52f   : > { %6429 = vpow2.f32 %v2654_v33  ;;  %v2646_v6 = vmul.f32 1.442695, %v2527_v29  ;;  %v2453_v50 = vpop.xlane.xlu1 %2452 }
 0x530   : > { %6431 = vpow2.f32 %v2632_v39  ;;  %v2522_v60 = vsub.f32 %v8744_v12, %v2453_v50  ;;  %v2523_v35 = vsub.f32 %v8745_v22, %v2453_v50 }
 0x531   : > { %v7637_v53 = vpop.eup %6411  ;;  %6433 = vpow2.f32 %v2634_v62 }
 0x532   : > { %v7639_v4 = vpop.eup %6413  ;;  %6435 = vpow2.f32 %v2644_v24  ;;  %v2636_v0 = vmul.f32 1.442695, %v2522_v60  ;;  %v2638_v46 = vmul.f32 1.442695, %v2523_v35 }
 0x533   : > { %6437 = vpow2.f32 %v2646_v6  ;;  %v2754_v38 = vadd.f32 %v7639_v4, %v7637_v53 }
 0x534   : > { %6439 = vpow2.f32 %v2636_v0 }
 0x535   : > { %v7643_v57 = vpop.eup %6415  ;;  %6441 = vpow2.f32 %v2638_v46  ;;  %2755 = vadd.xlane.f32.xlu0 %v2754_v38 }
 0x536   : > { %v7645_v33 = vpop.eup %6417 }
 0x537   : > { %v7647_v27 = vpop.eup %6419  ;;  %v2748_v26 = vadd.f32 %v7645_v33, %v7643_v57 }
 0x538   : > { %v7651_v23 = vpop.eup %6421 }
 0x539   : > { %v7653_v14 = vpop.eup %6423  ;;  %2749 = vadd.xlane.f32.xlu0 %v2748_v26  ;;  %v2757_v15 = vadd.f32 %v7651_v23, %v7647_v27 }
 0x53a   : > { %8746 = vst [vmem:[#allocation29_spill] sm:$0xff] %v7653_v14  ;;  %v7657_v1 = vpop.eup %6425 }
 0x53b   : > { %v7659_v25 = vpop.eup %6427  ;;  %2758 = vadd.xlane.f32.xlu1 %v2757_v15  ;;  %v2742_v29 = vadd.f32 %v7657_v1, %v7653_v14 }
 0x53c   : > { %v7663_v39 = vpop.eup %6429 }
 0x53d   : > { %v7665_v62 = vpop.eup %6431  ;;  %2743 = vadd.xlane.f32.xlu0 %v2742_v29  ;;  %v2751_v24 = vadd.f32 %v7663_v39, %v7659_v25 }
 0x53e   : > { %8747 = vst [vmem:[#allocation26_spill] sm:$0xff] %v7665_v62  ;;  %v7669_v6 = vpop.eup %6433 }
 0x53f   : > { %8748 = vst [vmem:[#allocation23_spill] sm:$0xff] %v7669_v6  ;;  %v7671_v50 = vpop.eup %6435  ;;  %2752 = vadd.xlane.f32.xlu1 %v2751_v24  ;;  %v2736_v12 = vadd.f32 %v7669_v6, %v7665_v62 }
 0x540   : > { %8749 = vst [vmem:[#allocation24_spill] sm:$0xff] %v7671_v50  ;;  %v7675_v60 = vpop.eup %6437 }
 0x541   : > { %v7677_v22 = vpop.eup %6439  ;;  %2737 = vadd.xlane.f32.xlu0 %v2736_v12  ;;  %v2745_v35 = vadd.f32 %v7675_v60, %v7671_v50 }
 0x542   : > { %8750 = vst [vmem:[#allocation27_spill] sm:$0xff] %v7677_v22  ;;  %v7681_v0 = vpop.eup %6441 }
 0x543   : > { %8751 = vst [vmem:[#allocation28_spill] sm:$0xff] %v7681_v0  ;;  %2746 = vadd.xlane.f32.xlu1 %v2745_v35  ;;  %v2739_v46 = vadd.f32 %v7681_v0, %v7677_v22 }
 0x547   : > { %2740 = vadd.xlane.f32.xlu1 %v2739_v46 }
 0x564   : > { %v2708_v38 = vpop.xlane.xlu0 %2707 }
 0x565   : > { %6443 = vrcp.f32 %v2708_v38 }
 0x568   : > { %v2444_v26 = vpop.xlane.xlu0 %2443 }
 0x569   : > { %v2516_v15 = vsub.f32 %v7421_v49, %v2444_v26  ;;  %v2517_v29 = vsub.f32 %v7423_v41, %v2444_v26 }
 0x56a   : > { %v2711_v24 = vpop.xlane.xlu1 %2710 }
 0x56b   : > { %v2624_v62 = vmul.f32 1.442695, %v2516_v15  ;;  %v2626_v12 = vmul.f32 1.442695, %v2517_v29  ;;  %6445 = vrcp.f32 %v2711_v24 }
 0x56c   : > { %v2702_v6 = vpop.xlane.xlu0 %2701 }
 0x56d   : > { %6447 = vpow2.f32 %v2624_v62 }
 0x56e   : > { %6449 = vpow2.f32 %v2626_v12  ;;  %v2447_v14 = vpop.xlane.xlu1 %2446 }
 0x56f   : > { %v2518_v35 = vsub.f32 %v7425_v42, %v2447_v14  ;;  %v2519_v22 = vsub.f32 %v7427_v51, %v2447_v14  ;;  %6451 = vrcp.f32 %v2702_v6 }
 0x570   : > { %v2438_v46 = vpop.xlane.xlu0 %2437 }
 0x571   : > { %v2628_v0 = vmul.f32 1.442695, %v2518_v35  ;;  %v2630_v38 = vmul.f32 1.442695, %v2519_v22  ;;  %v2512_v50 = vsub.f32 %v7413_v48, %v2438_v46  ;;  %v2513_v49 = vsub.f32 %v7415_v18, %v2438_v46 }
 0x572   : > { %v2705_v41 = vpop.xlane.xlu1 %2704  ;;  %v6444_v29 = vpop.eup %6443 }
 0x573   : > { %6453 = vpow2.f32 %v2628_v0  ;;  %v2616_v26 = vmul.f32 1.442695, %v2512_v50  ;;  %v2618_v15 = vmul.f32 1.442695, %v2513_v49  ;;  %v2821_v18 = vmul.f32 %v6444_v29, %v7491_v7 }
 0x574   : > { %6455 = vpow2.f32 %v2630_v38  ;;  %v2696_v62 = vpop.xlane.xlu0 %2695 }
 0x575   : > { %6457 = vpow2.f32 %v2616_v26 }
 0x576   : > { %6459 = vpow2.f32 %v2618_v15  ;;  %v2441_v42 = vpop.xlane.xlu1 %2440 }
 0x577   : > { %6461 = vrcp.f32 %v2705_v41  ;;  %v2514_v51 = vsub.f32 %v7417_v40, %v2441_v42  ;;  %v2515_v14 = vsub.f32 %v7419_v11, %v2441_v42  ;;  %v2820_v40 = vmul.f32 %v6444_v29, %v7488_v37 }
 0x578   : > { %v6446_v22 = vpop.eup %6445  ;;  %v2432_v48 = vpop.xlane.xlu0 %2431  ;;  %6463 = vrcp.f32 %v2696_v62 }
 0x579   : > { %v2620_v6 = vmul.f32 1.442695, %v2514_v51  ;;  %v2622_v24 = vmul.f32 1.442695, %v2515_v14  ;;  %v2508_v50 = vsub.f32 %v7405_v2, %v2432_v48  ;;  %v2509_v0 = vsub.f32 %v7407_v61, %v2432_v48 }
 0x57a   : > { %v7696_v12 = vpop.eup %6447  ;;  %v2699_v35 = vpop.xlane.xlu1 %2698  ;;  %v2823_v46 = vmul.f32 %v6446_v22, %v7505_v17  ;;  %v2822_v11 = vmul.f32 %v6446_v22, %v7501_v21 }
 0x57b   : > { %v7701_v38 = vpop.eup %6449  ;;  %6465 = vpow2.f32 %v2620_v6  ;;  %v2608_v7 = vmul.f32 1.442695, %v2508_v50  ;;  %v2610_v49 = vmul.f32 1.442695, %v2509_v0 }
 0x57c   : > { %6467 = vpow2.f32 %v2622_v24  ;;  %v2873_v41 = vpack.c.bf16 %v2823_v46, %v2821_v18  ;;  %v2690_v2 = vpop.xlane.xlu0 %2689  ;;  %v2872_v26 = vpack.c.bf16 %v2822_v11, %v2820_v40  ;;  %v2730_v61 = vadd.f32 %v7701_v38, %v7696_v12  ;;  %v6452_v37 = vpop.eup %6451 }
 0x57d   : > { %6469 = vpow2.f32 %v2608_v7  ;;  %v2816_v40 = vmul.f32 %v6452_v37, %v7497_v3 }
 0x57e   : > { %6471 = vpow2.f32 %v2610_v49  ;;  %2890 = vmatprep.subr.bf16.mxu1 %v2873_v41  ;;  %v2435_v17 = vpop.xlane.xlu1 %2434  ;;  %2731 = vadd.xlane.f32.xlu0 %v2730_v61 }
 0x57f   : > { %6473 = vrcp.f32 %v2699_v35  ;;  %2891 = vmatpush1.bf16.xpose.msra.mxu1 %v2872_v26  ;;  %v2510_v21 = vsub.f32 %v7409_v20, %v2435_v17  ;;  %v2511_v15 = vsub.f32 %v7411_v55, %v2435_v17  ;;  %v2817_v35 = vmul.f32 %v6452_v37, %v7499_v58 }
 0x580   : > { %v7707_v62 = vpop.eup %6453  ;;  %v2426_v29 = vpop.xlane.xlu0 %2425  ;;  %6475 = vrcp.f32 %v2690_v2 }
 0x581   : > { %v7709_v42 = vpop.eup %6455  ;;  %v2612_v51 = vmul.f32 1.442695, %v2510_v21  ;;  %v2614_v14 = vmul.f32 1.442695, %v2511_v15  ;;  %v2504_v22 = vsub.f32 %v8725_v56, %v2426_v29  ;;  %v2505_v48 = vsub.f32 %v8724_v30, %v2426_v29 }
 0x582   : > { %v7713_v18 = vpop.eup %6457  ;;  %v2693_v6 = vpop.xlane.xlu1 %2692  ;;  %v2733_v20 = vadd.f32 %v7709_v42, %v7707_v62 }
 0x583   : > { %v7717_v24 = vpop.eup %6459  ;;  %6477 = vpow2.f32 %v2612_v51  ;;  %v2600_v55 = vmul.f32 1.442695, %v2504_v22  ;;  %v2602_v50 = vmul.f32 1.442695, %v2505_v48 }
 0x584   : > { %v6462_v0 = vpop.eup %6461  ;;  %6479 = vpow2.f32 %v2614_v14  ;;  %2734 = vadd.xlane.f32.xlu1 %v2733_v20  ;;  %v2684_v56 = vpop.xlane.xlu0 %2683  ;;  %v2724_v30 = vadd.f32 %v7717_v24, %v7713_v18 }
 0x585   : > { %6481 = vpow2.f32 %v2600_v55  ;;  %v2819_v46 = vmul.f32 %v6462_v0, %v7519_v59  ;;  %v2818_v11 = vmul.f32 %v6462_v0, %v7515_v34  ;;  %v6464_v49 = vpop.eup %6463 }
 0x586   : > { %6483 = vpow2.f32 %v2602_v50  ;;  %v2429_v7 = vpop.xlane.xlu1 %2428  ;;  %2725 = vadd.xlane.f32.xlu0 %v2724_v30  ;;  %v2812_v22 = vmul.f32 %v6464_v49, %v7522_v13 }
 0x587   : > { %6485 = vrcp.f32 %v2693_v6  ;;  %v2871_v41 = vpack.c.bf16 %v2819_v46, %v2817_v35  ;;  %v2870_v2 = vpack.c.bf16 %v2818_v11, %v2816_v40  ;;  %v2506_v58 = vsub.f32 %v8728_v19, %v2429_v7 }
 0x588   : > { %v7726_v26 = vpop.eup %6465  ;;  %v2507_v61 = vsub.f32 %v8727_v9, %v2429_v7  ;;  %v2678_v17 = vpop.xlane.xlu0 %2677  ;;  %6487 = vrcp.f32 %v2684_v56  ;;  %v2813_v9 = vmul.f32 %v6464_v49, %v7527_v63 }
 0x589   : > { %v7729_v21 = vpop.eup %6467  ;;  %2892 = vmatprep.subr.bf16.mxu1 %v2871_v41  ;;  %v2604_v3 = vmul.f32 1.442695, %v2506_v58  ;;  %6489 = vrcp.f32 %v2678_v17 }
 0x58a   : > { %v7731_v34 = vpop.eup %6469  ;;  %2893 = vmatpush1.bf16.xpose.msra.mxu1 %v2870_v2  ;;  %v2606_v59 = vmul.f32 1.442695, %v2507_v61  ;;  %v2687_v37 = vpop.xlane.xlu1 %2686  ;;  %v2727_v15 = vadd.f32 %v7729_v21, %v7726_v26 }
 0x58b   : > { %v7735_v19 = vpop.eup %6471  ;;  %6491 = vpow2.f32 %v2604_v3 }
 0x58c   : > { %v6474_v29 = vpop.eup %6473  ;;  %6493 = vpow2.f32 %v2606_v59  ;;  %2728 = vadd.xlane.f32.xlu1 %v2727_v15  ;;  %v2718_v51 = vadd.f32 %v7735_v19, %v7731_v34  ;;  %v2672_v30 = vpop.xlane.xlu0 %2671 }
 0x58d   : > { %6495 = vrcp.f32 %v2687_v37  ;;  %v2815_v14 = vmul.f32 %v6474_v29, %v7543_v28  ;;  %v2814_v48 = vmul.f32 %v6474_v29, %v7538_v36  ;;  %v6476_v20 = vpop.eup %6475 }
 0x58e   : > { %v2681_v6 = vpop.xlane.xlu1 %2680  ;;  %2719 = vadd.xlane.f32.xlu0 %v2718_v51  ;;  %v2809_v46 = vmul.f32 %v6476_v20, %v7551_v54  ;;  %v2808_v7 = vmul.f32 %v6476_v20, %v7546_v32 }
 0x58f   : > { %v2869_v55 = vpack.c.bf16 %v2815_v14, %v2813_v9  ;;  %v2868_v50 = vpack.c.bf16 %v2814_v48, %v2812_v22  ;;  %6497 = vrcp.f32 %v2681_v6 }
 0x590   : > { %v7743_v0 = vpop.eup %6477  ;;  %v2666_v29 = vpop.xlane.xlu0 %2665 }
 0x591   : > { %v7745_v35 = vpop.eup %6479  ;;  %2894 = vmatprep.subr.bf16.mxu1 %v2869_v55  ;;  %v8752_v55 = vld [vmem:[#allocation15_spill] sm:$0xff] }
 0x592   : > { %v7747_v63 = vpop.eup %6481  ;;  %2895 = vmatpush1.bf16.xpose.msra.mxu1 %v2868_v50  ;;  %v2675_v56 = vpop.xlane.xlu1 %2674  ;;  %v2721_v13 = vadd.f32 %v7745_v35, %v7743_v0  ;;  %v8753_v50 = vld [vmem:[#allocation16_spill] sm:$0xff] }
 0x593   : > { %v7751_v28 = vpop.eup %6483  ;;  %6499 = vrcp.f32 %v2675_v56 }
 0x594   : > { %v6486_v36 = vpop.eup %6485  ;;  %2722 = vadd.xlane.f32.xlu1 %v2721_v13  ;;  %v2712_v40 = vadd.f32 %v7751_v28, %v7747_v63  ;;  %6501 = vrcp.f32 %v2672_v30 }
 0x595   : > { %v2811_v11 = vmul.f32 %v6486_v36, %v7565_v16  ;;  %v2810_v49 = vmul.f32 %v6486_v36, %v7560_v10  ;;  %v6488_v41 = vpop.eup %6487 }
 0x596   : > { %2713 = vadd.xlane.f32.xlu0 %v2712_v40  ;;  %v6490_v2 = vpop.eup %6489  ;;  %v2669_v59 = vpop.xlane.xlu1 %2668  ;;  %v2805_v32 = vmul.f32 %v6488_v41, %v7571_v52  ;;  %v2804_v9 = vmul.f32 %v6488_v41, %v7567_v8 }
 0x597   : > { %v2867_v58 = vpack.c.bf16 %v2811_v11, %v2809_v46  ;;  %v2866_v61 = vpack.c.bf16 %v2810_v49, %v2808_v7  ;;  %6503 = vrcp.f32 %v2669_v59  ;;  %v2801_v14 = vmul.f32 %v6490_v2, %v7579_v47  ;;  %v8754_v46 = vld [vmem:[#allocation30_spill] sm:$0xff]  ;;  %v8759_v59 = vld [vmem:[#allocation19_spill] sm:$0xff] }
 0x598   : > { %v7759_v17 = vpop.eup %6491  ;;  %6505 = vrcp.f32 %v2666_v29  ;;  %v2800_v8 = vmul.f32 %v6490_v2, %v8752_v55  ;;  %v8757_v49 = vld [vmem:[#allocation18_spill] sm:$0xff] }
 0x599   : > { %v7761_v3 = vpop.eup %6493  ;;  %2896 = vmatprep.subr.bf16.mxu1 %v2867_v58 }
 0x59a   : > { %v6496_v54 = vpop.eup %6495  ;;  %2897 = vmatpush1.bf16.xpose.msra.mxu1 %v2866_v61  ;;  %v2715_v16 = vadd.f32 %v7761_v3, %v7759_v17  ;;  %v8758_v61 = vld [vmem:[#allocation31_spill] sm:$0xff] }
 0x59b   : > { %v2807_v10 = vmul.f32 %v6496_v54, %v7585_v43  ;;  %v2806_v37 = vmul.f32 %v6496_v54, %v7581_v31 }
 0x59c   : > { %v6498_v15 = vpop.eup %6497  ;;  %2716 = vadd.xlane.f32.xlu1 %v2715_v16 }
 0x59d   : > { %v2865_v51 = vpack.c.bf16 %v2807_v10, %v2805_v32  ;;  %v2803_v22 = vmul.f32 %v6498_v15, %v7597_v45  ;;  %v2864_v48 = vpack.c.bf16 %v2806_v37, %v2804_v9  ;;  %v2802_v31 = vmul.f32 %v6498_v15, %v7593_v44  ;;  %v1589_v45 = vld [vmem:[%s8602_s7 + $0x8] sm:$0xff] }
 0x59e   : > { %v8755_v44 = vld [vmem:[#allocation32_spill] sm:$0xff] }
 0x59f   : > { %2898 = vmatprep.subr.bf16.mxu1 %v2865_v51  ;;  %v2863_v6 = vpack.c.bf16 %v2803_v22, %v2801_v14  ;;  %v2862_v13 = vpack.c.bf16 %v2802_v31, %v2800_v8  ;;  %v6581_v51 = vmov 0.0  }
 0x5a0   : > { %v6500_v52 = vpop.eup %6499  ;;  %571 = vst [vmem:[#allocation4] sm:$0xff] %v6581_v51  ;;  %572 = vst [vmem:[#allocation4 + $0x8] sm:$0xf] %v6581_v51 }
 0x5a1   : > { %v6502_v43 = vpop.eup %6501  ;;  %v2799_v20 = vmul.f32 %v6500_v52, %v7609_v5  ;;  %v2798_v40 = vmul.f32 %v6500_v52, %v8754_v46  ;;  %v8756_v5 = vld [vmem:[#allocation17_spill] sm:$0xff] }
 0x5a2   : > { %2899 = vmatpush1.bf16.xpose.msra.mxu1 %v2864_v48  ;;  %v2797_v56 = vmul.f32 %v6502_v43, %v8753_v50  ;;  %v2796_v7 = vmul.f32 %v6502_v43, %v8756_v5 }
 0x5a3   : > { %2900 = vmatprep.subr.bf16.mxu1 %v2863_v6 }
 0x5a4   : > { %v2861_v47 = vpack.c.bf16 %v2799_v20, %v2797_v56  ;;  %v6504_v36 = vpop.eup %6503  ;;  %v2860_v2 = vpack.c.bf16 %v2798_v40, %v2796_v7  ;;  %v8761_v7 = vld [vmem:[#allocation28_spill] sm:$0xff] }
 0x5a5   : > { %v6506_v30 = vpop.eup %6505  ;;  %v2795_v11 = vmul.f32 %v6504_v36, %v8755_v44  ;;  %v2794_v54 = vmul.f32 %v6504_v36, %v8758_v61 }
 0x5a6   : > { %v2793_v41 = vmul.f32 %v6506_v30, %v8757_v49  ;;  %v2792_v16 = vmul.f32 %v6506_v30, %v8759_v59 }
 0x5a8   : > { %v2859_v58 = vpack.c.bf16 %v2795_v11, %v2793_v41  ;;  %v2858_v32 = vpack.c.bf16 %v2794_v54, %v2792_v16  ;;  %v8762_v41 = vld [vmem:[#allocation29_spill] sm:$0xff]  ;;  %v8765_v54 = vld [vmem:[#allocation26_spill] sm:$0xff] }
 0x5aa   : > { %2901 = vmatpush1.bf16.xpose.msra.mxu1 %v2862_v13 }
 0x5ab   : > { %2902 = vmatprep.subr.bf16.mxu1 %v2861_v47 }
 0x5ac   : > { %1597 = vperm.xlu0 %6269, %v1589_v45  }
 0x5b2   : > { %2903 = vmatpush1.bf16.xpose.msra.mxu1 %v2860_v2 }
 0x5b3   : > { %2904 = vmatprep.subr.bf16.mxu1 %v2859_v58 }
 0x5ba   : > { %2905 = vmatpush1.bf16.xpose.msra.mxu1 %v2858_v32 }
 0x5be   : > { %v2756_v10 = vpop.xlane.xlu0 %2755 }
 0x5bf   : > { %6507 = vrcp.f32 %v2756_v10 }
 0x5c2   : > { %v2750_v37 = vpop.xlane.xlu0 %2749 }
 0x5c4   : > { %v2759_v15 = vpop.xlane.xlu1 %2758 }
 0x5c5   : > { %6509 = vrcp.f32 %v2759_v15 }
 0x5c6   : > { %6511 = vrcp.f32 %v2750_v37  ;;  %v2744_v9 = vpop.xlane.xlu0 %2743 }
 0x5c8   : > { %v2753_v29 = vpop.xlane.xlu1 %2752 }
 0x5c9   : > { %6513 = vrcp.f32 %v2753_v29 }
 0x5ca   : > { %6515 = vrcp.f32 %v2744_v9  ;;  %v2738_v52 = vpop.xlane.xlu0 %2737 }
 0x5cc   : > { %v2747_v14 = vpop.xlane.xlu1 %2746  ;;  %v6508_v22 = vpop.eup %6507 }
 0x5cd   : > { %6517 = vrcp.f32 %v2747_v14  ;;  %v2853_v43 = vmul.f32 %v6508_v22, %v7639_v4  ;;  %v2852_v20 = vmul.f32 %v6508_v22, %v7637_v53 }
 0x5d0   : > { %v2741_v48 = vpop.xlane.xlu1 %2740 }
 0x5d1   : > { %6519 = vrcp.f32 %v2741_v48 }
 0x5d2   : > { %v6510_v6 = vpop.eup %6509  ;;  %6521 = vrcp.f32 %v2738_v52 }
 0x5d3   : > { %v2855_v31 = vmul.f32 %v6510_v6, %v7651_v23  ;;  %v2854_v55 = vmul.f32 %v6510_v6, %v7647_v27  ;;  %v6512_v8 = vpop.eup %6511 }
 0x5d4   : > { %v2849_v47 = vmul.f32 %v6512_v8, %v7645_v33  ;;  %v2848_v27 = vmul.f32 %v6512_v8, %v7643_v57  ;;  %v8764_v57 = vld [vmem:[#allocation27_spill] sm:$0xff] }
 0x5d5   : > { %v2889_v50 = vpack.c.bf16 %v2855_v31, %v2853_v43  ;;  %v2888_v56 = vpack.c.bf16 %v2854_v55, %v2852_v20 }
 0x5d6   : > { %v6514_v13 = vpop.eup %6513 }
 0x5d7   : > { %2906 = vmatprep.subr.bf16.mxu1 %v2889_v50  ;;  %v2851_v45 = vmul.f32 %v6514_v13, %v7663_v39  ;;  %v6516_v36 = vpop.eup %6515  ;;  %v2850_v23 = vmul.f32 %v6514_v13, %v7659_v25  ;;  %v8760_v39 = vld [vmem:[#allocation24_spill] sm:$0xff]  ;;  %v8763_v25 = vld [vmem:[#allocation23_spill] sm:$0xff] }
 0x5d8   : > { %2907 = vmatpush2.bf16.xpose.msra.mxu1 %v2888_v56  ;;  %v2845_v46 = vmul.f32 %v6516_v36, %v7657_v1  ;;  %v2844_v2 = vmul.f32 %v6516_v36, %v8762_v41  ;;  %v1794_v56 = vpop.f32.mrf.mxu0 }
 0x5d9   : > { %v2887_v4 = vpack.c.bf16 %v2851_v45, %v2849_v47  ;;  %v2886_v40 = vpack.c.bf16 %v2850_v23, %v2848_v27 }
 0x5da   : > { %v6518_v30 = vpop.eup %6517  ;;  %v1796_v36 = vpop.f32.mrf.mxu0 }
 0x5db   : > { %2908 = vmatprep.subr.bf16.mxu1 %v2887_v4  ;;  %v2847_v53 = vmul.f32 %v6518_v30, %v7675_v60  ;;  %v2846_v5 = vmul.f32 %v6518_v30, %v8760_v39 }
 0x5dd   : > { %v2885_v44 = vpack.c.bf16 %v2847_v53, %v2845_v46  ;;  %v2884_v61 = vpack.c.bf16 %v2846_v5, %v2844_v2 }
 0x5de   : > { %v6520_v11 = vpop.eup %6519 }
 0x5df   : > { %v6522_v33 = vpop.eup %6521  ;;  %v2843_v49 = vmul.f32 %v6520_v11, %v8761_v7  ;;  %v2842_v1 = vmul.f32 %v6520_v11, %v8764_v57 }
 0x5e0   : > { %2909 = vmatpush2.bf16.xpose.msra.mxu1 %v2886_v40  ;;  %v2841_v58 = vmul.f32 %v6522_v33, %v8763_v25  ;;  %v2840_v59 = vmul.f32 %v6522_v33, %v8765_v54  ;;  %v8766_v40 = vld [vmem:[#allocation11_spill] sm:$0xff]  ;;  %v8767_v33 = vld [vmem:[#allocation9_spill] sm:$0xff] }
 0x5e1   : > { %2910 = vmatprep.subr.bf16.mxu1 %v2885_v44  ;;  %v8768_v54 = vld [vmem:[#allocation13_spill] sm:$0xff] }
 0x5e2   : > { %v2883_v60 = vpack.c.bf16 %v2843_v49, %v2841_v58  ;;  %v2882_v16 = vpack.c.bf16 %v2842_v1, %v2840_v59 }
 0x5e8   : > { %2911 = vmatpush2.bf16.xpose.msra.mxu1 %v2884_v61 }
 0x5e9   : > { %2912 = vmatprep.subr.bf16.mxu1 %v2883_v60 }
 0x5f0   : > { %2913 = vmatpush2.bf16.xpose.msra.mxu1 %v2882_v16  ;;  %v2039_v16 = vld [vmem:[#allocation5 + $0x10] sm:$0xf] }
 0x607   : > { %v2732_v32 = vpop.xlane.xlu0 %2731 }
 0x608   : > { %6523 = vrcp.f32 %v2732_v32  ;;  %v8769_v32 = vld [vmem:[#allocation12_spill] sm:$0xff] }
 0x60d   : > { %v2735_v10 = vpop.xlane.xlu1 %2734 }
 0x60e   : > { %6525 = vrcp.f32 %v2735_v10  ;;  %v3026_v10 = vpack.c.bf16 %v8769_v32, %v8769_v32 }
 0x60f   : > { %v2726_v37 = vpop.xlane.xlu0 %2725 }
 0x610   : > { %6527 = vrcp.f32 %v2726_v37  ;;  %v2856_v37 = vpack.c.bf16 %v2039_v16, %v2039_v16 }
 0x615   : > { %v2729_v15 = vpop.xlane.xlu1 %2728  ;;  %v6524_v9 = vpop.eup %6523 }
 0x616   : > { %6529 = vrcp.f32 %v2729_v15  ;;  %v2837_v22 = vmul.f32 %v6524_v9, %v7701_v38  ;;  %v2836_v6 = vmul.f32 %v6524_v9, %v7696_v12 }
 0x617   : > { %v2720_v29 = vpop.xlane.xlu0 %2719 }
 0x618   : > { %6531 = vrcp.f32 %v2720_v29 }
 0x61b   : > { %v6526_v14 = vpop.eup %6525 }
 0x61c   : > { %v2839_v48 = vmul.f32 %v6526_v14, %v7709_v42  ;;  %v2838_v52 = vmul.f32 %v6526_v14, %v7707_v62 }
 0x61d   : > { %v2723_v43 = vpop.xlane.xlu1 %2722  ;;  %v6528_v55 = vpop.eup %6527 }
 0x61e   : > { %6533 = vrcp.f32 %v2723_v43  ;;  %v2881_v31 = vpack.c.bf16 %v2839_v48, %v2837_v22  ;;  %v2880_v20 = vpack.c.bf16 %v2838_v52, %v2836_v6  ;;  %v2833_v13 = vmul.f32 %v6528_v55, %v7717_v24  ;;  %v8772_v22 = vld [vmem:[#allocation14_spill] sm:$0xff] }
 0x61f   : > { %v2714_v8 = vpop.xlane.xlu0 %2713  ;;  %v2832_v42 = vmul.f32 %v6528_v55, %v7713_v18  ;;  %v3027_v48 = vpack.c.bf16 %v8772_v22, %v8772_v22 }
 0x620   : > { %2914 = vmatprep.subr.bf16.mxu1 %v2881_v31  ;;  %6535 = vrcp.f32 %v2714_v8 }
 0x621   : > { %2915 = vmatpush2.bf16.xpose.msra.mxu1 %v2880_v20  ;;  %v3036_v52 = vrot.slane %v3027_v48, 2 }
 0x623   : > { %v6530_v50 = vpop.eup %6529 }
 0x624   : > { %v2835_v38 = vmul.f32 %v6530_v50, %v7729_v21  ;;  %v2834_v12 = vmul.f32 %v6530_v50, %v7726_v26 }
 0x625   : > { %v2717_v62 = vpop.xlane.xlu1 %2716  ;;  %v6532_v30 = vpop.eup %6531 }
 0x626   : > { %6537 = vrcp.f32 %v2717_v62  ;;  %v2879_v47 = vpack.c.bf16 %v2835_v38, %v2833_v13  ;;  %v2878_v45 = vpack.c.bf16 %v2834_v12, %v2832_v42  ;;  %v2829_v21 = vmul.f32 %v6532_v30, %v7735_v19 }
 0x627   : > { %v1598_v4 = vpop.permute.xlu0 %1597  ;;  %v2828_v18 = vmul.f32 %v6532_v30, %v7731_v34 }
 0x628   : > { %2916 = vmatprep.subr.bf16.mxu1 %v2879_v47  ;;  %v1795_v23 = vadd.f32 %v1794_v56, %v1598_v4  ;;  %v1797_v53 = vadd.f32 %v1796_v36, %v1598_v4  ;;  %v1837_v59 = vadd.f32 %v8768_v54, %v1598_v4 }
 0x629   : > { %2917 = vmatpush2.bf16.xpose.msra.mxu1 %v2878_v45 }
 0x62a   : > { %v1843_v27 = vmax.f32 %v1795_v23, 0.0  ;;  %v1844_v24 = vmax.f32 %v1797_v53, 0.0  ;;  %v1845_v15 = vmax.f32 %v1837_v59, 0.0 }
 0x62b   : > { %v6534_v46 = vpop.eup %6533 }
 0x62c   : > { %v1850_v26 = vmul.f32 %v1844_v24, %v8766_v40  ;;  %v2831_v44 = vmul.f32 %v6534_v46, %v7745_v35  ;;  %v2830_v11 = vmul.f32 %v6534_v46, %v7743_v0  ;;  %v1849_v39 = vmul.f32 %v1843_v27, %v8767_v33 }
 0x62d   : > { %v6536_v58 = vpop.eup %6535 }
 0x62e   : > { %v3029_v5 = vpack.c.bf16 %v1850_v26, %v1850_v26  ;;  %v2877_v7 = vpack.c.bf16 %v2831_v44, %v2829_v21  ;;  %v2876_v49 = vpack.c.bf16 %v2830_v11, %v2828_v18  ;;  %v3028_v41 = vpack.c.bf16 %v1849_v39, %v1849_v39 }
 0x62f   : > { %v2825_v35 = vmul.f32 %v6536_v58, %v7751_v28  ;;  %v2824_v61 = vmul.f32 %v6536_v58, %v7747_v63  ;;  %v3035_v28 = vrot.slane %v3026_v10, 2  ;;  %v8770_v63 = vld [vmem:[#allocation10_spill] sm:$0xff] }
 0x630   : > { %2918 = vmatprep.subr.bf16.mxu1 %v2877_v7  ;;  %v3137_v2 = vrot.slane %v3029_v5, 2  ;;  %v3136_v25 = vrot.slane %v3028_v41, 2 }
 0x631   : > { %2919 = vmatpush2.bf16.xpose.msra.mxu1 %v2876_v49 }
 0x632   : > { %5981 = vmatprep.subr.msk.bf16.mxu0 %vm2176_vm5, %v3137_v2  ;;  %v3143_v34 = vsel %vm2176_vm5, %v3136_v25, 0 }
 0x633   : > { %v6538_v19 = vpop.eup %6537  ;;  %3166 = vmatpush1.bf16.msra.mxu0 %v3143_v34 }
 0x634   : > { %v2827_v0 = vmul.f32 %v6538_v19, %v7761_v3  ;;  %v2826_v60 = vmul.f32 %v6538_v19, %v7759_v17  ;;  %v3025_v17 = vpack.c.bf16 %v8770_v63, %v8770_v63  ;;  %v8771_v3 = vld [vmem:[#allocation8_spill] sm:$0xff] }
 0x635   : > { %v1851_v29 = vmul.f32 %v1845_v15, %v8771_v3 }
 0x636   : > { %v2875_v57 = vpack.c.bf16 %v2827_v0, %v2825_v35  ;;  %v2874_v1 = vpack.c.bf16 %v2826_v60, %v2824_v61  ;;  %v3034_v9 = vrot.slane %v3025_v17, 2  ;;  %v8774_v35 = vmov 0  }
 0x637   : > { %v3030_v14 = vpack.c.bf16 %v1851_v29, %v1851_v29 }
 0x638   : > { %2920 = vmatprep.subr.bf16.mxu1 %v2875_v57 }
 0x639   : > { %2921 = vmatpush2.bf16.xpose.msra.mxu1 %v2874_v1  ;;  %v3138_v6 = vrot.slane %v3030_v14, 2 }
 0x63a   : > { %3054 = vmatprep.subr.bf16.mxu1 %v3029_v5 }
 0x63b   : > { %v3149_v43 = vsel %vm2176_vm5, %v3138_v6, 0 }
 0x640   : > { %2923 = vmatmul.mubr.bf16.vlgmr.msra.gmra.mxu1 %v2856_v37 }
 0x641   : > { %3055 = vmatpush1.bf16.xpose.msra.mxu1 %v3028_v41  ;;  %3072 = vmatprep.mubr.bf16.mxu1 %v3035_v28 }
 0x642   : > { %6179 = vmatprep.subr.bf16.mxu1 %v6581_v51 }
 0x648   : > { %3073 = vmatmul.mubr.bf16.vlgmr.msra.gmra.mxu1 %v3034_v9 }
 0x649   : > { %6180 = vmatpush3.bf16.xpose.msra.mxu1 %v3030_v14  ;;  %6181 = vmatprep.mubr.msk.bf16.mxu1 %vm6582_vm10, %v6581_v51 }
 0x64a   : > { %6185 = vmatprep.subr.bf16.mxu1 %v6581_v51 }
 0x650   : > { %6182 = vmatmul.mubr.bf16.vlgmr.msra.gmra.mxu1 %v3036_v52 }
 0x651   : > { %6186 = vmatpush3.bf16.msra.mxu1 %v3149_v43  ;;  %6187 = vmatprep.mubr.msk.bf16.mxu1 %vm6582_vm10, %v6581_v51 }
 0x652   : > { %6191 = vmatprep.subr.bf16.mxu1 %v6581_v51 }
 0x700   : > { %v2924_v31 = vpop.f32.mrf.mxu1 }
 0x701   : > { %2937 = vrot.lane.b32.xlu0 %v2924_v31, %s6583_s19  ;;  %s6593_s19 = smov 33  }
 0x702   : > { %v2926_v20 = vpop.f32.mrf.mxu1 }
 0x704   : > { %v2928_v55 = vpop.f32.mrf.mxu1 }
 0x705   : > { %2942 = vrot.lane.b32.xlu0 %v2924_v31, %s6584_s24  ;;  %s6594_s24 = smov 37  }
 0x706   : > { %v2929_v8 = vpop.f32.mrf.mxu1 }
 0x708   : > { %v3074_v50 = vpop.f32.mrf.mxu1 }
 0x709   : > { %2962 = vrot.lane.b32.xlu0 %v2924_v31, %s6585_s25  ;;  %s6595_s25 = smov 45  }
 0x70a   : > { %v3076_v56 = vpop.f32.mrf.mxu1 }
 0x70c   : > { %v3077_v13 = vpop.f32.mrf.mxu1 }
 0x70d   : > { %2957 = vrot.lane.b32.xlu0 %v2924_v31, %s6586_s22  ;;  %s6596_s22 = smov 43  }
 0x70e   : > { %v3078_v38 = vpop.f32.mrf.mxu1 }
 0x710   : > { %v3114_v42 = vpop.f32.mrf.mxu1 }
 0x711   : > { %v3115_v12 = vadd.f32 %v3114_v42, %v3074_v50  ;;  %2978 = vrot.lane.b32.xlu0 %v2926_v20, %s6587_s28  ;;  %s6597_s28 = smov 49  }
 0x712   : > { %v6183_v62 = vpop.f32.mrf.mxu1 }
 0x713   : > { %v3121_v47 = vsel %vm3120_vm11, %v3115_v12, -inf }
 0x714   : > { %3122 = vmax.xlane.f32.xlu1 %v3121_v47  ;;  %v3117_v45 = vpop.f32.mrf.mxu1 }
 0x715   : > { %2988 = vrot.lane.b32.xlu0 %v2926_v20, %s6588_s26  ;;  %s8782_s26 = smov 90  }
 0x716   : > { %v6184_v36 = vpop.f32.mrf.mxu1 }
 0x719   : > { %2993 = vrot.lane.b32.xlu0 %v2926_v20, %s6589_s20  ;;  %s8783_s20 = smov 109  }
 0x71d   : > { %3013 = vrot.lane.b32.xlu0 %v2926_v20, %s6590_s27  ;;  %s8784_s27 = smov 108  }
 0x773   : > { %v2938_v24 = vpop.permute.xlu0 %2937 }
 0x777   : > { %v2943_v46 = vpop.permute.xlu0 %2942 }
 0x77b   : > { %v2963_v21 = vpop.permute.xlu0 %2962 }
 0x77c   : > { %v2964_v39 = vrot.slane %v2963_v21, 4 }
 0x77e   : > { %v2966_v41 = vsel %vm2965_vm13, %v2964_v39, %v2963_v21  ;;  %vm3001_vm13 = vcmask 1003352  }
 0x77f   : > { %v2958_v26 = vpop.permute.xlu0 %2957 }
 0x783   : > { %v2979_v5 = vpop.permute.xlu0 %2978 }
 0x787   : > { %v2989_v25 = vpop.permute.xlu0 %2988 }
 0x78b   : > { %v2994_v0 = vpop.permute.xlu0 %2993 }
 0x78f   : > { %v3014_v54 = vpop.permute.xlu0 %3013 }
 0x79d   : > { %v3123_v4 = vpop.xlane.xlu1 %3122 }
 0x79e   : > { %v3124_v30 = vsub.f32 %v3115_v12, %v3123_v4 }
 0x7a0   : > { %v3125_v23 = vmul.f32 1.442695, %v3124_v30 }
 0x7a2   : > { %6539 = vpow2.f32 %v3125_v23 }
 0x7af   : > { %v6540_v53 = vpop.eup %6539 }
 0x7b0   : > { %v3127_v27 = vsel %vm3120_vm11, %v6540_v53, 0.0  ;;  %vm2975_vm11 = vcmask 265352  }
 0x7b1   : > { %3128 = vadd.xlane.f32.xlu1 %v3127_v27 }
 0x7c2   : > { %2932 = vrot.lane.b32.xlu1 %v2924_v31, %s8773_s30 }
 0x7c6   : > { %2947 = vrot.lane.b32.xlu1 %v2924_v31, %s6591_s17  ;;  %s8785_s17 = smov 92  }
 0x7ca   : > { %2952 = vrot.lane.b32.xlu1 %v2924_v31, %s6592_s18  ;;  %s8786_s18 = smov 127  }
 0x7ce   : > { %2972 = vrot.lane.b32.xlu1 %v2924_v31, %s6593_s19  ;;  %s8787_s19 = smov 126  }
 0x7d2   : > { %2983 = vrot.lane.b32.xlu1 %v2926_v20, %s6594_s24  ;;  %s8788_s24 = smov 110  }
 0x7d6   : > { %3003 = vrot.lane.b32.xlu1 %v2926_v20, %s6595_s25 }
 0x7da   : > { %2998 = vrot.lane.b32.xlu1 %v2926_v20, %s6596_s22 }
 0x7de   : > { %3018 = vrot.lane.b32.xlu1 %v2926_v20, %s6597_s28 }
 0x83a   : > { %v3129_v18 = vpop.xlane.xlu1 %3128 }
 0x83b   : > { %6541 = vrcp.f32 %v3129_v18 }
 0x83e   : > { %v2933_v44 = vpop.permute.xlu1 %2932 }
 0x83f   : > { %2936 = vst.msk [vmem:[#allocation4] sm:$0xf] %vm2935_vm14, %v2933_v44  ;;  %vm2981_vm14 = vcmask 412952  }
 0x840   : > { %2941 = vst.msk [vmem:[#allocation4] sm:$0xf] %vm2940_vm15, %v2938_v24  ;;  %vm2986_vm15 = vcmask 560552  }
 0x841   : > { %2946 = vst.msk [vmem:[#allocation4] sm:$0xf] %vm2945_vm1, %v2943_v46  ;;  %vm2991_vm1 = vcmask 708152  }
 0x842   : > { %v2948_v11 = vpop.permute.xlu1 %2947 }
 0x843   : > { %2951 = vst.msk [vmem:[#allocation4] sm:$0xf] %vm2950_vm3, %v2948_v11  ;;  %vm2996_vm3 = vcmask 855752  }
 0x846   : > { %v2953_v7 = vpop.permute.xlu1 %2952 }
 0x847   : > { %2956 = vst.msk [vmem:[#allocation4] sm:$0xf] %vm2955_vm12, %v2953_v7  ;;  %vm3006_vm12 = vcmask 367616  }
 0x848   : > { %v6542_v49 = vpop.eup %6541  ;;  %2961 = vst.msk [vmem:[#allocation4] sm:$0xf] %vm2960_vm2, %v2958_v26  ;;  %vm3011_vm2 = vmor %vm3010_vm7, %vm3009_vm4  ;;  %vm8779_vm4 = vcmask 154624   ;;  %vm8780_vm7 = vcmask 1043456  }
 0x849   : > { %2971 = vst.msk [vmem:[#allocation4] sm:$0xff] %vm2970_vm0, %v2966_v41  ;;  %v3131_v2 = vmul.f32 %v6542_v49, %v6540_v53  ;;  %vm3021_vm0 = vcmask 396552  }
 0x84a   : > { %v2973_v58 = vpop.permute.xlu1 %2972 }
 0x84b   : > { %2976 = vst.msk [vmem:[#allocation4 + $0x4] sm:$0xf] %vm2975_vm11, %v2973_v58  ;;  %v3132_v34 = vpack.c.bf16 %v3131_v2, %v3131_v2  ;;  %vm3257_vm11 = vcmask 1041560  }
 0x84c   : > { %2982 = vst.msk [vmem:[#allocation4 + $0x4] sm:$0xf] %vm2981_vm14, %v2979_v5  ;;  %vm3258_vm14 = vcmask 1045508  }
 0x84d   : > { %5982 = vmatmul.mubr.msk.bf16.vlgmr.msra.gmra.mxu0 %vm2127_vm9, %v3132_v34  ;;  %6188 = vmatmul.mubr.msk.bf16.vlgmr.msra.gmra.mxu1 %vm2127_vm9, %v3132_v34  ;;  %vm3016_vm9 = vcmask 248952  }
 0x84e   : > { %v2984_v19 = vpop.permute.xlu1 %2983  ;;  %6197 = vmatprep.mubr.msk.bf16.mxu1 %vm6582_vm10, %v6581_v51  ;;  %3526 = vmatprep.mubr.bf16.mxu0 %v8774_v35 }
 0x84f   : > { %2987 = vst.msk [vmem:[#allocation4 + $0x4] sm:$0xf] %vm2986_vm15, %v2984_v19  ;;  %vm3261_vm15 = vcmask 152580  }
 0x850   : > { %2992 = vst.msk [vmem:[#allocation4 + $0x4] sm:$0xf] %vm2991_vm1, %v2989_v25  ;;  %vm7848_vm1 = vmor %vm3258_vm14, %vm3257_vm11 }
 0x851   : > { %2997 = vst.msk [vmem:[#allocation4 + $0x4] sm:$0xf] %vm2996_vm3, %v2994_v0  ;;  %vm7853_vm3 = vmor %vm3261_vm15, %vm2176_vm5  ;;  %vm8795_vm15 = vcmask 891904  }
 0x852   : > { %v3004_v61 = vpop.permute.xlu1 %3003 }
 0x853   : > { %v3005_v60 = vrot.slane %v3004_v61, 4 }
 0x855   : > { %v3007_v1 = vsel %vm3006_vm12, %v3005_v60, %v3004_v61  ;;  %vm8781_vm12 = vmmov %vm8779_vm4 }
 0x856   : > { %v2999_v57 = vpop.permute.xlu1 %2998 }
 0x857   : > { %3002 = vst.msk [vmem:[#allocation4 + $0x4] sm:$0xf] %vm3001_vm13, %v2999_v57  ;;  %vm8789_vm13 = vmmov %vm8779_vm4 }
 0x858   : > { %3012 = vst.msk [vmem:[#allocation4 + $0x4] sm:$0xff] %vm3011_vm2, %v3007_v1  ;;  %vm8790_vm2 = vmmov %vm8780_vm7 }
 0x859   : > { %3017 = vst.msk [vmem:[#allocation4 + $0x8] sm:$0xf] %vm3016_vm9, %v3014_v54  ;;  %vm8791_vm9 = vmmov %vm8779_vm4 }
 0x85a   : > { %v3019_v59 = vpop.permute.xlu1 %3018  ;;  %vm8793_vm11 = vmmov %vm8790_vm2 }
 0x85b   : > { %3022 = vst.msk [vmem:[#allocation4 + $0x8] sm:$0xf] %vm3021_vm0, %v3019_v59  ;;  %vm8792_vm0 = vcmask 736256  }
 0x85c   : > { %vm8794_vm14 = vmmov %vm8792_vm0 }
 0x85f   : > { %v3023_v16 = vld [vmem:[#allocation4] sm:$0xff] }
 0x860   : > { %v3233_v32 = vcombine.high %v3023_v16, %v3023_v16 }
 0x862   : > { %v6126_v10 = vpack.c.bf16 %v3233_v32, %v3023_v16  ;;  %v3024_v37 = vld [vmem:[#allocation4 + $0x8] sm:$0xf] }
 0x863   : > { %v6127_v15 = vpack.c.bf16 %v3024_v37, %v3024_v37 }
 0x864   : > { %3246 = vrot.lane.b32.xlu0 %v6126_v10, %s8773_s30 }
 0x865   : > { %3248 = vrot.lane.b32.xlu1 %v6127_v15, %s8773_s30 }
 0x8d6   : > { %v3247_v28 = vpop.permute.xlu0 %3246 }
 0x8d7   : > { %v3250_v17 = vrot.slane %v3247_v28, 4  ;;  %v3249_v29 = vpop.permute.xlu1 %3248 }
 0x8d8   : > { %v3251_v9 = vrot.slane %v3249_v29, 4 }
 0x8d9   : > { %v3252_v22 = vsel %vm8779_vm4, %v3250_v17, %v3247_v28  ;;  %vm8798_vm4 = vcmask 883712  }
 0x8da   : > { %3260 = vst.msk [vmem:[#allocation2] sm:$0x33] %vm7848_vm1, %v3252_v22  ;;  %v3253_v48 = vsel %vm8780_vm7, %v3250_v17, %v3251_v9 }
 0x8db   : > { %v3254_v6 = vsel %vm8781_vm12, %v3253_v48, %v3249_v29  ;;  %vm8800_vm12 = vmmov %vm8798_vm4 }
 0x8dc   : > { %3263 = vst.msk [vmem:[#allocation2 + $0x8] sm:$0x33] %vm7853_vm3, %v3254_v6 }
 0x8e1   : > { %v3264_v52 = vld [vmem:[#allocation2] sm:$0x33] }
 0x8e2   : > { %3266 = vst [vmem:[#allocation3] sm:$0x33] %v3264_v52  ;;  %v3395_v47 = vld [vmem:[#allocation2] sm:$0x33] }
 0x8e3   : > { %v3265_v43 = vld [vmem:[#allocation2 + $0x8] sm:$0x3]  ;;  %v3323_v4 = vld [vmem:[#allocation2] sm:$0x33] }
 0x8e4   : > { %3267 = vst [vmem:[#allocation3 + $0x8] sm:$0x3] %v3265_v43  ;;  %v3396_v62 = vld [vmem:[#allocation2 + $0x8] sm:$0x33]  ;;  %v3340_v30 = vld [vmem:[#allocation2] sm:$0x33] }
 0x8e5   : > { %v3324_v45 = vld [vmem:[#allocation2 + $0x8] sm:$0x33]  ;;  %v3344_v53 = vrot.slane %v3340_v30, 6  ;;  %v3359_v46 = vld [vmem:[#allocation2] sm:$0x33] }
 0x8e6   : > { %v3341_v36 = vld [vmem:[#allocation2 + $0x8] sm:$0x33]  ;;  %v3376_v21 = vld [vmem:[#allocation2] sm:$0x33] }
 0x8e7   : > { %v3345_v23 = vrot.slane %v3341_v36, 6  ;;  %v3360_v27 = vld [vmem:[#allocation2 + $0x8] sm:$0x33]  ;;  %v3380_v44 = vrot.slane %v3376_v21, 6  ;;  %v3268_v11 = vld [vmem:[#allocation2] sm:$0x33] }
 0x8e8   : > { %v3377_v24 = vld [vmem:[#allocation2 + $0x8] sm:$0x33]  ;;  %v3272_v5 = vrot.slane %v3268_v11, 6  ;;  %v3287_v41 = vld [vmem:[#allocation2] sm:$0x33] }
 0x8e9   : > { %v3381_v18 = vrot.slane %v3377_v24, 6  ;;  %v3269_v26 = vld [vmem:[#allocation2 + $0x8] sm:$0x33]  ;;  %v3304_v2 = vld [vmem:[#allocation2] sm:$0x33] }
 0x8ea   : > { %v3273_v39 = vrot.slane %v3269_v26, 6  ;;  %v3288_v7 = vld [vmem:[#allocation2 + $0x8] sm:$0x33]  ;;  %v3308_v58 = vrot.slane %v3304_v2, 6 }
 0x8eb   : > { %v3305_v49 = vld [vmem:[#allocation2 + $0x8] sm:$0x33] }
 0x8ec   : > { %v3309_v25 = vrot.slane %v3305_v49, 6 }
 0x90d   : > { %v3185_v31 = vpop.f32.mrf.mxu0  ;;  %v3226_v20 = vpop.f32.mrf.mxu1 }
 0x90e   : > { %v6129_v55 = vpack.c.bf16 %v3226_v20, %v3226_v20 }
 0x90f   : > { %v3187_v8 = vpop.f32.mrf.mxu0  ;;  %v6189_v50 = vpop.f32.mrf.mxu1 }
 0x910   : > { %v6128_v56 = vpack.c.bf16 %v3187_v8, %v3185_v31  ;;  %3603 = vrot.lane.b32.xlu1 %v6129_v55, %s8773_s30 }
 0x911   : > { %v3189_v13 = vpop.f32.mrf.mxu0  ;;  %v3229_v38 = vpop.f32.mrf.mxu1 }
 0x912   : > { %3601 = vrot.lane.b32.xlu0 %v6128_v56, %s8773_s30 }
 0x913   : > { %v3190_v42 = vpop.f32.mrf.mxu0  ;;  %v6190_v12 = vpop.f32.mrf.mxu1 }
 0x914   : > { %3401 = vrot.lane.b32.xlu1 %v3396_v62, %s8782_s26 }
 0x916   : > { %3399 = vrot.lane.b32.xlu0 %v3395_v47, %s8782_s26 }
 0x918   : > { %3329 = vrot.lane.b32.xlu1 %v3324_v45, %s8783_s20 }
 0x91a   : > { %3327 = vrot.lane.b32.xlu0 %v3323_v4, %s8783_s20 }
 0x91c   : > { %3348 = vrot.lane.b32.xlu1 %v3345_v23, %s8784_s27 }
 0x91e   : > { %3346 = vrot.lane.b32.xlu0 %v3344_v53, %s8784_s27 }
 0x920   : > { %3365 = vrot.lane.b32.xlu1 %v3360_v27, %s8785_s17 }
 0x922   : > { %3363 = vrot.lane.b32.xlu0 %v3359_v46, %s8785_s17 }
 0x924   : > { %3384 = vrot.lane.b32.xlu1 %v3381_v18, %s8685_s0 }
 0x926   : > { %3382 = vrot.lane.b32.xlu0 %v3380_v44, %s8685_s0 }
 0x928   : > { %3276 = vrot.lane.b32.xlu1 %v3273_v39, %s8786_s18 }
 0x92a   : > { %3274 = vrot.lane.b32.xlu0 %v3272_v5, %s8786_s18 }
 0x92c   : > { %3293 = vrot.lane.b32.xlu1 %v3288_v7, %s8787_s19 }
 0x92e   : > { %3291 = vrot.lane.b32.xlu0 %v3287_v41, %s8787_s19 }
 0x930   : > { %3312 = vrot.lane.b32.xlu1 %v3309_v25, %s8788_s24 }
 0x932   : > { %3310 = vrot.lane.b32.xlu0 %v3308_v58, %s8788_s24 }
 0x982   : > { %v3604_v34 = vpop.permute.xlu1 %3603 }
 0x983   : > { %v3606_v0 = vrot.slane %v3604_v34, 4 }
 0x984   : > { %v3602_v19 = vpop.permute.xlu0 %3601 }
 0x985   : > { %v3605_v61 = vrot.slane %v3602_v19, 4 }
 0x986   : > { %v3402_v60 = vpop.permute.xlu1 %3401 }
 0x987   : > { %v3607_v57 = vsel %vm8789_vm13, %v3605_v61, %v3602_v19  ;;  %v3608_v1 = vsel %vm8790_vm2, %v3605_v61, %v3606_v0  ;;  %v3404_v54 = vrot.slane %v3402_v60, 4  ;;  %vm8801_vm13 = vcmask 752640  }
 0x988   : > { %v3609_v59 = vsel %vm8791_vm9, %v3608_v1, %v3604_v34  ;;  %3612 = vst.msk [vmem:[#allocation2] sm:$0x33] %vm7848_vm1, %v3607_v57  ;;  %v3400_v16 = vpop.permute.xlu0 %3399  ;;  %vm8796_vm1 = vmmov %vm8790_vm2 }
 0x989   : > { %3613 = vst.msk [vmem:[#allocation2 + $0x8] sm:$0x33] %vm7853_vm3, %v3609_v59  ;;  %v3407_v32 = vsel %vm8792_vm0, %v3402_v60, %v3404_v54  ;;  %v3403_v10 = vrot.slane %v3400_v16, 4  ;;  %vm8797_vm3 = vmmov %vm8795_vm15  ;;  %vm8804_vm0 = vcmask 744448  }
 0x98a   : > { %3411 = vst [vmem:[#allocation3 + $0x38] sm:$0x3] %v3407_v32  ;;  %v3330_v37 = vpop.permute.xlu1 %3329  ;;  %vm8799_vm7 = vmmov %vm8796_vm1 }
 0x98b   : > { %v3405_v15 = vsel %vm8793_vm11, %v3403_v10, %v3404_v54  ;;  %v3332_v28 = vrot.slane %v3330_v37, 4  ;;  %vm8802_vm2 = vmmov %vm8796_vm1 }
 0x98c   : > { %v3406_v17 = vsel %vm8794_vm14, %v3400_v16, %v3405_v15  ;;  %v3328_v29 = vpop.permute.xlu0 %3327  ;;  %vm8803_vm9 = vmmov %vm8801_vm13 }
 0x98d   : > { %3410 = vst [vmem:[#allocation3 + $0x30] sm:$0x33] %v3406_v17  ;;  %v3335_v9 = vsel %vm8795_vm15, %v3330_v37, %v3332_v28  ;;  %v3331_v63 = vrot.slane %v3328_v29, 4  ;;  %vm8805_vm11 = vmmov %vm8796_vm1  ;;  %vm8807_vm15 = vcmask 1039360  }
 0x98e   : > { %3339 = vst [vmem:[#allocation3 + $0x20] sm:$0x3] %v3335_v9  ;;  %v3349_v22 = vpop.permute.xlu1 %3348  ;;  %vm8806_vm14 = vmmov %vm8804_vm0 }
 0x98f   : > { %v3333_v14 = vsel %vm8796_vm1, %v3331_v63, %v3332_v28  ;;  %v3351_v48 = vrot.slane %v3349_v22, 4  ;;  %v3745_v6 = vld [vmem:[#allocation2] sm:$0x33] }
 0x990   : > { %v3334_v52 = vsel %vm8797_vm3, %v3328_v29, %v3333_v14  ;;  %3749 = vrot.lane.b32.xlu0 %v3745_v6, %s8782_s26  ;;  %v3347_v43 = vpop.permute.xlu0 %3346  ;;  %v3746_v31 = vld [vmem:[#allocation2 + $0x8] sm:$0x33]  ;;  %v3673_v38 = vld [vmem:[#allocation2] sm:$0x33]  ;;  %vm8808_vm3 = vmmov %vm8807_vm15 }
 0x991   : > { %3338 = vst [vmem:[#allocation3 + $0x18] sm:$0x33] %v3334_v52  ;;  %v3354_v20 = vsel %vm8798_vm4, %v3349_v22, %v3351_v48  ;;  %v3350_v55 = vrot.slane %v3347_v43, 4  ;;  %3751 = vrot.lane.b32.xlu1 %v3746_v31, %s8782_s26  ;;  %v6290_v8 = vld [vmem:[#allocation3 + $0x38] ss:$0 sps:$4 sm:$0x33]  }
 0x992   : > { %3358 = vst [vmem:[#allocation3 + $0x20] sm:$0xc] %v3354_v20  ;;  %v3366_v50 = vpop.permute.xlu1 %3365  ;;  %v3492_v42 = vsel %vm2176_vm5, %v6290_v8, 0  ;;  %v3674_v47 = vld [vmem:[#allocation2 + $0x8] sm:$0x33]  ;;  %vm8809_vm4 = vcmask 1031168  }
 0x993   : > { %v3352_v56 = vsel %vm8799_vm7, %v3350_v55, %v3351_v48  ;;  %v3368_v13 = vrot.slane %v3366_v50, 4  ;;  %6192 = vmatpush3.bf16.msra.mxu1 %v3492_v42  ;;  %v3709_v46 = vld [vmem:[#allocation2] sm:$0x33]  ;;  %v3710_v44 = vld [vmem:[#allocation2 + $0x8] sm:$0x33]  ;;  %vm8810_vm7 = vmmov %vm8796_vm1 }
 0x994   : > { %v3353_v12 = vsel %vm8800_vm12, %v3347_v43, %v3352_v56  ;;  %3677 = vrot.lane.b32.xlu0 %v3673_v38, %s8783_s20  ;;  %v3364_v62 = vpop.permute.xlu0 %3363  ;;  %v3422_v45 = vld [vmem:[#allocation3 + $0x30] sm:$0x33]  ;;  %6193 = vmatprep.subr.bf16.mxu1 %v6581_v51  ;;  %v3637_v41 = vld [vmem:[#allocation2] sm:$0x33]  ;;  %v3638_v34 = vld [vmem:[#allocation2 + $0x8] sm:$0x33] }
 0x995   : > { %3357 = vst [vmem:[#allocation3 + $0x18] sm:$0xcc] %v3353_v12  ;;  %v3371_v36 = vsel %vm8801_vm13, %v3366_v50, %v3368_v13  ;;  %v3367_v4 = vrot.slane %v3364_v62, 4  ;;  %3679 = vrot.lane.b32.xlu1 %v3674_v47, %s8783_s20  ;;  %v5994_v30 = vcombine.high %v3422_v45, %v3422_v45  ;;  %v5993_v23 = vcombine.low %v3422_v45, %v3422_v45  ;;  %v3690_v2 = vld [vmem:[#allocation2] sm:$0x33]  ;;  %vm8811_vm12 = vmmov %vm8809_vm4 }
 0x996   : > { %3375 = vst [vmem:[#allocation3 + $0x2c] sm:$0x3] %v3371_v36  ;;  %v3385_v53 = vpop.permute.xlu1 %3384  ;;  %v3691_v19 = vld [vmem:[#allocation2 + $0x8] sm:$0x33]  ;;  %v3694_v57 = vrot.slane %v3690_v2, 6  ;;  %vm8812_vm13 = vcmask 900096  }
 0x997   : > { %v3369_v27 = vsel %vm8802_vm2, %v3367_v4, %v3368_v13  ;;  %v3387_v24 = vrot.slane %v3385_v53, 4  ;;  %5996 = vmatprep.subr.msk.bf16.mxu0 %vm2176_vm5, %v5994_v30  ;;  %v3486_v21 = vsel %vm2176_vm5, %v5993_v23, 0  ;;  %v3695_v59 = vrot.slane %v3691_v19, 6  ;;  %v3726_v16 = vld [vmem:[#allocation2] sm:$0x33]  ;;  %vm8813_vm2 = vmmov %vm8796_vm1  ;;  %v3425_v30 = vld [vmem:[%s8604_s9 + $0x8] sm:$0xff] }
 0x998   : > { %v3370_v18 = vsel %vm8803_vm9, %v3364_v62, %v3369_v27  ;;  %3713 = vrot.lane.b32.xlu0 %v3709_v46, %s8785_s17  ;;  %v3383_v26 = vpop.permute.xlu0 %3382  ;;  %3505 = vmatpush1.bf16.msra.mxu0 %v3486_v21  ;;  %v3727_v37 = vld [vmem:[#allocation2 + $0x8] sm:$0x33]  ;;  %v3730_v9 = vrot.slane %v3726_v16, 6  ;;  %v3618_v48 = vld [vmem:[#allocation2] sm:$0x33]  ;;  %vm8814_vm9 = vmmov %vm8812_vm13 }
 0x999   : > { %3374 = vst [vmem:[#allocation3 + $0x24] sm:$0x33] %v3370_v18  ;;  %v3390_v11 = vsel %vm8804_vm0, %v3385_v53, %v3387_v24  ;;  %v3386_v39 = vrot.slane %v3383_v26, 4  ;;  %3715 = vrot.lane.b32.xlu1 %v3710_v44, %s8785_s17  ;;  %v3731_v14 = vrot.slane %v3727_v37, 6  ;;  %v3619_v6 = vld [vmem:[#allocation2 + $0x8] sm:$0x33] }
 0x99a   : > { %3394 = vst [vmem:[#allocation3 + $0x2c] sm:$0xc] %v3390_v11  ;;  %v3277_v5 = vpop.permute.xlu1 %3276  ;;  %v3622_v50 = vrot.slane %v3618_v48, 6  ;;  %v3623_v13 = vrot.slane %v3619_v6, 6  ;;  %v3654_v38 = vld [vmem:[#allocation2] sm:$0x33] }
 0x99b   : > { %v3388_v7 = vsel %vm8805_vm11, %v3386_v39, %v3387_v24  ;;  %v3279_v49 = vrot.slane %v3277_v5, 4  ;;  %v3655_v12 = vld [vmem:[#allocation2 + $0x8] sm:$0x33]  ;;  %v3658_v62 = vrot.slane %v3654_v38, 6  ;;  %v3424_v45 = vld [vmem:[%s8604_s9] sm:$0xff]  ;;  %vm3481_vm0 = vcmask 293888   ;;  %vm8815_vm11 = vmmov %vm8796_vm1 }
 0x99c   : > { %v3389_v25 = vsel %vm8806_vm14, %v3383_v26, %v3388_v7  ;;  %3641 = vrot.lane.b32.xlu0 %v3637_v41, %s8787_s19  ;;  %v3275_v58 = vpop.permute.xlu0 %3274  ;;  %v3659_v47 = vrot.slane %v3655_v12, 6  ;;  %v3615_v4 = vld [vmem:[#allocation2 + $0x8] sm:$0x3]  ;;  %v6300_v23 = vld [vmem:[%s8603_s8] sm:$0xff]   ;;  %vm8816_vm14 = vcmask 736256  }
 0x99d   : > { %3393 = vst [vmem:[#allocation3 + $0x24] sm:$0xcc] %v3389_v25  ;;  %v3282_v0 = vsel %vm8807_vm15, %v3277_v5, %v3279_v49  ;;  %v3278_v61 = vrot.slane %v3275_v58, 4  ;;  %3643 = vrot.lane.b32.xlu1 %v3638_v34, %s8787_s19  ;;  %v3614_v53 = vld [vmem:[#allocation2] sm:$0x33]  ;;  %v3775_v26 = vld [vmem:[%s8606_s11 + $0x8] sm:$0xff]  ;;  %vm8817_vm15 = vmmov %vm8816_vm14 }
 0x99e   : > { %3286 = vst [vmem:[#allocation3 + $0x8] sm:$0xc] %v3282_v0  ;;  %v3294_v60 = vpop.permute.xlu1 %3293  ;;  %v3774_v21 = vld [vmem:[%s8606_s11] sm:$0xff] }
 0x99f   : > { %v3280_v1 = vsel %vm8796_vm1, %v3278_v61, %v3279_v49  ;;  %v3296_v54 = vrot.slane %v3294_v60, 4 }
 0x9a0   : > { %v3281_v32 = vsel %vm8808_vm3, %v3275_v58, %v3280_v1  ;;  %3696 = vrot.lane.b32.xlu0 %v3694_v57, %s8784_s27  ;;  %v3292_v10 = vpop.permute.xlu0 %3291  ;;  %vm8818_vm3 = vcmask 891904  }
 0x9a1   : > { %3285 = vst [vmem:[#allocation3] sm:$0xcc] %v3281_v32  ;;  %v3299_v15 = vsel %vm8809_vm4, %v3294_v60, %v3296_v54  ;;  %v3295_v28 = vrot.slane %v3292_v10, 4  ;;  %3698 = vrot.lane.b32.xlu1 %v3695_v59, %s8784_s27  ;;  %v6293_v17 = vld [vmem:[#allocation3 + $0x20] ss:$12 sps:$4 sm:$0xff]   ;;  %vm8819_vm4 = vmmov %vm8818_vm3 }
 0x9a2   : > { %3303 = vst [vmem:[#allocation3 + $0x14] sm:$0x3] %v3299_v15  ;;  %v3313_v29 = vpop.permute.xlu1 %3312  ;;  %6194 = vmatpush3.bf16.msra.mxu1 %v6293_v17 }
 0x9a3   : > { %v3297_v63 = vsel %vm8810_vm7, %v3295_v28, %v3296_v54  ;;  %v3315_v22 = vrot.slane %v3313_v29, 4  ;;  %6195 = vmatprep.subr.bf16.mxu1 %v6581_v51  ;;  %vm8820_vm7 = vmmov %vm8796_vm1 }
 0x9a4   : > { %v3298_v52 = vsel %vm8811_vm12, %v3292_v10, %v3297_v63  ;;  %3732 = vrot.lane.b32.xlu0 %v3730_v9, %s8685_s0  ;;  %v3311_v43 = vpop.permute.xlu0 %3310  ;;  %v6294_v31 = vld [vmem:[#allocation3 + $0x1c] ss:$12 sps:$4 sm:$0xff]   ;;  %v6296_v20 = vld [vmem:[#allocation3 + $0x18] ss:$12 sps:$4 sm:$0xff]   ;;  %vm8821_vm12 = vcmask 752640  }
 0x9a5   : > { %3302 = vst [vmem:[#allocation3 + $0xc] sm:$0x33] %v3298_v52  ;;  %v3318_v55 = vsel %vm8812_vm13, %v3313_v29, %v3315_v22  ;;  %v3314_v8 = vrot.slane %v3311_v43, 4  ;;  %3734 = vrot.lane.b32.xlu1 %v3731_v14, %s8685_s0  ;;  %3506 = vmatprep.subr.bf16.mxu0 %v6294_v31  ;;  %vm8822_vm13 = vmmov %vm8821_vm12 }
 0x9a6   : > { %3322 = vst [vmem:[#allocation3 + $0x14] sm:$0xc] %v3318_v55  ;;  %3507 = vmatpush1.bf16.msra.mxu0 %v6296_v20 }
 0x9a7   : > { %v3316_v56 = vsel %vm8813_vm2, %v3314_v8, %v3315_v22  ;;  %vm8823_vm2 = vmmov %vm8796_vm1 }
 0x9a8   : > { %v3317_v42 = vsel %vm8814_vm9, %v3311_v43, %v3316_v56  ;;  %3624 = vrot.lane.b32.xlu0 %v3622_v50, %s8786_s18  ;;  %v3414_v27 = vld [vmem:[#allocation3] sm:$0xff]  ;;  %vm8824_vm9 = vcmask 1031168  }
 0x9a9   : > { %3321 = vst [vmem:[#allocation3 + $0xc] sm:$0xcc] %v3317_v42  ;;  %3626 = vrot.lane.b32.xlu1 %v3623_v13, %s8786_s18 }
 0x9ac   : > { %3660 = vrot.lane.b32.xlu0 %v3658_v62, %s8788_s24 }
 0x9ad   : > { %3662 = vrot.lane.b32.xlu1 %v3659_v47, %s8788_s24  ;;  %v6297_v36 = vld [vmem:[#allocation3 + $0x8] ss:$12 sps:$4 sm:$0xff]  }
 0x9ae   : > { %3617 = vst [vmem:[#allocation3 + $0x8] sm:$0x3] %v3615_v4  ;;  %6196 = vmatpush3.bf16.msra.mxu1 %v6297_v36 }
 0x9af   : > { %6201 = vmatprep.subr.bf16.mxu1 %v6581_v51 }
 0x9b0   : > { %3428 = vperm.xlu0 %6269, %v3424_v45   ;;  %v3416_v24 = vld [vmem:[#allocation3 + $0xc] sm:$0xff] }
 0x9b1   : > { %v6298_v46 = vld [vmem:[#allocation3 + $0x4] ss:$12 sps:$4 sm:$0xff]   ;;  %3433 = vperm.xlu1 %6270, %v3425_v30   ;;  %v5987_v18 = vcombine.low %v3414_v27, %v3416_v24  ;;  %6198 = vmatmul.mubr.msk.bf16.vlgmr.msra.gmra.mxu1 %vm3481_vm0, %v6300_v23 }
 0x9b2   : > { %3616 = vst [vmem:[#allocation3] sm:$0x33] %v3614_v53  ;;  %3508 = vmatprep.subr.bf16.mxu0 %v6298_v46  ;;  %6207 = vmatprep.mubr.msk.bf16.mxu1 %vm6582_vm10, %v6581_v51 }
 0x9b3   : > { %3509 = vmatpush1.bf16.msra.mxu0 %v5987_v18 }
 0x9b4   : > { %3778 = vperm.xlu0 %6269, %v3774_v21  }
 0x9b5   : > { %3783 = vperm.xlu1 %6270, %v3775_v26  }
 0x9b6   : > { %5997 = vmatmul.mubr.msk.bf16.vlgmr.msra.gmra.mxu0 %vm3481_vm0, %v6300_v23 }
 0x9b7   : > { %3875 = vmatprep.mubr.bf16.mxu0 %v8774_v35 }
 0xa02   : > { %v3750_v44 = vpop.permute.xlu0 %3749 }
 0xa03   : > { %v3753_v11 = vrot.slane %v3750_v44, 4  ;;  %v3752_v39 = vpop.permute.xlu1 %3751 }
 0xa04   : > { %v3754_v5 = vrot.slane %v3752_v39, 4 }
 0xa06   : > { %v3755_v7 = vsel %vm8815_vm11, %v3753_v11, %v3754_v5  ;;  %v3757_v49 = vsel %vm8816_vm14, %v3752_v39, %v3754_v5  ;;  %v3678_v41 = vpop.permute.xlu0 %3677  ;;  %vm8825_vm11 = vmmov %vm8824_vm9 }
 0xa07   : > { %v3756_v2 = vsel %vm8817_vm15, %v3750_v44, %v3755_v7  ;;  %3761 = vst [vmem:[#allocation3 + $0x38] sm:$0x3] %v3757_v49  ;;  %v3681_v25 = vrot.slane %v3678_v41, 4  ;;  %v3680_v58 = vpop.permute.xlu1 %3679  ;;  %vm8826_vm14 = vmmov %vm8796_vm1  ;;  %vm8827_vm15 = vcmask 883712  }
 0xa08   : > { %3760 = vst [vmem:[#allocation3 + $0x30] sm:$0x33] %v3756_v2  ;;  %v3682_v34 = vrot.slane %v3680_v58, 4  ;;  %v6312_v2 = vld [vmem:[%s8605_s10] sm:$0xff]  }
 0xa0a   : > { %v3683_v19 = vsel %vm8796_vm1, %v3681_v25, %v3682_v34  ;;  %v3685_v0 = vsel %vm8818_vm3, %v3680_v58, %v3682_v34  ;;  %v3714_v61 = vpop.permute.xlu0 %3713  ;;  %vm8828_vm1 = vmmov %vm8827_vm15  ;;  %vm8830_vm3 = vcmask 744448  }
 0xa0b   : > { %v3684_v60 = vsel %vm8819_vm4, %v3678_v41, %v3683_v19  ;;  %3689 = vst [vmem:[#allocation3 + $0x20] sm:$0x3] %v3685_v0  ;;  %v3717_v57 = vrot.slane %v3714_v61, 4  ;;  %v3716_v1 = vpop.permute.xlu1 %3715  ;;  %vm8831_vm4 = vmmov %vm8830_vm3 }
 0xa0c   : > { %3688 = vst [vmem:[#allocation3 + $0x18] sm:$0x33] %v3684_v60  ;;  %v3718_v54 = vrot.slane %v3716_v1, 4  ;;  %v6543_v60 = vld [vmem:[%s6709_s29 + $0x10] sm:$0xff] }
 0xa0e   : > { %v3719_v59 = vsel %vm8820_vm7, %v3717_v57, %v3718_v54  ;;  %v3721_v16 = vsel %vm8821_vm12, %v3716_v1, %v3718_v54  ;;  %v3642_v32 = vpop.permute.xlu0 %3641  ;;  %v6302_v10 = vld [vmem:[#allocation3 + $0x38] ss:$0 sps:$4 sm:$0x33]   ;;  %vm8832_vm7 = vmmov %vm8823_vm2  ;;  %vm8833_vm12 = vcmask 1039360   ;;  %v3941_v57 = vmul.f32 2.0, %v6543_v60 }
 0xa0f   : > { %v3720_v37 = vsel %vm8822_vm13, %v3714_v61, %v3719_v59  ;;  %3725 = vst [vmem:[#allocation3 + $0x2c] sm:$0x3] %v3721_v16  ;;  %v3645_v15 = vrot.slane %v3642_v32, 4  ;;  %v3644_v28 = vpop.permute.xlu1 %3643  ;;  %v3772_v17 = vld [vmem:[#allocation3 + $0x30] sm:$0x33]  ;;  %v3841_v63 = vsel %vm2176_vm5, %v6302_v10, 0  ;;  %vm8834_vm13 = vmmov %vm8833_vm12 }
 0xa10   : > { %3724 = vst [vmem:[#allocation3 + $0x24] sm:$0x33] %v3720_v37  ;;  %v3646_v29 = vrot.slane %v3644_v28, 4  ;;  %v6009_v9 = vcombine.high %v3772_v17, %v3772_v17  ;;  %v6008_v22 = vcombine.low %v3772_v17, %v3772_v17  ;;  %6202 = vmatpush3.bf16.msra.mxu1 %v3841_v63  ;;  %v6544_v37 = vld [vmem:[%s6709_s29 + $0x28] sm:$0xff] }
 0xa11   : > { %6203 = vmatprep.subr.bf16.mxu1 %v6581_v51 }
 0xa12   : > { %v3647_v14 = vsel %vm8823_vm2, %v3645_v15, %v3646_v29  ;;  %v3649_v48 = vsel %vm8824_vm9, %v3644_v28, %v3646_v29  ;;  %v3697_v6 = vpop.permute.xlu0 %3696  ;;  %6011 = vmatprep.subr.msk.bf16.mxu0 %vm2176_vm5, %v6009_v9  ;;  %v3835_v52 = vsel %vm2176_vm5, %v6008_v22, 0  ;;  %vm8829_vm5 = vmmov %vm8823_vm2  ;;  %vm8835_vm9 = vcmask 900096  }
 0xa13   : > { %v3648_v43 = vsel %vm8825_vm11, %v3642_v32, %v3647_v14  ;;  %3653 = vst [vmem:[#allocation3 + $0x14] sm:$0x3] %v3649_v48  ;;  %v3700_v31 = vrot.slane %v3697_v6, 4  ;;  %3854 = vmatpush1.bf16.msra.mxu0 %v3835_v52  ;;  %v3699_v20 = vpop.permute.xlu1 %3698  ;;  %vm8836_vm11 = vmmov %vm8835_vm9  ;;  %v3944_v15 = vmul.f32 2.0, %v6544_v37 }
 0xa14   : > { %3652 = vst [vmem:[#allocation3 + $0xc] sm:$0x33] %v3648_v43  ;;  %v3701_v55 = vrot.slane %v3699_v20, 4 }
 0xa16   : > { %v3702_v8 = vsel %vm8826_vm14, %v3700_v31, %v3701_v55  ;;  %v3704_v50 = vsel %vm8827_vm15, %v3699_v20, %v3701_v55  ;;  %v3733_v56 = vpop.permute.xlu0 %3732  ;;  %vm8838_vm14 = vmmov %vm8823_vm2 }
 0xa17   : > { %v3703_v13 = vsel %vm8828_vm1, %v3697_v6, %v3702_v8  ;;  %3708 = vst [vmem:[#allocation3 + $0x20] sm:$0xc] %v3704_v50  ;;  %v3736_v38 = vrot.slane %v3733_v56, 4  ;;  %v3735_v42 = vpop.permute.xlu1 %3734 }
 0xa18   : > { %3707 = vst [vmem:[#allocation3 + $0x18] sm:$0xcc] %v3703_v13  ;;  %v3737_v12 = vrot.slane %v3735_v42, 4 }
 0xa1a   : > { %v3738_v62 = vsel %vm8829_vm5, %v3736_v38, %v3737_v12  ;;  %v3740_v47 = vsel %vm8830_vm3, %v3735_v42, %v3737_v12  ;;  %v3625_v45 = vpop.permute.xlu0 %3624  ;;  %vm8843_vm5 = vmmov %vm8823_vm2 }
 0xa1b   : > { %v3739_v36 = vsel %vm8831_vm4, %v3733_v56, %v3738_v62  ;;  %3744 = vst [vmem:[#allocation3 + $0x2c] sm:$0xc] %v3740_v47  ;;  %v3628_v4 = vrot.slane %v3625_v45, 4  ;;  %v3627_v30 = vpop.permute.xlu1 %3626  ;;  %v6545_v47 = vld [vmem:[%s6709_s29] sm:$0xff] }
 0xa1c   : > { %3743 = vst [vmem:[#allocation3 + $0x24] sm:$0xcc] %v3739_v36  ;;  %v3629_v23 = vrot.slane %v3627_v30, 4  ;;  %v6546_v36 = vld [vmem:[%s6709_s29 + $0x8] sm:$0xff] }
 0xa1e   : > { %v3630_v53 = vsel %vm8832_vm7, %v3628_v4, %v3629_v23  ;;  %v3632_v27 = vsel %vm8833_vm12, %v3627_v30, %v3629_v23  ;;  %v3661_v24 = vpop.permute.xlu0 %3660  ;;  %v3940_v4 = vmul.f32 2.0, %v6546_v36  ;;  %vm8847_vm7 = vmmov %vm8823_vm2 }
 0xa1f   : > { %v3631_v46 = vsel %vm8834_vm13, %v3625_v45, %v3630_v53  ;;  %3636 = vst [vmem:[#allocation3 + $0x8] sm:$0xc] %v3632_v27  ;;  %v3664_v21 = vrot.slane %v3661_v24, 4  ;;  %v3663_v18 = vpop.permute.xlu1 %3662  ;;  %v3939_v45 = vmul.f32 2.0, %v6545_v47 }
 0xa20   : > { %3635 = vst [vmem:[#allocation3] sm:$0xcc] %v3631_v46  ;;  %v3665_v26 = vrot.slane %v3663_v18, 4 }
 0xa22   : > { %v3666_v44 = vsel %vm8823_vm2, %v3664_v21, %v3665_v26  ;;  %v3668_v11 = vsel %vm8835_vm9, %v3663_v18, %v3665_v26  ;;  %v6304_v39 = vld [vmem:[#allocation3 + $0x20] ss:$12 sps:$4 sm:$0xff]  }
 0xa23   : > { %v3667_v5 = vsel %vm8836_vm11, %v3661_v24, %v3666_v44  ;;  %3672 = vst [vmem:[#allocation3 + $0x14] sm:$0xc] %v3668_v11  ;;  %v6305_v7 = vld [vmem:[#allocation3 + $0x1c] ss:$12 sps:$4 sm:$0xff]   ;;  %v6307_v49 = vld [vmem:[#allocation3 + $0x18] ss:$12 sps:$4 sm:$0xff]   ;;  %6204 = vmatpush3.bf16.msra.mxu1 %v6304_v39 }
 0xa24   : > { %3671 = vst [vmem:[#allocation3 + $0xc] sm:$0xcc] %v3667_v5  ;;  %3855 = vmatprep.subr.bf16.mxu0 %v6305_v7  ;;  %6205 = vmatprep.subr.bf16.mxu1 %v6581_v51  ;;  %vm8851_vm11 = vcmask 744448  }
 0xa25   : > { %3856 = vmatpush1.bf16.msra.mxu0 %v6307_v49 }
 0xa2a   : > { %v6308_v41 = vld [vmem:[#allocation3 + $0x8] ss:$12 sps:$4 sm:$0xff]  }
 0xa2b   : > { %v6309_v25 = vld [vmem:[#allocation3 + $0x4] ss:$12 sps:$4 sm:$0xff]   ;;  %v6311_v58 = vld [vmem:[#allocation3] ss:$12 sps:$4 sm:$0xff]   ;;  %6206 = vmatpush3.bf16.msra.mxu1 %v6308_v41  ;;  %v3429_v34 = vpop.permute.xlu0 %3428 }
 0xa2c   : > { %3857 = vmatprep.subr.bf16.mxu0 %v6309_v25  ;;  %v3434_v54 = vpop.permute.xlu1 %3433 }
 0xa2d   : > { %3858 = vmatpush1.bf16.msra.mxu0 %v6311_v58  ;;  %v6548_v58 = vld [vmem:[%s6709_s29 + $0x20] sm:$0xff] }
 0xa2e   : > { %6208 = vmatmul.mubr.msk.bf16.vlgmr.msra.gmra.mxu1 %vm3481_vm0, %v6312_v2 }
 0xa2f   : > { %5071 = vmatprep.mubr.bf16.mxu1 %v8774_v35  ;;  %v3779_v43 = vpop.permute.xlu0 %3778 }
 0xa30   : > { %6012 = vmatmul.mubr.msk.bf16.vlgmr.msra.gmra.mxu0 %vm3481_vm0, %v6312_v2  ;;  %v3784_v42 = vpop.permute.xlu1 %3783  ;;  %v6547_v2 = vld [vmem:[%s6709_s29 + $0x18] sm:$0xff]  ;;  %vm8837_vm0 = vcmask 154624   ;;  %s8845_s29 = smov 91  }
 0xa31   : > { %v3942_v25 = vmul.f32 2.0, %v6547_v2  ;;  %vm8839_vm15 = vmmov %vm8837_vm0 }
 0xa32   : > { %vm8842_vm1 = vmmov %vm8837_vm0 }
 0xa33   : > { %vm8844_vm3 = vmmov %vm8837_vm0 }
 0xa34   : > { %vm8846_vm4 = vmmov %vm8837_vm0 }
 0xa35   : > { %vm8848_vm12 = vmmov %vm8837_vm0 }
 0xa36   : > { %vm8849_vm13 = vmmov %vm8837_vm0 }
 0xa37   : > { %vm8850_vm9 = vmmov %vm8837_vm0 }
 0xa71   : > { %v3571_v19 = vpop.f32.mrf.mxu1 }
 0xa72   : > { %v3572_v0 = vadd.f32 %v3571_v19, %v3429_v34 }
 0xa73   : > { %v6199_v61 = vpop.f32.mrf.mxu1 }
 0xa74   : > { %v3580_v1 = vmax.f32 %v3572_v0, 0.0 }
 0xa75   : > { %v3574_v59 = vpop.f32.mrf.mxu1 }
 0xa76   : > { %v3586_v16 = vmul.f32 %v3580_v1, %v8771_v3  ;;  %v3575_v32 = vadd.f32 %v3574_v59, %v3434_v54  ;;  %v3528_v63 = vpop.f32.mrf.mxu0 }
 0xa77   : > { %v6200_v10 = vpop.f32.mrf.mxu1  ;;  %v3529_v48 = vadd.f32 %v3528_v63, %v3429_v34  ;;  %v587_v63 = vld [vmem:[%s8008_s1 + $0x10] sm:$0xff] }
 0xa78   : > { %v3947_v28 = vadd.f32 %v3941_v57, %v3586_v16  ;;  %v3583_v17 = vmax.f32 %v3575_v32, 0.0  ;;  %v3530_v22 = vpop.f32.mrf.mxu0 }
 0xa79   : > { %v3531_v6 = vadd.f32 %v3530_v22, %v3429_v34  ;;  %v3578_v31 = vmax.f32 %v3529_v48, 0.0  ;;  %v3943_v34 = vmul.f32 2.0, %v6548_v58 }
 0xa7a   : > { %v3589_v29 = vmul.f32 %v3583_v17, %v8771_v3  ;;  %v3532_v14 = vpop.f32.mrf.mxu0 }
 0xa7b   : > { %v3579_v20 = vmax.f32 %v3531_v6, 0.0  ;;  %v3533_v50 = vadd.f32 %v3532_v14, %v3434_v54  ;;  %v3584_v30 = vmul.f32 %v3578_v31, %v8767_v33 }
 0xa7c   : > { %v3950_v9 = vadd.f32 %v3944_v15, %v3589_v29  ;;  %v3534_v52 = vpop.f32.mrf.mxu0 }
 0xa7d   : > { %v3535_v56 = vadd.f32 %v3534_v52, %v3434_v54  ;;  %v3585_v23 = vmul.f32 %v3579_v20, %v8766_v40  ;;  %v3581_v26 = vmax.f32 %v3533_v50, 0.0  ;;  %v3945_v19 = vadd.f32 %v3939_v45, %v3584_v30  ;;  %v590_v20 = vld [vmem:[%s8008_s1 + $0x28] sm:$0xff] }
 0xa7f   : > { %v3582_v44 = vmax.f32 %v3535_v56, 0.0  ;;  %v3946_v60 = vadd.f32 %v3940_v4, %v3585_v23  ;;  %v3587_v59 = vmul.f32 %v3581_v26, %v8767_v33  ;;  %v6137_v56 = vpack.c.bf16 %v590_v20, %v590_v20 }
 0xa81   : > { %v3588_v16 = vmul.f32 %v3582_v44, %v8766_v40  ;;  %v3948_v48 = vadd.f32 %v3942_v25, %v3587_v59 }
 0xa83   : > { %v3949_v6 = vadd.f32 %v3943_v34, %v3588_v16 }
 0xaee   : > { %v3920_v55 = vpop.f32.mrf.mxu1 }
 0xaef   : > { %v3921_v8 = vadd.f32 %v3920_v55, %v3779_v43  ;;  %v585_v55 = vld [vmem:[%s8008_s1] sm:$0xff] }
 0xaf0   : > { %v3877_v13 = vpop.f32.mrf.mxu0  ;;  %v6209_v38 = vpop.f32.mrf.mxu1 }
 0xaf1   : > { %v3929_v12 = vmax.f32 %v3921_v8, 0.0  ;;  %v3878_v62 = vadd.f32 %v3877_v13, %v3779_v43  ;;  %v586_v8 = vld [vmem:[%s8008_s1 + $0x8] sm:$0xff]  ;;  %v588_v38 = vld [vmem:[%s8008_s1 + $0x18] sm:$0xff] }
 0xaf2   : > { %v3879_v53 = vpop.f32.mrf.mxu0  ;;  %v3923_v27 = vpop.f32.mrf.mxu1  ;;  %v6134_v13 = vpack.c.bf16 %v586_v8, %v585_v55 }
 0xaf3   : > { %v3935_v24 = vmul.f32 %v3929_v12, %v8771_v3  ;;  %v3927_v46 = vmax.f32 %v3878_v62, 0.0  ;;  %v3880_v21 = vadd.f32 %v3879_v53, %v3779_v43  ;;  %v3924_v18 = vadd.f32 %v3923_v27, %v3784_v42 }
 0xaf4   : > { %v3881_v11 = vpop.f32.mrf.mxu0  ;;  %v6210_v39 = vpop.f32.mrf.mxu1 }
 0xaf5   : > { %v3953_v5 = vadd.f32 %v3947_v28, %v3935_v24  ;;  %v3933_v7 = vmul.f32 %v3927_v46, %v8767_v33  ;;  %v3928_v49 = vmax.f32 %v3880_v21, 0.0  ;;  %v3932_v41 = vmax.f32 %v3924_v18, 0.0 }
 0xaf6   : > { %v3882_v0 = vadd.f32 %v3881_v11, %v3784_v42  ;;  %v3883_v61 = vpop.f32.mrf.mxu0 }
 0xaf7   : > { %v6131_v57 = vpack.c.bf16 %v3953_v5, %v3953_v5  ;;  %v3934_v1 = vmul.f32 %v3928_v49, %v8766_v40  ;;  %v3938_v54 = vmul.f32 %v3932_v41, %v8771_v3  ;;  %v3884_v10 = vadd.f32 %v3883_v61, %v3784_v42  ;;  %v589_v42 = vld [vmem:[%s8008_s1 + $0x20] sm:$0xff]  ;;  %s561_s1 = scalar_lea.vmem %s8611_s16, %s6696_s23 }
 0xaf8   : > { %v3930_v32 = vmax.f32 %v3882_v0, 0.0  ;;  %v3951_v37 = vadd.f32 %v3945_v19, %v3933_v7  ;;  %v6136_v12 = vpack.c.bf16 %v589_v42, %v588_v38  ;;  %v4678_v42 = vld [vmem:[%s8608_s13 + $0x8] sm:$0xff] }
 0xaf9   : > { %v3952_v15 = vadd.f32 %v3946_v60, %v3934_v1  ;;  %v3956_v28 = vadd.f32 %v3950_v9, %v3938_v54  ;;  %3975 = vrot.lane.b32.xlu1 %v6131_v57, %s8773_s30  ;;  %v3931_v29 = vmax.f32 %v3884_v10, 0.0  ;;  %v6135_v9 = vpack.c.bf16 %v587_v63, %v587_v63 }
 0xafa   : > { %v3936_v17 = vmul.f32 %v3930_v32, %v8767_v33 }
 0xafb   : > { %v6130_v22 = vpack.c.bf16 %v3952_v15, %v3951_v37  ;;  %v6133_v14 = vpack.c.bf16 %v3956_v28, %v3956_v28  ;;  %v3937_v52 = vmul.f32 %v3931_v29, %v8766_v40 }
 0xafc   : > { %v3954_v43 = vadd.f32 %v3948_v48, %v3936_v17 }
 0xafd   : > { %3973 = vrot.lane.b32.xlu0 %v6130_v22, %s8773_s30  ;;  %3979 = vrot.lane.b32.xlu1 %v6133_v14, %s8773_s30  ;;  %v3955_v31 = vadd.f32 %v3949_v6, %v3937_v52  ;;  %v8174_v22 = vld [vmem:[%s8607_s12 + $0x4] ss:$12 sps:$4 sm:$0xff]  }
 0xafe   : > { %5028 = vmatprep.mubr.bf16.mxu0 %v8174_v22 }
 0xaff   : > { %v6132_v50 = vpack.c.bf16 %v3955_v31, %v3954_v43 }
 0xb01   : > { %4297 = vrot.lane.b32.xlu1 %v6135_v9, %s8773_s30  ;;  %3977 = vrot.lane.b32.xlu0 %v6132_v50, %s8773_s30 }
 0xb05   : > { %4301 = vrot.lane.b32.xlu1 %v6137_v56, %s8773_s30  ;;  %4295 = vrot.lane.b32.xlu0 %v6134_v13, %s8773_s30  ;;  %v4677_v56 = vld [vmem:[%s8608_s13] sm:$0xff] }
 0xb09   : > { %4299 = vrot.lane.b32.xlu0 %v6136_v12, %s8773_s30 }
 0xb6b   : > { %v3976_v62 = vpop.permute.xlu1 %3975 }
 0xb6c   : > { %v3982_v36 = vrot.slane %v3976_v62, 4 }
 0xb6f   : > { %v3974_v47 = vpop.permute.xlu0 %3973  ;;  %v3980_v45 = vpop.permute.xlu1 %3979 }
 0xb70   : > { %v3981_v4 = vrot.slane %v3974_v47, 4  ;;  %v3984_v18 = vrot.slane %v3980_v45, 4 }
 0xb72   : > { %v3985_v30 = vsel %vm8837_vm0, %v3981_v4, %v3974_v47  ;;  %v3986_v23 = vsel %vm8838_vm14, %v3981_v4, %v3982_v36  ;;  %vm8852_vm0 = vcmask 752640   ;;  %vm8853_vm14 = vcmask 883712  }
 0xb73   : > { %v3987_v53 = vsel %vm8839_vm15, %v3986_v23, %v3976_v62  ;;  %3995 = vst.msk [vmem:[#allocation2] sm:$0xff] %vm6725_vm6, %v3985_v30  ;;  %v4298_v24 = vpop.permute.xlu1 %4297  ;;  %v3978_v21 = vpop.permute.xlu0 %3977  ;;  %vm8854_vm15 = vcmask 891904  }
 0xb74   : > { %3996 = vst.msk [vmem:[#allocation2 + $0x8] sm:$0xff] %vm6736_vm8, %v3987_v53  ;;  %v3983_v26 = vrot.slane %v3978_v21, 4  ;;  %v4304_v39 = vrot.slane %v4298_v24, 4 }
 0xb76   : > { %v3988_v44 = vsel %vm8842_vm1, %v3983_v26, %v3978_v21  ;;  %v3989_v11 = vsel %vm8843_vm5, %v3983_v26, %v3984_v18  ;;  %vm8855_vm1 = vcmask 900096   ;;  %vm8856_vm5 = vcmask 1031168  }
 0xb77   : > { %v3990_v5 = vsel %vm8844_vm3, %v3989_v11, %v3980_v45  ;;  %3997 = vst.msk [vmem:[#allocation2 + $0x10] sm:$0xff] %vm6725_vm6, %v3988_v44  ;;  %v4296_v7 = vpop.permute.xlu0 %4295  ;;  %v4302_v49 = vpop.permute.xlu1 %4301  ;;  %vm8857_vm3 = vcmask 1039360  }
 0xb78   : > { %3998 = vst.msk [vmem:[#allocation2 + $0x18] sm:$0xff] %vm6736_vm8, %v3990_v5  ;;  %v4303_v41 = vrot.slane %v4296_v7, 4  ;;  %v4306_v19 = vrot.slane %v4302_v49, 4 }
 0xb7a   : > { %v8042_v2 = vld [vmem:[#allocation2] sm:$0xff]  ;;  %v4307_v58 = vsel %vm8846_vm4, %v4303_v41, %v4296_v7  ;;  %v4308_v34 = vsel %vm8847_vm7, %v4303_v41, %v4304_v39  ;;  %vm8858_vm4 = vmmov %vm8823_vm2 }
 0xb7b   : > { %4219 = vrot.lane.b32.xlu0 %v8042_v2, %s8845_s29  ;;  %v8046_v25 = vld [vmem:[#allocation2 + $0x8] sm:$0xff]  ;;  %v4309_v61 = vsel %vm8848_vm12, %v4308_v34, %v4298_v24  ;;  %v4300_v60 = vpop.permute.xlu0 %4299  ;;  %4317 = vst.msk [vmem:[#allocation2] sm:$0xff] %vm6725_vm6, %v4307_v58  ;;  %vm8859_vm7 = vmmov %vm8823_vm2 }
 0xb7c   : > { %v4000_v0 = vld [vmem:[#allocation2 + $0x8] sm:$0xf]  ;;  %4221 = vrot.lane.b32.xlu1 %v8046_v25, %s8845_s29  ;;  %v4305_v57 = vrot.slane %v4300_v60, 4  ;;  %vm8860_vm12 = vmmov %vm8851_vm11 }
 0xb7d   : > { %4004 = vst [vmem:[#allocation3 + $0x8] sm:$0xf] %v4000_v0  ;;  %4318 = vst.msk [vmem:[#allocation2 + $0x8] sm:$0xff] %vm6736_vm8, %v4309_v61 }
 0xb7e   : > { %v8059_v1 = vld [vmem:[#allocation2 + $0x10] sm:$0xff]  ;;  %v4310_v54 = vsel %vm8849_vm13, %v4305_v57, %v4300_v60  ;;  %v4311_v59 = vsel %vm8823_vm2, %v4305_v57, %v4306_v19  ;;  %vm8861_vm13 = vmmov %vm8851_vm11 }
 0xb7f   : > { %4185 = vrot.lane.b32.xlu0 %v8042_v2, %s8785_s17  ;;  %v8065_v16 = vld [vmem:[#allocation2 + $0x18] sm:$0xff]  ;;  %v4312_v32 = vsel %vm8850_vm9, %v4311_v59, %v4302_v49  ;;  %4319 = vst.msk [vmem:[#allocation2 + $0x10] sm:$0xff] %vm6725_vm6, %v4310_v54  ;;  %vm8862_vm9 = vmmov %vm8851_vm11 }
 0xb80   : > { %4187 = vrot.lane.b32.xlu1 %v8046_v25, %s8785_s17  ;;  %v4002_v10 = vld [vmem:[#allocation2 + $0x18] sm:$0xf] }
 0xb81   : > { %4320 = vst.msk [vmem:[#allocation2 + $0x18] sm:$0xff] %vm6736_vm8, %v4312_v32  ;;  %4006 = vst [vmem:[#allocation3 + $0x14] sm:$0xf] %v4002_v10 }
 0xb82   : > { %v8074_v37 = vld [vmem:[#allocation2] sm:$0xff] }
 0xb83   : > { %4151 = vrot.lane.b32.xlu0 %v8042_v2, %s8784_s27 }
 0xb84   : > { %4153 = vrot.lane.b32.xlu1 %v8046_v25, %s8784_s27  ;;  %v4322_v15 = vld [vmem:[#allocation2 + $0x8] sm:$0xf] }
 0xb85   : > { %4326 = vst [vmem:[#allocation3 + $0xe0] sm:$0xf] %v4322_v15  ;;  %v4500_v29 = vld [vmem:[#allocation2 + $0x8] sm:$0xff] }
 0xb86   : > { %v8080_v28 = vld [vmem:[#allocation2 + $0x10] sm:$0xff] }
 0xb87   : > { %4117 = vrot.lane.b32.xlu0 %v8042_v2, %s8783_s20 }
 0xb88   : > { %4119 = vrot.lane.b32.xlu1 %v8046_v25, %s8783_s20  ;;  %v4324_v17 = vld [vmem:[#allocation2 + $0x18] sm:$0xf] }
 0xb89   : > { %4328 = vst [vmem:[#allocation3 + $0xec] sm:$0xf] %v4324_v17  ;;  %v4502_v63 = vld [vmem:[#allocation2 + $0x18] sm:$0xff] }
 0xb8b   : > { %4083 = vrot.lane.b32.xlu0 %v8042_v2, %s8788_s24 }
 0xb8c   : > { %4085 = vrot.lane.b32.xlu1 %v8046_v25, %s8788_s24 }
 0xb8f   : > { %4049 = vrot.lane.b32.xlu0 %v8042_v2, %s8787_s19 }
 0xb90   : > { %4051 = vrot.lane.b32.xlu1 %v8046_v25, %s8787_s19 }
 0xb93   : > { %4015 = vrot.lane.b32.xlu0 %v8042_v2, %s8786_s18 }
 0xb94   : > { %4017 = vrot.lane.b32.xlu1 %v8046_v25, %s8786_s18 }
 0xb97   : > { %4223 = vrot.lane.b32.xlu0 %v8059_v1, %s8845_s29 }
 0xb98   : > { %4225 = vrot.lane.b32.xlu1 %v8065_v16, %s8845_s29 }
 0xb9b   : > { %4189 = vrot.lane.b32.xlu0 %v8059_v1, %s8785_s17 }
 0xb9c   : > { %4191 = vrot.lane.b32.xlu1 %v8065_v16, %s8785_s17 }
 0xb9f   : > { %4155 = vrot.lane.b32.xlu0 %v8059_v1, %s8784_s27 }
 0xba0   : > { %4157 = vrot.lane.b32.xlu1 %v8065_v16, %s8784_s27 }
 0xba3   : > { %4121 = vrot.lane.b32.xlu0 %v8059_v1, %s8783_s20 }
 0xba4   : > { %4123 = vrot.lane.b32.xlu1 %v8065_v16, %s8783_s20 }
 0xba7   : > { %4087 = vrot.lane.b32.xlu0 %v8059_v1, %s8788_s24 }
 0xba8   : > { %4089 = vrot.lane.b32.xlu1 %v8065_v16, %s8788_s24 }
 0xbab   : > { %4053 = vrot.lane.b32.xlu0 %v8059_v1, %s8787_s19 }
 0xbac   : > { %4055 = vrot.lane.b32.xlu1 %v8065_v16, %s8787_s19 }
 0xbaf   : > { %4019 = vrot.lane.b32.xlu0 %v8059_v1, %s8786_s18 }
 0xbb0   : > { %4021 = vrot.lane.b32.xlu1 %v8065_v16, %s8786_s18 }
 0xbb3   : > { %4507 = vrot.lane.b32.xlu0 %v8074_v37, %s8785_s17 }
 0xbb4   : > { %4509 = vrot.lane.b32.xlu1 %v4500_v29, %s8785_s17 }
 0xbb7   : > { %4473 = vrot.lane.b32.xlu0 %v8074_v37, %s8784_s27 }
 0xbb8   : > { %4475 = vrot.lane.b32.xlu1 %v4500_v29, %s8784_s27 }
 0xbbb   : > { %4439 = vrot.lane.b32.xlu0 %v8074_v37, %s8783_s20 }
 0xbbc   : > { %4441 = vrot.lane.b32.xlu1 %v4500_v29, %s8783_s20 }
 0xbbf   : > { %4405 = vrot.lane.b32.xlu0 %v8074_v37, %s8788_s24 }
 0xbc0   : > { %4407 = vrot.lane.b32.xlu1 %v4500_v29, %s8788_s24 }
 0xbc3   : > { %4371 = vrot.lane.b32.xlu0 %v8074_v37, %s8787_s19 }
 0xbc4   : > { %4373 = vrot.lane.b32.xlu1 %v4500_v29, %s8787_s19 }
 0xbc7   : > { %4337 = vrot.lane.b32.xlu0 %v8074_v37, %s8786_s18 }
 0xbc8   : > { %4339 = vrot.lane.b32.xlu1 %v4500_v29, %s8786_s18 }
 0xbcb   : > { %4511 = vrot.lane.b32.xlu0 %v8080_v28, %s8785_s17 }
 0xbcc   : > { %4513 = vrot.lane.b32.xlu1 %v4502_v63, %s8785_s17 }
 0xbcf   : > { %4477 = vrot.lane.b32.xlu0 %v8080_v28, %s8784_s27 }
 0xbd0   : > { %4479 = vrot.lane.b32.xlu1 %v4502_v63, %s8784_s27 }
 0xbd3   : > { %4443 = vrot.lane.b32.xlu0 %v8080_v28, %s8783_s20 }
 0xbd4   : > { %4445 = vrot.lane.b32.xlu1 %v4502_v63, %s8783_s20 }
 0xbd7   : > { %4409 = vrot.lane.b32.xlu0 %v8080_v28, %s8788_s24 }
 0xbd8   : > { %4411 = vrot.lane.b32.xlu1 %v4502_v63, %s8788_s24 }
 0xbdb   : > { %4375 = vrot.lane.b32.xlu0 %v8080_v28, %s8787_s19 }
 0xbdc   : > { %4377 = vrot.lane.b32.xlu1 %v4502_v63, %s8787_s19 }
 0xbdf   : > { %4341 = vrot.lane.b32.xlu0 %v8080_v28, %s8786_s18 }
 0xbe0   : > { %4343 = vrot.lane.b32.xlu1 %v4502_v63, %s8786_s18 }
 0xbe3   : > { %4253 = vrot.lane.b32.xlu0 %v8042_v2, %s8782_s26 }
 0xbe4   : > { %4255 = vrot.lane.b32.xlu1 %v8046_v25, %s8782_s26 }
 0xbe7   : > { %4257 = vrot.lane.b32.xlu0 %v8059_v1, %s8782_s26 }
 0xbe8   : > { %4259 = vrot.lane.b32.xlu1 %v8065_v16, %s8782_s26 }
 0xbeb   : > { %4575 = vrot.lane.b32.xlu0 %v8074_v37, %s8782_s26 }
 0xbec   : > { %4577 = vrot.lane.b32.xlu1 %v4500_v29, %s8782_s26 }
 0xbed   : > { %v4220_v14 = vpop.permute.xlu0 %4219 }
 0xbee   : > { %v4222_v48 = vpop.permute.xlu1 %4221  ;;  %v4227_v44 = vrot.slane %v4220_v14, 4 }
 0xbef   : > { %v4228_v6 = vrot.slane %v4222_v48, 4  ;;  %4579 = vrot.lane.b32.xlu0 %v8080_v28, %s8782_s26 }
 0xbf0   : > { %4543 = vrot.lane.b32.xlu1 %v4500_v29, %s8845_s29 }
 0xbf1   : > { %v4233_v52 = vsel %vm8851_vm11, %v4222_v48, %v4228_v6  ;;  %v8181_v9 = vpop.permute.xlu0 %4185  ;;  %v4231_v25 = vsel %vm8858_vm4, %v4227_v44, %v4228_v6  ;;  %vm8863_vm11 = vmmov %vm8823_vm2 }
 0xbf2   : > { %4242 = vst [vmem:[#allocation3 + $0xb0] sm:$0xf] %v4233_v52  ;;  %v4188_v43 = vpop.permute.xlu1 %4187  ;;  %v4193_v7 = vrot.slane %v8181_v9, 4  ;;  %v4232_v61 = vsel %vm8861_vm13, %v4220_v14, %v4231_v25 }
 0xbf3   : > { %v4194_v31 = vrot.slane %v4188_v43, 4  ;;  %4541 = vrot.lane.b32.xlu0 %v8074_v37, %s8845_s29 }
 0xbf4   : > { %4581 = vrot.lane.b32.xlu1 %v4502_v63, %s8782_s26 }
 0xbf5   : > { %v4199_v20 = vsel %vm8852_vm0, %v4188_v43, %v4194_v31  ;;  %v8187_v55 = vpop.permute.xlu0 %4151  ;;  %v4197_v60 = vsel %vm8823_vm2, %v4193_v7, %v4194_v31 }
 0xbf6   : > { %4208 = vst [vmem:[#allocation3 + $0x98] sm:$0xf] %v4199_v20  ;;  %v8189_v8 = vpop.permute.xlu1 %4153  ;;  %v4159_v16 = vrot.slane %v8187_v55, 4 }
 0xbf7   : > { %v4160_v50 = vrot.slane %v8189_v8, 4  ;;  %4545 = vrot.lane.b32.xlu0 %v8080_v28, %s8845_s29 }
 0xbf8   : > { %4547 = vrot.lane.b32.xlu1 %v4502_v63, %s8845_s29 }
 0xbf9   : > { %v4165_v13 = vsel %vm8853_vm14, %v8189_v8, %v4160_v50  ;;  %v8200_v38 = vpop.permute.xlu0 %4117  ;;  %vm8864_vm14 = vmmov %vm8852_vm0 }
 0xbfa   : > { %4174 = vst [vmem:[#allocation3 + $0x80] sm:$0xf] %v4165_v13  ;;  %v8205_v12 = vpop.permute.xlu1 %4119  ;;  %v4198_v14 = vsel %vm8864_vm14, %v8181_v9, %v4197_v60  ;;  %v4125_v48 = vrot.slane %v8200_v38, 4 }
 0xbfb   : > { %v4126_v62 = vrot.slane %v8205_v12, 4  ;;  %4681 = vperm.xlu0 %6269, %v4677_v56  }
 0xbfc   : > { %4686 = vperm.xlu1 %6270, %v4678_v42  }
 0xbfd   : > { %v4131_v47 = vsel %vm8854_vm15, %v8205_v12, %v4126_v62  ;;  %v8210_v45 = vpop.permute.xlu0 %4083  ;;  %vm8865_vm15 = vmmov %vm8852_vm0 }
 0xbfe   : > { %4140 = vst [vmem:[#allocation3 + $0x68] sm:$0xf] %v4131_v47  ;;  %v8212_v36 = vpop.permute.xlu1 %4085 }
 0xbff   : > { %v4092_v4 = vrot.slane %v8212_v36, 4 }
 0xc01   : > { %v4097_v30 = vsel %vm8855_vm1, %v8212_v36, %v4092_v4  ;;  %v8219_v23 = vpop.permute.xlu0 %4049  ;;  %vm8866_vm1 = vmmov %vm8823_vm2  ;;  %vm8873_vm2 = vcmask 891904  }
 0xc02   : > { %4106 = vst [vmem:[#allocation3 + $0x50] sm:$0xf] %v4097_v30  ;;  %v8221_v53 = vpop.permute.xlu1 %4051  ;;  %v4163_v31 = vsel %vm8866_vm1, %v4159_v16, %v4160_v50  ;;  %v4091_v50 = vrot.slane %v8210_v45, 4  ;;  %vm8872_vm13 = vmmov %vm8866_vm1 }
 0xc03   : > { %v4058_v24 = vrot.slane %v8221_v53, 4 }
 0xc05   : > { %v4063_v21 = vsel %vm8856_vm5, %v8221_v53, %v4058_v24  ;;  %v8228_v18 = vpop.permute.xlu0 %4015  ;;  %vm8867_vm5 = vmmov %vm8866_vm1 }
 0xc06   : > { %4072 = vst [vmem:[#allocation3 + $0x38] sm:$0xf] %v4063_v21  ;;  %v8230_v26 = vpop.permute.xlu1 %4017 }
 0xc07   : > { %v4024_v11 = vrot.slane %v8230_v26, 4 }
 0xc09   : > { %v4029_v39 = vsel %vm8857_vm3, %v8230_v26, %v4024_v11  ;;  %v4224_v5 = vpop.permute.xlu0 %4223  ;;  %vm8868_vm3 = vcmask 883712  }
 0xc0a   : > { %4038 = vst [vmem:[#allocation3 + $0x20] sm:$0xf] %v4029_v39  ;;  %v4229_v49 = vrot.slane %v4224_v5, 4  ;;  %v4226_v41 = vpop.permute.xlu1 %4225  ;;  %vm8869_vm4 = vmmov %vm8868_vm3 }
 0xc0b   : > { %v4230_v58 = vrot.slane %v4226_v41, 4  ;;  %v4164_v9 = vsel %vm8869_vm4, %v8187_v55, %v4163_v31 }
 0xc0d   : > { %v4234_v34 = vsel %vm8859_vm7, %v4229_v49, %v4230_v58  ;;  %v4236_v19 = vsel %vm8860_vm12, %v4226_v41, %v4230_v58  ;;  %v4190_v0 = vpop.permute.xlu0 %4189  ;;  %vm8870_vm7 = vmmov %vm8866_vm1 }
 0xc0e   : > { %v4235_v57 = vsel %vm8862_vm9, %v4224_v5, %v4234_v34  ;;  %4244 = vst [vmem:[#allocation3 + $0xbc] sm:$0xf] %v4236_v19  ;;  %v4195_v54 = vrot.slane %v4190_v0, 4  ;;  %v4192_v59 = vpop.permute.xlu1 %4191  ;;  %v4129_v47 = vsel %vm8870_vm7, %v4125_v48, %v4126_v62  ;;  %vm8871_vm12 = vmmov %vm8868_vm3  ;;  %v4057_v62 = vrot.slane %v8219_v23, 4 }
 0xc0f   : > { %v4196_v32 = vrot.slane %v4192_v59, 4  ;;  %v6047_v10 = vcombine.high %v4232_v61, %v4235_v57  ;;  %v6046_v15 = vcombine.low %v4232_v61, %v4235_v57  ;;  %vm8874_vm9 = vmmov %vm8873_vm2  ;;  %vm8883_vm7 = vcmask 1031168  }
 0xc10   : > { %v4130_v55 = vsel %vm8874_vm9, %v8200_v38, %v4129_v47 }
 0xc11   : > { %v4200_v17 = vsel %vm8863_vm11, %v4195_v54, %v4196_v32  ;;  %v4202_v29 = vsel %vm8852_vm0, %v4192_v59, %v4196_v32  ;;  %v4156_v63 = vpop.permute.xlu0 %4155  ;;  %4996 = vmatprep.subr.bf16.mxu0 %v6047_v10  ;;  %vm8875_vm11 = vmmov %vm8873_vm2 }
 0xc12   : > { %v4201_v6 = vsel %vm8865_vm15, %v4190_v0, %v4200_v17  ;;  %4210 = vst [vmem:[#allocation3 + $0xa4] sm:$0xf] %v4202_v29  ;;  %v4161_v52 = vrot.slane %v4156_v63, 4  ;;  %v4158_v43 = vpop.permute.xlu1 %4157  ;;  %4997 = vmatpush1.bf16.msra.mxu0 %v6046_v15  ;;  %vm8876_vm0 = vmmov %vm8866_vm1  ;;  %vm8878_vm15 = vcmask 900096   ;;  %v4023_v15 = vrot.slane %v8228_v18, 4 }
 0xc13   : > { %v4162_v20 = vrot.slane %v4158_v43, 4  ;;  %v6044_v8 = vcombine.high %v4198_v14, %v4201_v6  ;;  %v6043_v56 = vcombine.low %v4198_v14, %v4201_v6  ;;  %v4095_v0 = vsel %vm8876_vm0, %v4091_v50, %v4092_v4  ;;  %vm8877_vm14 = vmmov %vm8876_vm0 }
 0xc14   : > { %vm8879_vm1 = vmmov %vm8878_vm15 }
 0xc15   : > { %v4166_v13 = vsel %vm8867_vm5, %v4161_v52, %v4162_v20  ;;  %v4168_v42 = vsel %vm8868_vm3, %v4158_v43, %v4162_v20  ;;  %v4122_v12 = vpop.permute.xlu0 %4121  ;;  %4998 = vmatprep.subr.bf16.mxu0 %v6044_v8  ;;  %v4096_v16 = vsel %vm8879_vm1, %v8210_v45, %v4095_v0  ;;  %vm8880_vm5 = vmmov %vm8876_vm0 }
 0xc16   : > { %v4167_v30 = vsel %vm8871_vm12, %v4156_v63, %v4166_v13  ;;  %4176 = vst [vmem:[#allocation3 + $0x8c] sm:$0xf] %v4168_v42  ;;  %v4127_v21 = vrot.slane %v4122_v12, 4  ;;  %v4124_v44 = vpop.permute.xlu1 %4123  ;;  %4999 = vmatpush1.bf16.msra.mxu0 %v6043_v56  ;;  %v4061_v32 = vsel %vm8880_vm5, %v4057_v62, %v4058_v24  ;;  %vm8881_vm3 = vmmov %vm8879_vm1  ;;  %vm8892_vm1 = vcmask 752640  }
 0xc17   : > { %v4128_v39 = vrot.slane %v4124_v44, 4  ;;  %v6041_v5 = vcombine.high %v4164_v9, %v4167_v30  ;;  %v6040_v7 = vcombine.low %v4164_v9, %v4167_v30  ;;  %vm8882_vm4 = vmmov %vm8876_vm0 }
 0xc18   : > { %vm8884_vm12 = vmmov %vm8883_vm7 }
 0xc19   : > { %v4132_v49 = vsel %vm8872_vm13, %v4127_v21, %v4128_v39  ;;  %v4134_v41 = vsel %vm8873_vm2, %v4124_v44, %v4128_v39  ;;  %v4088_v25 = vpop.permute.xlu0 %4087  ;;  %5000 = vmatprep.subr.bf16.mxu0 %v6041_v5  ;;  %v4062_v53 = vsel %vm8884_vm12, %v8219_v23, %v4061_v32  ;;  %vm8885_vm13 = vmmov %vm8883_vm7  ;;  %v6026_v39 = vcombine.high %v8042_v2, %v8059_v1 }
 0xc1a   : > { %v4133_v58 = vsel %vm8875_vm11, %v4122_v12, %v4132_v49  ;;  %4142 = vst [vmem:[#allocation3 + $0x74] sm:$0xf] %v4134_v41  ;;  %v4093_v34 = vrot.slane %v4088_v25, 4  ;;  %v4090_v19 = vpop.permute.xlu1 %4089  ;;  %5001 = vmatpush1.bf16.msra.mxu0 %v6040_v7  ;;  %vm8886_vm2 = vmmov %vm8876_vm0  ;;  %vm8888_vm11 = vcmask 1039360   ;;  %v6025_v41 = vcombine.low %v8042_v2, %v8059_v1 }
 0xc1b   : > { %v4094_v61 = vrot.slane %v4090_v19, 4  ;;  %v6038_v60 = vcombine.high %v4130_v55, %v4133_v58  ;;  %v6037_v57 = vcombine.low %v4130_v55, %v4133_v58  ;;  %v4027_v43 = vsel %vm8886_vm2, %v4023_v15, %v4024_v11  ;;  %vm8887_vm9 = vmmov %vm8876_vm0 }
 0xc1c   : > { %vm8889_vm0 = vmmov %vm8888_vm11 }
 0xc1d   : > { %v4098_v54 = vsel %vm8877_vm14, %v4093_v34, %v4094_v61  ;;  %v4100_v59 = vsel %vm8878_vm15, %v4090_v19, %v4094_v61  ;;  %v4054_v38 = vpop.permute.xlu0 %4053  ;;  %5002 = vmatprep.subr.bf16.mxu0 %v6038_v60  ;;  %v4028_v23 = vsel %vm8889_vm0, %v8228_v18, %v4027_v43  ;;  %vm8890_vm14 = vmmov %vm8889_vm0 }
 0xc1e   : > { %v4099_v36 = vsel %vm8881_vm3, %v4088_v25, %v4098_v54  ;;  %4108 = vst [vmem:[#allocation3 + $0x5c] sm:$0xf] %v4100_v59  ;;  %v4059_v4 = vrot.slane %v4054_v38, 4  ;;  %v4056_v10 = vpop.permute.xlu1 %4055  ;;  %5003 = vmatpush1.bf16.msra.mxu0 %v6037_v57  ;;  %vm8891_vm15 = vmmov %vm8886_vm2 }
 0xc1f   : > { %v4060_v17 = vrot.slane %v4056_v10, 4  ;;  %v6035_v29 = vcombine.high %v4096_v16, %v4099_v36  ;;  %v6034_v63 = vcombine.low %v4096_v16, %v4099_v36  ;;  %vm8893_vm5 = vmmov %vm8892_vm1 }
 0xc20   : > { %vm8894_vm3 = vmmov %vm8886_vm2 }
 0xc21   : > { %v4064_v14 = vsel %vm8882_vm4, %v4059_v4, %v4060_v17  ;;  %v4066_v48 = vsel %vm8883_vm7, %v4056_v10, %v4060_v17  ;;  %v4020_v45 = vpop.permute.xlu0 %4019  ;;  %5004 = vmatprep.subr.bf16.mxu0 %v6035_v29  ;;  %vm8895_vm4 = vcmask 883712   ;;  %vm8897_vm12 = vmmov %vm8886_vm2 }
 0xc22   : > { %v4065_v24 = vsel %vm8885_vm13, %v4054_v38, %v4064_v14  ;;  %4074 = vst [vmem:[#allocation3 + $0x44] sm:$0xf] %v4066_v48  ;;  %v4025_v6 = vrot.slane %v4020_v45, 4  ;;  %v4022_v52 = vpop.permute.xlu1 %4021  ;;  %5005 = vmatpush1.bf16.msra.mxu0 %v6034_v63  ;;  %vm8896_vm7 = vmmov %vm8895_vm4  ;;  %vm8898_vm13 = vcmask 891904  }
 0xc23   : > { %v4026_v31 = vrot.slane %v4022_v52, 4  ;;  %v6032_v20 = vcombine.high %v4062_v53, %v4065_v24  ;;  %v6031_v8 = vcombine.low %v4062_v53, %v4065_v24  ;;  %vm8899_vm2 = vmmov %vm8898_vm13 }
 0xc25   : > { %v4030_v56 = vsel %vm8887_vm9, %v4025_v6, %v4026_v31  ;;  %v4032_v13 = vsel %vm8888_vm11, %v4022_v52, %v4026_v31  ;;  %v4508_v42 = vpop.permute.xlu0 %4507  ;;  %5006 = vmatprep.subr.bf16.mxu0 %v6032_v20  ;;  %vm8900_vm9 = vmmov %vm8894_vm3  ;;  %vm8901_vm11 = vcmask 900096  }
 0xc26   : > { %v4031_v12 = vsel %vm8890_vm14, %v4020_v45, %v4030_v56  ;;  %4040 = vst [vmem:[#allocation3 + $0x2c] sm:$0xf] %v4032_v13  ;;  %v4515_v9 = vrot.slane %v4508_v42, 4  ;;  %v4510_v47 = vpop.permute.xlu1 %4509  ;;  %5007 = vmatpush1.bf16.msra.mxu0 %v6031_v8  ;;  %vm8902_vm0 = vmmov %vm8901_vm11 }
 0xc27   : > { %v4516_v26 = vrot.slane %v4510_v47, 4  ;;  %v6029_v11 = vcombine.high %v4028_v23, %v4031_v12  ;;  %v6028_v30 = vcombine.low %v4028_v23, %v4031_v12  ;;  %vm8903_vm14 = vmmov %vm8894_vm3 }
 0xc29   : > { %v4519_v21 = vsel %vm8891_vm15, %v4515_v9, %v4516_v26  ;;  %v4521_v44 = vsel %vm8892_vm1, %v4510_v47, %v4516_v26  ;;  %v4474_v50 = vpop.permute.xlu0 %4473  ;;  %5008 = vmatprep.subr.bf16.mxu0 %v6029_v11  ;;  %vm8904_vm15 = vcmask 1031168  }
 0xc2a   : > { %v8295_v18 = vsel %vm8893_vm5, %v4508_v42, %v4519_v21  ;;  %4530 = vst [vmem:[#allocation3 + $0x170] sm:$0xf] %v4521_v44  ;;  %v4481_v5 = vrot.slane %v4474_v50, 4  ;;  %v4476_v7 = vpop.permute.xlu1 %4475  ;;  %5009 = vmatpush1.bf16.msra.mxu0 %v6028_v30  ;;  %vm8905_vm1 = vmmov %vm8904_vm15 }
 0xc2b   : > { %v4482_v49 = vrot.slane %v4476_v7, 4  ;;  %5010 = vmatprep.subr.bf16.mxu0 %v6026_v39  ;;  %vm8906_vm5 = vmmov %vm8894_vm3 }
 0xc2d   : > { %v4485_v25 = vsel %vm8894_vm3, %v4481_v5, %v4482_v49  ;;  %v4487_v55 = vsel %vm8895_vm4, %v4476_v7, %v4482_v49  ;;  %v4440_v62 = vpop.permute.xlu0 %4439  ;;  %vm8907_vm3 = vcmask 1039360  }
 0xc2e   : > { %v8302_v58 = vsel %vm8896_vm7, %v4474_v50, %v4485_v25  ;;  %4496 = vst [vmem:[#allocation3 + $0x158] sm:$0xf] %v4487_v55  ;;  %v4447_v34 = vrot.slane %v4440_v62, 4  ;;  %v4442_v19 = vpop.permute.xlu1 %4441  ;;  %5011 = vmatpush1.bf16.msra.mxu0 %v6025_v41  ;;  %vm8908_vm4 = vmmov %vm8907_vm3 }
 0xc2f   : > { %v4448_v0 = vrot.slane %v4442_v19, 4  ;;  %vm8909_vm7 = vmmov %vm8906_vm5 }
 0xc31   : > { %v4451_v61 = vsel %vm8897_vm12, %v4447_v34, %v4448_v0  ;;  %v4453_v60 = vsel %vm8898_vm13, %v4442_v19, %v4448_v0  ;;  %v4406_v57 = vpop.permute.xlu0 %4405  ;;  %vm8910_vm12 = vcmask 752640  }
 0xc32   : > { %v8307_v2 = vsel %vm8899_vm2, %v4440_v62, %v4451_v61  ;;  %4462 = vst [vmem:[#allocation3 + $0x140] sm:$0xf] %v4453_v60  ;;  %v4413_v1 = vrot.slane %v4406_v57, 4  ;;  %v4408_v54 = vpop.permute.xlu1 %4407  ;;  %vm8911_vm13 = vmmov %vm8910_vm12 }
 0xc33   : > { %v4414_v59 = vrot.slane %v4408_v54, 4  ;;  %vm8912_vm2 = vmmov %vm8906_vm5 }
 0xc35   : > { %v4417_v38 = vsel %vm8900_vm9, %v4413_v1, %v4414_v59  ;;  %v4419_v16 = vsel %vm8901_vm11, %v4408_v54, %v4414_v59  ;;  %v4372_v32 = vpop.permute.xlu0 %4371  ;;  %vm8913_vm9 = vcmask 883712  }
 0xc36   : > { %v8312_v36 = vsel %vm8902_vm0, %v4406_v57, %v4417_v38  ;;  %4428 = vst [vmem:[#allocation3 + $0x128] sm:$0xf] %v4419_v16  ;;  %v4379_v4 = vrot.slane %v4372_v32, 4  ;;  %v4374_v10 = vpop.permute.xlu1 %4373  ;;  %vm8914_vm11 = vmmov %vm8913_vm9 }
 0xc37   : > { %v4380_v15 = vrot.slane %v4374_v10, 4  ;;  %vm8915_vm0 = vmmov %vm8912_vm2 }
 0xc39   : > { %v4383_v17 = vsel %vm8903_vm14, %v4379_v4, %v4380_v15  ;;  %v4385_v29 = vsel %vm8904_vm15, %v4374_v10, %v4380_v15  ;;  %v4338_v63 = vpop.permute.xlu0 %4337  ;;  %vm8916_vm14 = vcmask 891904  }
 0xc3a   : > { %v8317_v14 = vsel %vm8905_vm1, %v4372_v32, %v4383_v17  ;;  %4394 = vst [vmem:[#allocation3 + $0x110] sm:$0xf] %v4385_v29  ;;  %v4345_v48 = vrot.slane %v4338_v63, 4  ;;  %v4340_v45 = vpop.permute.xlu1 %4339  ;;  %vm8917_vm15 = vmmov %vm8916_vm14 }
 0xc3b   : > { %v4346_v53 = vrot.slane %v4340_v45, 4  ;;  %vm8918_vm1 = vmmov %vm8915_vm0 }
 0xc3d   : > { %v4349_v24 = vsel %vm8906_vm5, %v4345_v48, %v4346_v53  ;;  %v4351_v6 = vsel %vm8907_vm3, %v4340_v45, %v4346_v53  ;;  %v4512_v52 = vpop.permute.xlu0 %4511  ;;  %vm8919_vm5 = vcmask 900096  }
 0xc3e   : > { %v8322_v43 = vsel %vm8908_vm4, %v4338_v63, %v4349_v24  ;;  %4360 = vst [vmem:[#allocation3 + $0xf8] sm:$0xf] %v4351_v6  ;;  %v4517_v31 = vrot.slane %v4512_v52, 4  ;;  %v4514_v20 = vpop.permute.xlu1 %4513  ;;  %vm8920_vm3 = vmmov %vm8919_vm5 }
 0xc3f   : > { %v4518_v8 = vrot.slane %v4514_v20, 4  ;;  %vm8921_vm4 = vmmov %vm8915_vm0 }
 0xc41   : > { %v4522_v56 = vsel %vm8909_vm7, %v4517_v31, %v4518_v8  ;;  %v4524_v13 = vsel %vm8910_vm12, %v4514_v20, %v4518_v8  ;;  %v4478_v42 = vpop.permute.xlu0 %4477  ;;  %vm8922_vm7 = vcmask 1031168  }
 0xc42   : > { %v4523_v23 = vsel %vm8911_vm13, %v4512_v52, %v4522_v56  ;;  %4532 = vst [vmem:[#allocation3 + $0x17c] sm:$0xf] %v4524_v13  ;;  %v4483_v12 = vrot.slane %v4478_v42, 4  ;;  %v4480_v9 = vpop.permute.xlu1 %4479  ;;  %vm8923_vm12 = vmmov %vm8922_vm7 }
 0xc43   : > { %v4484_v47 = vrot.slane %v4480_v9, 4  ;;  %v6070_v26 = vcombine.low %v8295_v18, %v4523_v23  ;;  %v6071_v11 = vcombine.high %v8295_v18, %v4523_v23  ;;  %vm8924_vm13 = vmmov %vm8915_vm0  ;;  %v6053_v23 = vcombine.high %v8074_v37, %v8080_v28 }
 0xc45   : > { %v4488_v30 = vsel %vm8912_vm2, %v4483_v12, %v4484_v47  ;;  %v4490_v21 = vsel %vm8913_vm9, %v4480_v9, %v4484_v47  ;;  %v4444_v44 = vpop.permute.xlu0 %4443  ;;  %5012 = vmatprep.subr.bf16.mxu0 %v6071_v11  ;;  %vm8925_vm2 = vcmask 1039360   ;;  %v6052_v11 = vcombine.low %v8074_v37, %v8080_v28 }
 0xc46   : > { %v4489_v50 = vsel %vm8914_vm11, %v4478_v42, %v4488_v30  ;;  %4498 = vst [vmem:[#allocation3 + $0x164] sm:$0xf] %v4490_v21  ;;  %v4449_v39 = vrot.slane %v4444_v44, 4  ;;  %v4446_v5 = vpop.permute.xlu1 %4445  ;;  %5013 = vmatpush2.bf16.msra.mxu0 %v6070_v26  ;;  %vm8926_vm9 = vmmov %vm8925_vm2  ;;  %vm8927_vm11 = vcmask 736256  }
 0xc47   : > { %v4450_v7 = vrot.slane %v4446_v5, 4  ;;  %v6067_v49 = vcombine.low %v8302_v58, %v4489_v50  ;;  %v6068_v41 = vcombine.high %v8302_v58, %v4489_v50 }
 0xc49   : > { %v4454_v25 = vsel %vm8915_vm0, %v4449_v39, %v4450_v7  ;;  %v4456_v18 = vsel %vm8916_vm14, %v4446_v5, %v4450_v7  ;;  %v4410_v55 = vpop.permute.xlu0 %4409  ;;  %5014 = vmatprep.subr.bf16.mxu0 %v6068_v41  ;;  %vm8928_vm14 = vmmov %vm8915_vm0 }
 0xc4a   : > { %v4455_v62 = vsel %vm8917_vm15, %v4444_v44, %v4454_v25  ;;  %4464 = vst [vmem:[#allocation3 + $0x14c] sm:$0xf] %v4456_v18  ;;  %v4415_v34 = vrot.slane %v4410_v55, 4  ;;  %v4412_v19 = vpop.permute.xlu1 %4411  ;;  %5015 = vmatpush2.bf16.msra.mxu0 %v6067_v49  ;;  %vm8929_vm15 = vmmov %vm8927_vm11  ;;  %v6313_v18 = vld [vmem:[#allocation3 + $0x170] ss:$12 sps:$4 sm:$0xff]  }
 0xc4b   : > { %v4416_v0 = vrot.slane %v4412_v19, 4  ;;  %v6064_v61 = vcombine.low %v8307_v2, %v4455_v62  ;;  %v6065_v60 = vcombine.high %v8307_v2, %v4455_v62 }
 0xc4d   : > { %v4420_v57 = vsel %vm8918_vm1, %v4415_v34, %v4416_v0  ;;  %v4422_v58 = vsel %vm8919_vm5, %v4412_v19, %v4416_v0  ;;  %v4376_v1 = vpop.permute.xlu0 %4375  ;;  %5016 = vmatprep.subr.bf16.mxu0 %v6065_v60  ;;  %vm8930_vm1 = vmmov %vm8927_vm11  ;;  %v6317_v0 = vld [vmem:[#allocation3 + $0xb0] ss:$12 sps:$4 sm:$0xff]  }
 0xc4e   : > { %v4421_v54 = vsel %vm8920_vm3, %v4410_v55, %v4420_v57  ;;  %4430 = vst [vmem:[#allocation3 + $0x134] sm:$0xf] %v4422_v58  ;;  %v4381_v59 = vrot.slane %v4376_v1, 4  ;;  %v4378_v38 = vpop.permute.xlu1 %4377  ;;  %5017 = vmatpush2.bf16.msra.mxu0 %v6064_v61  ;;  %vm8931_vm5 = vmmov %vm8930_vm1  ;;  %v8369_v55 = vld [vmem:[%s8607_s12] ss:$12 sps:$4 sm:$0xff]  }
 0xc4f   : > { %v4382_v16 = vrot.slane %v4378_v38, 4  ;;  %v6061_v32 = vcombine.low %v8312_v36, %v4421_v54  ;;  %v6062_v4 = vcombine.high %v8312_v36, %v4421_v54  ;;  %vm8932_vm3 = vmmov %vm8915_vm0  ;;  %v6318_v57 = vld [vmem:[#allocation3 + $0x158] ss:$12 sps:$4 sm:$0xff]  }
 0xc51   : > { %v4386_v10 = vsel %vm8921_vm4, %v4381_v59, %v4382_v16  ;;  %v4388_v2 = vsel %vm8922_vm7, %v4378_v38, %v4382_v16  ;;  %v4342_v15 = vpop.permute.xlu0 %4341  ;;  %5018 = vmatprep.subr.bf16.mxu0 %v6062_v4  ;;  %vm8933_vm4 = vmmov %vm8930_vm1  ;;  %v6319_v16 = vld [vmem:[#allocation3 + $0x98] ss:$12 sps:$4 sm:$0xff]  }
 0xc52   : > { %v4387_v17 = vsel %vm8923_vm12, %v4376_v1, %v4386_v10  ;;  %4396 = vst [vmem:[#allocation3 + $0x11c] sm:$0xf] %v4388_v2  ;;  %v4347_v29 = vrot.slane %v4342_v15, 4  ;;  %v4344_v63 = vpop.permute.xlu1 %4343  ;;  %5019 = vmatpush2.bf16.msra.mxu0 %v6061_v32  ;;  %vm8934_vm7 = vmmov %vm8930_vm1  ;;  %vm8935_vm12 = vcmask 744448  }
 0xc53   : > { %v4348_v48 = vrot.slane %v4344_v63, 4  ;;  %v6058_v45 = vcombine.low %v8317_v14, %v4387_v17  ;;  %v6059_v53 = vcombine.high %v8317_v14, %v4387_v17 }
 0xc55   : > { %v4352_v24 = vsel %vm8924_vm13, %v4347_v29, %v4348_v48  ;;  %v4354_v36 = vsel %vm8925_vm2, %v4344_v63, %v4348_v48  ;;  %v4254_v6 = vpop.permute.xlu0 %4253  ;;  %5020 = vmatprep.subr.bf16.mxu0 %v6059_v53  ;;  %vm8936_vm13 = vmmov %vm8915_vm0  ;;  %v6321_v53 = vld [vmem:[#allocation3 + $0x80] ss:$12 sps:$4 sm:$0xff]  }
 0xc56   : > { %v4353_v52 = vsel %vm8926_vm9, %v4342_v15, %v4352_v24  ;;  %4362 = vst [vmem:[#allocation3 + $0x104] sm:$0xf] %v4354_v36  ;;  %v4256_v31 = vpop.permute.xlu1 %4255  ;;  %5021 = vmatpush2.bf16.msra.mxu0 %v6058_v45  ;;  %v4261_v20 = vrot.slane %v4254_v6, 4  ;;  %vm8937_vm2 = vmmov %vm8935_vm12  ;;  %v6320_v15 = vld [vmem:[#allocation3 + $0x140] ss:$12 sps:$4 sm:$0xff]  }
 0xc57   : > { %v4262_v8 = vrot.slane %v4256_v31, 4  ;;  %v6055_v56 = vcombine.low %v8322_v43, %v4353_v52  ;;  %v6056_v13 = vcombine.high %v8322_v43, %v4353_v52  ;;  %vm8938_vm9 = vmmov %vm8915_vm0 }
 0xc59   : > { %v4267_v42 = vsel %vm8927_vm11, %v4256_v31, %v4262_v8  ;;  %v4258_v14 = vpop.permute.xlu0 %4257  ;;  %5022 = vmatprep.subr.bf16.mxu0 %v6056_v13  ;;  %v4265_v47 = vsel %vm8915_vm0, %v4261_v20, %v4262_v8  ;;  %vm8939_vm11 = vmmov %vm8930_vm1  ;;  %v6323_v8 = vld [vmem:[#allocation3 + $0x68] ss:$12 sps:$4 sm:$0xff]  }
 0xc5a   : > { %4276 = vst [vmem:[#allocation3 + $0xc8] sm:$0xf] %v4267_v42  ;;  %v4263_v12 = vrot.slane %v4258_v14, 4  ;;  %v4260_v9 = vpop.permute.xlu1 %4259  ;;  %5023 = vmatpush2.bf16.msra.mxu0 %v6055_v56  ;;  %v4266_v44 = vsel %vm8930_vm1, %v4254_v6, %v4265_v47  ;;  %vm8940_vm0 = vmmov %vm8930_vm1  ;;  %v6322_v6 = vld [vmem:[#allocation3 + $0x128] ss:$12 sps:$4 sm:$0xff]  }
 0xc5b   : > { %v4264_v26 = vrot.slane %v4260_v9, 4  ;;  %5024 = vmatprep.subr.bf16.mxu0 %v6053_v23  ;;  %vm8943_vm1 = vmmov %vm8937_vm2  ;;  %v6324_v56 = vld [vmem:[#allocation3 + $0x110] ss:$12 sps:$4 sm:$0xff]   ;;  %v6325_v13 = vld [vmem:[%s8607_s12 + $0x8] ss:$12 sps:$4 sm:$0xff]  }
 0xc5c   : > { %v6326_v42 = vld [vmem:[#allocation3 + $0x50] ss:$12 sps:$4 sm:$0xff]   ;;  %v6331_v47 = vld [vmem:[#allocation3 + $0xe0] ss:$12 sps:$4 sm:$0xff]  }
 0xc5d   : > { %v4268_v43 = vsel %vm8928_vm14, %v4263_v12, %v4264_v26  ;;  %v4270_v30 = vsel %vm8929_vm15, %v4260_v9, %v4264_v26  ;;  %v4576_v21 = vpop.permute.xlu0 %4575  ;;  %vm8941_vm14 = vmmov %vm8932_vm3  ;;  %v6328_v23 = vld [vmem:[#allocation3 + $0xf8] ss:$12 sps:$4 sm:$0xff]   ;;  %v6332_v26 = vld [vmem:[#allocation3 + $0x20] ss:$12 sps:$4 sm:$0xff]  }
 0xc5e   : > { %v4269_v50 = vsel %vm8931_vm5, %v4258_v14, %v4268_v43  ;;  %4278 = vst [vmem:[#allocation3 + $0xd4] sm:$0xf] %v4270_v30  ;;  %v4583_v39 = vrot.slane %v4576_v21, 4  ;;  %v4578_v5 = vpop.permute.xlu1 %4577  ;;  %5025 = vmatpush2.bf16.msra.mxu0 %v6052_v11  ;;  %vm8942_vm15 = vmmov %vm8937_vm2  ;;  %vm4992_vm5 = vcmask 261120   ;;  %v6329_v12 = vld [vmem:[#allocation3 + $0x38] ss:$12 sps:$4 sm:$0xff]  }
 0xc5f   : > { %v4584_v7 = vrot.slane %v4578_v5, 4  ;;  %v6050_v49 = vcombine.high %v4266_v44, %v4269_v50  ;;  %v6049_v41 = vcombine.low %v4266_v44, %v4269_v50  ;;  %v6334_v43 = vld [vmem:[#allocation3 + $0x8] ss:$12 sps:$4 sm:$0xff]  }
 0xc61   : > { %v4587_v25 = vsel %vm8932_vm3, %v4583_v39, %v4584_v7  ;;  %v4589_v37 = vsel %vm8933_vm4, %v4578_v5, %v4584_v7  ;;  %v4580_v28 = vpop.permute.xlu0 %4579  ;;  %5026 = vmatprep.subr.bf16.mxu0 %v6050_v49 }
 0xc62   : > { %v4588_v62 = vsel %vm8934_vm7, %v4576_v21, %v4587_v25  ;;  %4598 = vst [vmem:[#allocation3 + $0x1a0] sm:$0xf] %v4589_v37  ;;  %v4544_v34 = vpop.permute.xlu1 %4543  ;;  %5027 = vmatpush2.bf16.msra.mxu0 %v6049_v41  ;;  %v4585_v54 = vrot.slane %v4580_v28, 4 }
 0xc63   : > { %v4550_v19 = vrot.slane %v4544_v34, 4  ;;  %6154 = vmatprep.subr.bf16.mxu0 %v6313_v18 }
 0xc65   : > { %v4555_v61 = vsel %vm8935_vm12, %v4544_v34, %v4550_v19  ;;  %v4542_v60 = vpop.permute.xlu0 %4541  ;;  %5029 = vmatmul.mubr.bf16.vlgmr.msra.gmra.mxu0 %v8369_v55  ;;  %v6333_v11 = vld [vmem:[#allocation3 + $0xc8] ss:$12 sps:$4 sm:$0xff]  }
 0xc66   : > { %4564 = vst [vmem:[#allocation3 + $0x188] sm:$0xf] %v4555_v61  ;;  %v4549_v58 = vrot.slane %v4542_v60, 4  ;;  %v4582_v1 = vpop.permute.xlu1 %4581  ;;  %6155 = vmatpush3.bf16.msra.mxu0 %v6317_v0  ;;  %5114 = vmatprep.mubr.bf16.mxu0 %v8174_v22 }
 0xc67   : > { %v4586_v59 = vrot.slane %v4582_v1, 4  ;;  %6156 = vmatprep.subr.bf16.mxu0 %v6318_v57 }
 0xc68   : > { %v4553_v38 = vsel %vm8936_vm13, %v4549_v58, %v4550_v19 }
 0xc69   : > { %v4554_v32 = vsel %vm8937_vm2, %v4542_v60, %v4553_v38  ;;  %v4590_v4 = vsel %vm8938_vm9, %v4585_v54, %v4586_v59  ;;  %v4592_v10 = vsel %vm8939_vm11, %v4582_v1, %v4586_v59  ;;  %v4546_v2 = vpop.permute.xlu0 %4545  ;;  %vm8954_vm11 = vmmov %vm8943_vm1 }
 0xc6a   : > { %v4591_v17 = vsel %vm8940_vm0, %v4580_v28, %v4590_v4  ;;  %4600 = vst [vmem:[#allocation3 + $0x1ac] sm:$0xf] %v4592_v10  ;;  %v4551_v29 = vrot.slane %v4546_v2, 4  ;;  %v4548_v63 = vpop.permute.xlu1 %4547  ;;  %6157 = vmatpush3.bf16.msra.mxu0 %v6319_v16 }
 0xc6b   : > { %v4552_v22 = vrot.slane %v4548_v63, 4  ;;  %6158 = vmatprep.subr.bf16.mxu0 %v6320_v15  ;;  %v6076_v48 = vcombine.low %v4588_v62, %v4591_v17  ;;  %v6077_v45 = vcombine.high %v4588_v62, %v4591_v17 }
 0xc6d   : > { %v4556_v24 = vsel %vm8941_vm14, %v4551_v29, %v4552_v22  ;;  %v4558_v36 = vsel %vm8942_vm15, %v4548_v63, %v4552_v22  ;;  %5051 = vmatprep.subr.bf16.mxu1 %v6077_v45  ;;  %vm8956_vm14 = vcmask 752640  }
 0xc6e   : > { %v4557_v52 = vsel %vm8943_vm1, %v4546_v2, %v4556_v24  ;;  %4566 = vst [vmem:[#allocation3 + $0x194] sm:$0xf] %v4558_v36  ;;  %5052 = vmatpush1.bf16.msra.mxu1 %v6076_v48  ;;  %6159 = vmatpush3.bf16.msra.mxu0 %v6321_v53  ;;  %vm8957_vm15 = vmmov %vm8956_vm14 }
 0xc6f   : > { %6160 = vmatprep.subr.bf16.mxu0 %v6322_v6  ;;  %v6073_v31 = vcombine.low %v4554_v32, %v4557_v52  ;;  %v6074_v20 = vcombine.high %v4554_v32, %v4557_v52 }
 0xc71   : > { %5053 = vmatprep.subr.bf16.mxu1 %v6074_v20  ;;  %v6327_v14 = vld [vmem:[#allocation3 + $0x1a0] ss:$12 sps:$4 sm:$0xff]  }
 0xc72   : > { %5054 = vmatpush1.bf16.msra.mxu1 %v6073_v31  ;;  %6161 = vmatpush3.bf16.msra.mxu0 %v6323_v8 }
 0xc73   : > { %6162 = vmatprep.subr.bf16.mxu0 %v6324_v56  ;;  %6211 = vmatprep.subr.bf16.mxu1 %v6581_v51 }
 0xc75   : > { %6079 = vmatmul.mubr.msk.bf16.vlgmr.msra.gmra.mxu1 %vm4992_vm5, %v6325_v13  ;;  %v6330_v9 = vld [vmem:[#allocation3 + $0x188] ss:$12 sps:$4 sm:$0xff]  }
 0xc76   : > { %6163 = vmatpush3.bf16.msra.mxu0 %v6326_v42  ;;  %6212 = vmatpush3.bf16.msra.mxu1 %v6327_v14  ;;  %v4682_v44 = vpop.permute.xlu0 %4681 }
 0xc77   : > { %6164 = vmatprep.subr.bf16.mxu0 %v6328_v23  ;;  %6213 = vmatprep.subr.bf16.mxu1 %v6581_v51  ;;  %v4687_v5 = vpop.permute.xlu1 %4686 }
 0xc78   : > { %6215 = vmatprep.mubr.msk.bf16.mxu1 %vm6582_vm10, %v6581_v51  ;;  %vm8944_vm10 = vcmask 154624  }
 0xc79   : > { %vm8945_vm3 = vmmov %vm8944_vm10 }
 0xc7a   : > { %6165 = vmatpush3.bf16.msra.mxu0 %v6329_v12  ;;  %6214 = vmatpush3.bf16.msra.mxu1 %v6330_v9  ;;  %vm8947_vm4 = vmmov %vm8945_vm3 }
 0xc7b   : > { %6166 = vmatprep.subr.bf16.mxu0 %v6331_v47  ;;  %vm8949_vm12 = vmmov %vm8945_vm3 }
 0xc7d   : > { %6216 = vmatmul.mubr.msk.bf16.vlgmr.msra.gmra.mxu1 %vm4992_vm5, %v6325_v13  ;;  %vm8959_vm5 = vcmask 883712  }
 0xc7e   : > { %6167 = vmatpush3.bf16.msra.mxu0 %v6332_v26 }
 0xc7f   : > { %6168 = vmatprep.subr.bf16.mxu0 %v6333_v11 }
 0xc82   : > { %6169 = vmatpush3.bf16.msra.mxu0 %v6334_v43 }
 0xc83   : > { %5747 = vmatprep.subr.bf16.mxu0 %v8774_v35 }
 0xc85   : > { %5115 = vmatmul.mubr.bf16.vlgmr.msra.gmra.mxu0 %v8369_v55 }
 0xd25   : > { %v5030_v30 = vpop.f32.mrf.mxu0 }
 0xd26   : > { %v5031_v50 = vadd.f32 %v5030_v30, %v4682_v44 }
 0xd27   : > { %v5032_v21 = vpop.f32.mrf.mxu0 }
 0xd28   : > { %v5033_v7 = vadd.f32 %v5032_v21, %v4682_v44 }
 0xd29   : > { %v5034_v51 = vpop.f32.mrf.mxu0 }
 0xd2a   : > { %v5035_v37 = vadd.f32 %v5034_v51, %v4687_v5 }
 0xd2b   : > { %v5036_v41 = vpop.f32.mrf.mxu0 }
 0xd2c   : > { %v5037_v34 = vadd.f32 %v5036_v41, %v4687_v5 }
 0xd35   : > { %v5073_v39 = vpop.f32.mrf.mxu1 }
 0xd36   : > { %v5074_v49 = vadd.f32 %v5073_v39, %v5031_v50 }
 0xd37   : > { %v5075_v25 = vpop.f32.mrf.mxu1 }
 0xd38   : > { %v5164_v28 = vmax.f32 %v5074_v49, 0.0  ;;  %v5076_v18 = vadd.f32 %v5075_v25, %v5033_v7  ;;  %v5536_v25 = vld [vmem:[%s8610_s15] sm:$0xff] }
 0xd39   : > { %v5077_v62 = vpop.f32.mrf.mxu1 }
 0xd3a   : > { %v5165_v19 = vmax.f32 %v5076_v18, 0.0  ;;  %v5078_v0 = vadd.f32 %v5077_v62, %v5035_v37  ;;  %v5170_v55 = vmul.f32 %v5164_v28, %v8767_v33  ;;  %v6344_v37 = vld [vmem:[%s8609_s14 + $0x4] ss:$8 sps:$4 sm:$0xff]  }
 0xd3b   : > { %v5079_v61 = vpop.f32.mrf.mxu1  ;;  %v5537_v28 = vld [vmem:[%s8610_s15 + $0x8] sm:$0xff] }
 0xd3c   : > { %v5171_v60 = vmul.f32 %v5165_v19, %v8766_v40  ;;  %v5167_v57 = vmax.f32 %v5078_v0, 0.0  ;;  %v5080_v58 = vadd.f32 %v5079_v61, %v5037_v34 }
 0xd3d   : > { %v5157_v1 = vpop.f32.mrf.mxu1 }
 0xd3e   : > { %v6138_v54 = vpack.c.bf16 %v5171_v60, %v5170_v55  ;;  %v5168_v59 = vmax.f32 %v5080_v58, 0.0  ;;  %v5173_v16 = vmul.f32 %v5167_v57, %v8767_v33 }
 0xd3f   : > { %v6217_v38 = vpop.f32.mrf.mxu1 }
 0xd40   : > { %v5174_v32 = vmul.f32 %v5168_v59, %v8766_v40  ;;  %5192 = vrot.lane.b32.xlu0 %v6138_v54, %s8773_s30 }
 0xd41   : > { %v5160_v4 = vpop.f32.mrf.mxu1 }
 0xd42   : > { %v6140_v10 = vpack.c.bf16 %v5174_v32, %v5173_v16 }
 0xd43   : > { %v6218_v2 = vpop.f32.mrf.mxu1 }
 0xd44   : > { %5196 = vrot.lane.b32.xlu0 %v6140_v10, %s8773_s30 }
 0xd45   : > { %v6170_v15 = vpop.f32.mrf.mxu0 }
 0xd47   : > { %v6171_v17 = vpop.f32.mrf.mxu0 }
 0xd48   : > { %v6172_v29 = vadd.f32 %v6171_v17, %v6170_v15 }
 0xd49   : > { %v6173_v63 = vpop.f32.mrf.mxu0 }
 0xd4a   : > { %v5117_v22 = vadd.f32 %v6172_v29, %v4682_v44 }
 0xd4b   : > { %v6174_v48 = vpop.f32.mrf.mxu0 }
 0xd4c   : > { %v5158_v45 = vadd.f32 %v5157_v1, %v5117_v22  ;;  %v6175_v53 = vadd.f32 %v6174_v48, %v6173_v63 }
 0xd4e   : > { %v5166_v24 = vmax.f32 %v5158_v45, 0.0  ;;  %v5120_v36 = vadd.f32 %v6175_v53, %v4687_v5 }
 0xd50   : > { %v5172_v6 = vmul.f32 %v5166_v24, %v8771_v3  ;;  %v5161_v52 = vadd.f32 %v5160_v4, %v5120_v36 }
 0xd52   : > { %v5169_v31 = vmax.f32 %v5161_v52, 0.0  ;;  %v6139_v20 = vpack.c.bf16 %v5172_v6, %v5172_v6 }
 0xd54   : > { %v5175_v8 = vmul.f32 %v5169_v31, %v8771_v3  ;;  %5194 = vrot.lane.b32.xlu1 %v6139_v20, %s8773_s30 }
 0xd56   : > { %v6141_v56 = vpack.c.bf16 %v5175_v8, %v5175_v8 }
 0xd58   : > { %5198 = vrot.lane.b32.xlu1 %v6141_v56, %s8773_s30 }
 0xdb2   : > { %v5193_v13 = vpop.permute.xlu0 %5192 }
 0xdb3   : > { %v5200_v42 = vrot.slane %v5193_v13, 4 }
 0xdb5   : > { %v5204_v14 = vsel %vm8944_vm10, %v5200_v42, %v5193_v13  ;;  %vm8960_vm10 = vmmov %vm8959_vm5 }
 0xdb6   : > { %5214 = vst.msk [vmem:[#allocation2] sm:$0xff] %vm6725_vm6, %v5204_v14  ;;  %v5197_v23 = vpop.permute.xlu0 %5196 }
 0xdb7   : > { %v5202_v12 = vrot.slane %v5197_v23, 4 }
 0xdb9   : > { %v5207_v9 = vsel %vm8945_vm3, %v5202_v12, %v5197_v23 }
 0xdba   : > { %5216 = vst.msk [vmem:[#allocation2 + $0x10] sm:$0xff] %vm6725_vm6, %v5207_v9  ;;  %vm8946_vm6 = vmmov %vm8938_vm9 }
 0xdbb   : > { %vm8948_vm7 = vmmov %vm8946_vm6 }
 0xdbc   : > { %vm8952_vm2 = vmmov %vm8946_vm6 }
 0xdbd   : > { %v8410_v47 = vld [vmem:[#allocation2] sm:$0xff]  ;;  %vm8953_vm9 = vmmov %vm8943_vm1 }
 0xdbe   : > { %5438 = vrot.lane.b32.xlu0 %v8410_v47, %s8845_s29  ;;  %5222 = vst [vmem:[#allocation3] sm:$0xff] %v8410_v47  ;;  %vm8955_vm0 = vmmov %vm8952_vm2 }
 0xdbf   : > { %vm8958_vm1 = vmmov %vm8955_vm0 }
 0xdc0   : > { %vm8961_vm3 = vmmov %vm8955_vm0 }
 0xdc1   : > { %v8415_v26 = vld [vmem:[#allocation2 + $0x10] sm:$0xff] }
 0xdc2   : > { %5404 = vrot.lane.b32.xlu0 %v8410_v47, %s8785_s17  ;;  %5224 = vst [vmem:[#allocation3 + $0xc] sm:$0xff] %v8415_v26  ;;  %v6087_v11 = vcombine.low %v8410_v47, %v8415_v26  ;;  %v6088_v27 = vcombine.high %v8410_v47, %v8415_v26 }
 0xdc6   : > { %v5195_v43 = vpop.permute.xlu1 %5194  ;;  %5370 = vrot.lane.b32.xlu0 %v8410_v47, %s8784_s27 }
 0xdc7   : > { %v5201_v30 = vrot.slane %v5195_v43, 4 }
 0xdc9   : > { %v5205_v21 = vsel %vm8946_vm6, %v5200_v42, %v5201_v30  ;;  %vm8962_vm6 = vcmask 891904  }
 0xdca   : > { %v5206_v44 = vsel %vm8947_vm4, %v5205_v21, %v5195_v43  ;;  %v5199_v51 = vpop.permute.xlu1 %5198  ;;  %5336 = vrot.lane.b32.xlu0 %v8410_v47, %s8783_s20  ;;  %vm8963_vm4 = vmmov %vm8962_vm6 }
 0xdcb   : > { %5215 = vst.msk [vmem:[#allocation2 + $0x8] sm:$0xff] %vm6736_vm8, %v5206_v44  ;;  %v5203_v50 = vrot.slane %v5199_v51, 4 }
 0xdcd   : > { %v5208_v39 = vsel %vm8948_vm7, %v5202_v12, %v5203_v50  ;;  %vm8964_vm7 = vmmov %vm8955_vm0 }
 0xdce   : > { %v5209_v5 = vsel %vm8949_vm12, %v5208_v39, %v5199_v51  ;;  %5302 = vrot.lane.b32.xlu0 %v8410_v47, %s8788_s24  ;;  %vm8965_vm12 = vcmask 900096  }
 0xdcf   : > { %5217 = vst.msk [vmem:[#allocation2 + $0x18] sm:$0xff] %vm6736_vm8, %v5209_v5  ;;  %vm8950_vm8 = vcmask 130048  }
 0xdd0   : > { %6115 = vmatprep.mubr.msk.bf16.mxu0 %vm8950_vm8, %v6344_v37  ;;  %vm8951_vm13 = vmmov %vm8950_vm8 }
 0xdd1   : > { %6114 = vmatprep.mubr.msk.bf16.mxu1 %vm8951_vm13, %v6344_v37  ;;  %vm8966_vm8 = vmmov %vm8965_vm12 }
 0xdd2   : > { %5268 = vrot.lane.b32.xlu0 %v8410_v47, %s8787_s19  ;;  %v5431_v7 = vld [vmem:[#allocation2 + $0x8] sm:$0xff]  ;;  %vm8967_vm13 = vmmov %vm8955_vm0 }
 0xdd3   : > { %v5219_v49 = vld [vmem:[#allocation2 + $0x8] sm:$0xf]  ;;  %5440 = vrot.lane.b32.xlu1 %v5431_v7, %s8845_s29 }
 0xdd4   : > { %5223 = vst [vmem:[#allocation3 + $0x8] sm:$0xf] %v5219_v49 }
 0xdd6   : > { %5234 = vrot.lane.b32.xlu0 %v8410_v47, %s8786_s18  ;;  %v5221_v41 = vld [vmem:[#allocation2 + $0x18] sm:$0xf] }
 0xdd7   : > { %5406 = vrot.lane.b32.xlu1 %v5431_v7, %s8785_s17  ;;  %5225 = vst [vmem:[#allocation3 + $0x14] sm:$0xf] %v5221_v41  ;;  %v5433_v46 = vld [vmem:[#allocation2 + $0x18] sm:$0xff] }
 0xdda   : > { %5442 = vrot.lane.b32.xlu0 %v8415_v26, %s8845_s29 }
 0xddb   : > { %5372 = vrot.lane.b32.xlu1 %v5431_v7, %s8784_s27 }
 0xdde   : > { %5408 = vrot.lane.b32.xlu0 %v8415_v26, %s8785_s17 }
 0xddf   : > { %5338 = vrot.lane.b32.xlu1 %v5431_v7, %s8783_s20 }
 0xde2   : > { %5374 = vrot.lane.b32.xlu0 %v8415_v26, %s8784_s27 }
 0xde3   : > { %5304 = vrot.lane.b32.xlu1 %v5431_v7, %s8788_s24 }
 0xde6   : > { %5340 = vrot.lane.b32.xlu0 %v8415_v26, %s8783_s20 }
 0xde7   : > { %5270 = vrot.lane.b32.xlu1 %v5431_v7, %s8787_s19 }
 0xdea   : > { %5306 = vrot.lane.b32.xlu0 %v8415_v26, %s8788_s24 }
 0xdeb   : > { %5236 = vrot.lane.b32.xlu1 %v5431_v7, %s8786_s18 }
 0xdee   : > { %5272 = vrot.lane.b32.xlu0 %v8415_v26, %s8787_s19 }
 0xdef   : > { %5444 = vrot.lane.b32.xlu1 %v5433_v46, %s8845_s29 }
 0xdf2   : > { %5238 = vrot.lane.b32.xlu0 %v8415_v26, %s8786_s18 }
 0xdf3   : > { %5410 = vrot.lane.b32.xlu1 %v5433_v46, %s8785_s17 }
 0xdf6   : > { %5472 = vrot.lane.b32.xlu0 %v8410_v47, %s8782_s26 }
 0xdf7   : > { %5376 = vrot.lane.b32.xlu1 %v5433_v46, %s8784_s27 }
 0xdfa   : > { %5476 = vrot.lane.b32.xlu0 %v8415_v26, %s8782_s26 }
 0xdfb   : > { %5342 = vrot.lane.b32.xlu1 %v5433_v46, %s8783_s20 }
 0xdfe   : > { %5540 = vperm.xlu0 %6269, %v5536_v25  }
 0xdff   : > { %5308 = vrot.lane.b32.xlu1 %v5433_v46, %s8788_s24 }
 0xe03   : > { %5274 = vrot.lane.b32.xlu1 %v5433_v46, %s8787_s19 }
 0xe07   : > { %5240 = vrot.lane.b32.xlu1 %v5433_v46, %s8786_s18 }
 0xe0b   : > { %5474 = vrot.lane.b32.xlu1 %v5431_v7, %s8782_s26 }
 0xe0f   : > { %5478 = vrot.lane.b32.xlu1 %v5433_v46, %s8782_s26 }
 0xe13   : > { %5545 = vperm.xlu1 %6270, %v5537_v28  }
 0xe30   : > { %v5439_v18 = vpop.permute.xlu0 %5438 }
 0xe31   : > { %v5446_v60 = vrot.slane %v5439_v18, 4 }
 0xe34   : > { %v5405_v62 = vpop.permute.xlu0 %5404 }
 0xe35   : > { %v5412_v16 = vrot.slane %v5405_v62, 4 }
 0xe38   : > { %v5371_v34 = vpop.permute.xlu0 %5370 }
 0xe39   : > { %v5378_v17 = vrot.slane %v5371_v34, 4 }
 0xe3c   : > { %v5337_v19 = vpop.permute.xlu0 %5336 }
 0xe3d   : > { %v5344_v24 = vrot.slane %v5337_v19, 4 }
 0xe40   : > { %v5303_v0 = vpop.permute.xlu0 %5302 }
 0xe41   : > { %v5310_v56 = vrot.slane %v5303_v0, 4 }
 0xe44   : > { %v5269_v61 = vpop.permute.xlu0 %5268 }
 0xe45   : > { %v5441_v55 = vpop.permute.xlu1 %5440  ;;  %v5276_v9 = vrot.slane %v5269_v61, 4 }
 0xe46   : > { %v5447_v57 = vrot.slane %v5441_v55, 4 }
 0xe48   : > { %v5450_v58 = vsel %vm8952_vm2, %v5446_v60, %v5447_v57  ;;  %v5452_v1 = vsel %vm8953_vm9, %v5441_v55, %v5447_v57  ;;  %v5235_v59 = vpop.permute.xlu0 %5234  ;;  %vm8968_vm2 = vcmask 1031168  }
 0xe49   : > { %v8490_v54 = vsel %vm8954_vm11, %v5439_v18, %v5450_v58  ;;  %5461 = vst [vmem:[#allocation3 + $0xb0] sm:$0xf] %v5452_v1  ;;  %v5407_v38 = vpop.permute.xlu1 %5406  ;;  %vm8969_vm9 = vmmov %vm8968_vm2  ;;  %v5242_v39 = vrot.slane %v5235_v59, 4 }
 0xe4a   : > { %v5413_v32 = vrot.slane %v5407_v38, 4  ;;  %vm8970_vm11 = vmmov %vm8955_vm0 }
 0xe4c   : > { %v5416_v4 = vsel %vm8955_vm0, %v5412_v16, %v5413_v32  ;;  %v5418_v10 = vsel %vm8956_vm14, %v5407_v38, %v5413_v32  ;;  %v5443_v63 = vpop.permute.xlu0 %5442  ;;  %vm8971_vm0 = vcmask 1039360  }
 0xe4d   : > { %v8495_v2 = vsel %vm8957_vm15, %v5405_v62, %v5416_v4  ;;  %5427 = vst [vmem:[#allocation3 + $0x98] sm:$0xf] %v5418_v10  ;;  %v5373_v15 = vpop.permute.xlu1 %5372  ;;  %vm8972_vm14 = vmmov %vm8971_vm0  ;;  %v5448_v37 = vrot.slane %v5443_v63, 4 }
 0xe4e   : > { %v5379_v29 = vrot.slane %v5373_v15, 4  ;;  %vm8973_vm15 = vmmov %vm8958_vm1 }
 0xe50   : > { %v5382_v22 = vsel %vm8958_vm1, %v5378_v17, %v5379_v29  ;;  %v5384_v48 = vsel %vm8959_vm5, %v5373_v15, %v5379_v29  ;;  %v5409_v31 = vpop.permute.xlu0 %5408  ;;  %vm8974_vm1 = vcmask 744448  }
 0xe51   : > { %v8500_v45 = vsel %vm8960_vm10, %v5371_v34, %v5382_v22  ;;  %5393 = vst [vmem:[#allocation3 + $0x80] sm:$0xf] %v5384_v48  ;;  %v5339_v53 = vpop.permute.xlu1 %5338  ;;  %vm8975_vm5 = vmmov %vm8974_vm1 }
 0xe52   : > { %v5345_v36 = vrot.slane %v5339_v53, 4  ;;  %vm8976_vm10 = vmmov %vm8961_vm3 }
 0xe54   : > { %v5348_v6 = vsel %vm8961_vm3, %v5344_v24, %v5345_v36  ;;  %v5350_v52 = vsel %vm8962_vm6, %v5339_v53, %v5345_v36  ;;  %v5375_v30 = vpop.permute.xlu0 %5374  ;;  %vm8977_vm3 = vcmask 752640  }
 0xe55   : > { %v8505_v20 = vsel %vm8963_vm4, %v5337_v19, %v5348_v6  ;;  %5359 = vst [vmem:[#allocation3 + $0x68] sm:$0xf] %v5350_v52  ;;  %v5305_v8 = vpop.permute.xlu1 %5304  ;;  %vm8978_vm6 = vmmov %vm8977_vm3  ;;  %v5380_v16 = vrot.slane %v5375_v30, 4 }
 0xe56   : > { %v5311_v13 = vrot.slane %v5305_v8, 4  ;;  %vm8979_vm4 = vmmov %vm8964_vm7 }
 0xe58   : > { %v5314_v42 = vsel %vm8964_vm7, %v5310_v56, %v5311_v13  ;;  %v5316_v14 = vsel %vm8965_vm12, %v5305_v8, %v5311_v13  ;;  %v5341_v41 = vpop.permute.xlu0 %5340  ;;  %vm8980_vm7 = vcmask 883712  }
 0xe59   : > { %v8510_v23 = vsel %vm8966_vm8, %v5303_v0, %v5314_v42  ;;  %5325 = vst [vmem:[#allocation3 + $0x50] sm:$0xf] %v5316_v14  ;;  %v5271_v12 = vpop.permute.xlu1 %5270  ;;  %v5414_v0 = vrot.slane %v5409_v31, 4  ;;  %vm8981_vm12 = vmmov %vm8980_vm7  ;;  %v5346_v48 = vrot.slane %v5341_v41, 4 }
 0xe5a   : > { %v5277_v43 = vrot.slane %v5271_v12, 4  ;;  %vm8982_vm8 = vmmov %vm8979_vm4 }
 0xe5c   : > { %v5280_v21 = vsel %vm8967_vm13, %v5276_v9, %v5277_v43  ;;  %v5282_v44 = vsel %vm8968_vm2, %v5271_v12, %v5277_v43  ;;  %v5307_v57 = vpop.permute.xlu0 %5306  ;;  %vm8983_vm13 = vcmask 891904  }
 0xe5d   : > { %v8515_v51 = vsel %vm8969_vm9, %v5269_v61, %v5280_v21  ;;  %5291 = vst [vmem:[#allocation3 + $0x38] sm:$0xf] %v5282_v44  ;;  %v5237_v50 = vpop.permute.xlu1 %5236  ;;  %vm8984_vm2 = vmmov %vm8983_vm13  ;;  %v5312_v56 = vrot.slane %v5307_v57, 4 }
 0xe5e   : > { %5290 = vst [vmem:[#allocation3 + $0x30] sm:$0xff] %v8515_v51  ;;  %v5243_v5 = vrot.slane %v5237_v50, 4  ;;  %vm8985_vm9 = vmmov %vm8979_vm4 }
 0xe60   : > { %v5246_v7 = vsel %vm8970_vm11, %v5242_v39, %v5243_v5  ;;  %v5248_v49 = vsel %vm8971_vm0, %v5237_v50, %v5243_v5  ;;  %v5273_v29 = vpop.permute.xlu0 %5272  ;;  %vm8986_vm11 = vcmask 900096  }
 0xe61   : > { %v8521_v46 = vsel %vm8972_vm14, %v5235_v59, %v5246_v7  ;;  %5257 = vst [vmem:[#allocation3 + $0x20] sm:$0xf] %v5248_v49  ;;  %v5445_v25 = vpop.permute.xlu1 %5444  ;;  %vm8987_vm0 = vmmov %vm8986_vm11  ;;  %v5278_v44 = vrot.slane %v5273_v29, 4 }
 0xe62   : > { %5256 = vst [vmem:[#allocation3 + $0x18] sm:$0xff] %v8521_v46  ;;  %v5449_v28 = vrot.slane %v5445_v25, 4  ;;  %vm8988_vm14 = vmmov %vm8979_vm4 }
 0xe64   : > { %v5453_v18 = vsel %vm8973_vm15, %v5448_v37, %v5449_v28  ;;  %v5455_v62 = vsel %vm8974_vm1, %v5445_v25, %v5449_v28  ;;  %v5239_v14 = vpop.permute.xlu0 %5238  ;;  %vm8989_vm15 = vcmask 1031168  }
 0xe65   : > { %v5454_v34 = vsel %vm8975_vm5, %v5443_v63, %v5453_v18  ;;  %5463 = vst [vmem:[#allocation3 + $0xbc] sm:$0xf] %v5455_v62  ;;  %v5411_v19 = vpop.permute.xlu1 %5410  ;;  %vm8990_vm1 = vmmov %vm8989_vm15  ;;  %v5244_v28 = vrot.slane %v5239_v14, 4 }
 0xe66   : > { %v5415_v61 = vrot.slane %v5411_v19, 4  ;;  %v6108_v55 = vcombine.low %v8490_v54, %v5454_v34  ;;  %v6109_v60 = vcombine.high %v8490_v54, %v5454_v34  ;;  %vm8991_vm5 = vmmov %vm8979_vm4 }
 0xe68   : > { %v5419_v58 = vsel %vm8976_vm10, %v5414_v0, %v5415_v61  ;;  %v5421_v1 = vsel %vm8977_vm3, %v5411_v19, %v5415_v61  ;;  %5704 = vmatprep.subr.bf16.mxu1 %v6109_v60  ;;  %vm8992_vm10 = vcmask 1039360  }
 0xe69   : > { %v5420_v59 = vsel %vm8978_vm6, %v5409_v31, %v5419_v58  ;;  %5429 = vst [vmem:[#allocation3 + $0xa4] sm:$0xf] %v5421_v1  ;;  %v5377_v38 = vpop.permute.xlu1 %5376  ;;  %5705 = vmatpush1.bf16.msra.mxu1 %v6108_v55  ;;  %vm8993_vm3 = vmmov %vm8992_vm10 }
 0xe6a   : > { %v5381_v32 = vrot.slane %v5377_v38, 4  ;;  %v6105_v4 = vcombine.low %v8495_v2, %v5420_v59  ;;  %v6106_v10 = vcombine.high %v8495_v2, %v5420_v59  ;;  %vm8994_vm6 = vmmov %vm8979_vm4 }
 0xe6c   : > { %v5385_v15 = vsel %vm8979_vm4, %v5380_v16, %v5381_v32  ;;  %v5387_v54 = vsel %vm8980_vm7, %v5377_v38, %v5381_v32  ;;  %v6335_v17 = vld [vmem:[#allocation3 + $0xb0] ss:$12 sps:$4 sm:$0xff]   ;;  %5706 = vmatprep.subr.bf16.mxu1 %v6106_v10  ;;  %vm8995_vm4 = vcmask 736256  }
 0xe6d   : > { %v5386_v63 = vsel %vm8981_vm12, %v5375_v30, %v5385_v15  ;;  %5395 = vst [vmem:[#allocation3 + $0x8c] sm:$0xf] %v5387_v54  ;;  %v5343_v22 = vpop.permute.xlu1 %5342  ;;  %5707 = vmatpush1.bf16.msra.mxu1 %v6105_v4  ;;  %5748 = vmatpush1.bf16.msra.mxu0 %v6335_v17  ;;  %vm8996_vm7 = vmmov %vm8995_vm4 }
 0xe6e   : > { %v5347_v53 = vrot.slane %v5343_v22, 4  ;;  %v6102_v24 = vcombine.low %v8500_v45, %v5386_v63  ;;  %v6103_v36 = vcombine.high %v8500_v45, %v5386_v63  ;;  %5749 = vmatprep.subr.bf16.mxu0 %v8774_v35  ;;  %vm8997_vm12 = vmmov %vm8991_vm5 }
 0xe70   : > { %v5351_v2 = vsel %vm8982_vm8, %v5346_v48, %v5347_v53  ;;  %v5353_v6 = vsel %vm8983_vm13, %v5343_v22, %v5347_v53  ;;  %v6336_v52 = vld [vmem:[#allocation3 + $0x98] ss:$12 sps:$4 sm:$0xff]   ;;  %5708 = vmatprep.subr.bf16.mxu1 %v6103_v36  ;;  %vm8998_vm8 = vmmov %vm8995_vm4  ;;  %v6346_v48 = vld [vmem:[%s8609_s14] ss:$8 sps:$4 sm:$0xff]  }
 0xe71   : > { %v5352_v31 = vsel %vm8984_vm2, %v5341_v41, %v5351_v2  ;;  %5361 = vst [vmem:[#allocation3 + $0x74] sm:$0xf] %v5353_v6  ;;  %v5309_v8 = vpop.permute.xlu1 %5308  ;;  %5709 = vmatpush1.bf16.msra.mxu1 %v6102_v24  ;;  %5750 = vmatpush1.bf16.msra.mxu0 %v6336_v52  ;;  %v5473_v41 = vpop.permute.xlu0 %5472  ;;  %vm8999_vm13 = vmmov %vm8995_vm4 }
 0xe72   : > { %v5313_v13 = vrot.slane %v5309_v8, 4  ;;  %v6099_v42 = vcombine.low %v8505_v20, %v5352_v31  ;;  %v6100_v45 = vcombine.high %v8505_v20, %v5352_v31  ;;  %5751 = vmatprep.subr.bf16.mxu0 %v8774_v35  ;;  %v5480_v60 = vrot.slane %v5473_v41, 4 }
 0xe74   : > { %v5317_v12 = vsel %vm8985_vm9, %v5312_v56, %v5313_v13  ;;  %v5319_v9 = vsel %vm8986_vm11, %v5309_v8, %v5313_v13  ;;  %v6337_v43 = vld [vmem:[#allocation3 + $0x80] ss:$12 sps:$4 sm:$0xff]   ;;  %5710 = vmatprep.subr.bf16.mxu1 %v6100_v45 }
 0xe75   : > { %v5318_v30 = vsel %vm8987_vm0, %v5307_v57, %v5317_v12  ;;  %5327 = vst [vmem:[#allocation3 + $0x5c] sm:$0xf] %v5319_v9  ;;  %v5275_v21 = vpop.permute.xlu1 %5274  ;;  %5711 = vmatpush1.bf16.msra.mxu1 %v6099_v42  ;;  %5752 = vmatpush1.bf16.msra.mxu0 %v6337_v43  ;;  %v5477_v1 = vpop.permute.xlu0 %5476 }
 0xe76   : > { %v5279_v50 = vrot.slane %v5275_v21, 4  ;;  %v6096_v39 = vcombine.low %v8510_v23, %v5318_v30  ;;  %v6097_v20 = vcombine.high %v8510_v23, %v5318_v30  ;;  %5753 = vmatprep.subr.bf16.mxu0 %v8774_v35  ;;  %v5482_v10 = vrot.slane %v5477_v1, 4 }
 0xe78   : > { %v5283_v5 = vsel %vm8988_vm14, %v5278_v44, %v5279_v50  ;;  %v5285_v7 = vsel %vm8989_vm15, %v5275_v21, %v5279_v50  ;;  %v6338_v49 = vld [vmem:[#allocation3 + $0x68] ss:$12 sps:$4 sm:$0xff]   ;;  %5712 = vmatprep.subr.bf16.mxu1 %v6097_v20 }
 0xe79   : > { %v5284_v25 = vsel %vm8990_vm1, %v5273_v29, %v5283_v5  ;;  %5293 = vst [vmem:[#allocation3 + $0x44] sm:$0xf] %v5285_v7  ;;  %v5241_v37 = vpop.permute.xlu1 %5240  ;;  %5713 = vmatpush1.bf16.msra.mxu1 %v6096_v39  ;;  %5754 = vmatpush1.bf16.msra.mxu0 %v6338_v49  ;;  %v5541_v47 = vpop.permute.xlu0 %5540 }
 0xe7a   : > { %v5245_v18 = vrot.slane %v5241_v37, 4  ;;  %v6093_v62 = vcombine.low %v8515_v51, %v5284_v25  ;;  %v6094_v23 = vcombine.high %v8515_v51, %v5284_v25  ;;  %5755 = vmatprep.subr.bf16.mxu0 %v8774_v35 }
 0xe7c   : > { %v5249_v34 = vsel %vm8991_vm5, %v5244_v28, %v5245_v18  ;;  %v5251_v19 = vsel %vm8992_vm10, %v5241_v37, %v5245_v18  ;;  %v6339_v0 = vld [vmem:[#allocation3 + $0x50] ss:$12 sps:$4 sm:$0xff]   ;;  %5714 = vmatprep.subr.bf16.mxu1 %v6094_v23 }
 0xe7d   : > { %v5250_v61 = vsel %vm8993_vm3, %v5239_v14, %v5249_v34  ;;  %5259 = vst [vmem:[#allocation3 + $0x2c] sm:$0xf] %v5251_v19  ;;  %v5475_v55 = vpop.permute.xlu1 %5474  ;;  %5715 = vmatpush1.bf16.msra.mxu1 %v6093_v62  ;;  %5756 = vmatpush1.bf16.msra.mxu0 %v6339_v0 }
 0xe7e   : > { %5258 = vst [vmem:[#allocation3 + $0x24] sm:$0xff] %v5250_v61  ;;  %v5481_v57 = vrot.slane %v5475_v55, 4  ;;  %v6090_v58 = vcombine.low %v8521_v46, %v5250_v61  ;;  %v6091_v51 = vcombine.high %v8521_v46, %v5250_v61  ;;  %5757 = vmatprep.subr.bf16.mxu0 %v8774_v35 }
 0xe80   : > { %v5484_v59 = vsel %vm8994_vm6, %v5480_v60, %v5481_v57  ;;  %v5486_v38 = vsel %vm8995_vm4, %v5475_v55, %v5481_v57  ;;  %v6340_v16 = vld [vmem:[#allocation3 + $0x38] ss:$12 sps:$4 sm:$0xff]   ;;  %5716 = vmatprep.subr.bf16.mxu1 %v6091_v51 }
 0xe81   : > { %v5485_v32 = vsel %vm8996_vm7, %v5473_v41, %v5484_v59  ;;  %5495 = vst [vmem:[#allocation3 + $0xc8] sm:$0xf] %v5486_v38  ;;  %v5479_v4 = vpop.permute.xlu1 %5478  ;;  %5717 = vmatpush1.bf16.msra.mxu1 %v6090_v58  ;;  %5758 = vmatpush1.bf16.msra.mxu0 %v6340_v16 }
 0xe82   : > { %v5483_v15 = vrot.slane %v5479_v4, 4  ;;  %5718 = vmatprep.subr.bf16.mxu1 %v6088_v27  ;;  %5759 = vmatprep.subr.bf16.mxu0 %v8774_v35  ;;  %v6342_v27 = vld [vmem:[#allocation3 + $0x8] ss:$12 sps:$4 sm:$0xff]  }
 0xe84   : > { %v5487_v46 = vsel %vm8997_vm12, %v5482_v10, %v5483_v15  ;;  %v5489_v54 = vsel %vm8998_vm8, %v5479_v4, %v5483_v15  ;;  %v6341_v17 = vld [vmem:[#allocation3 + $0x20] ss:$12 sps:$4 sm:$0xff]  }
 0xe85   : > { %v5488_v29 = vsel %vm8999_vm13, %v5477_v1, %v5487_v46  ;;  %5497 = vst [vmem:[#allocation3 + $0xd4] sm:$0xf] %v5489_v54  ;;  %5719 = vmatpush1.bf16.msra.mxu1 %v6087_v11  ;;  %5760 = vmatpush1.bf16.msra.mxu0 %v6341_v17 }
 0xe86   : > { %v6111_v63 = vcombine.low %v5485_v32, %v5488_v29  ;;  %v6112_v22 = vcombine.high %v5485_v32, %v5488_v29  ;;  %5761 = vmatprep.subr.bf16.mxu0 %v8774_v35 }
 0xe88   : > { %5734 = vmatprep.subr.bf16.mxu1 %v6112_v22 }
 0xe89   : > { %5735 = vmatpush2.bf16.msra.mxu1 %v6111_v63  ;;  %5762 = vmatpush1.bf16.msra.mxu0 %v6342_v27 }
 0xe8a   : > { %5777 = vmatprep.subr.bf16.mxu0 %v8774_v35 }
 0xe8c   : > { %v6343_v53 = vld [vmem:[#allocation3 + $0xc8] ss:$12 sps:$4 sm:$0xff]   ;;  %5737 = vmatmul.mubr.bf16.vlgmr.msra.gmra.mxu1 %v6346_v48 }
 0xe8d   : > { %5778 = vmatpush2.bf16.msra.mxu0 %v6343_v53 }
 0xe8e   : > { %v5546_v6 = vpop.permute.xlu1 %5545 }
 0xe90   : > { %5780 = vmatmul.mubr.bf16.vlgmr.msra.gmra.mxu0 %v6346_v48 }
 0xf4c   : > { %v5738_v26 = vpop.f32.mrf.mxu1 }
 0xf4d   : > { %v5739_v11 = vadd.f32 %v5738_v26, %v5541_v47 }
 0xf4e   : > { %v5740_v24 = vpop.f32.mrf.mxu1 }
 0xf4f   : > { %v5788_v36 = vmax.f32 %v5739_v11, 0.0  ;;  %v5741_v2 = vadd.f32 %v5740_v24, %v5541_v47 }
 0xf50   : > { %v5742_v52 = vpop.f32.mrf.mxu1  ;;  %v5781_v31 = vpop.f32.mrf.mxu0 }
 0xf51   : > { %v5794_v8 = vmul.f32 %v5788_v36, %v8767_v33  ;;  %v5789_v35 = vmax.f32 %v5741_v2, 0.0  ;;  %v5743_v56 = vadd.f32 %v5742_v52, %v5546_v6  ;;  %v5782_v13 = vadd.f32 %v5781_v31, %v5541_v47 }
 0xf52   : > { %v5744_v42 = vpop.f32.mrf.mxu1  ;;  %v5783_v45 = vpop.f32.mrf.mxu0 }
 0xf53   : > { %5800 = vst [vmem:[%s561_s1] sm:$0xff] %v5794_v8  ;;  %v5795_v14 = vmul.f32 %v5789_v35, %v8766_v40  ;;  %v5791_v12 = vmax.f32 %v5743_v56, 0.0  ;;  %v5745_v9 = vadd.f32 %v5744_v42, %v5546_v6  ;;  %v5790_v43 = vmax.f32 %v5782_v13, 0.0 }
 0xf54   : > { %v5784_v30 = vpop.f32.mrf.mxu0 }
 0xf55   : > { %5801 = vst [vmem:[%s561_s1 + $0x8] sm:$0xff] %v5795_v14  ;;  %v5797_v21 = vmul.f32 %v5791_v12, %v8767_v33  ;;  %v5792_v44 = vmax.f32 %v5745_v9, 0.0  ;;  %v5796_v50 = vmul.f32 %v5790_v43, %v8771_v3  ;;  %v5785_v39 = vadd.f32 %v5784_v30, %v5546_v6 }
 0xf56   : > { %v5786_v20 = vpop.f32.mrf.mxu0 }
 0xf57   : > { %5803 = vst [vmem:[%s561_s1 + $0x18] sm:$0xff] %v5797_v21  ;;  %v5798_v5 = vmul.f32 %v5792_v44, %v8766_v40  ;;  %5802 = vst [vmem:[%s561_s1 + $0x10] sm:$0xff] %v5796_v50  ;;  %v5793_v7 = vmax.f32 %v5785_v39, 0.0 }
 0xf59   : > { %5804 = vst [vmem:[%s561_s1 + $0x20] sm:$0xff] %v5798_v5  ;;  %v5799_v49 = vmul.f32 %v5793_v7, %v8771_v3 }
 0xf5b   : > { %5805 = vst [vmem:[%s561_s1 + $0x28] sm:$0xff] %v5799_v49 }
 0xf5c PF: > { %s26_s21 = sadd.s32 1, %s6555_s21  }
 0xf5d   : > { %p23_p4 = scmp.ge.s32.totalorder %s26_s21, 4  }
 0xf5f   :  { %25 = sbr.rel (!%p23_p4) target bundleno = 4 (0x4), region = 120 }

</bundles_post_ra>
